<compile_context>
chip_gen: v5e
topology: v5e:2x2
jax: 0.10.0
libtpu: 0.0.40
codegen_flags: <defaults>
</compile_context>

<pallas_src>
import jax
import jax.numpy as jnp
from jax.experimental import pallas as pl
from jax.experimental.pallas import tpu as pltpu

EPS = 1e-5


def _fused_bn_conv_bn_kernel(x_ref, w_ref, g1_ref, b1_ref, g2_ref, b2_ref, o_ref):
    # x_ref:  [Cin, S]   (full input, resident across grid steps)
    # w_ref:  [TC, Cin]  (native conv-weight layout tile, lane-dense on Cin)
    # g1/b1:  [Cin, 1],  g2/b2: [TC, 1]
    # o_ref:  [TC, S]
    x = x_ref[...].astype(jnp.float32)

    # ---- BatchNorm2d #1 (training-mode batch stats, biased variance) ----
    m1 = jnp.mean(x, axis=1, keepdims=True)                          # [Cin, 1]
    v1 = jnp.mean((x - m1) * (x - m1), axis=1, keepdims=True)        # [Cin, 1]
    scale1 = g1_ref[...] * jax.lax.rsqrt(v1 + EPS)                   # [Cin, 1]
    shift1 = b1_ref[...] - m1 * scale1                               # [Cin, 1]
    xn = x * scale1 + shift1                                         # [Cin, S]

    # ---- Conv2d 1x1 (no bias) == matmul on the MXU, weight in native layout
    y = jnp.dot(w_ref[...], xn, preferred_element_type=jnp.float32)  # [TC, S]

    # ---- BatchNorm2d #2 (training-mode batch stats, biased variance) ----
    m2 = jnp.mean(y, axis=1, keepdims=True)                          # [TC, 1]
    v2 = jnp.mean((y - m2) * (y - m2), axis=1, keepdims=True)        # [TC, 1]
    scale2 = g2_ref[...] * jax.lax.rsqrt(v2 + EPS)                   # [TC, 1]
    o_ref[...] = ((y - m2) * scale2 + b2_ref[...]).astype(o_ref.dtype)


def fused_bn_conv_bn(x_nchw, w, g1, b1, g2, b2, *, cout_tile=896):
    N, Cin, H, W = x_nchw.shape
    Cout = w.shape[0]
    S = N * H * W
    assert N == 1, "kernel written for N=1 (matches reference input)"
    assert Cout % cout_tile == 0
    assert cout_tile % 8 == 0, "output-channel tile must be sublane-aligned"

    # Wrapper-side plumbing is reshapes only (no data movement).
    x2d = x_nchw.reshape(Cin, S)                       # [Cin, S]
    w2d = w.reshape(Cout, Cin)                         # [Cout, Cin] (native)
    g1r = g1.reshape(Cin, 1).astype(jnp.float32)
    b1r = b1.reshape(Cin, 1).astype(jnp.float32)
    g2r = g2.reshape(Cout, 1).astype(jnp.float32)
    b2r = b2.reshape(Cout, 1).astype(jnp.float32)

    grid = (Cout // cout_tile,)

    out2d = pl.pallas_call(
        _fused_bn_conv_bn_kernel,
        out_shape=jax.ShapeDtypeStruct((Cout, S), jnp.float32),
        grid_spec=pltpu.PrefetchScalarGridSpec(
            num_scalar_prefetch=0,
            grid=grid,
            in_specs=[
                pl.BlockSpec((Cin, S), lambda i: (0, 0)),             # x (resident)
                pl.BlockSpec((cout_tile, Cin), lambda i: (i, 0)),     # weight tile
                pl.BlockSpec((Cin, 1), lambda i: (0, 0)),             # gamma1
                pl.BlockSpec((Cin, 1), lambda i: (0, 0)),             # beta1
                pl.BlockSpec((cout_tile, 1), lambda i: (i, 0)),       # gamma2 tile
                pl.BlockSpec((cout_tile, 1), lambda i: (i, 0)),       # beta2 tile
            ],
            out_specs=pl.BlockSpec((cout_tile, S), lambda i: (i, 0)),
        ),
        compiler_params=pltpu.CompilerParams(
            dimension_semantics=("parallel",)),
    )(x2d, w2d, g1r, b1r, g2r, b2r)

    # [Cout, S] is already NCHW order for N=1: pure reshape.
    return out2d.reshape(1, Cout, H, W)


def reference(x_nchw, w, g1, b1, g2, b2):
    # Pure-JAX reference of the same training-mode BN -> 1x1 conv -> BN chain.
    N, Cin, H, W = x_nchw.shape
    Cout = w.shape[0]
    x = x_nchw.reshape(Cin, N * H * W)
    m1 = x.mean(axis=1, keepdims=True)
    v1 = ((x - m1) ** 2).mean(axis=1, keepdims=True)
    xn = (x - m1) / jnp.sqrt(v1 + EPS) * g1[:, None] + b1[:, None]
    y = w.reshape(Cout, Cin) @ xn
    m2 = y.mean(axis=1, keepdims=True)
    v2 = ((y - m2) ** 2).mean(axis=1, keepdims=True)
    yn = (y - m2) / jnp.sqrt(v2 + EPS) * g2[:, None] + b2[:, None]
    return yn.reshape(1, Cout, H, W)


if __name__ == "__main__":
    key = jax.random.PRNGKey(0)
    kx, kw, kg1, kb1, kg2, kb2 = jax.random.split(key, 6)

    N, Cin, Cout, H, W = 1, 448, 2688, 7, 7

    x = jax.random.normal(kx, (N, Cin, H, W), dtype=jnp.float32)
    w = jax.random.normal(kw, (Cout, Cin, 1, 1), dtype=jnp.float32) * 0.05
    gamma1 = 1.0 + 0.1 * jax.random.normal(kg1, (Cin,), dtype=jnp.float32)
    beta1 = 0.1 * jax.random.normal(kb1, (Cin,), dtype=jnp.float32)
    gamma2 = 1.0 + 0.1 * jax.random.normal(kg2, (Cout,), dtype=jnp.float32)
    beta2 = 0.1 * jax.random.normal(kb2, (Cout,), dtype=jnp.float32)

    out = fused_bn_conv_bn(x, w, gamma1, beta1, gamma2, beta2)
    out = jax.block_until_ready(out)

    ref = reference(x, w, gamma1, beta1, gamma2, beta2)
    assert out.shape == (1, Cout, H, W), out.shape
    assert jnp.allclose(out, ref, atol=1e-3, rtol=1e-3), float(
        jnp.max(jnp.abs(out - ref)))

    print("KERNEL_OK")
</pallas_src>

<mosaic_0001>
module attributes {stable_mosaic.version = 11 : i64} {
  func.func @_fused_bn_conv_bn_kernel(%arg0: i32, %arg1: memref<448x49xf32, #tpu.memory_space<vmem>>, %arg2: memref<896x448xf32, #tpu.memory_space<vmem>>, %arg3: memref<448x1xf32, #tpu.memory_space<vmem>>, %arg4: memref<448x1xf32, #tpu.memory_space<vmem>>, %arg5: memref<896x1xf32, #tpu.memory_space<vmem>>, %arg6: memref<896x1xf32, #tpu.memory_space<vmem>>, %arg7: memref<896x49xf32, #tpu.memory_space<vmem>>) attributes {dimension_semantics = [#tpu.dimension_semantics<parallel>], iteration_bounds = array<i64: 3>, scalar_prefetch = 0 : i64, scratch_operands = 0 : i64, tpu.core_type = #tpu.core_type<tc>, window_params = [{pipeline_mode = #tpu.pipeline_mode<synchronous>, transform_indices = @transform_0, window_bounds = array<i64: 448, 49>}, {transform_indices = @transform_1, window_bounds = array<i64: 896, 448>}, {pipeline_mode = #tpu.pipeline_mode<synchronous>, transform_indices = @transform_2, window_bounds = array<i64: 448, 1>}, {pipeline_mode = #tpu.pipeline_mode<synchronous>, transform_indices = @transform_3, window_bounds = array<i64: 448, 1>}, {transform_indices = @transform_4, window_bounds = array<i64: 896, 1>}, {transform_indices = @transform_5, window_bounds = array<i64: 896, 1>}, {transform_indices = @transform_6, window_bounds = array<i64: 896, 49>}]} {
    %c0 = arith.constant 0 : index
    %c0_0 = arith.constant 0 : index
    %0 = vector.load %arg1[%c0, %c0_0] : memref<448x49xf32, #tpu.memory_space<vmem>>, vector<448x49xf32>
    %cst = arith.constant dense<0.000000e+00> : vector<448xf32>
    %1 = vector.multi_reduction <add>, %0, %cst [1] : vector<448x49xf32> to vector<448xf32>
    %2 = vector.shape_cast %1 : vector<448xf32> to vector<448x1xf32>
    %cst_1 = arith.constant 4.900000e+01 : f32
    %3 = vector.broadcast %cst_1 : f32 to vector<448x1xf32>
    %4 = arith.divf %2, %3 : vector<448x1xf32>
    %5 = vector.broadcast %4 : vector<448x1xf32> to vector<448x49xf32>
    %6 = arith.subf %0, %5 : vector<448x49xf32>
    %7 = vector.broadcast %4 : vector<448x1xf32> to vector<448x49xf32>
    %8 = arith.subf %0, %7 : vector<448x49xf32>
    %9 = arith.mulf %6, %8 : vector<448x49xf32>
    %cst_2 = arith.constant dense<0.000000e+00> : vector<448xf32>
    %10 = vector.multi_reduction <add>, %9, %cst_2 [1] : vector<448x49xf32> to vector<448xf32>
    %11 = vector.shape_cast %10 : vector<448xf32> to vector<448x1xf32>
    %cst_3 = arith.constant 4.900000e+01 : f32
    %12 = vector.broadcast %cst_3 : f32 to vector<448x1xf32>
    %13 = arith.divf %11, %12 : vector<448x1xf32>
    %c0_4 = arith.constant 0 : index
    %c0_5 = arith.constant 0 : index
    %14 = vector.load %arg3[%c0_4, %c0_5] : memref<448x1xf32, #tpu.memory_space<vmem>>, vector<448x1xf32>
    %cst_6 = arith.constant 9.99999974E-6 : f32
    %15 = vector.broadcast %cst_6 : f32 to vector<448x1xf32>
    %16 = arith.addf %13, %15 : vector<448x1xf32>
    %17 = math.rsqrt %16 : vector<448x1xf32>
    %18 = arith.mulf %14, %17 : vector<448x1xf32>
    %c0_7 = arith.constant 0 : index
    %c0_8 = arith.constant 0 : index
    %19 = vector.load %arg4[%c0_7, %c0_8] : memref<448x1xf32, #tpu.memory_space<vmem>>, vector<448x1xf32>
    %20 = arith.mulf %4, %18 : vector<448x1xf32>
    %21 = arith.subf %19, %20 : vector<448x1xf32>
    %22 = vector.broadcast %18 : vector<448x1xf32> to vector<448x49xf32>
    %23 = arith.mulf %0, %22 : vector<448x49xf32>
    %24 = vector.broadcast %21 : vector<448x1xf32> to vector<448x49xf32>
    %25 = arith.addf %23, %24 : vector<448x49xf32>
    %c0_9 = arith.constant 0 : index
    %c0_10 = arith.constant 0 : index
    %26 = vector.load %arg2[%c0_9, %c0_10] : memref<896x448xf32, #tpu.memory_space<vmem>>, vector<896x448xf32>
    %cst_11 = arith.constant dense<0.000000e+00> : vector<896x49xf32>
    %27 = tpu.matmul %26, %25, %cst_11 {dimension_numbers = #tpu.dot_dimension_numbers<[1], [0], [0], [1], [0, 0, 1, 1], [], []>} : vector<896x448xf32>, vector<448x49xf32>, vector<896x49xf32> -> vector<896x49xf32>
    %cst_12 = arith.constant dense<0.000000e+00> : vector<896xf32>
    %28 = vector.multi_reduction <add>, %27, %cst_12 [1] : vector<896x49xf32> to vector<896xf32>
    %29 = vector.shape_cast %28 : vector<896xf32> to vector<896x1xf32>
    %cst_13 = arith.constant 4.900000e+01 : f32
    %30 = vector.broadcast %cst_13 : f32 to vector<896x1xf32>
    %31 = arith.divf %29, %30 : vector<896x1xf32>
    %32 = vector.broadcast %31 : vector<896x1xf32> to vector<896x49xf32>
    %33 = arith.subf %27, %32 : vector<896x49xf32>
    %34 = vector.broadcast %31 : vector<896x1xf32> to vector<896x49xf32>
    %35 = arith.subf %27, %34 : vector<896x49xf32>
    %36 = arith.mulf %33, %35 : vector<896x49xf32>
    %cst_14 = arith.constant dense<0.000000e+00> : vector<896xf32>
    %37 = vector.multi_reduction <add>, %36, %cst_14 [1] : vector<896x49xf32> to vector<896xf32>
    %38 = vector.shape_cast %37 : vector<896xf32> to vector<896x1xf32>
    %cst_15 = arith.constant 4.900000e+01 : f32
    %39 = vector.broadcast %cst_15 : f32 to vector<896x1xf32>
    %40 = arith.divf %38, %39 : vector<896x1xf32>
    %c0_16 = arith.constant 0 : index
    %c0_17 = arith.constant 0 : index
    %41 = vector.load %arg5[%c0_16, %c0_17] : memref<896x1xf32, #tpu.memory_space<vmem>>, vector<896x1xf32>
    %cst_18 = arith.constant 9.99999974E-6 : f32
    %42 = vector.broadcast %cst_18 : f32 to vector<896x1xf32>
    %43 = arith.addf %40, %42 : vector<896x1xf32>
    %44 = math.rsqrt %43 : vector<896x1xf32>
    %45 = arith.mulf %41, %44 : vector<896x1xf32>
    %46 = vector.broadcast %31 : vector<896x1xf32> to vector<896x49xf32>
    %47 = arith.subf %27, %46 : vector<896x49xf32>
    %48 = vector.broadcast %45 : vector<896x1xf32> to vector<896x49xf32>
    %49 = arith.mulf %47, %48 : vector<896x49xf32>
    %c0_19 = arith.constant 0 : index
    %c0_20 = arith.constant 0 : index
    %50 = vector.load %arg6[%c0_19, %c0_20] : memref<896x1xf32, #tpu.memory_space<vmem>>, vector<896x1xf32>
    %51 = vector.broadcast %50 : vector<896x1xf32> to vector<896x49xf32>
    %52 = arith.addf %49, %51 : vector<896x49xf32>
    %c0_21 = arith.constant 0 : index
    %c0_22 = arith.constant 0 : index
    %53 = vector.load %arg7[%c0_21, %c0_22] : memref<896x49xf32, #tpu.memory_space<vmem>>, vector<896x49xf32>
    tpu.vector_store %arg7[%c0_21, %c0_22], %52 {strides = array<i32>} : memref<896x49xf32, #tpu.memory_space<vmem>>, vector<896x49xf32>,
    return
  }
  func.func @transform_0(%arg0: i32) -> (i32, i32) {
    %c0_i32 = arith.constant 0 : i32
    %c0_i32_0 = arith.constant 0 : i32
    %c0_i32_1 = arith.constant 0 : i32
    return %c0_i32, %c0_i32_0 : i32, i32
  }
  func.func @transform_1(%arg0: i32) -> (i32, i32) {
    %c0_i32 = arith.constant 0 : i32
    %c0_i32_0 = arith.constant 0 : i32
    return %arg0, %c0_i32 : i32, i32
  }
  func.func @transform_2(%arg0: i32) -> (i32, i32) {
    %c0_i32 = arith.constant 0 : i32
    %c0_i32_0 = arith.constant 0 : i32
    %c0_i32_1 = arith.constant 0 : i32
    return %c0_i32, %c0_i32_0 : i32, i32
  }
  func.func @transform_3(%arg0: i32) -> (i32, i32) {
    %c0_i32 = arith.constant 0 : i32
    %c0_i32_0 = arith.constant 0 : i32
    %c0_i32_1 = arith.constant 0 : i32
    return %c0_i32, %c0_i32_0 : i32, i32
  }
  func.func @transform_4(%arg0: i32) -> (i32, i32) {
    %c0_i32 = arith.constant 0 : i32
    %c0_i32_0 = arith.constant 0 : i32
    return %arg0, %c0_i32 : i32, i32
  }
  func.func @transform_5(%arg0: i32) -> (i32, i32) {
    %c0_i32 = arith.constant 0 : i32
    %c0_i32_0 = arith.constant 0 : i32
    return %arg0, %c0_i32 : i32, i32
  }
  func.func @transform_6(%arg0: i32) -> (i32, i32) {
    %c0_i32 = arith.constant 0 : i32
    %c0_i32_0 = arith.constant 0 : i32
    return %arg0, %c0_i32 : i32, i32
  }
}

</mosaic_0001>

<bundles_post_ra>
// kernel: tpu_custom_call.1
= control target key start
LH: loop header
LB: loop body
LE: loop exit
PB: predicated region body
PF: predicated region fallthrough
CT: control target
= control target key end

     0   :  { %s9492_s21 = smov 0   ;;  %s15795_s0 = inlined_call_operand.vmem [shape: f32[448,49], index: 0, kind: input, shape index: {}]   ;;  %s15796_s1 = inlined_call_operand.vmem [shape: f32[2688,448], index: 1, kind: input, shape index: {}]   ;;  %s15797_s2 = inlined_call_operand.vmem [shape: f32[448,1], index: 2, kind: input, shape index: {}]   ;;  %s15798_s3 = inlined_call_operand.vmem [shape: f32[448,1], index: 3, kind: input, shape index: {}]   ;;  %s15799_s4 = inlined_call_operand.vmem [shape: f32[2688,1], index: 4, kind: input, shape index: {}]   ;;  %s15800_s5 = inlined_call_operand.vmem [shape: f32[2688,1], index: 5, kind: input, shape index: {}]   ;;  %s15801_s6 = inlined_call_operand.vmem [shape: f32[2688,49], index: 6, kind: output, shape index: {}]  }
   0x1 LB: > { %s8915_s22 = sadd.s32 4294967295, %s9453_s21   ;;  %p8919_p0 = scmp.ge.s32.totalorder %s9453_s21, 1  ;;  %s9453_s21 = sphi %s9492_s21, %s16_s21  }
   0x2   : > { %p236_p1 = scmp.lt.s32.totalorder %s9453_s21, 4 }
   0x4   : > { %p237_p2 = pnand %p8919_p0, %p236_p1 }
   0x6   : > { %240 = sbr.rel (%p237_p2) target bundleno = 3957 (0xf75), region = 44 }
   0xb   : > { %v9503_v0 = vld [vmem:[%s15795_s0 + $0x20] sm:$0xff]  ;;  %vm358_vm0 = vcmask 400384   ;;  %v9508_v1 = vld [vmem:[%s15795_s0 + $0x10] sm:$0xff]  ;;  %v9524_v6 = vld [vmem:[%s15795_s0 + $0x28] sm:$0xff]  ;;  %s277_s7 = smul.u32 112, %s8915_s22 }
   0xc   : > { %v9513_v2 = vld [vmem:[%s15795_s0] sm:$0xff]  ;;  %v371_v3 = vsel %vm358_vm0, %v9503_v0, 0.0  ;;  %v365_v4 = vsel %vm358_vm0, %v9508_v1, 0.0  ;;  %v9529_v7 = vld [vmem:[%s15795_s0 + $0x18] sm:$0xff]  ;;  %v9534_v8 = vld [vmem:[%s15795_s0 + $0x8] sm:$0xff]  ;;  %v374_v9 = vsel %vm358_vm0, %v9524_v6, 0.0 }
   0xd   : > { %v359_v5 = vsel %vm358_vm0, %v9513_v2, 0.0  ;;  %372 = vadd.xlane.f32.xlu2 %v371_v3  ;;  %366 = vadd.xlane.f32.xlu1 %v365_v4  ;;  %v368_v10 = vsel %vm358_vm0, %v9529_v7, 0.0  ;;  %v362_v11 = vsel %vm358_vm0, %v9534_v8, 0.0  ;;  %v9545_v12 = vld [vmem:[%s15795_s0 + $0x40] sm:$0xff]  ;;  %v9550_v13 = vld [vmem:[%s15795_s0 + $0x38] sm:$0xff]  ;;  %v9555_v14 = vld [vmem:[%s15795_s0 + $0x30] sm:$0xff] }
   0xe   : > { %360 = vadd.xlane.f32.xlu0 %v359_v5  ;;  %v383_v15 = vsel %vm358_vm0, %v9545_v12, 0.0  ;;  %v380_v16 = vsel %vm358_vm0, %v9550_v13, 0.0  ;;  %v377_v17 = vsel %vm358_vm0, %v9555_v14, 0.0  ;;  %v9566_v18 = vld [vmem:[%s15795_s0 + $0x58] sm:$0xff]  ;;  %v9571_v19 = vld [vmem:[%s15795_s0 + $0x50] sm:$0xff]  ;;  %v9576_v20 = vld [vmem:[%s15795_s0 + $0x48] sm:$0xff] }
   0xf   : > { %v392_v21 = vsel %vm358_vm0, %v9566_v18, 0.0  ;;  %v389_v22 = vsel %vm358_vm0, %v9571_v19, 0.0  ;;  %v386_v23 = vsel %vm358_vm0, %v9576_v20, 0.0  ;;  %v9587_v24 = vld [vmem:[%s15795_s0 + $0x70] sm:$0xff]  ;;  %v9592_v25 = vld [vmem:[%s15795_s0 + $0x68] sm:$0xff]  ;;  %v9597_v26 = vld [vmem:[%s15795_s0 + $0x60] sm:$0xff] }
  0x10   : > { %v401_v27 = vsel %vm358_vm0, %v9587_v24, 0.0  ;;  %v398_v28 = vsel %vm358_vm0, %v9592_v25, 0.0  ;;  %v395_v29 = vsel %vm358_vm0, %v9597_v26, 0.0  ;;  %v9608_v30 = vld [vmem:[%s15795_s0 + $0x88] sm:$0xff]  ;;  %v9613_v31 = vld [vmem:[%s15795_s0 + $0x80] sm:$0xff]  ;;  %v9618_v32 = vld [vmem:[%s15795_s0 + $0x78] sm:$0xff] }
  0x11   : > { %v410_v33 = vsel %vm358_vm0, %v9608_v30, 0.0  ;;  %v407_v34 = vsel %vm358_vm0, %v9613_v31, 0.0  ;;  %v404_v35 = vsel %vm358_vm0, %v9618_v32, 0.0  ;;  %v9629_v36 = vld [vmem:[%s15795_s0 + $0xa0] sm:$0xff]  ;;  %v9634_v37 = vld [vmem:[%s15795_s0 + $0x98] sm:$0xff]  ;;  %v9639_v38 = vld [vmem:[%s15795_s0 + $0x90] sm:$0xff] }
  0x12   : > { %v419_v39 = vsel %vm358_vm0, %v9629_v36, 0.0  ;;  %v416_v40 = vsel %vm358_vm0, %v9634_v37, 0.0  ;;  %v413_v41 = vsel %vm358_vm0, %v9639_v38, 0.0  ;;  %v9650_v42 = vld [vmem:[%s15795_s0 + $0xb8] sm:$0xff]  ;;  %v9655_v43 = vld [vmem:[%s15795_s0 + $0xb0] sm:$0xff]  ;;  %v9660_v44 = vld [vmem:[%s15795_s0 + $0xa8] sm:$0xff] }
  0x13   : > { %v428_v45 = vsel %vm358_vm0, %v9650_v42, 0.0  ;;  %v425_v46 = vsel %vm358_vm0, %v9655_v43, 0.0  ;;  %v422_v47 = vsel %vm358_vm0, %v9660_v44, 0.0  ;;  %v9671_v48 = vld [vmem:[%s15795_s0 + $0xd0] sm:$0xff]  ;;  %v9676_v49 = vld [vmem:[%s15795_s0 + $0xc8] sm:$0xff]  ;;  %v9681_v50 = vld [vmem:[%s15795_s0 + $0xc0] sm:$0xff] }
  0x14   : > { %v437_v51 = vsel %vm358_vm0, %v9671_v48, 0.0  ;;  %v434_v52 = vsel %vm358_vm0, %v9676_v49, 0.0  ;;  %v431_v53 = vsel %vm358_vm0, %v9681_v50, 0.0  ;;  %v9692_v54 = vld [vmem:[%s15795_s0 + $0xe8] sm:$0xff]  ;;  %v9697_v55 = vld [vmem:[%s15795_s0 + $0xe0] sm:$0xff]  ;;  %v9702_v56 = vld [vmem:[%s15795_s0 + $0xd8] sm:$0xff] }
  0x15   : > { %375 = vadd.xlane.f32.xlu2 %v374_v9  ;;  %369 = vadd.xlane.f32.xlu1 %v368_v10  ;;  %v446_v57 = vsel %vm358_vm0, %v9692_v54, 0.0  ;;  %v443_v58 = vsel %vm358_vm0, %v9697_v55, 0.0  ;;  %v440_v59 = vsel %vm358_vm0, %v9702_v56, 0.0  ;;  %v9713_v60 = vld [vmem:[%s15795_s0 + $0x100] sm:$0xff]  ;;  %v9718_v61 = vld [vmem:[%s15795_s0 + $0xf8] sm:$0xff]  ;;  %v9723_v62 = vld [vmem:[%s15795_s0 + $0xf0] sm:$0xff] }
  0x16   : > { %363 = vadd.xlane.f32.xlu0 %v362_v11  ;;  %v455_v63 = vsel %vm358_vm0, %v9713_v60, 0.0  ;;  %v452_v3 = vsel %vm358_vm0, %v9718_v61, 0.0  ;;  %v449_v4 = vsel %vm358_vm0, %v9723_v62, 0.0  ;;  %v9734_v5 = vld [vmem:[%s15795_s0 + $0x118] sm:$0xff]  ;;  %v9739_v9 = vld [vmem:[%s15795_s0 + $0x110] sm:$0xff]  ;;  %v9744_v10 = vld [vmem:[%s15795_s0 + $0x108] sm:$0xff] }
  0x17   : > { %v464_v11 = vsel %vm358_vm0, %v9734_v5, 0.0  ;;  %p278_p3 = scmp.lt.s32.totalorder %s277_s7, 335 }
  0x19   : > { %s16620_s7 = smov (!%p278_p3, %s277_s7), 335 }
  0x1a   : > { %s9039_s13 = sshll.u32 %s16620_s7, 5  ;;  %s12785_s12 = sshll.u32 %s16620_s7, 3 }
  0x1b   : > { %s12343_s20 = scalar_lea.vmem %s15796_s1, %s9039_s13  ;;  %s12791_s15 = scalar_lea.vmem %s15800_s5, %s12785_s12 }
  0x1c   : > { %s12955_s17 = scalar_lea.vmem %s15799_s4, %s12785_s12  ;;  %s13123_s23 = scalar_lea.vmem %s15801_s6, %s12785_s12 }
  0x1d   : > { %384 = vadd.xlane.f32.xlu2 %v383_v15  ;;  %381 = vadd.xlane.f32.xlu1 %v380_v16  ;;  %v461_v15 = vsel %vm358_vm0, %v9739_v9, 0.0  ;;  %v458_v16 = vsel %vm358_vm0, %v9744_v10, 0.0 }
  0x1e   : > { %378 = vadd.xlane.f32.xlu0 %v377_v17  ;;  %v9755_v17 = vld [vmem:[%s15795_s0 + $0x130] sm:$0xff] }
  0x25   : > { %393 = vadd.xlane.f32.xlu2 %v392_v21  ;;  %390 = vadd.xlane.f32.xlu1 %v389_v22  ;;  %v9760_v21 = vld [vmem:[%s15795_s0 + $0x128] sm:$0xff]  ;;  %v9765_v22 = vld [vmem:[%s15795_s0 + $0x120] sm:$0xff] }
  0x26   : > { %387 = vadd.xlane.f32.xlu0 %v386_v23  ;;  %v473_v23 = vsel %vm358_vm0, %v9755_v17, 0.0 }
  0x2d   : > { %402 = vadd.xlane.f32.xlu2 %v401_v27  ;;  %399 = vadd.xlane.f32.xlu1 %v398_v28  ;;  %v470_v27 = vsel %vm358_vm0, %v9760_v21, 0.0  ;;  %v467_v28 = vsel %vm358_vm0, %v9765_v22, 0.0 }
  0x2e   : > { %396 = vadd.xlane.f32.xlu0 %v395_v29  ;;  %v9776_v29 = vld [vmem:[%s15795_s0 + $0x148] sm:$0xff] }
  0x35   : > { %411 = vadd.xlane.f32.xlu2 %v410_v33  ;;  %408 = vadd.xlane.f32.xlu1 %v407_v34  ;;  %v9781_v33 = vld [vmem:[%s15795_s0 + $0x140] sm:$0xff]  ;;  %v9786_v34 = vld [vmem:[%s15795_s0 + $0x138] sm:$0xff] }
  0x36   : > { %405 = vadd.xlane.f32.xlu0 %v404_v35  ;;  %15997 = vst [vmem:[#allocation2_spill] sm:$0xff] %v9781_v33  ;;  %v482_v35 = vsel %vm358_vm0, %v9776_v29, 0.0 }
  0x3d   : > { %420 = vadd.xlane.f32.xlu2 %v419_v39  ;;  %417 = vadd.xlane.f32.xlu1 %v416_v40  ;;  %v479_v39 = vsel %vm358_vm0, %v9781_v33, 0.0  ;;  %v476_v40 = vsel %vm358_vm0, %v9786_v34, 0.0 }
  0x3e   : > { %414 = vadd.xlane.f32.xlu0 %v413_v41  ;;  %v9455_v41 = vmov 49.0  }
  0x3f   : > { %9053 = vrcp.f32 %v9455_v41 }
  0x45   : > { %429 = vadd.xlane.f32.xlu2 %v428_v45  ;;  %426 = vadd.xlane.f32.xlu1 %v425_v46  ;;  %v9797_v45 = vld [vmem:[%s15795_s0 + $0x160] sm:$0xff]  ;;  %v9802_v46 = vld [vmem:[%s15795_s0 + $0x158] sm:$0xff] }
  0x46   : > { %423 = vadd.xlane.f32.xlu0 %v422_v47  ;;  %15998 = vst [vmem:[#allocation3_spill] sm:$0xff] %v9797_v45  ;;  %v9807_v47 = vld [vmem:[%s15795_s0 + $0x150] sm:$0xff] }
  0x47   : > { %15999 = vst [vmem:[#allocation4_spill] sm:$0xff] %v9802_v46 }
  0x48   : > { %16000 = vst [vmem:[#allocation5_spill] sm:$0xff] %v9807_v47 }
  0x4d   : > { %438 = vadd.xlane.f32.xlu2 %v437_v51  ;;  %435 = vadd.xlane.f32.xlu1 %v434_v52  ;;  %v491_v51 = vsel %vm358_vm0, %v9797_v45, 0.0  ;;  %v488_v52 = vsel %vm358_vm0, %v9802_v46, 0.0 }
  0x4e   : > { %432 = vadd.xlane.f32.xlu0 %v431_v53  ;;  %v485_v53 = vsel %vm358_vm0, %v9807_v47, 0.0 }
  0x55   : > { %447 = vadd.xlane.f32.xlu2 %v446_v57  ;;  %444 = vadd.xlane.f32.xlu1 %v443_v58  ;;  %v9054_v57 = vpop.eup %9053 }
  0x56   : > { %441 = vadd.xlane.f32.xlu0 %v440_v59  ;;  %v528_v58 = vmul.f32 49.0, %v9054_v57  ;;  %v9818_v59 = vld [vmem:[%s15795_s0 + $0x178] sm:$0xff]  ;;  %vm532_vm1 = vweird.f32 %v9054_v57 }
  0x57   : > { %16001 = vst [vmem:[#allocation6_spill] sm:$0xff] %v9818_v59 }
  0x5d   : > { %456 = vadd.xlane.f32.xlu2 %v455_v63  ;;  %453 = vadd.xlane.f32.xlu1 %v452_v3  ;;  %v9823_v63 = vld [vmem:[%s15795_s0 + $0x170] sm:$0xff] }
  0x5e   : > { %450 = vadd.xlane.f32.xlu0 %v449_v4  ;;  %16002 = vst [vmem:[#allocation7_spill] sm:$0xff] %v9823_v63 }
  0x65   : > { %465 = vadd.xlane.f32.xlu2 %v464_v11  ;;  %462 = vadd.xlane.f32.xlu1 %v461_v15  ;;  %v9830_v11 = vld [vmem:[%s15795_s0 + $0x168] sm:$0xff] }
  0x66   : > { %459 = vadd.xlane.f32.xlu0 %v458_v16  ;;  %16003 = vst [vmem:[#allocation8_spill] sm:$0xff] %v9830_v11  ;;  %v500_v16 = vsel %vm358_vm0, %v9818_v59, 0.0  ;;  %v9890_v59 = vld [vmem:[%s15795_s0 + $0x1b8] sm:$0xff] }
  0x67   : > { %16012 = vst [vmem:[#allocation17_spill] sm:$0xff] %v9890_v59 }
  0x6d   : > { %474 = vadd.xlane.f32.xlu2 %v473_v23  ;;  %471 = vadd.xlane.f32.xlu1 %v470_v27  ;;  %v497_v23 = vsel %vm358_vm0, %v9823_v63, 0.0  ;;  %v529_v27 = vsub.f32 1.0, %v528_v58  ;;  %v9864_v63 = vld [vmem:[%s15795_s0 + $0x1a8] sm:$0xff] }
  0x6e   : > { %468 = vadd.xlane.f32.xlu0 %v467_v28  ;;  %v494_v28 = vsel %vm358_vm0, %v9830_v11, 0.0  ;;  %16008 = vst [vmem:[#allocation13_spill] sm:$0xff] %v9864_v63 }
  0x75   : > { %483 = vadd.xlane.f32.xlu2 %v482_v35  ;;  %480 = vadd.xlane.f32.xlu1 %v479_v39  ;;  %v530_v35 = vmul.f32 %v9054_v57, %v529_v27  ;;  %v9841_v39 = vld [vmem:[%s15795_s0 + $0x190] sm:$0xff] }
  0x76   : > { %477 = vadd.xlane.f32.xlu0 %v476_v40  ;;  %16004 = vst [vmem:[#allocation9_spill] sm:$0xff] %v9841_v39  ;;  %v9846_v40 = vld [vmem:[%s15795_s0 + $0x188] sm:$0xff]  ;;  %v509_v58 = vsel %vm358_vm0, %v9841_v39, 0.0  ;;  %v9869_v39 = vld [vmem:[%s15795_s0 + $0x1a0] sm:$0xff] }
  0x77   : > { %16005 = vst [vmem:[#allocation10_spill] sm:$0xff] %v9846_v40 }
  0x78   : > { %16009 = vst [vmem:[#allocation14_spill] sm:$0xff] %v9869_v39 }
  0x7d   : > { %492 = vadd.xlane.f32.xlu2 %v491_v51  ;;  %489 = vadd.xlane.f32.xlu1 %v488_v52  ;;  %v9851_v52 = vld [vmem:[%s15795_s0 + $0x180] sm:$0xff] }
  0x7e   : > { %486 = vadd.xlane.f32.xlu0 %v485_v53  ;;  %16006 = vst [vmem:[#allocation11_spill] sm:$0xff] %v9851_v52  ;;  %v503_v27 = vsel %vm358_vm0, %v9851_v52, 0.0 }
  0x80   : > { %v9825_v3 = vpop.xlane.xlu2 %372  ;;  %v367_v4 = vpop.xlane.xlu1 %366 }
  0x81   : > { %v361_v15 = vpop.xlane.xlu0 %360 }
  0x85   : > { %501 = vadd.xlane.f32.xlu2 %v500_v16  ;;  %498 = vadd.xlane.f32.xlu1 %v497_v23  ;;  %v506_v16 = vsel %vm358_vm0, %v9846_v40, 0.0  ;;  %v531_v23 = vadd.f32 %v9054_v57, %v530_v35 }
  0x86   : > { %495 = vadd.xlane.f32.xlu0 %v494_v28 }
  0x87   : > { %v9859_v28 = vsel %vm532_vm1, %v9054_v57, %v531_v23  ;;  %v9877_v57 = vld [vmem:[%s15795_s0 + $0x198] sm:$0xff]  ;;  %v515_v23 = vsel %vm358_vm0, %v9869_v39, 0.0 }
  0x88   : > { %v376_v41 = vpop.xlane.xlu2 %375  ;;  %v370_v51 = vpop.xlane.xlu1 %369  ;;  %16007 = vst [vmem:[#allocation12_spill] sm:$0xff] %v9859_v28  ;;  %v9872_v35 = vmul.f32 %v9859_v28, %v361_v15  ;;  %v9893_v46 = vmul.f32 %v9859_v28, %v367_v4 }
  0x89   : > { %v364_v53 = vpop.xlane.xlu0 %363  ;;  %16011 = vst [vmem:[#allocation16_spill] sm:$0xff] %v9877_v57 }
  0x8a   : > { %16010 = vst [vmem:[#allocation15_spill] sm:$0xff] %v9872_v35  ;;  %v590_v15 = vsub.f32 %v9513_v2, %v9872_v35  ;;  %v9901_v2 = vld [vmem:[%s15795_s0 + $0x1b0] sm:$0xff]  ;;  %v524_v35 = vsel %vm358_vm0, %v9890_v59, 0.0 }
  0x8b   : > { %16013 = vst [vmem:[#allocation18_spill] sm:$0xff] %v9901_v2  ;;  %v521_v4 = vsel %vm358_vm0, %v9901_v2, 0.0 }
  0x8d   : > { %510 = vadd.xlane.f32.xlu2 %v509_v58  ;;  %507 = vadd.xlane.f32.xlu1 %v506_v16  ;;  %v518_v16 = vsel %vm358_vm0, %v9864_v63, 0.0  ;;  %v9896_v63 = vmul.f32 %v9859_v28, %v370_v51 }
  0x8e   : > { %504 = vadd.xlane.f32.xlu0 %v503_v27  ;;  %v512_v27 = vsel %vm358_vm0, %v9877_v57, 0.0  ;;  %v592_v57 = vsub.f32 %v9508_v1, %v9893_v46  ;;  %v9925_v1 = vmul.f32 %v9859_v28, %v9825_v3 }
  0x8f   : > { %v593_v45 = vsub.f32 %v9529_v7, %v9896_v63 }
  0x90   : > { %v385_v40 = vpop.xlane.xlu2 %384  ;;  %v382_v52 = vpop.xlane.xlu1 %381  ;;  %v648_v33 = vmul.f32 %v592_v57, %v592_v57  ;;  %v594_v3 = vsub.f32 %v9503_v0, %v9925_v1 }
  0x91   : > { %v379_v58 = vpop.xlane.xlu0 %378  ;;  %v649_v47 = vmul.f32 %v593_v45, %v593_v45  ;;  %v9937_v57 = vmul.f32 %v9859_v28, %v385_v40 }
  0x92   : > { %v9921_v59 = vmul.f32 %v9859_v28, %v379_v58 }
  0x93   : > { %16016 = vst [vmem:[#allocation21_spill] sm:$0xff] %v9937_v57  ;;  %v598_v40 = vsub.f32 %v9545_v12, %v9937_v57 }
  0x94   : > { %16015 = vst [vmem:[#allocation20_spill] sm:$0xff] %v9921_v59  ;;  %v596_v58 = vsub.f32 %v9555_v14, %v9921_v59  ;;  %v9943_v14 = vmul.f32 %v9859_v28, %v382_v52 }
  0x95   : > { %519 = vadd.xlane.f32.xlu2 %v518_v16  ;;  %516 = vadd.xlane.f32.xlu1 %v515_v23  ;;  %v646_v16 = vmul.f32 %v590_v15, %v590_v15  ;;  %v9904_v23 = vmul.f32 %v9859_v28, %v364_v53  ;;  %v9918_v15 = vmul.f32 %v9859_v28, %v376_v41 }
  0x96   : > { %513 = vadd.xlane.f32.xlu0 %v512_v27  ;;  %v597_v52 = vsub.f32 %v9550_v13, %v9943_v14  ;;  %v654_v12 = vmul.f32 %v598_v40, %v598_v40 }
  0x97   : > { %v702_v51 = vsel %vm358_vm0, %v646_v16, 0.0  ;;  %v591_v53 = vsub.f32 %v9534_v8, %v9904_v23  ;;  %16014 = vst [vmem:[#allocation19_spill] sm:$0xff] %v9918_v15  ;;  %v711_v8 = vsel %vm358_vm0, %v649_v47, 0.0  ;;  %v595_v41 = vsub.f32 %v9524_v6, %v9918_v15 }
  0x98   : > { %v394_v39 = vpop.xlane.xlu2 %393  ;;  %v391_v11 = vpop.xlane.xlu1 %390 }
  0x99   : > { %v388_v27 = vpop.xlane.xlu0 %387  ;;  %v651_v6 = vmul.f32 %v595_v41, %v595_v41  ;;  %v9955_v41 = vmul.f32 %v9859_v28, %v394_v39 }
  0x9b   : > { %16018 = vst [vmem:[#allocation23_spill] sm:$0xff] %v9955_v41  ;;  %v601_v39 = vsub.f32 %v9566_v18, %v9955_v41 }
  0x9d   : > { %525 = vadd.xlane.f32.xlu1 %v524_v35  ;;  %703 = vadd.xlane.f32.xlu2 %v702_v51  ;;  %v647_v35 = vmul.f32 %v591_v53, %v591_v53  ;;  %v708_v51 = vsel %vm358_vm0, %v648_v33, 0.0  ;;  %v9940_v33 = vmul.f32 %v9859_v28, %v388_v27  ;;  %v652_v53 = vmul.f32 %v596_v58, %v596_v58 }
  0x9e   : > { %522 = vadd.xlane.f32.xlu0 %v521_v4  ;;  %v657_v18 = vmul.f32 %v601_v39, %v601_v39 }
  0x9f   : > { %v705_v45 = vsel %vm358_vm0, %v647_v35, 0.0  ;;  %16017 = vst [vmem:[#allocation22_spill] sm:$0xff] %v9940_v33  ;;  %v717_v35 = vsel %vm358_vm0, %v651_v6, 0.0  ;;  %v720_v0 = vsel %vm358_vm0, %v652_v53, 0.0  ;;  %v599_v27 = vsub.f32 %v9576_v20, %v9940_v33 }
  0xa0   : > { %v403_v2 = vpop.xlane.xlu2 %402  ;;  %v400_v16 = vpop.xlane.xlu1 %399  ;;  %v9961_v20 = vmul.f32 %v9859_v28, %v391_v11 }
  0xa1   : > { %v397_v7 = vpop.xlane.xlu0 %396  ;;  %v655_v53 = vmul.f32 %v599_v27, %v599_v27  ;;  %v9973_v40 = vmul.f32 %v9859_v28, %v403_v2 }
  0xa2   : > { %v9958_v58 = vmul.f32 %v9859_v28, %v397_v7  ;;  %16020 = vst [vmem:[#allocation25_spill] sm:$0xff] %v9961_v20  ;;  %v600_v11 = vsub.f32 %v9571_v19, %v9961_v20 }
  0xa3   : > { %v729_v13 = vsel %vm358_vm0, %v655_v53, 0.0  ;;  %16021 = vst [vmem:[#allocation26_spill] sm:$0xff] %v9973_v40  ;;  %v604_v2 = vsub.f32 %v9587_v24, %v9973_v40 }
  0xa4   : > { %16019 = vst [vmem:[#allocation24_spill] sm:$0xff] %v9958_v58  ;;  %v602_v7 = vsub.f32 %v9597_v26, %v9958_v58  ;;  %v9979_v26 = vmul.f32 %v9859_v28, %v400_v16 }
  0xa5   : > { %709 = vadd.xlane.f32.xlu1 %v708_v51  ;;  %712 = vadd.xlane.f32.xlu2 %v711_v8  ;;  %v650_v8 = vmul.f32 %v594_v3, %v594_v3  ;;  %v660_v24 = vmul.f32 %v604_v2, %v604_v2 }
  0xa6   : > { %706 = vadd.xlane.f32.xlu0 %v705_v45  ;;  %v658_v53 = vmul.f32 %v602_v7, %v602_v7  ;;  %16023 = vst [vmem:[#allocation28_spill] sm:$0xff] %v9979_v26  ;;  %v603_v16 = vsub.f32 %v9592_v25, %v9979_v26 }
  0xa7   : > { %v714_v45 = vsel %vm358_vm0, %v650_v8, 0.0  ;;  %v653_v8 = vmul.f32 %v597_v52, %v597_v52 }
  0xa8   : > { %v412_v47 = vpop.xlane.xlu2 %411  ;;  %v409_v4 = vpop.xlane.xlu1 %408  ;;  %v738_v19 = vsel %vm358_vm0, %v658_v53, 0.0 }
  0xa9   : > { %v406_v51 = vpop.xlane.xlu0 %405  ;;  %v9991_v39 = vmul.f32 %v9859_v28, %v412_v47 }
  0xaa   : > { %v9976_v27 = vmul.f32 %v9859_v28, %v406_v51 }
  0xab   : > { %16024 = vst [vmem:[#allocation29_spill] sm:$0xff] %v9991_v39  ;;  %v607_v47 = vsub.f32 %v9608_v30, %v9991_v39 }
  0xac   : > { %16022 = vst [vmem:[#allocation27_spill] sm:$0xff] %v9976_v27  ;;  %v605_v51 = vsub.f32 %v9618_v32, %v9976_v27  ;;  %v9997_v32 = vmul.f32 %v9859_v28, %v409_v4 }
  0xad   : > { %718 = vadd.xlane.f32.xlu1 %v717_v35  ;;  %721 = vadd.xlane.f32.xlu2 %v720_v0  ;;  %v726_v0 = vsel %vm358_vm0, %v654_v12, 0.0  ;;  %v663_v30 = vmul.f32 %v607_v47, %v607_v47 }
  0xae   : > { %715 = vadd.xlane.f32.xlu0 %v714_v45  ;;  %v723_v45 = vsel %vm358_vm0, %v653_v8, 0.0  ;;  %v656_v8 = vmul.f32 %v600_v11, %v600_v11  ;;  %v661_v53 = vmul.f32 %v605_v51, %v605_v51  ;;  %16026 = vst [vmem:[#allocation31_spill] sm:$0xff] %v9997_v32  ;;  %v606_v4 = vsub.f32 %v9613_v31, %v9997_v32 }
  0xb0   : > { %v421_v3 = vpop.xlane.xlu2 %420  ;;  %v418_v6 = vpop.xlane.xlu1 %417  ;;  %v747_v25 = vsel %vm358_vm0, %v661_v53, 0.0 }
  0xb1   : > { %v415_v35 = vpop.xlane.xlu0 %414  ;;  %v10009_v2 = vmul.f32 %v9859_v28, %v421_v3 }
  0xb2   : > { %v9994_v7 = vmul.f32 %v9859_v28, %v415_v35 }
  0xb3   : > { %16027 = vst [vmem:[#allocation32_spill] sm:$0xff] %v10009_v2  ;;  %v610_v3 = vsub.f32 %v9629_v36, %v10009_v2 }
  0xb4   : > { %16025 = vst [vmem:[#allocation30_spill] sm:$0xff] %v9994_v7  ;;  %v608_v35 = vsub.f32 %v9639_v38, %v9994_v7  ;;  %v10015_v38 = vmul.f32 %v9859_v28, %v418_v6  ;;  %v928_v7 = vld [vmem:[%s15797_s2 + $0x10] sm:$0xff] }
  0xb5   : > { %727 = vadd.xlane.f32.xlu1 %v726_v0  ;;  %730 = vadd.xlane.f32.xlu2 %v729_v13  ;;  %v735_v13 = vsel %vm358_vm0, %v657_v18, 0.0  ;;  %v666_v36 = vmul.f32 %v610_v3, %v610_v3 }
  0xb6   : > { %724 = vadd.xlane.f32.xlu0 %v723_v45  ;;  %v732_v45 = vsel %vm358_vm0, %v656_v8, 0.0  ;;  %v659_v8 = vmul.f32 %v603_v16, %v603_v16  ;;  %v664_v53 = vmul.f32 %v608_v35, %v608_v35  ;;  %16029 = vst [vmem:[#allocation34_spill] sm:$0xff] %v10015_v38  ;;  %v609_v6 = vsub.f32 %v9634_v37, %v10015_v38 }
  0xb8   : > { %v430_v52 = vpop.xlane.xlu2 %429  ;;  %v427_v12 = vpop.xlane.xlu1 %426  ;;  %v756_v31 = vsel %vm358_vm0, %v664_v53, 0.0 }
  0xb9   : > { %v424_v0 = vpop.xlane.xlu0 %423  ;;  %v10027_v47 = vmul.f32 %v9859_v28, %v430_v52 }
  0xba   : > { %v10012_v51 = vmul.f32 %v9859_v28, %v424_v0 }
  0xbb   : > { %16030 = vst [vmem:[#allocation35_spill] sm:$0xff] %v10027_v47  ;;  %v613_v52 = vsub.f32 %v9650_v42, %v10027_v47 }
  0xbc   : > { %16028 = vst [vmem:[#allocation33_spill] sm:$0xff] %v10012_v51  ;;  %v611_v0 = vsub.f32 %v9660_v44, %v10012_v51  ;;  %v10033_v44 = vmul.f32 %v9859_v28, %v427_v12  ;;  %v927_v51 = vld [vmem:[%s15797_s2 + $0x8] sm:$0xff] }
  0xbd   : > { %736 = vadd.xlane.f32.xlu1 %v735_v13  ;;  %739 = vadd.xlane.f32.xlu2 %v738_v19  ;;  %v744_v19 = vsel %vm358_vm0, %v660_v24, 0.0  ;;  %v669_v42 = vmul.f32 %v613_v52, %v613_v52 }
  0xbe   : > { %733 = vadd.xlane.f32.xlu0 %v732_v45  ;;  %v741_v45 = vsel %vm358_vm0, %v659_v8, 0.0  ;;  %v662_v8 = vmul.f32 %v606_v4, %v606_v4  ;;  %v667_v53 = vmul.f32 %v611_v0, %v611_v0  ;;  %16032 = vst [vmem:[#allocation37_spill] sm:$0xff] %v10033_v44  ;;  %v612_v12 = vsub.f32 %v9655_v43, %v10033_v44 }
  0xc0   : > { %v439_v11 = vpop.xlane.xlu2 %438  ;;  %v436_v18 = vpop.xlane.xlu1 %435  ;;  %v765_v37 = vsel %vm358_vm0, %v667_v53, 0.0 }
  0xc1   : > { %v433_v13 = vpop.xlane.xlu0 %432  ;;  %v10045_v3 = vmul.f32 %v9859_v28, %v439_v11 }
  0xc2   : > { %v10030_v35 = vmul.f32 %v9859_v28, %v433_v13 }
  0xc3   : > { %16033 = vst [vmem:[#allocation38_spill] sm:$0xff] %v10045_v3  ;;  %v616_v11 = vsub.f32 %v9671_v48, %v10045_v3 }
  0xc4   : > { %16031 = vst [vmem:[#allocation36_spill] sm:$0xff] %v10030_v35  ;;  %v614_v13 = vsub.f32 %v9681_v50, %v10030_v35  ;;  %v10051_v50 = vmul.f32 %v9859_v28, %v436_v18 }
  0xc5   : > { %745 = vadd.xlane.f32.xlu1 %v744_v19  ;;  %748 = vadd.xlane.f32.xlu2 %v747_v25  ;;  %v753_v25 = vsel %vm358_vm0, %v663_v30, 0.0  ;;  %v672_v48 = vmul.f32 %v616_v11, %v616_v11 }
  0xc6   : > { %742 = vadd.xlane.f32.xlu0 %v741_v45  ;;  %v750_v45 = vsel %vm358_vm0, %v662_v8, 0.0  ;;  %v665_v8 = vmul.f32 %v609_v6, %v609_v6  ;;  %v670_v53 = vmul.f32 %v614_v13, %v614_v13  ;;  %16035 = vst [vmem:[#allocation40_spill] sm:$0xff] %v10051_v50  ;;  %v615_v18 = vsub.f32 %v9676_v49, %v10051_v50 }
  0xc8   : > { %v448_v16 = vpop.xlane.xlu2 %447  ;;  %v445_v24 = vpop.xlane.xlu1 %444  ;;  %v774_v43 = vsel %vm358_vm0, %v670_v53, 0.0 }
  0xc9   : > { %v442_v19 = vpop.xlane.xlu0 %441  ;;  %v10063_v52 = vmul.f32 %v9859_v28, %v448_v16 }
  0xca   : > { %v10048_v0 = vmul.f32 %v9859_v28, %v442_v19 }
  0xcb   : > { %16036 = vst [vmem:[#allocation41_spill] sm:$0xff] %v10063_v52  ;;  %v619_v16 = vsub.f32 %v9692_v54, %v10063_v52 }
  0xcc   : > { %16034 = vst [vmem:[#allocation39_spill] sm:$0xff] %v10048_v0  ;;  %v617_v19 = vsub.f32 %v9702_v56, %v10048_v0  ;;  %v10069_v56 = vmul.f32 %v9859_v28, %v445_v24 }
  0xcd   : > { %754 = vadd.xlane.f32.xlu1 %v753_v25  ;;  %757 = vadd.xlane.f32.xlu2 %v756_v31  ;;  %v762_v31 = vsel %vm358_vm0, %v666_v36, 0.0  ;;  %v675_v54 = vmul.f32 %v619_v16, %v619_v16 }
  0xce   : > { %751 = vadd.xlane.f32.xlu0 %v750_v45  ;;  %v759_v45 = vsel %vm358_vm0, %v665_v8, 0.0  ;;  %v668_v8 = vmul.f32 %v612_v12, %v612_v12  ;;  %v673_v53 = vmul.f32 %v617_v19, %v617_v19  ;;  %16038 = vst [vmem:[#allocation43_spill] sm:$0xff] %v10069_v56  ;;  %v618_v24 = vsub.f32 %v9697_v55, %v10069_v56 }
  0xd0   : > { %v457_v4 = vpop.xlane.xlu2 %456  ;;  %v454_v30 = vpop.xlane.xlu1 %453  ;;  %v783_v49 = vsel %vm358_vm0, %v673_v53, 0.0 }
  0xd1   : > { %v451_v25 = vpop.xlane.xlu0 %450  ;;  %v10081_v11 = vmul.f32 %v9859_v28, %v457_v4 }
  0xd2   : > { %v10066_v13 = vmul.f32 %v9859_v28, %v451_v25 }
  0xd3   : > { %16039 = vst [vmem:[#allocation44_spill] sm:$0xff] %v10081_v11  ;;  %v622_v4 = vsub.f32 %v9713_v60, %v10081_v11 }
  0xd4   : > { %16037 = vst [vmem:[#allocation42_spill] sm:$0xff] %v10066_v13  ;;  %v620_v25 = vsub.f32 %v9723_v62, %v10066_v13  ;;  %v10087_v62 = vmul.f32 %v9859_v28, %v454_v30 }
  0xd5   : > { %763 = vadd.xlane.f32.xlu1 %v762_v31  ;;  %766 = vadd.xlane.f32.xlu2 %v765_v37  ;;  %v771_v37 = vsel %vm358_vm0, %v669_v42, 0.0  ;;  %v678_v60 = vmul.f32 %v622_v4, %v622_v4 }
  0xd6   : > { %760 = vadd.xlane.f32.xlu0 %v759_v45  ;;  %v768_v45 = vsel %vm358_vm0, %v668_v8, 0.0  ;;  %v671_v8 = vmul.f32 %v615_v18, %v615_v18  ;;  %v676_v53 = vmul.f32 %v620_v25, %v620_v25  ;;  %16041 = vst [vmem:[#allocation46_spill] sm:$0xff] %v10087_v62  ;;  %v621_v30 = vsub.f32 %v9718_v61, %v10087_v62 }
  0xd8   : > { %v466_v6 = vpop.xlane.xlu2 %465  ;;  %v463_v36 = vpop.xlane.xlu1 %462  ;;  %v792_v55 = vsel %vm358_vm0, %v676_v53, 0.0 }
  0xd9   : > { %v460_v31 = vpop.xlane.xlu0 %459  ;;  %v10099_v16 = vmul.f32 %v9859_v28, %v466_v6 }
  0xda   : > { %v10084_v19 = vmul.f32 %v9859_v28, %v460_v31 }
  0xdb   : > { %16042 = vst [vmem:[#allocation47_spill] sm:$0xff] %v10099_v16  ;;  %v625_v6 = vsub.f32 %v9734_v5, %v10099_v16 }
  0xdc   : > { %16040 = vst [vmem:[#allocation45_spill] sm:$0xff] %v10084_v19  ;;  %v623_v31 = vsub.f32 %v9744_v10, %v10084_v19  ;;  %v10105_v10 = vmul.f32 %v9859_v28, %v463_v36 }
  0xdd   : > { %772 = vadd.xlane.f32.xlu1 %v771_v37  ;;  %775 = vadd.xlane.f32.xlu2 %v774_v43  ;;  %v780_v43 = vsel %vm358_vm0, %v672_v48, 0.0  ;;  %v681_v5 = vmul.f32 %v625_v6, %v625_v6 }
  0xde   : > { %769 = vadd.xlane.f32.xlu0 %v768_v45  ;;  %v777_v45 = vsel %vm358_vm0, %v671_v8, 0.0  ;;  %v674_v8 = vmul.f32 %v618_v24, %v618_v24  ;;  %v679_v53 = vmul.f32 %v623_v31, %v623_v31  ;;  %16044 = vst [vmem:[#allocation49_spill] sm:$0xff] %v10105_v10  ;;  %v624_v36 = vsub.f32 %v9739_v9, %v10105_v10 }
  0xe0   : > { %v475_v12 = vpop.xlane.xlu2 %474  ;;  %v472_v42 = vpop.xlane.xlu1 %471  ;;  %v801_v61 = vsel %vm358_vm0, %v679_v53, 0.0 }
  0xe1   : > { %v469_v37 = vpop.xlane.xlu0 %468  ;;  %v10117_v4 = vmul.f32 %v9859_v28, %v475_v12 }
  0xe2   : > { %v10102_v25 = vmul.f32 %v9859_v28, %v469_v37 }
  0xe3   : > { %16045 = vst [vmem:[#allocation50_spill] sm:$0xff] %v10117_v4  ;;  %v628_v12 = vsub.f32 %v9755_v17, %v10117_v4 }
  0xe4   : > { %16043 = vst [vmem:[#allocation48_spill] sm:$0xff] %v10102_v25  ;;  %v626_v37 = vsub.f32 %v9765_v22, %v10102_v25  ;;  %v10123_v22 = vmul.f32 %v9859_v28, %v472_v42 }
  0xe5   : > { %781 = vadd.xlane.f32.xlu1 %v780_v43  ;;  %784 = vadd.xlane.f32.xlu2 %v783_v49  ;;  %v789_v49 = vsel %vm358_vm0, %v675_v54, 0.0  ;;  %v684_v17 = vmul.f32 %v628_v12, %v628_v12  ;;  %v16052_v12 = vld [vmem:[#allocation2_spill] sm:$0xff] }
  0xe6   : > { %778 = vadd.xlane.f32.xlu0 %v777_v45  ;;  %v786_v45 = vsel %vm358_vm0, %v674_v8, 0.0  ;;  %v677_v8 = vmul.f32 %v621_v30, %v621_v30  ;;  %v682_v53 = vmul.f32 %v626_v37, %v626_v37  ;;  %16047 = vst [vmem:[#allocation52_spill] sm:$0xff] %v10123_v22  ;;  %v627_v42 = vsub.f32 %v9760_v21, %v10123_v22 }
  0xe8   : > { %v484_v18 = vpop.xlane.xlu2 %483  ;;  %v481_v48 = vpop.xlane.xlu1 %480  ;;  %v810_v9 = vsel %vm358_vm0, %v682_v53, 0.0 }
  0xe9   : > { %v478_v43 = vpop.xlane.xlu0 %477  ;;  %v10135_v6 = vmul.f32 %v9859_v28, %v484_v18 }
  0xea   : > { %v10120_v31 = vmul.f32 %v9859_v28, %v478_v43 }
  0xeb   : > { %16048 = vst [vmem:[#allocation53_spill] sm:$0xff] %v10135_v6  ;;  %v631_v18 = vsub.f32 %v9776_v29, %v10135_v6 }
  0xec   : > { %16046 = vst [vmem:[#allocation51_spill] sm:$0xff] %v10120_v31  ;;  %v629_v43 = vsub.f32 %v9786_v34, %v10120_v31  ;;  %v10141_v34 = vmul.f32 %v9859_v28, %v481_v48 }
  0xed   : > { %790 = vadd.xlane.f32.xlu1 %v789_v49  ;;  %793 = vadd.xlane.f32.xlu2 %v792_v55  ;;  %v798_v55 = vsel %vm358_vm0, %v678_v60, 0.0  ;;  %v687_v29 = vmul.f32 %v631_v18, %v631_v18  ;;  %v16058_v18 = vld [vmem:[#allocation4_spill] sm:$0xff] }
  0xee   : > { %787 = vadd.xlane.f32.xlu0 %v786_v45  ;;  %v795_v45 = vsel %vm358_vm0, %v677_v8, 0.0  ;;  %v680_v8 = vmul.f32 %v624_v36, %v624_v36  ;;  %v685_v53 = vmul.f32 %v629_v43, %v629_v43  ;;  %16050 = vst [vmem:[#allocation55_spill] sm:$0xff] %v10141_v34  ;;  %v630_v48 = vsub.f32 %v16052_v12, %v10141_v34 }
  0xf0   : > { %v493_v24 = vpop.xlane.xlu2 %492  ;;  %v490_v54 = vpop.xlane.xlu1 %489  ;;  %v819_v21 = vsel %vm358_vm0, %v685_v53, 0.0 }
  0xf1   : > { %v487_v49 = vpop.xlane.xlu0 %486  ;;  %v10153_v43 = vmul.f32 %v9859_v28, %v493_v24 }
  0xf2   : > { %v10138_v37 = vmul.f32 %v9859_v28, %v487_v49 }
  0xf4   : > { %16049 = vst [vmem:[#allocation54_spill] sm:$0xff] %v10138_v37 }
  0xf5   : > { %799 = vadd.xlane.f32.xlu1 %v798_v55  ;;  %802 = vadd.xlane.f32.xlu2 %v801_v61  ;;  %v807_v61 = vsel %vm358_vm0, %v681_v5, 0.0 }
  0xf6   : > { %796 = vadd.xlane.f32.xlu0 %v795_v45  ;;  %v804_v45 = vsel %vm358_vm0, %v680_v8, 0.0  ;;  %v683_v8 = vmul.f32 %v627_v42, %v627_v42 }
  0xf8   : > { %v502_v30 = vpop.xlane.xlu2 %501  ;;  %v499_v60 = vpop.xlane.xlu1 %498  ;;  %v813_v31 = vsel %vm358_vm0, %v683_v8, 0.0  ;;  %v686_v8 = vmul.f32 %v630_v48, %v630_v48 }
  0xf9   : > { %v496_v55 = vpop.xlane.xlu0 %495 }
  0xfa   : > { %v10156_v42 = vmul.f32 %v9859_v28, %v496_v55  ;;  %v822_v4 = vsel %vm358_vm0, %v686_v8, 0.0 }
  0xfc   : > { %16054 = vst [vmem:[#allocation2_spill] sm:$0xff] %v10156_v42 }
  0xfd   : > { %808 = vadd.xlane.f32.xlu1 %v807_v61  ;;  %811 = vadd.xlane.f32.xlu2 %v810_v9  ;;  %v816_v9 = vsel %vm358_vm0, %v684_v17, 0.0 }
  0xfe   : > { %805 = vadd.xlane.f32.xlu0 %v804_v45  ;;  %v16051_v45 = vld [vmem:[#allocation5_spill] sm:$0xff] }
  0xff   : > { %v632_v49 = vsub.f32 %v16051_v45, %v10138_v37  ;;  %16053 = vst [vmem:[#allocation5_spill] sm:$0xff] %v10153_v43  ;;  %v10159_v45 = vmul.f32 %v9859_v28, %v490_v54  ;;  %v16057_v37 = vld [vmem:[#allocation8_spill] sm:$0xff] }
 0x100   : > { %v511_v36 = vpop.xlane.xlu2 %510  ;;  %v508_v5 = vpop.xlane.xlu1 %507  ;;  %v635_v55 = vsub.f32 %v16057_v37, %v10156_v42  ;;  %v10179_v37 = vmul.f32 %v9859_v28, %v499_v60 }
 0x101   : > { %v505_v61 = vpop.xlane.xlu0 %504  ;;  %v688_v6 = vmul.f32 %v632_v49, %v632_v49  ;;  %16055 = vst [vmem:[#allocation56_spill] sm:$0xff] %v10159_v45  ;;  %v633_v54 = vsub.f32 %v16058_v18, %v10159_v45  ;;  %v10171_v49 = vmul.f32 %v9859_v28, %v502_v30  ;;  %v16062_v30 = vld [vmem:[#allocation6_spill] sm:$0xff] }
 0x102   : > { %v10174_v48 = vmul.f32 %v9859_v28, %v505_v61  ;;  %16061 = vst [vmem:[#allocation4_spill] sm:$0xff] %v10179_v37  ;;  %v16063_v61 = vld [vmem:[#allocation11_spill] sm:$0xff] }
 0x103   : > { %v828_v12 = vsel %vm358_vm0, %v688_v6, 0.0  ;;  %v637_v18 = vsub.f32 %v16062_v30, %v10171_v49 }
 0x104   : > { %16060 = vst [vmem:[#allocation8_spill] sm:$0xff] %v10174_v48  ;;  %v638_v42 = vsub.f32 %v16063_v61, %v10174_v48  ;;  %v10197_v61 = vmul.f32 %v9859_v28, %v508_v5 }
 0x105   : > { %817 = vadd.xlane.f32.xlu1 %v816_v9  ;;  %820 = vadd.xlane.f32.xlu2 %v819_v21  ;;  %v825_v21 = vsel %vm358_vm0, %v687_v29, 0.0  ;;  %v693_v30 = vmul.f32 %v637_v18, %v637_v18 }
 0x106   : > { %814 = vadd.xlane.f32.xlu0 %v813_v31  ;;  %v16056_v31 = vld [vmem:[#allocation3_spill] sm:$0xff] }
 0x107   : > { %v634_v24 = vsub.f32 %v16056_v31, %v10153_v43  ;;  %16059 = vst [vmem:[#allocation3_spill] sm:$0xff] %v10171_v49  ;;  %v691_v43 = vmul.f32 %v635_v55, %v635_v55  ;;  %v10191_v55 = vmul.f32 %v9859_v28, %v511_v36  ;;  %v694_v49 = vmul.f32 %v638_v42, %v638_v42  ;;  %v16070_v42 = vld [vmem:[#allocation10_spill] sm:$0xff] }
 0x108   : > { %v520_v17 = vpop.xlane.xlu2 %519  ;;  %v517_v53 = vpop.xlane.xlu1 %516 }
 0x109   : > { %v514_v9 = vpop.xlane.xlu0 %513  ;;  %v690_v31 = vmul.f32 %v634_v24, %v634_v24  ;;  %v16064_v24 = vld [vmem:[#allocation7_spill] sm:$0xff]  ;;  %16065 = vst [vmem:[#allocation6_spill] sm:$0xff] %v10191_v55  ;;  %v846_v36 = vsel %vm358_vm0, %v694_v49, 0.0  ;;  %v10214_v49 = vmul.f32 %v9859_v28, %v520_v17 }
 0x10a   : > { %v636_v60 = vsub.f32 %v16064_v24, %v10179_v37  ;;  %16067 = vst [vmem:[#allocation7_spill] sm:$0xff] %v10197_v61  ;;  %v16069_v37 = vld [vmem:[#allocation16_spill] sm:$0xff] }
 0x10d   : > { %826 = vadd.xlane.f32.xlu1 %v825_v21  ;;  %829 = vadd.xlane.f32.xlu2 %v828_v12  ;;  %v689_v21 = vmul.f32 %v633_v54, %v633_v54  ;;  %v834_v12 = vsel %vm358_vm0, %v690_v31, 0.0  ;;  %v10194_v54 = vmul.f32 %v9859_v28, %v514_v9  ;;  %v16068_v9 = vld [vmem:[#allocation9_spill] sm:$0xff] }
 0x10e   : > { %823 = vadd.xlane.f32.xlu0 %v822_v4  ;;  %v837_v4 = vsel %vm358_vm0, %v691_v43, 0.0  ;;  %v640_v48 = vsub.f32 %v16068_v9, %v10191_v55  ;;  %16071 = vst [vmem:[#allocation9_spill] sm:$0xff] %v10214_v49 }
 0x10f   : > { %v831_v45 = vsel %vm358_vm0, %v689_v21, 0.0  ;;  %16066 = vst [vmem:[#allocation11_spill] sm:$0xff] %v10194_v54  ;;  %v692_v21 = vmul.f32 %v636_v60, %v636_v60  ;;  %v641_v18 = vsub.f32 %v16069_v37, %v10194_v54  ;;  %v639_v60 = vsub.f32 %v16070_v42, %v10197_v61 }
 0x110   : > { %v10176_v6 = vpop.xlane.xlu1 %525  ;;  %v704_v29 = vpop.xlane.xlu2 %703  ;;  %v10222_v54 = vmul.f32 %v9859_v28, %v517_v53 }
 0x111   : > { %v523_v8 = vpop.xlane.xlu0 %522  ;;  %v840_v5 = vsel %vm358_vm0, %v692_v21, 0.0  ;;  %v696_v21 = vmul.f32 %v640_v48, %v640_v48  ;;  %v695_v42 = vmul.f32 %v639_v60, %v639_v60 }
 0x112   : > { %v10219_v9 = vmul.f32 %v9859_v28, %v523_v8  ;;  %16073 = vst [vmem:[#allocation10_spill] sm:$0xff] %v10222_v54  ;;  %v16074_v8 = vld [vmem:[#allocation13_spill] sm:$0xff] }
 0x113   : > { %v852_v48 = vsel %vm358_vm0, %v696_v21, 0.0 }
 0x114   : > { %16072 = vst [vmem:[#allocation16_spill] sm:$0xff] %v10219_v9 }
 0x115   : > { %835 = vadd.xlane.f32.xlu1 %v834_v12  ;;  %838 = vadd.xlane.f32.xlu2 %v837_v4  ;;  %v870_v4 = vmul.f32 %v704_v29, %v9859_v28 }
 0x116   : > { %832 = vadd.xlane.f32.xlu0 %v831_v45  ;;  %v843_v45 = vsel %vm358_vm0, %v693_v30, 0.0 }
 0x117   : > { %v10210_v29 = vadd.f32 1e-05, %v870_v4 }
 0x118   : > { %v710_v43 = vpop.xlane.xlu1 %709  ;;  %v713_v31 = vpop.xlane.xlu2 %712 }
 0x119   : > { %v707_v12 = vpop.xlane.xlu0 %706  ;;  %9055 = vrsqrt.f32 %v10210_v29  ;;  %v873_v17 = vmul.f32 %v713_v31, %v9859_v28  ;;  %v16076_v31 = vld [vmem:[#allocation14_spill] sm:$0xff]  ;;  %vm1044_vm4 = vweird.f32 %v10210_v29 }
 0x11a   : > { %v871_v24 = vmul.f32 %v707_v12, %v9859_v28  ;;  %v872_v12 = vmul.f32 %v710_v43, %v9859_v28  ;;  %v642_v55 = vsub.f32 %v16076_v31, %v10222_v54 }
 0x11b   : > { %v10240_v61 = vadd.f32 1e-05, %v873_v17 }
 0x11c   : > { %v10216_v30 = vadd.f32 1e-05, %v871_v24  ;;  %v10225_v43 = vadd.f32 1e-05, %v872_v12  ;;  %v643_v24 = vsub.f32 %v16074_v8, %v10214_v49  ;;  %v849_v12 = vsel %vm358_vm0, %v695_v42, 0.0 }
 0x11d   : > { %844 = vadd.xlane.f32.xlu1 %v843_v45  ;;  %847 = vadd.xlane.f32.xlu2 %v846_v36  ;;  %v697_v36 = vmul.f32 %v641_v18, %v641_v18  ;;  %v16075_v18 = vld [vmem:[#allocation18_spill] sm:$0xff]  ;;  %vm1074_vm13 = vweird.f32 %v10240_v61 }
 0x11e   : > { %841 = vadd.xlane.f32.xlu0 %v840_v5  ;;  %9057 = vrsqrt.f32 %v10216_v30  ;;  %v644_v60 = vsub.f32 %v16075_v18, %v10219_v9  ;;  %vm1054_vm5 = vweird.f32 %v10216_v30  ;;  %vm1064_vm9 = vweird.f32 %v10225_v43 }
 0x11f   : > { %v855_v53 = vsel %vm358_vm0, %v697_v36, 0.0  ;;  %9059 = vrsqrt.f32 %v10225_v43  ;;  %v10242_v8 = vpop.eup %9055 }
 0x120   : > { %v719_v37 = vpop.xlane.xlu1 %718  ;;  %v722_v45 = vpop.xlane.xlu2 %721  ;;  %v700_v18 = vmul.f32 %v644_v60, %v644_v60  ;;  %9061 = vrsqrt.f32 %v10240_v61  ;;  %vm1045_vm2 = vweird.f32 %v10242_v8 }
 0x121   : > { %v716_v4 = vpop.xlane.xlu0 %715  ;;  %v875_v60 = vmul.f32 %v719_v37, %v9859_v28  ;;  %v16078_v37 = vld [vmem:[#allocation17_spill] sm:$0xff]  ;;  %vm10337_vm6 = vmor %vm1044_vm4, %vm1045_vm2 }
 0x122   : > { %v874_v5 = vmul.f32 %v716_v4, %v9859_v28  ;;  %v699_v4 = vmul.f32 %v643_v24, %v643_v24  ;;  %v698_v24 = vmul.f32 %v642_v55, %v642_v55  ;;  %v864_v55 = vsel %vm358_vm0, %v700_v18, 0.0 }
 0x123   : > { %v10273_v16 = vadd.f32 1e-05, %v875_v60 }
 0x124   : > { %v10244_v21 = vadd.f32 1e-05, %v874_v5  ;;  %v10246_v42 = vpop.eup %9057  ;;  %v1039_v5 = vmul.f32 %v10242_v8, %v10210_v29  ;;  %v861_v9 = vsel %vm358_vm0, %v699_v4, 0.0 }
 0x125   : > { %853 = vadd.xlane.f32.xlu1 %v852_v48  ;;  %856 = vadd.xlane.f32.xlu2 %v855_v53  ;;  %v9456_v48 = vmov 0   ;;  %v10250_v53 = vmul.f32 %v9859_v28, %v10176_v6  ;;  %v10260_v54 = vpop.eup %9059  ;;  %v1049_v6 = vmul.f32 %v10246_v42, %v10216_v30  ;;  %vm1055_vm3 = vweird.f32 %v10246_v42 }
 0x126   : > { %850 = vadd.xlane.f32.xlu0 %v849_v12  ;;  %9051 = vset.pattern.permute.xlu2 %v9456_v48  ;;  %9063 = vrsqrt.f32 %v10244_v21  ;;  %v1040_v4 = vmul.f32 %v10242_v8, %v1039_v5  ;;  %v1059_v25 = vmul.f32 %v10260_v54, %v10225_v43  ;;  %vm1065_vm7 = vweird.f32 %v10260_v54  ;;  %vm10345_vm8 = vmor %vm1054_vm5, %vm1055_vm3 }
 0x127   : > { %9050 = vset.pattern.permute.xlu1 %v9456_v48  ;;  %16077 = vst [vmem:[#allocation13_spill] sm:$0xff] %v10250_v53  ;;  %9052 = vset.pattern.permute.xlu0 %v9456_v48  ;;  %v858_v48 = vsel %vm358_vm0, %v698_v24, 0.0  ;;  %vm10389_vm11 = vmor %vm1064_vm9, %vm1065_vm7  ;;  %vm1084_vm14 = vweird.f32 %v10244_v21  ;;  %vm1094_vm7 = vweird.f32 %v10273_v16 }
 0x128   : > { %v728_v36 = vpop.xlane.xlu1 %727  ;;  %v731_v49 = vpop.xlane.xlu2 %730  ;;  %v1041_v34 = vmul.f32 0.5, %v1040_v4  ;;  %v1060_v19 = vmul.f32 %v10260_v54, %v1059_v25 }
 0x129   : > { %v879_v17 = vmul.f32 %v731_v49, %v9859_v28  ;;  %v725_v12 = vpop.xlane.xlu0 %724  ;;  %v876_v49 = vmul.f32 %v722_v45, %v9859_v28  ;;  %v10276_v45 = vpop.eup %9061 }
 0x12a   : > { %v877_v60 = vmul.f32 %v725_v12, %v9859_v28  ;;  %v1069_v22 = vmul.f32 %v10276_v45, %v10240_v61  ;;  %v878_v12 = vmul.f32 %v728_v36, %v9859_v28  ;;  %v1042_v11 = vsub.f32 1.5, %v1041_v34 }
 0x12b   : > { %v10257_v31 = vadd.f32 1e-05, %v879_v17  ;;  %v645_v17 = vsub.f32 %v16078_v37, %v10250_v53  ;;  %v10279_v18 = vadd.f32 1e-05, %v876_v49  ;;  %v1061_v13 = vmul.f32 0.5, %v1060_v19 }
 0x12c   : > { %v10284_v53 = vpop.eup %9063  ;;  %v10300_v25 = vadd.f32 1e-05, %v877_v60  ;;  %vm1075_vm10 = vweird.f32 %v10276_v45 }
 0x12d   : > { %862 = vadd.xlane.f32.xlu1 %v861_v9  ;;  %865 = vadd.xlane.f32.xlu2 %v864_v55  ;;  %9065 = vrsqrt.f32 %v10257_v31  ;;  %v1050_v9 = vmul.f32 %v10246_v42, %v1049_v6  ;;  %v701_v5 = vmul.f32 %v645_v17, %v645_v17  ;;  %v1079_v17 = vmul.f32 %v10284_v53, %v10244_v21  ;;  %vm10420_vm15 = vmor %vm1074_vm13, %vm1075_vm10  ;;  %v929_v21 = vld [vmem:[%s15797_s2 + $0x18] sm:$0xff] }
 0x12e   : > { %859 = vadd.xlane.f32.xlu0 %v858_v48  ;;  %9067 = vrsqrt.f32 %v10273_v16  ;;  %v1062_v60 = vsub.f32 1.5, %v1061_v13  ;;  %vm1085_vm12 = vweird.f32 %v10284_v53  ;;  %vm1134_vm3 = vweird.f32 %v10257_v31 }
 0x12f   : > { %v1051_v6 = vmul.f32 0.5, %v1050_v9  ;;  %9069 = vrsqrt.f32 %v10279_v18  ;;  %v867_v4 = vsel %vm358_vm0, %v701_v5, 0.0  ;;  %v1070_v9 = vmul.f32 %v10276_v45, %v1069_v22  ;;  %vm10436_vm1 = vmor %vm1084_vm14, %vm1085_vm12 }
 0x130   : > { %v10281_v24 = vpop.xlane.xlu1 %736  ;;  %v740_v55 = vpop.xlane.xlu2 %739  ;;  %v1080_v36 = vmul.f32 %v10284_v53, %v1079_v17  ;;  %v10311_v5 = vadd.f32 1e-05, %v878_v12 }
 0x131   : > { %v882_v48 = vmul.f32 %v740_v55, %v9859_v28  ;;  %v734_v37 = vpop.xlane.xlu0 %733  ;;  %v1052_v10 = vsub.f32 1.5, %v1051_v6  ;;  %v1071_v6 = vmul.f32 0.5, %v1070_v9  ;;  %v881_v50 = vmul.f32 %v10281_v24, %v9859_v28 }
 0x132   : > { %v1081_v13 = vmul.f32 0.5, %v1080_v36  ;;  %v880_v29 = vmul.f32 %v734_v37, %v9859_v28  ;;  %v1063_v36 = vmul.f32 %v10260_v54, %v1062_v60  ;;  %v926_v60 = vld [vmem:[%s15797_s2] sm:$0xff] }
 0x133   : > { %v10292_v49 = vadd.f32 1e-05, %v882_v48  ;;  %v10294_v55 = vpop.eup %9065  ;;  %v1053_v3 = vmul.f32 %v10246_v42, %v1052_v10  ;;  %v1072_v10 = vsub.f32 1.5, %v1071_v6  ;;  %v10409_v43 = vadd.f32 1e-05, %v881_v50 }
 0x134   : > { %v1129_v48 = vmul.f32 %v10294_v55, %v10257_v31  ;;  %v10308_v62 = vpop.eup %9067  ;;  %vm1135_vm2 = vweird.f32 %v10294_v55 }
 0x135   : > { %9071 = vrsqrt.f32 %v10292_v49  ;;  %v10316_v22 = vpop.eup %9069  ;;  %v1089_v17 = vmul.f32 %v10308_v62, %v10273_v16  ;;  %vm10466_vm4 = vmor %vm1134_vm3, %vm1135_vm2  ;;  %vm1095_vm5 = vweird.f32 %v10308_v62  ;;  %vm1164_vm12 = vweird.f32 %v10292_v49 }
 0x136   : > { %868 = vadd.xlane.f32.xlu0 %v867_v4  ;;  %9073 = vrsqrt.f32 %v10300_v25  ;;  %v1043_v4 = vmul.f32 %v10242_v8, %v1042_v11  ;;  %v1130_v12 = vmul.f32 %v10294_v55, %v1129_v48  ;;  %v1099_v35 = vmul.f32 %v10316_v22, %v10279_v18  ;;  %vm10494_vm9 = vmor %vm1094_vm7, %vm1095_vm5 }
 0x137   : > { %9075 = vrsqrt.f32 %v10311_v5  ;;  %v1090_v56 = vmul.f32 %v10308_v62, %v1089_v17  ;;  %v1082_v17 = vsub.f32 1.5, %v1081_v13  ;;  %v10381_v48 = vadd.f32 1e-05, %v880_v29 }
 0x138   : > { %v10306_v52 = vpop.xlane.xlu1 %745  ;;  %v749_v0 = vpop.xlane.xlu2 %748  ;;  %v1047_v30 = vsel %vm10337_vm6, %v10242_v8, %v1043_v4  ;;  %v1131_v47 = vmul.f32 0.5, %v1130_v12  ;;  %v1057_v8 = vsel %vm10345_vm8, %v10246_v42, %v1053_v3  ;;  %v1100_v4 = vmul.f32 %v10316_v22, %v1099_v35 }
 0x139   : > { %v885_v34 = vmul.f32 %v749_v0, %v9859_v28  ;;  %v10314_v19 = vpop.xlane.xlu0 %742  ;;  %v10383_v35 = vmul.f32 %v1057_v8, %v927_v51  ;;  %v10385_v13 = vmul.f32 %v1047_v30, %v926_v60  ;;  %v1091_v24 = vmul.f32 0.5, %v1090_v56 }
 0x13a   : > { %v1132_v2 = vsub.f32 1.5, %v1131_v47  ;;  %v1067_v29 = vsel %vm10389_vm11, %v10260_v54, %v1063_v36  ;;  %v1073_v51 = vmul.f32 %v10276_v45, %v1072_v10  ;;  %v1101_v30 = vmul.f32 0.5, %v1100_v4 }
 0x13b   : > { %v10325_v0 = vadd.f32 1e-05, %v885_v34  ;;  %v10332_v9 = vpop.eup %9071  ;;  %v1083_v60 = vmul.f32 %v10284_v53, %v1082_v17  ;;  %v10416_v36 = vmul.f32 %v1067_v29, %v928_v7  ;;  %v1092_v50 = vsub.f32 1.5, %v1091_v24  ;;  %v938_v17 = vld [vmem:[%s15797_s2 + $0x60] sm:$0xff] }
 0x13c   : > { %v10353_v34 = vpop.eup %9073  ;;  %v1159_v12 = vmul.f32 %v10332_v9, %v10292_v49  ;;  %v1077_v7 = vsel %vm10420_vm15, %v10276_v45, %v1073_v51  ;;  %v930_v45 = vld [vmem:[%s15797_s2 + $0x20] sm:$0xff]  ;;  %v883_v39 = vmul.f32 %v10314_v19, %v9859_v28  ;;  %vm1105_vm6 = vweird.f32 %v10316_v22 }
 0x13d   : > { %9077 = vrsqrt.f32 %v10325_v0  ;;  %v10377_v3 = vpop.eup %9075  ;;  %v1109_v42 = vmul.f32 %v10353_v34, %v10300_v25  ;;  %v1087_v51 = vsel %vm10436_vm1, %v10284_v53, %v1083_v60  ;;  %v10462_v27 = vmul.f32 %v1077_v7, %v929_v21 }
 0x13e   : > { %v1160_v8 = vmul.f32 %v10332_v9, %v1159_v12  ;;  %v1119_v56 = vmul.f32 %v10377_v3, %v10311_v5  ;;  %9079 = vrsqrt.f32 %v10381_v48  ;;  %v1133_v12 = vmul.f32 %v10294_v55, %v1132_v2 }
 0x13f   : > { %v1110_v10 = vmul.f32 %v10353_v34, %v1109_v42  ;;  %v1102_v42 = vsub.f32 1.5, %v1101_v30  ;;  %9081 = vrsqrt.f32 %v10409_v43  ;;  %v10470_v31 = vmul.f32 %v1087_v51, %v930_v45  ;;  %v931_v45 = vld [vmem:[%s15797_s2 + $0x28] sm:$0xff] }
 0x140   : > { %v10357_v37 = vpop.xlane.xlu1 %754  ;;  %v758_v6 = vpop.xlane.xlu2 %757  ;;  %v1161_v24 = vmul.f32 0.5, %v1160_v8  ;;  %v1120_v61 = vmul.f32 %v10377_v3, %v1119_v56  ;;  %v884_v8 = vmul.f32 %v10306_v52, %v9859_v28  ;;  %v1137_v60 = vsel %vm10466_vm4, %v10294_v55, %v1133_v12 }
 0x141   : > { %v10371_v11 = vpop.xlane.xlu0 %751  ;;  %v888_v54 = vmul.f32 %v758_v6, %v9859_v28  ;;  %v1111_v30 = vmul.f32 0.5, %v1110_v10  ;;  %v1093_v56 = vmul.f32 %v10308_v62, %v1092_v50  ;;  %v935_v10 = vld [vmem:[%s15797_s2 + $0x48] sm:$0xff]  ;;  %v1103_v21 = vmul.f32 %v10316_v22, %v1102_v42 }
 0x142   : > { %v1162_v19 = vsub.f32 1.5, %v1161_v24  ;;  %vm1104_vm8 = vweird.f32 %v10279_v18  ;;  %v1121_v55 = vmul.f32 0.5, %v1120_v61  ;;  %v10490_v7 = vadd.f32 1e-05, %v884_v8 }
 0x143   : > { %v10404_v47 = vpop.eup %9077  ;;  %v10455_v2 = vadd.f32 1e-05, %v888_v54  ;;  %v1112_v50 = vsub.f32 1.5, %v1111_v30  ;;  %v10502_v42 = vadd.f32 1e-05, %v883_v39  ;;  %v1097_v51 = vsel %vm10494_vm9, %v10308_v62, %v1093_v56  ;;  %vm1106_vm10 = vmor %vm1104_vm8, %vm1105_vm6  ;;  %v932_v30 = vld [vmem:[%s15797_s2 + $0x30] sm:$0xff] }
 0x144   : > { %v1189_v29 = vmul.f32 %v10404_v47, %v10325_v0  ;;  %v10477_v52 = vpop.eup %9079  ;;  %v1107_v8 = vsel %vm1106_vm10, %v10316_v22, %v1103_v21  ;;  %v1163_v53 = vmul.f32 %v10332_v9, %v1162_v19  ;;  %vm1165_vm11 = vweird.f32 %v10332_v9  ;;  %v934_v19 = vld [vmem:[%s15797_s2 + $0x40] sm:$0xff] }
 0x145   : > { %1829 = vperm.xlu2 %9051, %v10383_v35   ;;  %9083 = vrsqrt.f32 %v10455_v2  ;;  %v10498_v12 = vpop.eup %9081  ;;  %v1139_v16 = vmul.f32 %v10477_v52, %v10381_v48  ;;  %v1122_v62 = vsub.f32 1.5, %v1121_v55  ;;  %v10531_v56 = vmul.f32 %v1097_v51, %v931_v45  ;;  %vm10538_vm13 = vmor %vm1164_vm12, %vm1165_vm11 }
 0x146   : > { %1824 = vperm.xlu1 %9050, %v10385_v13   ;;  %v1190_v54 = vmul.f32 %v10404_v47, %v1189_v29  ;;  %v10508_v29 = vmul.f32 %v1137_v60, %v935_v10  ;;  %v1149_v60 = vmul.f32 %v10498_v12, %v10409_v43  ;;  %9085 = vrsqrt.f32 %v10490_v7 }
 0x147   : > { %16094 = vst [vmem:[#allocation14_spill] sm:$0xff] %v10531_v56  ;;  %v1140_v22 = vmul.f32 %v10477_v52, %v1139_v16  ;;  %v10536_v10 = vmul.f32 %v1107_v8, %v932_v30  ;;  %v1113_v49 = vmul.f32 %v10353_v34, %v1112_v50  ;;  %vm1115_vm14 = vweird.f32 %v10353_v34  ;;  %v933_v30 = vld [vmem:[%s15797_s2 + $0x38] sm:$0xff] }
 0x148   : > { %v10424_v4 = vpop.xlane.xlu1 %763  ;;  %v10426_v6 = vpop.xlane.xlu2 %766  ;;  %16093 = vst [vmem:[#allocation18_spill] sm:$0xff] %v10508_v29  ;;  %v1191_v61 = vmul.f32 0.5, %v1190_v54  ;;  %9087 = vrsqrt.f32 %v10502_v42  ;;  %v887_v55 = vmul.f32 %v10357_v37, %v9859_v28  ;;  %v1167_v16 = vsel %vm10538_vm13, %v10332_v9, %v1163_v53 }
 0x149   : > { %v10444_v44 = vpop.xlane.xlu0 %760  ;;  %16095 = vst [vmem:[#allocation17_spill] sm:$0xff] %v10536_v10  ;;  %vm1114_vm15 = vweird.f32 %v10300_v25  ;;  %v891_v50 = vmul.f32 %v10426_v6, %v9859_v28  ;;  %vm1124_vm1 = vweird.f32 %v10311_v5  ;;  %v886_v45 = vmul.f32 %v10371_v11, %v9859_v28 }
 0x14a   : > { %1834 = vperm.xlu0 %9052, %v10416_v36   ;;  %v1192_v21 = vsub.f32 1.5, %v1191_v61  ;;  %vm10563_vm2 = vmor %vm1114_vm15, %vm1115_vm14  ;;  %v1123_v9 = vmul.f32 %v10377_v3, %v1122_v62  ;;  %v1141_v25 = vmul.f32 0.5, %v1140_v22  ;;  %v10570_v6 = vmul.f32 %v1167_v16, %v938_v17 }
 0x14b   : > { %v10533_v54 = vpop.eup %9083  ;;  %v1117_v8 = vsel %vm10563_vm2, %v10353_v34, %v1113_v49  ;;  %vm1125_vm3 = vweird.f32 %v10377_v3  ;;  %v1150_v53 = vmul.f32 %v10498_v12, %v1149_v60  ;;  %v10582_v62 = vadd.f32 1e-05, %v887_v55 }
 0x14c   : > { %v1219_v37 = vmul.f32 %v10533_v54, %v10455_v2  ;;  %16100 = vst [vmem:[#allocation57_spill] sm:$0xff] %v10570_v6  ;;  %v10579_v11 = vpop.eup %9085  ;;  %vm1126_vm4 = vmor %vm1124_vm1, %vm1125_vm3  ;;  %v1193_v17 = vmul.f32 %v10404_v47, %v1192_v21  ;;  %vm1195_vm5 = vweird.f32 %v10404_v47  ;;  %v10593_v34 = vadd.f32 1e-05, %v891_v50 }
 0x14d   : > { %1839 = vperm.xlu2 %9051, %v10462_v27   ;;  %v1127_v60 = vsel %vm1126_vm4, %v10377_v3, %v1123_v9  ;;  %vm1194_vm6 = vweird.f32 %v10325_v0  ;;  %v10603_v5 = vadd.f32 1e-05, %v886_v45  ;;  %v10605_v51 = vmul.f32 %v1117_v8, %v933_v30  ;;  %v941_v3 = vld [vmem:[%s15797_s2 + $0x78] sm:$0xff]  ;;  %v936_v8 = vld [vmem:[%s15797_s2 + $0x50] sm:$0xff] }
 0x14e   : > { %1844 = vperm.xlu1 %9050, %v10470_v31   ;;  %v10599_v55 = vpop.eup %9087  ;;  %v1220_v16 = vmul.f32 %v10533_v54, %v1219_v37  ;;  %v1142_v21 = vsub.f32 1.5, %v1141_v25  ;;  %v10607_v38 = vmul.f32 %v1127_v60, %v934_v19  ;;  %vm1196_vm7 = vmor %vm1194_vm6, %vm1195_vm5  ;;  %v1151_v50 = vmul.f32 0.5, %v1150_v53 }
 0x14f   : > { %9089 = vrsqrt.f32 %v10582_v62  ;;  %v1197_v0 = vsel %vm1196_vm7, %v10404_v47, %v1193_v17  ;;  %v1179_v37 = vmul.f32 %v10579_v11, %v10490_v7  ;;  %v1169_v45 = vmul.f32 %v10599_v55, %v10502_v42 }
 0x150   : > { %v10504_v24 = vpop.xlane.xlu1 %772  ;;  %v10506_v18 = vpop.xlane.xlu2 %775  ;;  %16101 = vst [vmem:[#allocation58_spill] sm:$0xff] %v10607_v38  ;;  %9091 = vrsqrt.f32 %v10593_v34  ;;  %vm1144_vm8 = vweird.f32 %v10381_v48  ;;  %v1221_v9 = vmul.f32 0.5, %v1220_v16  ;;  %v10627_v47 = vmul.f32 %v1197_v0, %v941_v3 }
 0x151   : > { %v10518_v39 = vpop.xlane.xlu0 %769  ;;  %9093 = vrsqrt.f32 %v10603_v5  ;;  %v894_v25 = vmul.f32 %v10506_v18, %v9859_v28  ;;  %v1143_v53 = vmul.f32 %v10477_v52, %v1142_v21  ;;  %vm1145_vm9 = vweird.f32 %v10477_v52 }
 0x152   : > { %1869 = vperm.xlu0 %9052, %v10508_v29   ;;  %16102 = vst [vmem:[#allocation59_spill] sm:$0xff] %v10627_v47  ;;  %v1152_v19 = vsub.f32 1.5, %v1151_v50  ;;  %vm1146_vm10 = vmor %vm1144_vm8, %vm1145_vm9  ;;  %v1180_v48 = vmul.f32 %v10579_v11, %v1179_v37  ;;  %v1170_v17 = vmul.f32 %v10599_v55, %v1169_v45  ;;  %v889_v18 = vmul.f32 %v10444_v44, %v9859_v28 }
 0x153   : > { %v1147_v16 = vsel %vm1146_vm10, %v10477_v52, %v1143_v53  ;;  %v890_v21 = vmul.f32 %v10424_v4, %v9859_v28  ;;  %v1222_v37 = vsub.f32 1.5, %v1221_v9  ;;  %v10650_v45 = vadd.f32 1e-05, %v894_v25 }
 0x154   : > { %v10646_v50 = vmul.f32 %v1147_v16, %v936_v8  ;;  %v1153_v52 = vmul.f32 %v10498_v12, %v1152_v19  ;;  %vm1154_vm11 = vweird.f32 %v10409_v43  ;;  %v1181_v53 = vmul.f32 0.5, %v1180_v48  ;;  %v937_v16 = vld [vmem:[%s15797_s2 + $0x58] sm:$0xff] }
 0x155   : > { %1849 = vperm.xlu2 %9051, %v10531_v56   ;;  %v10642_v3 = vpop.eup %9089  ;;  %v10659_v4 = vadd.f32 1e-05, %v889_v18  ;;  %v10661_v8 = vadd.f32 1e-05, %v890_v21  ;;  %vm1155_vm12 = vweird.f32 %v10498_v12  ;;  %9095 = vrsqrt.f32 %v10650_v45 }
 0x156   : > { %1854 = vperm.xlu1 %9050, %v10536_v10   ;;  %16103 = vst [vmem:[#allocation60_spill] sm:$0xff] %v10646_v50  ;;  %v10648_v0 = vpop.eup %9091  ;;  %vm1156_vm13 = vmor %vm1154_vm11, %vm1155_vm12  ;;  %v1223_v48 = vmul.f32 %v10533_v54, %v1222_v37  ;;  %vm1225_vm14 = vweird.f32 %v10533_v54  ;;  %vm1224_vm15 = vweird.f32 %v10455_v2  ;;  %v1182_v37 = vsub.f32 1.5, %v1181_v53  ;;  %v944_v2 = vld [vmem:[%s15797_s2 + $0x90] sm:$0xff] }
 0x157   : > { %v10654_v44 = vpop.eup %9093  ;;  %v1249_v9 = vmul.f32 %v10648_v0, %v10593_v34  ;;  %9097 = vrsqrt.f32 %v10659_v4  ;;  %vm1226_vm1 = vmor %vm1224_vm15, %vm1225_vm14  ;;  %vm1184_vm2 = vweird.f32 %v10490_v7  ;;  %v892_v53 = vmul.f32 %v10518_v39, %v9859_v28 }
 0x158   : > { %v10568_v61 = vpop.xlane.xlu2 %784  ;;  %v10595_v49 = vpop.xlane.xlu1 %781  ;;  %v1199_v43 = vmul.f32 %v10654_v44, %v10603_v5  ;;  %9099 = vrsqrt.f32 %v10661_v8  ;;  %vm1174_vm3 = vweird.f32 %v10502_v42  ;;  %vm1175_vm4 = vweird.f32 %v10599_v55 }
 0x159   : > { %v10584_v22 = vpop.xlane.xlu0 %778  ;;  %v897_v25 = vmul.f32 %v10568_v61, %v9859_v28  ;;  %v1209_v61 = vmul.f32 %v10642_v3, %v10582_v62  ;;  %v1183_v39 = vmul.f32 %v10579_v11, %v1182_v37  ;;  %vm1176_vm5 = vmor %vm1174_vm3, %vm1175_vm4  ;;  %vm1185_vm6 = vweird.f32 %v10579_v11 }
 0x15a   : > { %1884 = vperm.xlu0 %9052, %v10570_v6   ;;  %v1250_v6 = vmul.f32 %v10648_v0, %v1249_v9  ;;  %v1200_v32 = vmul.f32 %v10654_v44, %v1199_v43  ;;  %v893_v9 = vmul.f32 %v10504_v24, %v9859_v28  ;;  %v10732_v42 = vadd.f32 1e-05, %v892_v53  ;;  %vm1186_vm7 = vmor %vm1184_vm2, %vm1185_vm6 }
 0x15b   : > { %v10687_v58 = vadd.f32 1e-05, %v897_v25  ;;  %v10700_v25 = vpop.eup %9095  ;;  %vm1254_vm8 = vweird.f32 %v10593_v34  ;;  %vm1255_vm9 = vweird.f32 %v10648_v0  ;;  %vm1205_vm11 = vweird.f32 %v10654_v44 }
 0x15c   : > { %v1251_v43 = vmul.f32 0.5, %v1250_v6  ;;  %v1201_v24 = vmul.f32 0.5, %v1200_v32  ;;  %v940_v32 = vld [vmem:[%s15797_s2 + $0x70] sm:$0xff]  ;;  %vm1256_vm10 = vmor %vm1254_vm8, %vm1255_vm9  ;;  %vm1204_vm12 = vweird.f32 %v10603_v5  ;;  %vm1214_vm14 = vweird.f32 %v10582_v62 }
 0x15d   : > { %1859 = vperm.xlu2 %9051, %v10605_v51   ;;  %9101 = vrsqrt.f32 %v10687_v58  ;;  %vm1206_vm15 = vmor %vm1204_vm12, %vm1205_vm11  ;;  %vm1285_vm2 = vweird.f32 %v10700_v25  ;;  %vm1284_vm3 = vweird.f32 %v10650_v45  ;;  %vm1234_vm4 = vweird.f32 %v10659_v4 }
 0x15e   : > { %1864 = vperm.xlu1 %9050, %v10607_v38   ;;  %v1202_v29 = vsub.f32 1.5, %v1201_v24  ;;  %vm1244_vm8 = vweird.f32 %v10661_v8  ;;  %vm1314_vm12 = vweird.f32 %v10687_v58 }
 0x160   : > { %v10625_v30 = vpop.xlane.xlu2 %793  ;;  %v10652_v40 = vpop.xlane.xlu1 %790  ;;  %v1203_v34 = vmul.f32 %v10654_v44, %v1202_v29  ;;  %v942_v29 = vld [vmem:[%s15797_s2 + $0x80] sm:$0xff] }
 0x161   : > { %v10638_v60 = vpop.xlane.xlu0 %787 }
 0x162   : > { %1899 = vperm.xlu0 %9052, %v10627_v47   ;;  %v1171_v47 = vmul.f32 0.5, %v1170_v17  ;;  %v1157_v17 = vsel %vm1156_vm13, %v10498_v12, %v1153_v52  ;;  %v1210_v52 = vmul.f32 %v10642_v3, %v1209_v61  ;;  %v939_v61 = vld [vmem:[%s15797_s2 + $0x68] sm:$0xff]  ;;  %vm1215_vm13 = vweird.f32 %v10642_v3 }
 0x163   : > { %v10683_v18 = vmul.f32 %v1157_v17, %v937_v16 }
 0x164   : > { %v1172_v21 = vsub.f32 1.5, %v1171_v47  ;;  %v1227_v47 = vsel %vm1226_vm1, %v10533_v54, %v1223_v48  ;;  %v10711_v48 = vpop.eup %9097  ;;  %vm1216_vm1 = vmor %vm1214_vm14, %vm1215_vm13 }
 0x165   : > { %1874 = vperm.xlu2 %9051, %v10646_v50   ;;  %16104 = vst [vmem:[#allocation61_spill] sm:$0xff] %v10683_v18  ;;  %v10708_v17 = vmul.f32 %v1227_v47, %v944_v2  ;;  %v1211_v2 = vmul.f32 0.5, %v1210_v52  ;;  %v10723_v47 = vadd.f32 1e-05, %v893_v9  ;;  %v1252_v52 = vsub.f32 1.5, %v1251_v43 }
 0x166   : > { %1879 = vperm.xlu1 %9050, %v10683_v18   ;;  %v1173_v54 = vmul.f32 %v10599_v55, %v1172_v21  ;;  %v10721_v18 = vpop.eup %9099  ;;  %v1279_v21 = vmul.f32 %v10700_v25, %v10650_v45  ;;  %v1229_v9 = vmul.f32 %v10711_v48, %v10659_v4  ;;  %vm1235_vm6 = vweird.f32 %v10711_v48 }
 0x167   : > { %16105 = vst [vmem:[#allocation62_spill] sm:$0xff] %v10708_v17  ;;  %v1239_v33 = vmul.f32 %v10721_v18, %v10661_v8  ;;  %v10746_v53 = vpop.eup %9101  ;;  %9103 = vrsqrt.f32 %v10723_v47  ;;  %vm1236_vm9 = vmor %vm1234_vm4, %vm1235_vm6  ;;  %vm1274_vm14 = vweird.f32 %v10723_v47 }
 0x168   : > { %v10674_v19 = vpop.xlane.xlu2 %802  ;;  %v10705_v16 = vpop.xlane.xlu1 %799  ;;  %v1177_v37 = vsel %vm1176_vm5, %v10599_v55, %v1173_v54  ;;  %v1212_v55 = vsub.f32 1.5, %v1211_v2  ;;  %v1280_v7 = vmul.f32 %v10700_v25, %v1279_v21  ;;  %9105 = vrsqrt.f32 %v10732_v42  ;;  %v947_v2 = vld [vmem:[%s15797_s2 + $0xa8] sm:$0xff]  ;;  %vm1286_vm5 = vmor %vm1284_vm3, %vm1285_vm2 }
 0x169   : > { %v10691_v12 = vpop.xlane.xlu0 %796  ;;  %v10739_v41 = vmul.f32 %v1177_v37, %v939_v61  ;;  %v1230_v43 = vmul.f32 %v10711_v48, %v1229_v9  ;;  %v1253_v54 = vmul.f32 %v10648_v0, %v1252_v52  ;;  %v1240_v24 = vmul.f32 %v10721_v18, %v1239_v33 }
 0x16a   : > { %1914 = vperm.xlu0 %9052, %v10708_v17   ;;  %v1187_v17 = vsel %vm1186_vm7, %v10579_v11, %v1183_v39  ;;  %v1309_v61 = vmul.f32 %v10746_v53, %v10687_v58  ;;  %v1213_v33 = vmul.f32 %v10642_v3, %v1212_v55  ;;  %v896_v37 = vmul.f32 %v10595_v49, %v9859_v28  ;;  %v943_v49 = vld [vmem:[%s15797_s2 + $0x88] sm:$0xff] }
 0x16b   : > { %16106 = vst [vmem:[#allocation63_spill] sm:$0xff] %v10739_v41  ;;  %v10744_v26 = vmul.f32 %v1187_v17, %v940_v32  ;;  %v900_v17 = vmul.f32 %v10625_v30, %v9859_v28  ;;  %v1281_v30 = vmul.f32 0.5, %v1280_v7  ;;  %v895_v32 = vmul.f32 %v10584_v22, %v9859_v28 }
 0x16c   : > { %v1257_v52 = vsel %vm1256_vm10, %v10648_v0, %v1253_v54  ;;  %v1231_v22 = vmul.f32 0.5, %v1230_v43  ;;  %v1241_v0 = vmul.f32 0.5, %v1240_v24  ;;  %v1310_v54 = vmul.f32 %v10746_v53, %v1309_v61 }
 0x16d   : > { %16107 = vst [vmem:[#allocation64_spill] sm:$0xff] %v10744_v26  ;;  %1889 = vperm.xlu2 %9051, %v10739_v41   ;;  %v10784_v9 = vpop.eup %9103  ;;  %v10787_v7 = vadd.f32 1e-05, %v900_v17  ;;  %v10789_v55 = vmul.f32 %v1257_v52, %v947_v2  ;;  %v1282_v41 = vsub.f32 1.5, %v1281_v30  ;;  %v10798_v62 = vadd.f32 1e-05, %v895_v32 }
 0x16e   : > { %1894 = vperm.xlu1 %9050, %v10744_v26   ;;  %v10794_v5 = vpop.eup %9105  ;;  %v1207_v26 = vsel %vm1206_vm15, %v10654_v44, %v1203_v34  ;;  %v1217_v17 = vsel %vm1216_vm1, %v10642_v3, %v1213_v33  ;;  %v1269_v2 = vmul.f32 %v10784_v9, %v10723_v47  ;;  %v10806_v52 = vadd.f32 1e-05, %v896_v37 }
 0x16f   : > { %16108 = vst [vmem:[#allocation65_spill] sm:$0xff] %v10789_v55  ;;  %v10801_v43 = vmul.f32 %v1207_v26, %v942_v29  ;;  %v10808_v24 = vmul.f32 %v1217_v17, %v943_v49  ;;  %v1232_v61 = vsub.f32 1.5, %v1231_v22  ;;  %v1259_v44 = vmul.f32 %v10794_v5, %v10732_v42  ;;  %v950_v49 = vld [vmem:[%s15797_s2 + $0xc0] sm:$0xff] }
 0x170   : > { %v10719_v6 = vpop.xlane.xlu2 %811  ;;  %v10763_v39 = vpop.xlane.xlu1 %808  ;;  %9107 = vrsqrt.f32 %v10787_v7  ;;  %v1311_v34 = vmul.f32 0.5, %v1310_v54  ;;  %v903_v26 = vmul.f32 %v10674_v19, %v9859_v28  ;;  %v1242_v30 = vsub.f32 1.5, %v1241_v0 }
 0x171   : > { %v10753_v11 = vpop.xlane.xlu0 %805  ;;  %16109 = vst [vmem:[#allocation66_spill] sm:$0xff] %v10801_v43  ;;  %9109 = vrsqrt.f32 %v10798_v62  ;;  %v1283_v32 = vmul.f32 %v10700_v25, %v1282_v41  ;;  %v1270_v33 = vmul.f32 %v10784_v9, %v1269_v2  ;;  %v1260_v29 = vmul.f32 %v10794_v5, %v1259_v44 }
 0x172   : > { %1929 = vperm.xlu0 %9052, %v10789_v55   ;;  %16110 = vst [vmem:[#allocation67_spill] sm:$0xff] %v10808_v24  ;;  %9111 = vrsqrt.f32 %v10806_v52  ;;  %v899_v22 = vmul.f32 %v10652_v40, %v9859_v28  ;;  %v898_v41 = vmul.f32 %v10638_v60, %v9859_v28  ;;  %v1233_v45 = vmul.f32 %v10711_v48, %v1232_v61  ;;  %v945_v40 = vld [vmem:[%s15797_s2 + $0x98] sm:$0xff] }
 0x173   : > { %v1312_v0 = vsub.f32 1.5, %v1311_v34  ;;  %v10839_v54 = vadd.f32 1e-05, %v903_v26  ;;  %v1287_v2 = vsel %vm1286_vm5, %v10700_v25, %v1283_v32  ;;  %v1243_v60 = vmul.f32 %v10721_v18, %v1242_v30  ;;  %v946_v25 = vld [vmem:[%s15797_s2 + $0xa0] sm:$0xff] }
 0x174   : > { %vm1245_vm7 = vweird.f32 %v10721_v18  ;;  %v1271_v4 = vmul.f32 0.5, %v1270_v33  ;;  %v10851_v61 = vmul.f32 %v1287_v2, %v950_v49  ;;  %v1261_v34 = vmul.f32 0.5, %v1260_v29 }
 0x175   : > { %1904 = vperm.xlu2 %9051, %v10801_v43   ;;  %v10858_v26 = vadd.f32 1e-05, %v899_v22  ;;  %v10860_v32 = vadd.f32 1e-05, %v898_v41  ;;  %v1237_v30 = vsel %vm1236_vm9, %v10711_v48, %v1233_v45  ;;  %vm1246_vm10 = vmor %vm1244_vm8, %vm1245_vm7  ;;  %v902_v33 = vmul.f32 %v10705_v16, %v9859_v28 }
 0x176   : > { %1909 = vperm.xlu1 %9050, %v10808_v24   ;;  %v10841_v17 = vpop.eup %9107  ;;  %16111 = vst [vmem:[#allocation68_spill] sm:$0xff] %v10851_v61  ;;  %v10870_v49 = vmul.f32 %v1237_v30, %v945_v40  ;;  %v1247_v29 = vsel %vm1246_vm10, %v10721_v18, %v1243_v60  ;;  %9113 = vrsqrt.f32 %v10839_v54  ;;  %v1313_v48 = vmul.f32 %v10746_v53, %v1312_v0 }
 0x177   : > { %v10856_v44 = vpop.eup %9109  ;;  %v1339_v8 = vmul.f32 %v10841_v17, %v10787_v7  ;;  %v10874_v22 = vmul.f32 %v1247_v29, %v946_v25  ;;  %vm1315_vm11 = vweird.f32 %v10746_v53  ;;  %v901_v16 = vmul.f32 %v10691_v12, %v9859_v28  ;;  %v953_v12 = vld [vmem:[%s15797_s2 + $0xd8] sm:$0xff] }
 0x178   : > { %v10770_v21 = vpop.xlane.xlu2 %820  ;;  %v10825_v37 = vpop.xlane.xlu1 %817  ;;  %16112 = vst [vmem:[#allocation69_spill] sm:$0xff] %v10870_v49  ;;  %v1289_v41 = vmul.f32 %v10856_v44, %v10798_v62  ;;  %9115 = vrsqrt.f32 %v10858_v26  ;;  %v906_v0 = vmul.f32 %v10719_v6, %v9859_v28  ;;  %v1262_v2 = vsub.f32 1.5, %v1261_v34  ;;  %vm1316_vm13 = vmor %vm1314_vm12, %vm1315_vm11 }
 0x179   : > { %v10817_v3 = vpop.xlane.xlu0 %814  ;;  %v10863_v55 = vpop.eup %9111  ;;  %16113 = vst [vmem:[#allocation70_spill] sm:$0xff] %v10874_v22  ;;  %9117 = vrsqrt.f32 %v10860_v32  ;;  %v10896_v40 = vadd.f32 1e-05, %v902_v33  ;;  %v905_v60 = vmul.f32 %v10763_v39, %v9859_v28  ;;  %v1272_v25 = vsub.f32 1.5, %v1271_v4 }
 0x17a   : > { %1944 = vperm.xlu0 %9052, %v10851_v61   ;;  %v1299_v18 = vmul.f32 %v10863_v55, %v10806_v52  ;;  %v1340_v30 = vmul.f32 %v10841_v17, %v1339_v8  ;;  %v904_v34 = vmul.f32 %v10753_v11, %v9859_v28  ;;  %v1317_v29 = vsel %vm1316_vm13, %v10746_v53, %v1313_v48  ;;  %v948_v53 = vld [vmem:[%s15797_s2 + $0xb0] sm:$0xff] }
 0x17b   : > { %v1290_v33 = vmul.f32 %v10856_v44, %v1289_v41  ;;  %v10911_v61 = vadd.f32 1e-05, %v901_v16  ;;  %v10913_v39 = vmul.f32 %v1317_v29, %v953_v12  ;;  %vm1264_vm15 = vweird.f32 %v10732_v42 }
 0x17c   : > { %v1300_v4 = vmul.f32 %v10863_v55, %v1299_v18  ;;  %v10920_v8 = vadd.f32 1e-05, %v906_v0  ;;  %9119 = vrsqrt.f32 %v10896_v40  ;;  %v10923_v11 = vadd.f32 1e-05, %v905_v60 }
 0x17d   : > { %1919 = vperm.xlu2 %9051, %v10870_v49   ;;  %16114 = vst [vmem:[#allocation71_spill] sm:$0xff] %v10913_v39  ;;  %v1263_v48 = vmul.f32 %v10794_v5, %v1262_v2  ;;  %vm1265_vm1 = vweird.f32 %v10794_v5  ;;  %v1341_v42 = vmul.f32 0.5, %v1340_v30  ;;  %v10933_v16 = vadd.f32 1e-05, %v904_v34 }
 0x17e   : > { %1924 = vperm.xlu1 %9050, %v10874_v22   ;;  %v10915_v22 = vpop.eup %9113  ;;  %vm1266_vm2 = vmor %vm1264_vm15, %vm1265_vm1  ;;  %v1273_v18 = vmul.f32 %v10784_v9, %v1272_v25  ;;  %vm1275_vm3 = vweird.f32 %v10784_v9  ;;  %v1291_v12 = vmul.f32 0.5, %v1290_v33  ;;  %9121 = vrsqrt.f32 %v10911_v61  ;;  %v949_v25 = vld [vmem:[%s15797_s2 + $0xb8] sm:$0xff] }
 0x17f   : > { %v10931_v41 = vpop.eup %9115  ;;  %v1369_v60 = vmul.f32 %v10915_v22, %v10839_v54  ;;  %v1267_v2 = vsel %vm1266_vm2, %v10794_v5, %v1263_v48  ;;  %9123 = vrsqrt.f32 %v10920_v8  ;;  %vm1276_vm4 = vmor %vm1274_vm14, %vm1275_vm3  ;;  %v1301_v34 = vmul.f32 0.5, %v1300_v4 }
 0x180   : > { %v10827_v19 = vpop.xlane.xlu2 %829  ;;  %v10900_v58 = vpop.xlane.xlu1 %826  ;;  %v10944_v30 = vmul.f32 %v1267_v2, %v948_v53  ;;  %v1329_v29 = vmul.f32 %v10931_v41, %v10858_v26  ;;  %9125 = vrsqrt.f32 %v10923_v11  ;;  %v1277_v33 = vsel %vm1276_vm4, %v10784_v9, %v1273_v18 }
 0x181   : > { %v10883_v45 = vpop.xlane.xlu0 %823  ;;  %v10937_v0 = vpop.eup %9117  ;;  %v1342_v48 = vsub.f32 1.5, %v1341_v42  ;;  %9127 = vrsqrt.f32 %v10933_v16  ;;  %v909_v47 = vmul.f32 %v10770_v21, %v9859_v28  ;;  %v1292_v2 = vsub.f32 1.5, %v1291_v12 }
 0x182   : > { %1959 = vperm.xlu0 %9052, %v10913_v39   ;;  %16115 = vst [vmem:[#allocation72_spill] sm:$0xff] %v10944_v30  ;;  %v1319_v53 = vmul.f32 %v10937_v0, %v10860_v32  ;;  %v10963_v4 = vpop.eup %9119  ;;  %v1370_v39 = vmul.f32 %v10915_v22, %v1369_v60  ;;  %v10966_v24 = vmul.f32 %v1277_v33, %v949_v25  ;;  %vm1304_vm5 = vweird.f32 %v10806_v52 }
 0x183   : > { %v907_v18 = vmul.f32 %v10817_v3, %v9859_v28  ;;  %v1302_v21 = vsub.f32 1.5, %v1301_v34  ;;  %vm1294_vm6 = vweird.f32 %v10798_v62  ;;  %v1330_v12 = vmul.f32 %v10931_v41, %v1329_v29  ;;  %v956_v3 = vld [vmem:[%s15797_s2 + $0xf0] sm:$0xff] }
 0x184   : > { %16116 = vst [vmem:[#allocation73_spill] sm:$0xff] %v10966_v24  ;;  %v10975_v49 = vpop.eup %9121  ;;  %vm1344_vm7 = vweird.f32 %v10787_v7  ;;  %v1320_v25 = vmul.f32 %v10937_v0, %v1319_v53  ;;  %v10984_v33 = vadd.f32 1e-05, %v909_v47  ;;  %v1343_v34 = vmul.f32 %v10841_v17, %v1342_v48 }
 0x185   : > { %1934 = vperm.xlu2 %9051, %v10944_v30   ;;  %v10981_v60 = vpop.eup %9123  ;;  %vm1345_vm8 = vweird.f32 %v10841_v17  ;;  %v1359_v7 = vmul.f32 %v10963_v4, %v10896_v40  ;;  %v1371_v29 = vmul.f32 0.5, %v1370_v39  ;;  %v1293_v53 = vmul.f32 %v10856_v44, %v1292_v2 }
 0x186   : > { %1939 = vperm.xlu1 %9050, %v10966_v24   ;;  %v10991_v30 = vpop.eup %9125  ;;  %v908_v24 = vmul.f32 %v10825_v37, %v9859_v28  ;;  %vm1346_vm9 = vmor %vm1344_vm7, %vm1345_vm8  ;;  %v11000_v43 = vadd.f32 1e-05, %v907_v18  ;;  %v912_v48 = vmul.f32 %v10827_v19, %v9859_v28  ;;  %vm1295_vm10 = vweird.f32 %v10856_v44  ;;  %v951_v37 = vld [vmem:[%s15797_s2 + $0xc8] sm:$0xff]  ;;  %v952_v18 = vld [vmem:[%s15797_s2 + $0xd0] sm:$0xff] }
 0x187   : > { %v10998_v47 = vpop.eup %9127  ;;  %v1347_v38 = vsel %vm1346_vm9, %v10841_v17, %v1343_v34  ;;  %v1399_v39 = vmul.f32 %v10981_v60, %v10920_v8  ;;  %vm11015_vm11 = vmor %vm1294_vm6, %vm1295_vm10  ;;  %v1303_v19 = vmul.f32 %v10863_v55, %v1302_v21  ;;  %vm1305_vm12 = vweird.f32 %v10863_v55 }
 0x188   : > { %v10904_v6 = vpop.xlane.xlu2 %838  ;;  %v10968_v9 = vpop.xlane.xlu1 %835  ;;  %v11008_v57 = vmul.f32 %v1347_v38, %v956_v3  ;;  %v1349_v17 = vmul.f32 %v10975_v49, %v10911_v61  ;;  %v1389_v38 = vmul.f32 %v10991_v30, %v10923_v11  ;;  %9129 = vrsqrt.f32 %v10984_v33  ;;  %vm1306_vm13 = vmor %vm1304_vm5, %vm1305_vm12 }
 0x189   : > { %v10955_v5 = vpop.xlane.xlu0 %832  ;;  %v1297_v62 = vsel %vm11015_vm11, %v10856_v44, %v1293_v53  ;;  %v1331_v3 = vmul.f32 0.5, %v1330_v12  ;;  %v1321_v21 = vmul.f32 0.5, %v1320_v25  ;;  %v1379_v34 = vmul.f32 %v10998_v47, %v10933_v16 }
 0x18a   : > { %16117 = vst [vmem:[#allocation74_spill] sm:$0xff] %v11008_v57  ;;  %v11034_v10 = vadd.f32 1e-05, %v908_v24  ;;  %1974 = vperm.xlu0 %9052, %v11008_v57   ;;  %9131 = vrsqrt.f32 %v11000_v43  ;;  %v11042_v44 = vadd.f32 1e-05, %v912_v48  ;;  %v11044_v53 = vmul.f32 %v1297_v62, %v951_v37 }
 0x18b   : > { %v1307_v12 = vsel %vm1306_vm13, %v10863_v55, %v1303_v19  ;;  %v1372_v25 = vsub.f32 1.5, %v1371_v29  ;;  %v1400_v2 = vmul.f32 %v10981_v60, %v1399_v39  ;;  %v911_v24 = vmul.f32 %v10900_v58, %v9859_v28 }
 0x18c   : > { %16120 = vst [vmem:[#allocation75_spill] sm:$0xff] %v11044_v53  ;;  %v11050_v57 = vmul.f32 %v1307_v12, %v952_v18  ;;  %v1360_v20 = vmul.f32 %v10963_v4, %v1359_v7  ;;  %v1350_v48 = vmul.f32 %v10975_v49, %v1349_v17  ;;  %v1390_v37 = vmul.f32 %v10991_v30, %v1389_v38 }
 0x18d   : > { %1949 = vperm.xlu2 %9051, %v11044_v53   ;;  %vm1334_vm14 = vweird.f32 %v10858_v26  ;;  %v1322_v55 = vsub.f32 1.5, %v1321_v21  ;;  %9133 = vrsqrt.f32 %v11034_v10  ;;  %v910_v58 = vmul.f32 %v10883_v45, %v9859_v28 }
 0x18e   : > { %16121 = vst [vmem:[#allocation76_spill] sm:$0xff] %v11050_v57  ;;  %1954 = vperm.xlu1 %9050, %v11050_v57   ;;  %v11065_v29 = vpop.eup %9129  ;;  %v1332_v39 = vsub.f32 1.5, %v1331_v3  ;;  %vm1324_vm15 = vweird.f32 %v10860_v32  ;;  %v1380_v7 = vmul.f32 %v10998_v47, %v1379_v34  ;;  %9135 = vrsqrt.f32 %v11042_v44 }
 0x18f   : > { %vm1374_vm1 = vweird.f32 %v10839_v54  ;;  %v1401_v19 = vmul.f32 0.5, %v1400_v2  ;;  %v11071_v17 = vadd.f32 1e-05, %v911_v24  ;;  %v1373_v38 = vmul.f32 %v10915_v22, %v1372_v25  ;;  %v959_v25 = vld [vmem:[%s15797_s2 + $0x108] sm:$0xff] }
 0x190   : > { %v10970_v42 = vpop.xlane.xlu2 %847  ;;  %v11052_v52 = vpop.xlane.xlu1 %844  ;;  %v11076_v45 = vmul.f32 0.5, %v1360_v20  ;;  %v11078_v18 = vmul.f32 0.5, %v1350_v48  ;;  %v11080_v3 = vmul.f32 0.5, %v1390_v37  ;;  %v915_v21 = vmul.f32 %v10904_v6, %v9859_v28  ;;  %v954_v6 = vld [vmem:[%s15797_s2 + $0xe0] sm:$0xff] }
 0x191   : > { %v11039_v59 = vpop.xlane.xlu0 %841  ;;  %v11074_v62 = vpop.eup %9131  ;;  %v1429_v34 = vmul.f32 %v11065_v29, %v10984_v33  ;;  %v11086_v12 = vadd.f32 1e-05, %v910_v58  ;;  %vm1375_vm2 = vweird.f32 %v10915_v22  ;;  %v1323_v20 = vmul.f32 %v10937_v0, %v1322_v55 }
 0x192   : > { %v1381_v2 = vmul.f32 0.5, %v1380_v7  ;;  %vm11095_vm3 = vmor %vm1374_vm1, %vm1375_vm2  ;;  %vm1325_vm4 = vweird.f32 %v10937_v0  ;;  %v1333_v48 = vmul.f32 %v10931_v41, %v1332_v39  ;;  %vm1335_vm5 = vweird.f32 %v10931_v41  ;;  %v955_v39 = vld [vmem:[%s15797_s2 + $0xe8] sm:$0xff] }
 0x193   : > { %v11105_v37 = vpop.eup %9133  ;;  %v1402_v55 = vsub.f32 1.5, %v1401_v19  ;;  %v1409_v54 = vmul.f32 %v11074_v62, %v11000_v43  ;;  %9137 = vrsqrt.f32 %v11071_v17  ;;  %v1377_v58 = vsel %vm11095_vm3, %v10915_v22, %v1373_v38  ;;  %vm1326_vm6 = vmor %vm1324_vm15, %vm1325_vm4 }
 0x194   : > { %v11120_v57 = vpop.eup %9135  ;;  %v11122_v19 = vadd.f32 1e-05, %v915_v21  ;;  %v913_v53 = vmul.f32 %v10955_v5, %v9859_v28  ;;  %v11126_v56 = vmul.f32 %v1377_v58, %v959_v25  ;;  %v1327_v22 = vsel %vm1326_vm6, %v10937_v0, %v1323_v20  ;;  %vm1336_vm7 = vmor %vm1334_vm14, %vm1335_vm5 }
 0x195   : > { %vm1364_vm8 = vweird.f32 %v10896_v40  ;;  %v1430_v32 = vmul.f32 %v11065_v29, %v1429_v34  ;;  %9139 = vrsqrt.f32 %v11086_v12  ;;  %v11134_v38 = vmul.f32 %v1327_v22, %v954_v6 }
 0x196   : > { %16124 = vst [vmem:[#allocation77_spill] sm:$0xff] %v11126_v56  ;;  %v1337_v21 = vsel %vm1336_vm7, %v10931_v41, %v1333_v48  ;;  %vm1354_vm9 = vweird.f32 %v10911_v61  ;;  %v1382_v0 = vsub.f32 1.5, %v1381_v2  ;;  %v914_v26 = vmul.f32 %v10968_v9, %v9859_v28  ;;  %1989 = vperm.xlu0 %9052, %v11126_v56  }
 0x197   : > { %16125 = vst [vmem:[#allocation78_spill] sm:$0xff] %v11134_v38  ;;  %v11145_v25 = vmul.f32 %v1337_v21, %v955_v39  ;;  %v1362_v34 = vsub.f32 1.5, %v11076_v45  ;;  %v1352_v20 = vsub.f32 1.5, %v11078_v18  ;;  %v1419_v41 = vmul.f32 %v11105_v37, %v11034_v10  ;;  %1964 = vperm.xlu2 %9051, %v11134_v38  }
 0x198   : > { %v11054_v50 = vpop.xlane.xlu2 %856  ;;  %v11137_v24 = vpop.xlane.xlu1 %853  ;;  %v1459_v6 = vmul.f32 %v11120_v57, %v11042_v44  ;;  %v1410_v2 = vmul.f32 %v11074_v62, %v1409_v54  ;;  %9141 = vrsqrt.f32 %v11122_v19  ;;  %v11156_v9 = vadd.f32 1e-05, %v913_v53 }
 0x199   : > { %v11118_v7 = vpop.xlane.xlu0 %850  ;;  %16126 = vst [vmem:[#allocation79_spill] sm:$0xff] %v11145_v25  ;;  %v918_v48 = vmul.f32 %v10970_v42, %v9859_v28  ;;  %1969 = vperm.xlu1 %9050, %v11145_v25   ;;  %v11161_v45 = vpop.eup %9137  ;;  %v1392_v18 = vsub.f32 1.5, %v11080_v3  ;;  %vm1404_vm10 = vweird.f32 %v10920_v8  ;;  %v1431_v58 = vmul.f32 0.5, %v1430_v32 }
 0x19a   : > { %v1403_v39 = vmul.f32 %v10981_v60, %v1402_v55  ;;  %v11167_v54 = vmul.f32 %v10998_v47, %v1382_v0  ;;  %vm1384_vm11 = vweird.f32 %v10933_v16  ;;  %vm1385_vm12 = vweird.f32 %v10998_v47 }
 0x19b   : > { %v11171_v53 = vadd.f32 1e-05, %v914_v26  ;;  %vm1405_vm13 = vweird.f32 %v10981_v60  ;;  %v11174_v42 = vpop.eup %9139  ;;  %vm1434_vm14 = vweird.f32 %v10984_v33  ;;  %v1460_v8 = vmul.f32 %v11120_v57, %v1459_v6  ;;  %v962_v26 = vld [vmem:[%s15797_s2 + $0x120] sm:$0xff]  ;;  %v957_v6 = vld [vmem:[%s15797_s2 + $0xf8] sm:$0xff] }
 0x19c   : > { %vm11178_vm15 = vmor %vm1404_vm10, %vm1405_vm13  ;;  %v1353_v55 = vmul.f32 %v10975_v49, %v1352_v20  ;;  %vm1355_vm1 = vweird.f32 %v10975_v49  ;;  %v1363_v22 = vmul.f32 %v10963_v4, %v1362_v34  ;;  %v1420_v32 = vmul.f32 %v11105_v37, %v1419_v41  ;;  %v965_v33 = vld [vmem:[%s15797_s2 + $0x138] sm:$0xff] }
 0x19d   : > { %v1411_v21 = vmul.f32 0.5, %v1410_v2  ;;  %9143 = vrsqrt.f32 %v11156_v9  ;;  %v11187_v0 = vadd.f32 1e-05, %v918_v48  ;;  %vm11197_vm2 = vmor %vm1354_vm9, %vm1355_vm1  ;;  %vm1395_vm3 = vweird.f32 %v10991_v30 }
 0x19e   : > { %v1432_v34 = vsub.f32 1.5, %v1431_v58  ;;  %v1407_v41 = vsel %vm11178_vm15, %v10981_v60, %v1403_v39  ;;  %v1357_v2 = vsel %vm11197_vm2, %v10975_v49, %v1353_v55  ;;  %vm1365_vm4 = vweird.f32 %v10963_v4  ;;  %v11213_v56 = vpop.eup %9141  ;;  %v958_v49 = vld [vmem:[%s15797_s2 + $0x100] sm:$0xff]  ;;  %vm11266_vm9 = vmor %vm1384_vm11, %vm1385_vm12 }
 0x19f   : > { %v1449_v25 = vmul.f32 %v11161_v45, %v11071_v17  ;;  %v1439_v58 = vmul.f32 %v11174_v42, %v11086_v12  ;;  %9145 = vrsqrt.f32 %v11171_v53  ;;  %v916_v60 = vmul.f32 %v11039_v59, %v9859_v28  ;;  %vm11227_vm5 = vmor %vm1364_vm8, %vm1365_vm4 }
 0x1a0   : > { %v11139_v5 = vpop.xlane.xlu2 %865  ;;  %vm1394_vm6 = vweird.f32 %v10923_v11  ;;  %v1461_v3 = vmul.f32 0.5, %v1460_v8  ;;  %v11232_v55 = vmul.f32 %v1407_v41, %v962_v26  ;;  %v11234_v20 = vmul.f32 %v1357_v2, %v957_v6 }
 0x1a1   : > { %v11209_v48 = vpop.xlane.xlu0 %859  ;;  %v1367_v59 = vsel %vm11227_vm5, %v10963_v4, %v1363_v22  ;;  %v11241_v38 = vmul.f32 0.5, %v1420_v32  ;;  %v1412_v40 = vsub.f32 1.5, %v1411_v21  ;;  %9147 = vrsqrt.f32 %v11187_v0  ;;  %vm1396_vm15 = vmor %vm1394_vm6, %vm1395_vm3 }
 0x1a2   : > { %16134 = vst [vmem:[#allocation81_spill] sm:$0xff] %v11232_v55  ;;  %v921_v15 = vmul.f32 %v11054_v50, %v9859_v28  ;;  %v1433_v8 = vmul.f32 %v11065_v29, %v1432_v34  ;;  %vm1435_vm7 = vweird.f32 %v11065_v29  ;;  %v1489_v26 = vmul.f32 %v11213_v56, %v11122_v19  ;;  %2004 = vperm.xlu0 %9052, %v11232_v55  }
 0x1a3   : > { %1979 = vperm.xlu2 %9051, %v11234_v20   ;;  %v11252_v4 = vmul.f32 %v1367_v59, %v958_v49  ;;  %v11254_v22 = vpop.eup %9143  ;;  %v1393_v32 = vmul.f32 %v10991_v30, %v1392_v18  ;;  %vm1414_vm8 = vweird.f32 %v11000_v43  ;;  %v917_v50 = vmul.f32 %v11052_v52, %v9859_v28  ;;  %vm11281_vm11 = vmor %vm1434_vm14, %vm1435_vm7 }
 0x1a4   : > { %v11260_v21 = vadd.f32 1e-05, %v916_v60  ;;  %vm1425_vm10 = vweird.f32 %v11105_v37  ;;  %v1450_v34 = vmul.f32 %v11161_v45, %v1449_v25  ;;  %v1462_v18 = vsub.f32 1.5, %v1461_v3 }
 0x1a5   : > { %16135 = vst [vmem:[#allocation82_spill] sm:$0xff] %v11252_v4  ;;  %v1440_v41 = vmul.f32 %v11174_v42, %v1439_v58  ;;  %1984 = vperm.xlu1 %9050, %v11252_v4   ;;  %v11274_v52 = vpop.eup %9145  ;;  %v1422_v2 = vsub.f32 1.5, %v11241_v38  ;;  %v11286_v60 = vmul.f32 %v11074_v62, %v1412_v40  ;;  %vm1415_vm12 = vweird.f32 %v11074_v62 }
 0x1a6   : > { %v11289_v25 = vadd.f32 1e-05, %v921_v15  ;;  %vm1424_vm13 = vweird.f32 %v11034_v10  ;;  %v1490_v58 = vmul.f32 %v11213_v56, %v1489_v26  ;;  %v1469_v38 = vmul.f32 %v11254_v22, %v11156_v9  ;;  %v960_v15 = vld [vmem:[%s15797_s2 + $0x110] sm:$0xff]  ;;  %vm11359_vm1 = vmor %vm1414_vm8, %vm1415_vm12 }
 0x1a7   : > { %v1437_v49 = vsel %vm11281_vm11, %v11065_v29, %v1433_v8  ;;  %v1387_v39 = vsel %vm11266_vm9, %v10998_v47, %v11167_v54  ;;  %v11310_v59 = vpop.eup %9147  ;;  %vm1465_vm14 = vweird.f32 %v11120_v57  ;;  %v11313_v40 = vadd.f32 1e-05, %v917_v50  ;;  %v961_v54 = vld [vmem:[%s15797_s2 + $0x118] sm:$0xff]  ;;  %vm11401_vm7 = vmor %vm1424_vm13, %vm1425_vm10  ;;  %v964_v10 = vld [vmem:[%s15797_s2 + $0x130] sm:$0xff] }
 0x1a8   : > { %v11211_v61 = vpop.permute.xlu2 %1829  ;;  %9149 = vrsqrt.f32 %v11260_v21  ;;  %v919_v29 = vmul.f32 %v11118_v7, %v9859_v28  ;;  %v11318_v8 = vmul.f32 0.5, %v1450_v34  ;;  %v1463_v26 = vmul.f32 %v11120_v57, %v1462_v18 }
 0x1a9   : > { %16131 = vst [vmem:[#allocation80_spill] sm:$0xff] %v11211_v61  ;;  %v11239_v61 = vpop.xlane.xlu1 %862  ;;  %v1441_v16 = vmul.f32 0.5, %v1440_v41  ;;  %v1479_v47 = vmul.f32 %v11274_v52, %v11171_v53  ;;  %v11326_v6 = vpop.xlane.xlu0 %868  ;;  %9151 = vrsqrt.f32 %v11289_v25  ;;  %v924_v7 = vmul.f32 %v11139_v5, %v9859_v28 }
 0x1aa   : > { %v11337_v34 = vmul.f32 %v1437_v49, %v965_v33  ;;  %v11339_v18 = vmul.f32 %v1387_v39, %v960_v15  ;;  %v1491_v41 = vmul.f32 0.5, %v1490_v58  ;;  %v1397_v55 = vsel %vm1396_vm15, %v10991_v30, %v1393_v32  ;;  %v968_v33 = vld [vmem:[%s15797_s2 + $0x150] sm:$0xff]  ;;  %v963_v15 = vld [vmem:[%s15797_s2 + $0x128] sm:$0xff] }
 0x1ab   : > { %9153 = vrsqrt.f32 %v11313_v40  ;;  %v920_v11 = vmul.f32 %v11137_v24, %v9859_v28  ;;  %v11348_v4 = vadd.f32 1e-05, %v919_v29  ;;  %v11352_v5 = vmul.f32 %v1397_v55, %v961_v54 }
 0x1ac   : > { %2019 = vperm.xlu0 %9052, %v11337_v34   ;;  %1994 = vperm.xlu2 %9051, %v11339_v18   ;;  %v1423_v58 = vmul.f32 %v11105_v37, %v1422_v2  ;;  %vm1464_vm2 = vweird.f32 %v11042_v44  ;;  %v1442_v24 = vsub.f32 1.5, %v1441_v16  ;;  %vm1444_vm3 = vweird.f32 %v11086_v12 }
 0x1ad   : > { %vm1455_vm4 = vweird.f32 %v11161_v45  ;;  %vm11370_vm5 = vmor %vm1464_vm2, %vm1465_vm14  ;;  %vm1445_vm6 = vweird.f32 %v11174_v42  ;;  %v1480_v43 = vmul.f32 %v11274_v52, %v1479_v47  ;;  %v11376_v2 = vadd.f32 1e-05, %v924_v7  ;;  %1999 = vperm.xlu1 %9050, %v11352_v5  }
 0x1ae   : > { %v11365_v32 = vpop.eup %9149  ;;  %v1492_v44 = vsub.f32 1.5, %v1491_v41  ;;  %v1467_v49 = vsel %vm11370_vm5, %v11120_v57, %v1463_v26  ;;  %v1417_v39 = vsel %vm11359_vm1, %v11074_v62, %v11286_v60  ;;  %v1452_v57 = vsub.f32 1.5, %v11318_v8  ;;  %vm11447_vm9 = vmor %vm1444_vm3, %vm1445_vm6 }
 0x1af   : > { %v11395_v16 = vpop.eup %9151  ;;  %v11406_v54 = vadd.f32 1e-05, %v920_v11  ;;  %9155 = vrsqrt.f32 %v11348_v4  ;;  %v1443_v62 = vmul.f32 %v11174_v42, %v1442_v24  ;;  %vm1495_vm8 = vweird.f32 %v11213_v56 }
 0x1b0   : > { %v11308_v3 = vpop.permute.xlu2 %1839  ;;  %v1499_v60 = vmul.f32 %v11365_v32, %v11260_v21  ;;  %v1427_v8 = vsel %vm11401_vm7, %v11105_v37, %v1423_v58  ;;  %9157 = vrsqrt.f32 %v11376_v2  ;;  %v922_v7 = vmul.f32 %v11209_v48, %v9859_v28 }
 0x1b1   : > { %16140 = vst [vmem:[#allocation83_spill] sm:$0xff] %v11308_v3  ;;  %v1470_v3 = vmul.f32 %v11254_v22, %v1469_v38  ;;  %v11426_v41 = vmul.f32 %v1467_v49, %v968_v33  ;;  %v11428_v11 = vmul.f32 %v1417_v39, %v963_v15  ;;  %v1481_v30 = vmul.f32 0.5, %v1480_v43  ;;  %v971_v39 = vld [vmem:[%s15797_s2 + $0x168] sm:$0xff] }
 0x1b2   : > { %v1493_v24 = vmul.f32 %v11213_v56, %v1492_v44  ;;  %v1549_v37 = vmul.f32 %v11395_v16, %v11289_v25  ;;  %9159 = vrsqrt.f32 %v11406_v54  ;;  %v11440_v48 = vmul.f32 %v1427_v8, %v964_v10 }
 0x1b3   : > { %v1471_v26 = vmul.f32 0.5, %v1470_v3  ;;  %v1453_v43 = vmul.f32 %v11161_v45, %v1452_v57  ;;  %vm1494_vm10 = vweird.f32 %v11122_v19  ;;  %vm1454_vm11 = vweird.f32 %v11071_v17  ;;  %v966_v57 = vld [vmem:[%s15797_s2 + $0x140] sm:$0xff] }
 0x1b4   : > { %2034 = vperm.xlu0 %9052, %v11426_v41   ;;  %2009 = vperm.xlu2 %9051, %v11428_v11   ;;  %vm11460_vm12 = vmor %vm1494_vm10, %vm1495_vm8  ;;  %vm1474_vm13 = vweird.f32 %v11156_v9  ;;  %v11465_v12 = vadd.f32 1e-05, %v922_v7  ;;  %v1550_v15 = vmul.f32 %v11395_v16, %v1549_v37  ;;  %v1482_v7 = vsub.f32 1.5, %v1481_v30  ;;  %v967_v37 = vld [vmem:[%s15797_s2 + $0x148] sm:$0xff] }
 0x1b5   : > { %v1472_v47 = vsub.f32 1.5, %v1471_v26  ;;  %2014 = vperm.xlu1 %9050, %v11440_v48   ;;  %v1497_v17 = vsel %vm11460_vm12, %v11213_v56, %v1493_v24  ;;  %v1447_v26 = vsel %vm11447_vm9, %v11174_v42, %v1443_v62  ;;  %vm11487_vm14 = vmor %vm1454_vm11, %vm1455_vm4  ;;  %vm1475_vm15 = vweird.f32 %v11254_v22 }
 0x1b6   : > { %v1457_v30 = vsel %vm11487_vm14, %v11161_v45, %v1453_v43  ;;  %9161 = vrsqrt.f32 %v11465_v12  ;;  %vm1525_vm1 = vweird.f32 %v11310_v59  ;;  %v1551_v49 = vmul.f32 0.5, %v1550_v15  ;;  %vm11531_vm4 = vmor %vm1474_vm13, %vm1475_vm15 }
 0x1b7   : > { %v1473_v56 = vmul.f32 %v11254_v22, %v1472_v47  ;;  %v11509_v47 = vmul.f32 %v1497_v17, %v971_v39  ;;  %vm1485_vm2 = vweird.f32 %v11274_v52  ;;  %vm1524_vm3 = vweird.f32 %v11187_v0 }
 0x1b8   : > { %v11328_v50 = vpop.permute.xlu1 %1824  ;;  %v11393_v29 = vpop.permute.xlu2 %1849  ;;  %v1483_v43 = vmul.f32 %v11274_v52, %v1482_v7  ;;  %vm1484_vm5 = vweird.f32 %v11171_v53  ;;  %vm11542_vm6 = vmor %vm1524_vm3, %vm1525_vm1  ;;  %v1552_v7 = vsub.f32 1.5, %v1551_v49  ;;  %vm1505_vm8 = vweird.f32 %v11365_v32  ;;  %v972_v49 = vld [vmem:[%s15797_s2 + $0x170] sm:$0xff] }
 0x1b9   : > { %16141 = vst [vmem:[#allocation84_spill] sm:$0xff] %v11328_v50  ;;  %v1519_v50 = vmul.f32 %v11310_v59, %v11187_v0  ;;  %vm11569_vm7 = vmor %vm1484_vm5, %vm1485_vm2  ;;  %vm1555_vm9 = vweird.f32 %v11395_v16  ;;  %vm1504_vm11 = vweird.f32 %v11260_v21  ;;  %vm1554_vm13 = vweird.f32 %v11289_v25  ;;  %v977_v25 = vld [vmem:[%s15797_s2 + $0x198] sm:$0xff] }
 0x1ba   : > { %vm11602_vm12 = vmor %vm1504_vm11, %vm1505_vm8  ;;  %vm1514_vm14 = vweird.f32 %v11313_v40  ;;  %vm1544_vm8 = vweird.f32 %v11406_v54 }
 0x1bb   : > { %v1520_v38 = vmul.f32 %v11310_v59, %v1519_v50  ;;  %v11421_v50 = vpop.eup %9153  ;;  %vm11614_vm15 = vmor %vm1554_vm13, %vm1555_vm9  ;;  %vm1564_vm13 = vweird.f32 %v11465_v12 }
 0x1bc   : > { %v11419_v3 = vpop.permute.xlu0 %1834  ;;  %v11455_v33 = vpop.eup %9155  ;;  %2049 = vperm.xlu0 %9052, %v11509_v47   ;;  %vm1515_vm10 = vweird.f32 %v11421_v50 }
 0x1bd   : > { %16148 = vst [vmem:[#allocation85_spill] sm:$0xff] %v11419_v3  ;;  %v1521_v55 = vmul.f32 0.5, %v1520_v38  ;;  %v923_v3 = vmul.f32 %v11239_v61, %v9859_v28  ;;  %v1509_v61 = vmul.f32 %v11421_v50, %v11313_v40  ;;  %v1500_v38 = vmul.f32 %v11365_v32, %v1499_v60  ;;  %v11483_v10 = vpop.eup %9157  ;;  %vm11640_vm1 = vmor %vm1514_vm14, %vm1515_vm10 }
 0x1be   : > { %v1529_v62 = vmul.f32 %v11455_v33, %v11348_v4  ;;  %v11504_v44 = vpop.eup %9159  ;;  %v1579_v8 = vmul.f32 %v11483_v10, %v11376_v2  ;;  %vm1535_vm2 = vweird.f32 %v11455_v33  ;;  %vm1585_vm3 = vweird.f32 %v11483_v10 }
 0x1bf   : > { %v1522_v19 = vsub.f32 1.5, %v1521_v55  ;;  %v11493_v24 = vadd.f32 1e-05, %v923_v3  ;;  %v1510_v55 = vmul.f32 %v11421_v50, %v1509_v61  ;;  %v1501_v42 = vmul.f32 0.5, %v1500_v38 }
 0x1c0   : > { %v11433_v58 = vpop.permute.xlu1 %1844  ;;  %v11481_v60 = vpop.permute.xlu2 %1859  ;;  %v925_v3 = vmul.f32 %v11326_v6, %v9859_v28  ;;  %v11511_v61 = vmul.f32 %v1447_v26, %v966_v57  ;;  %v11524_v6 = vmul.f32 %v1457_v30, %v967_v37  ;;  %v1539_v39 = vmul.f32 %v11504_v44, %v11406_v54  ;;  %v969_v37 = vld [vmem:[%s15797_s2 + $0x158] sm:$0xff] }
 0x1c1   : > { %16149 = vst [vmem:[#allocation86_spill] sm:$0xff] %v11433_v58  ;;  %v1523_v38 = vmul.f32 %v11310_v59, %v1522_v19  ;;  %9163 = vrsqrt.f32 %v11493_v24  ;;  %v1511_v15 = vmul.f32 0.5, %v1510_v55  ;;  %v1502_v0 = vsub.f32 1.5, %v1501_v42  ;;  %v974_v42 = vld [vmem:[%s15797_s2 + $0x180] sm:$0xff] }
 0x1c2   : > { %2024 = vperm.xlu2 %9051, %v11511_v61   ;;  %v1530_v9 = vmul.f32 %v11455_v33, %v1529_v62  ;;  %v11547_v26 = vadd.f32 1e-05, %v925_v3  ;;  %2029 = vperm.xlu1 %9050, %v11524_v6   ;;  %v1580_v55 = vmul.f32 %v11483_v10, %v1579_v8  ;;  %v1477_v62 = vsel %vm11531_vm4, %v11254_v22, %v1473_v56  ;;  %v11565_v3 = vpop.eup %9161  ;;  %v970_v22 = vld [vmem:[%s15797_s2 + $0x160] sm:$0xff] }
 0x1c3   : > { %v1527_v53 = vsel %vm11542_vm6, %v11310_v59, %v1523_v38  ;;  %v1512_v59 = vsub.f32 1.5, %v1511_v15  ;;  %v1503_v38 = vmul.f32 %v11365_v32, %v1502_v0  ;;  %v1540_v8 = vmul.f32 %v11504_v44, %v1539_v39 }
 0x1c4   : > { %v11517_v45 = vpop.permute.xlu0 %1869  ;;  %v1487_v56 = vsel %vm11569_vm7, %v11274_v52, %v1483_v43  ;;  %v1531_v57 = vmul.f32 0.5, %v1530_v9  ;;  %9165 = vrsqrt.f32 %v11547_v26  ;;  %v11585_v28 = vmul.f32 %v1527_v53, %v974_v42 }
 0x1c5   : > { %v11587_v15 = vmul.f32 %v1477_v62, %v969_v37  ;;  %v1553_v0 = vmul.f32 %v11395_v16, %v1552_v7  ;;  %v1581_v39 = vmul.f32 0.5, %v1580_v55  ;;  %v1559_v58 = vmul.f32 %v11565_v3, %v11465_v12 }
 0x1c6   : > { %2064 = vperm.xlu0 %9052, %v11585_v28   ;;  %v11597_v52 = vmul.f32 %v1487_v56, %v970_v22  ;;  %v1513_v43 = vmul.f32 %v11421_v50, %v1512_v59  ;;  %v1541_v7 = vmul.f32 0.5, %v1540_v8  ;;  %v1532_v53 = vsub.f32 1.5, %v1531_v57 }
 0x1c7   : > { %v11582_v19 = vpop.eup %9163  ;;  %v1582_v37 = vsub.f32 1.5, %v1581_v39  ;;  %v1560_v62 = vmul.f32 %v11565_v3, %v1559_v58  ;;  %v1557_v40 = vsel %vm11614_vm15, %v11395_v16, %v1553_v0  ;;  %v1507_v59 = vsel %vm11602_vm12, %v11365_v32, %v1503_v38  ;;  %v973_v0 = vld [vmem:[%s15797_s2 + $0x178] sm:$0xff] }
 0x1c8   : > { %v11537_v17 = vpop.permute.xlu1 %1854  ;;  %v11563_v30 = vpop.permute.xlu2 %1874  ;;  %v1569_v21 = vmul.f32 %v11582_v19, %v11493_v24  ;;  %v1542_v16 = vsub.f32 1.5, %v1541_v7  ;;  %v1517_v32 = vsel %vm11640_vm1, %v11421_v50, %v1513_v43  ;;  %v1533_v38 = vmul.f32 %v11455_v33, %v1532_v53  ;;  %v978_v53 = vld [vmem:[%s15797_s2 + $0x1a0] sm:$0xff] }
 0x1c9   : > { %v11653_v39 = vmul.f32 %v1557_v40, %v977_v25  ;;  %v11655_v9 = vmul.f32 %v1507_v59, %v972_v49  ;;  %v1583_v7 = vmul.f32 %v11483_v10, %v1582_v37  ;;  %vm1534_vm4 = vweird.f32 %v11348_v4  ;;  %v980_v25 = vld [vmem:[%s15797_s2 + $0x1b0] sm:$0xff]  ;;  %v975_v49 = vld [vmem:[%s15797_s2 + $0x188] sm:$0xff] }
 0x1ca   : > { %2039 = vperm.xlu2 %9051, %v11587_v15   ;;  %2044 = vperm.xlu1 %9050, %v11597_v52   ;;  %v11636_v58 = vpop.eup %9165  ;;  %v1570_v57 = vmul.f32 %v11582_v19, %v1569_v21  ;;  %v1561_v21 = vmul.f32 0.5, %v1560_v62  ;;  %v11664_v50 = vmul.f32 %v1517_v32, %v973_v0  ;;  %v1543_v43 = vmul.f32 %v11504_v44, %v1542_v16  ;;  %vm11668_vm6 = vmor %vm1534_vm4, %vm1535_vm2 }
 0x1cb   : > { %v1589_v42 = vmul.f32 %v11636_v58, %v11547_v26  ;;  %vm1545_vm5 = vweird.f32 %v11504_v44  ;;  %vm1584_vm7 = vweird.f32 %v11376_v2  ;;  %v1537_v2 = vsel %vm11668_vm6, %v11455_v33, %v1533_v38 }
 0x1cc   : > { %v11609_v55 = vpop.permute.xlu0 %1884  ;;  %v1571_v37 = vmul.f32 0.5, %v1570_v57  ;;  %vm1586_vm9 = vmor %vm1584_vm7, %vm1585_vm3  ;;  %v1562_v4 = vsub.f32 1.5, %v1561_v21  ;;  %v11700_v32 = vmul.f32 %v1537_v2, %v975_v49  ;;  %vm1565_vm11 = vweird.f32 %v11565_v3  ;;  %v1658_v49 = vld [vmem:[%s15798_s3 + $0x20] sm:$0xff]  ;;  %v981_v2 = vld [vmem:[%s15797_s2 + $0x1b8] sm:$0xff] }
 0x1cd   : > { %v1590_v62 = vmul.f32 %v11636_v58, %v1589_v42  ;;  %v1587_v40 = vsel %vm1586_vm9, %v11483_v10, %v1583_v7  ;;  %vm1546_vm10 = vmor %vm1544_vm8, %vm1545_vm5  ;;  %v976_v10 = vld [vmem:[%s15797_s2 + $0x190] sm:$0xff]  ;;  %vm1575_vm12 = vweird.f32 %v11582_v19  ;;  %vm1574_vm15 = vweird.f32 %v11493_v24 }
 0x1ce   : > { %2079 = vperm.xlu0 %9052, %v11653_v39   ;;  %v1572_v56 = vsub.f32 1.5, %v1571_v37  ;;  %v1547_v16 = vsel %vm1546_vm10, %v11504_v44, %v1543_v43  ;;  %v11698_v0 = vmul.f32 %v1587_v40, %v980_v25  ;;  %v1563_v33 = vmul.f32 %v11565_v3, %v1562_v4  ;;  %vm1566_vm14 = vmor %vm1564_vm13, %vm1565_vm11  ;;  %v1655_v43 = vld [vmem:[%s15798_s3 + $0x8] sm:$0xff] }
 0x1cf   : > { %v1591_v38 = vmul.f32 0.5, %v1590_v62  ;;  %v11706_v7 = vmul.f32 %v1547_v16, %v976_v10  ;;  %v1711_v44 = vmul.f32 %v10383_v35, %v9904_v23  ;;  %vm1576_vm1 = vmor %vm1574_vm15, %vm1575_vm12  ;;  %v979_v23 = vld [vmem:[%s15797_s2 + $0x1a8] sm:$0xff]  ;;  %vm1595_vm2 = vweird.f32 %v11636_v58 }
 0x1d0   : > { %v11632_v8 = vpop.permute.xlu1 %1864  ;;  %v11634_v22 = vpop.permute.xlu2 %1889  ;;  %v1573_v21 = vmul.f32 %v11582_v19, %v1572_v56  ;;  %v1567_v37 = vsel %vm1566_vm14, %v11565_v3, %v1563_v33  ;;  %vm1594_vm3 = vweird.f32 %v11547_v26  ;;  %v16173_v16 = vld [vmem:[#allocation15_spill] sm:$0xff]  ;;  %vm2942_vm5 = vcmask 523264  }
 0x1d1   : > { %v1592_v42 = vsub.f32 1.5, %v1591_v38  ;;  %v1767_v4 = vsub.f32 %v1655_v43, %v1711_v44  ;;  %v11730_v62 = vmul.f32 %v1567_v37, %v978_v53  ;;  %vm1596_vm4 = vmor %vm1594_vm3, %vm1595_vm2  ;;  %v1710_v26 = vmul.f32 %v10385_v13, %v16173_v16  ;;  %v1656_v43 = vld [vmem:[%s15798_s3 + $0x10] sm:$0xff]  ;;  %v1657_v37 = vld [vmem:[%s15798_s3 + $0x18] sm:$0xff] }
 0x1d2   : > { %2054 = vperm.xlu2 %9051, %v11655_v9   ;;  %2059 = vperm.xlu1 %9050, %v11664_v50   ;;  %v1577_v35 = vsel %vm1576_vm1, %v11582_v19, %v1573_v21  ;;  %v1714_v19 = vmul.f32 %v10470_v31, %v9925_v1  ;;  %v1654_v1 = vld [vmem:[%s15798_s3] sm:$0xff]  ;;  %v1717_v13 = vmul.f32 %v10605_v51, %v9943_v14  ;;  %v16179_v16 = vld [vmem:[#allocation20_spill] sm:$0xff] }
 0x1d3   : > { %v1593_v25 = vmul.f32 %v11636_v58, %v1592_v42  ;;  %v11737_v3 = vmul.f32 %v1577_v35, %v979_v23  ;;  %v1766_v21 = vsub.f32 %v1654_v1, %v1710_v26  ;;  %v1661_v42 = vld [vmem:[%s15798_s3 + $0x38] sm:$0xff]  ;;  %v1713_v53 = vmul.f32 %v10462_v27, %v9896_v63  ;;  %v16175_v35 = vld [vmem:[#allocation19_spill] sm:$0xff]  ;;  %v1664_v63 = vld [vmem:[%s15798_s3 + $0x50] sm:$0xff] }
 0x1d4   : > { %v11686_v54 = vpop.permute.xlu0 %1899  ;;  %v1770_v31 = vsub.f32 %v1658_v49, %v1714_v19  ;;  %v16177_v19 = vld [vmem:[#allocation25_spill] sm:$0xff]  ;;  %v16178_v49 = vld [vmem:[#allocation60_spill] sm:$0xff]  ;;  %v1659_v27 = vld [vmem:[%s15798_s3 + $0x28] sm:$0xff] }
 0x1d5   : > { %v1597_v56 = vsel %vm1596_vm4, %v11636_v58, %v1593_v25  ;;  %v1712_v58 = vmul.f32 %v10416_v36, %v9893_v46  ;;  %v1773_v36 = vsub.f32 %v1661_v42, %v1717_v13  ;;  %v1769_v51 = vsub.f32 %v1657_v37, %v1713_v53  ;;  %v16180_v26 = vld [vmem:[#allocation17_spill] sm:$0xff]  ;;  %v16182_v53 = vld [vmem:[#allocation58_spill] sm:$0xff] }
 0x1d6   : > { %2094 = vperm.xlu0 %9052, %v11698_v0   ;;  %v11757_v33 = vmul.f32 %v1597_v56, %v981_v2  ;;  %v1720_v2 = vmul.f32 %v16178_v49, %v16177_v19  ;;  %v1716_v1 = vmul.f32 %v16180_v26, %v16179_v16  ;;  %v16185_v19 = vld [vmem:[#allocation22_spill] sm:$0xff] }
 0x1d7   : > { %v1768_v14 = vsub.f32 %v1656_v43, %v1712_v58  ;;  %v16181_v43 = vld [vmem:[#allocation21_spill] sm:$0xff]  ;;  %v16186_v49 = vld [vmem:[#allocation18_spill] sm:$0xff] }
 0x1d8   : > { %v11688_v59 = vpop.permute.xlu2 %1904  ;;  %v11696_v57 = vpop.permute.xlu1 %1879  ;;  %v1718_v37 = vmul.f32 %v16182_v53, %v16181_v43  ;;  %v16189_v43 = vld [vmem:[#allocation31_spill] sm:$0xff]  ;;  %v16190_v53 = vld [vmem:[#allocation66_spill] sm:$0xff] }
 0x1d9   : > { %16170 = vst [vmem:[#allocation87_spill] sm:$0xff] %v11688_v59 }
 0x1da   : > { %2069 = vperm.xlu2 %9051, %v11700_v32   ;;  %2074 = vperm.xlu1 %9050, %v11706_v7  }
 0x1dc   : > { %v11728_v24 = vpop.permute.xlu0 %1914 }
 0x1dd   : > { %16172 = vst [vmem:[#allocation89_spill] sm:$0xff] %v11728_v24 }
 0x1de   : > { %2165 = vperm.xlu0 %9052, %v1767_v4   ;;  %v16176_v4 = vld [vmem:[#allocation14_spill] sm:$0xff] }
 0x1df   : > { %v1715_v25 = vmul.f32 %v16176_v4, %v16175_v35  ;;  %v1667_v35 = vld [vmem:[%s15798_s3 + $0x68] sm:$0xff] }
 0x1e0   : > { %v11722_v12 = vpop.permute.xlu2 %1919  ;;  %v11734_v40 = vpop.permute.xlu1 %1894 }
 0x1e1   : > { %16171 = vst [vmem:[#allocation88_spill] sm:$0xff] %v11722_v12  ;;  %v1771_v58 = vsub.f32 %v1659_v27, %v1715_v25  ;;  %v1662_v25 = vld [vmem:[%s15798_s3 + $0x40] sm:$0xff] }
 0x1e2   : > { %2084 = vperm.xlu2 %9051, %v11730_v62   ;;  %2089 = vperm.xlu1 %9050, %v11737_v3   ;;  %v1774_v26 = vsub.f32 %v1662_v25, %v1718_v37  ;;  %v1665_v37 = vld [vmem:[%s15798_s3 + $0x58] sm:$0xff] }
 0x1e4   : > { %v11759_v38 = vpop.permute.xlu0 %1929 }
 0x1e6   : > { %2180 = vperm.xlu0 %9052, %v1770_v31   ;;  %v1660_v31 = vld [vmem:[%s15798_s3 + $0x30] sm:$0xff] }
 0x1e7   : > { %v1772_v42 = vsub.f32 %v1660_v31, %v1716_v1 }
 0x1e8   : > { %v11750_v10 = vpop.permute.xlu2 %1934  ;;  %v11762_v44 = vpop.permute.xlu1 %1909 }
 0x1e9   : > { %16174 = vst [vmem:[#allocation15_spill] sm:$0xff] %v11762_v44  ;;  %v16204_v44 = vld [vmem:[#allocation72_spill] sm:$0xff] }
 0x1ea   : > { %2099 = vperm.xlu2 %9051, %v11757_v33   ;;  %2160 = vperm.xlu1 %9050, %v1766_v21   ;;  %v1776_v21 = vsub.f32 %v1664_v63, %v1720_v2  ;;  %v1719_v2 = vmul.f32 %v16186_v49, %v16185_v19  ;;  %v1663_v63 = vld [vmem:[%s15798_s3 + $0x48] sm:$0xff]  ;;  %v1666_v49 = vld [vmem:[%s15798_s3 + $0x60] sm:$0xff] }
 0x1ec   : > { %v11781_v23 = vpop.permute.xlu0 %1944  ;;  %v1775_v1 = vsub.f32 %v1663_v63, %v1719_v2 }
 0x1ee   : > { %2195 = vperm.xlu0 %9052, %v1773_v36   ;;  %v16183_v36 = vld [vmem:[#allocation28_spill] sm:$0xff] }
 0x1f0   : > { %v11779_v46 = vpop.permute.xlu2 %1949  ;;  %v11793_v56 = vpop.permute.xlu1 %1924 }
 0x1f2   : > { %2170 = vperm.xlu2 %9051, %v1768_v14   ;;  %2175 = vperm.xlu1 %9050, %v1769_v51   ;;  %v16184_v14 = vld [vmem:[#allocation63_spill] sm:$0xff] }
 0x1f3   : > { %v1723_v51 = vmul.f32 %v16184_v14, %v16183_v36  ;;  %v1726_v36 = vmul.f32 %v16190_v53, %v16189_v43  ;;  %v1670_v14 = vld [vmem:[%s15798_s3 + $0x80] sm:$0xff]  ;;  %v16196_v53 = vld [vmem:[#allocation69_spill] sm:$0xff] }
 0x1f4   : > { %v11809_v4 = vpop.permute.xlu0 %1959  ;;  %v16195_v43 = vld [vmem:[#allocation34_spill] sm:$0xff] }
 0x1f5   : > { %v1779_v16 = vsub.f32 %v1667_v35, %v1723_v51  ;;  %v16191_v51 = vld [vmem:[#allocation24_spill] sm:$0xff]  ;;  %v16192_v35 = vld [vmem:[#allocation57_spill] sm:$0xff]  ;;  %v1782_v2 = vsub.f32 %v1670_v14, %v1726_v36  ;;  %v1729_v59 = vmul.f32 %v16196_v53, %v16195_v43  ;;  %v16198_v36 = vld [vmem:[#allocation27_spill] sm:$0xff] }
 0x1f6   : > { %2210 = vperm.xlu0 %9052, %v1776_v21   ;;  %v16187_v21 = vld [vmem:[#allocation23_spill] sm:$0xff]  ;;  %v1722_v25 = vmul.f32 %v16192_v35, %v16191_v51  ;;  %v1673_v35 = vld [vmem:[%s15798_s3 + $0x98] sm:$0xff] }
 0x1f7   : > { %v16199_v14 = vld [vmem:[#allocation59_spill] sm:$0xff] }
 0x1f8   : > { %v11800_v13 = vpop.permute.xlu2 %1964  ;;  %v11819_v27 = vpop.permute.xlu1 %1939  ;;  %v16202_v43 = vld [vmem:[#allocation67_spill] sm:$0xff] }
 0x1fa   : > { %2185 = vperm.xlu2 %9051, %v1771_v58   ;;  %2190 = vperm.xlu1 %9050, %v1772_v42   ;;  %v16188_v58 = vld [vmem:[#allocation61_spill] sm:$0xff] }
 0x1fb   : > { %v1721_v42 = vmul.f32 %v16188_v58, %v16187_v21  ;;  %v16194_v21 = vld [vmem:[#allocation64_spill] sm:$0xff] }
 0x1fc   : > { %v11835_v19 = vpop.permute.xlu0 %1974 }
 0x1fd   : > { %v1777_v63 = vsub.f32 %v1665_v37, %v1721_v42  ;;  %v1668_v42 = vld [vmem:[%s15798_s3 + $0x70] sm:$0xff]  ;;  %v1725_v37 = vmul.f32 %v16199_v14, %v16198_v36 }
 0x1fe   : > { %2225 = vperm.xlu0 %9052, %v1779_v16  }
 0x200   : > { %v11821_v31 = vpop.permute.xlu2 %1979  ;;  %v11840_v16 = vpop.permute.xlu1 %1954 }
 0x202   : > { %2200 = vperm.xlu2 %9051, %v1774_v26   ;;  %2205 = vperm.xlu1 %9050, %v1775_v1   ;;  %v1778_v26 = vsub.f32 %v1666_v49, %v1722_v25  ;;  %v16193_v1 = vld [vmem:[#allocation26_spill] sm:$0xff]  ;;  %v1669_v25 = vld [vmem:[%s15798_s3 + $0x78] sm:$0xff]  ;;  %v1785_v49 = vsub.f32 %v1673_v35, %v1729_v59  ;;  %v1676_v59 = vld [vmem:[%s15798_s3 + $0xb0] sm:$0xff] }
 0x203   : > { %v1724_v58 = vmul.f32 %v16194_v21, %v16193_v1  ;;  %v16201_v21 = vld [vmem:[#allocation29_spill] sm:$0xff]  ;;  %v16206_v35 = vld [vmem:[#allocation30_spill] sm:$0xff] }
 0x204   : > { %v1727_v53 = vmul.f32 %v16202_v43, %v16201_v21  ;;  %v16211_v43 = vld [vmem:[#allocation40_spill] sm:$0xff] }
 0x206   : > { %2240 = vperm.xlu0 %9052, %v1782_v2   ;;  %v1780_v2 = vsub.f32 %v1668_v42, %v1724_v58  ;;  %v1671_v58 = vld [vmem:[%s15798_s3 + $0x88] sm:$0xff]  ;;  %v16207_v42 = vld [vmem:[#allocation62_spill] sm:$0xff] }
 0x207   : > { %v1728_v14 = vmul.f32 %v16207_v42, %v16206_v35 }
 0x208   : > { %v11846_v51 = vpop.permute.xlu2 %1994 }
 0x209   : > { %16197 = vst [vmem:[#allocation19_spill] sm:$0xff] %v11846_v51  ;;  %v16203_v51 = vld [vmem:[#allocation37_spill] sm:$0xff] }
 0x20a   : > { %2215 = vperm.xlu2 %9051, %v1777_v63   ;;  %2220 = vperm.xlu1 %9050, %v1778_v26   ;;  %v11859_v63 = vpop.permute.xlu0 %1989  ;;  %v1781_v26 = vsub.f32 %v1669_v25, %v1725_v37  ;;  %v1732_v24 = vmul.f32 %v16204_v44, %v16203_v51  ;;  %v1672_v37 = vld [vmem:[%s15798_s3 + $0x90] sm:$0xff]  ;;  %v1783_v44 = vsub.f32 %v1671_v58, %v1727_v53  ;;  %v1674_v53 = vld [vmem:[%s15798_s3 + $0xa0] sm:$0xff]  ;;  %v16216_v58 = vld [vmem:[#allocation65_spill] sm:$0xff] }
 0x20b   : > { %16200 = vst [vmem:[#allocation14_spill] sm:$0xff] %v11859_v63  ;;  %v11861_v1 = vpop.permute.xlu1 %1969  ;;  %v1784_v51 = vsub.f32 %v1672_v37, %v1728_v14  ;;  %v16212_v63 = vld [vmem:[#allocation75_spill] sm:$0xff] }
 0x20c   : > { %v1788_v25 = vsub.f32 %v1676_v59, %v1732_v24  ;;  %v1679_v24 = vld [vmem:[%s15798_s3 + $0xc8] sm:$0xff]  ;;  %v16215_v59 = vld [vmem:[#allocation33_spill] sm:$0xff] }
 0x20d   : > { %v1731_v42 = vmul.f32 %v16216_v58, %v16215_v59  ;;  %v1682_v59 = vld [vmem:[%s15798_s3 + $0xe0] sm:$0xff] }
 0x20e   : > { %2255 = vperm.xlu0 %9052, %v1785_v49  }
 0x210   : > { %v11867_v36 = vpop.permute.xlu2 %2009 }
 0x211   : > { %16205 = vst [vmem:[#allocation25_spill] sm:$0xff] %v11867_v36  ;;  %v1735_v36 = vmul.f32 %v16212_v63, %v16211_v43  ;;  %v1675_v63 = vld [vmem:[%s15798_s3 + $0xa8] sm:$0xff]  ;;  %v16220_v43 = vld [vmem:[#allocation78_spill] sm:$0xff] }
 0x212   : > { %2230 = vperm.xlu2 %9051, %v1780_v2   ;;  %2235 = vperm.xlu1 %9050, %v1781_v26   ;;  %v16209_v2 = vld [vmem:[#allocation32_spill] sm:$0xff]  ;;  %v16210_v26 = vld [vmem:[#allocation70_spill] sm:$0xff] }
 0x213   : > { %v1730_v21 = vmul.f32 %v16210_v26, %v16209_v2  ;;  %v1791_v14 = vsub.f32 %v1679_v24, %v1735_v36  ;;  %v16219_v26 = vld [vmem:[#allocation43_spill] sm:$0xff]  ;;  %v1677_v36 = vld [vmem:[%s15798_s3 + $0xb8] sm:$0xff]  ;;  %v16223_v24 = vld [vmem:[#allocation68_spill] sm:$0xff] }
 0x214   : > { %v11880_v49 = vpop.permute.xlu0 %2004 }
 0x215   : > { %16208 = vst [vmem:[#allocation60_spill] sm:$0xff] %v11880_v49  ;;  %v1786_v37 = vsub.f32 %v1674_v53, %v1730_v21  ;;  %v16222_v21 = vld [vmem:[#allocation36_spill] sm:$0xff] }
 0x216   : > { %2270 = vperm.xlu0 %9052, %v1788_v25   ;;  %v1787_v25 = vsub.f32 %v1675_v63, %v1731_v42  ;;  %v1734_v53 = vmul.f32 %v16223_v24, %v16222_v21  ;;  %v1678_v42 = vld [vmem:[%s15798_s3 + $0xc0] sm:$0xff]  ;;  %v1685_v24 = vld [vmem:[%s15798_s3 + $0xf8] sm:$0xff] }
 0x217   : > { %v11888_v35 = vpop.permute.xlu1 %1984 }
 0x218   : > { %16214 = vst [vmem:[#allocation17_spill] sm:$0xff] %v11888_v35  ;;  %v1738_v35 = vmul.f32 %v16220_v43, %v16219_v26  ;;  %v16227_v26 = vld [vmem:[#allocation46_spill] sm:$0xff] }
 0x219   : > { %v1741_v43 = vmul.f32 %v11234_v20, %v16227_v26  ;;  %v1681_v20 = vld [vmem:[%s15798_s3 + $0xd8] sm:$0xff] }
 0x21a   : > { %2245 = vperm.xlu2 %9051, %v1783_v44   ;;  %2250 = vperm.xlu1 %9050, %v1784_v51   ;;  %v16217_v44 = vld [vmem:[#allocation35_spill] sm:$0xff]  ;;  %v16218_v51 = vld [vmem:[#allocation73_spill] sm:$0xff]  ;;  %v1794_v63 = vsub.f32 %v1682_v59, %v1738_v35  ;;  %v1680_v35 = vld [vmem:[%s15798_s3 + $0xd0] sm:$0xff] }
 0x21b   : > { %v1733_v2 = vmul.f32 %v16218_v51, %v16217_v44  ;;  %v16226_v44 = vld [vmem:[#allocation76_spill] sm:$0xff]  ;;  %v16229_v59 = vld [vmem:[#allocation71_spill] sm:$0xff] }
 0x21c   : > { %v11886_v12 = vpop.permute.xlu2 %2024 }
 0x21d   : > { %16213 = vst [vmem:[#allocation20_spill] sm:$0xff] %v11886_v12 }
 0x21e   : > { %2285 = vperm.xlu0 %9052, %v1791_v14   ;;  %v11905_v49 = vpop.permute.xlu0 %2019  ;;  %v1789_v14 = vsub.f32 %v1677_v36, %v1733_v2  ;;  %v16228_v2 = vld [vmem:[#allocation39_spill] sm:$0xff] }
 0x21f   : > { %16221 = vst [vmem:[#allocation21_spill] sm:$0xff] %v11905_v49  ;;  %v11917_v58 = vpop.permute.xlu1 %1999  ;;  %v1737_v36 = vmul.f32 %v16229_v59, %v16228_v2 }
 0x220   : > { %16224 = vst [vmem:[#allocation58_spill] sm:$0xff] %v11917_v58  ;;  %v16233_v58 = vld [vmem:[#allocation49_spill] sm:$0xff] }
 0x221   : > { %v1744_v2 = vmul.f32 %v11339_v18, %v16233_v58 }
 0x222   : > { %2260 = vperm.xlu2 %9051, %v1786_v37   ;;  %2265 = vperm.xlu1 %9050, %v1787_v25   ;;  %v1790_v37 = vsub.f32 %v1678_v42, %v1734_v53  ;;  %v16225_v25 = vld [vmem:[#allocation38_spill] sm:$0xff]  ;;  %v1797_v42 = vsub.f32 %v1685_v24, %v1741_v43 }
 0x223   : > { %v1736_v51 = vmul.f32 %v16226_v44, %v16225_v25  ;;  %v16232_v25 = vld [vmem:[#allocation79_spill] sm:$0xff]  ;;  %v16235_v43 = vld [vmem:[#allocation42_spill] sm:$0xff] }
 0x224   : > { %v11907_v12 = vpop.permute.xlu2 %2039  ;;  %v16236_v24 = vld [vmem:[#allocation74_spill] sm:$0xff] }
 0x226   : > { %2300 = vperm.xlu0 %9052, %v1794_v63   ;;  %v11926_v49 = vpop.permute.xlu0 %2034  ;;  %v1792_v63 = vsub.f32 %v1680_v35, %v1736_v51  ;;  %v1683_v51 = vld [vmem:[%s15798_s3 + $0xe8] sm:$0xff]  ;;  %v1740_v35 = vmul.f32 %v16236_v24, %v16235_v43 }
 0x227   : > { %v11938_v53 = vpop.permute.xlu1 %2014 }
 0x228   : > { %16230 = vst [vmem:[#allocation28_spill] sm:$0xff] %v11938_v53  ;;  %v1688_v53 = vld [vmem:[%s15798_s3 + $0x110] sm:$0xff] }
 0x229   : > { %v1800_v18 = vsub.f32 %v1688_v53, %v1744_v2  ;;  %v1686_v53 = vld [vmem:[%s15798_s3 + $0x100] sm:$0xff]  ;;  %v16243_v2 = vld [vmem:[#allocation77_spill] sm:$0xff] }
 0x22a   : > { %2275 = vperm.xlu2 %9051, %v1789_v14   ;;  %2280 = vperm.xlu1 %9050, %v1790_v37   ;;  %v1793_v14 = vsub.f32 %v1681_v20, %v1737_v36  ;;  %v16231_v37 = vld [vmem:[#allocation41_spill] sm:$0xff]  ;;  %v1684_v20 = vld [vmem:[%s15798_s3 + $0xf0] sm:$0xff] }
 0x22b   : > { %v1739_v44 = vmul.f32 %v16232_v25, %v16231_v37 }
 0x22c   : > { %v11928_v21 = vpop.permute.xlu2 %2054 }
 0x22d   : > { %v1795_v58 = vsub.f32 %v1683_v51, %v1739_v44  ;;  %v16242_v44 = vld [vmem:[#allocation45_spill] sm:$0xff] }
 0x22e   : > { %2315 = vperm.xlu0 %9052, %v1797_v42   ;;  %v11945_v26 = vpop.permute.xlu0 %2049  ;;  %v1796_v42 = vsub.f32 %v1684_v20, %v1740_v35  ;;  %v1743_v51 = vmul.f32 %v16243_v2, %v16242_v44  ;;  %v1687_v20 = vld [vmem:[%s15798_s3 + $0x108] sm:$0xff] }
 0x232   : > { %2290 = vperm.xlu2 %9051, %v1792_v63   ;;  %2295 = vperm.xlu1 %9050, %v1793_v14   ;;  %v16238_v63 = vld [vmem:[#allocation44_spill] sm:$0xff]  ;;  %v16239_v14 = vld [vmem:[#allocation82_spill] sm:$0xff] }
 0x233   : > { %v1742_v37 = vmul.f32 %v16239_v14, %v16238_v63  ;;  %v16246_v14 = vld [vmem:[#allocation47_spill] sm:$0xff] }
 0x234   : > { %v11949_v59 = vpop.permute.xlu2 %2069  ;;  %v11959_v36 = vpop.permute.xlu1 %2029  ;;  %v1745_v44 = vmul.f32 %v11352_v5, %v16246_v14  ;;  %v16250_v14 = vld [vmem:[#allocation50_spill] sm:$0xff] }
 0x235   : > { %16234 = vst [vmem:[#allocation63_spill] sm:$0xff] %v11949_v59  ;;  %v16241_v59 = vld [vmem:[#allocation52_spill] sm:$0xff] }
 0x236   : > { %16237 = vst [vmem:[#allocation22_spill] sm:$0xff] %v11959_v36  ;;  %2330 = vperm.xlu0 %9052, %v1800_v18   ;;  %v1747_v43 = vmul.f32 %v11428_v11, %v16241_v59  ;;  %v1691_v36 = vld [vmem:[%s15798_s3 + $0x128] sm:$0xff]  ;;  %v1798_v59 = vsub.f32 %v1686_v53, %v1742_v37  ;;  %v1799_v18 = vsub.f32 %v1687_v20, %v1743_v51  ;;  %v16247_v37 = vld [vmem:[#allocation48_spill] sm:$0xff] }
 0x238   : > { %v11966_v25 = vpop.permute.xlu0 %2064  ;;  %v1803_v11 = vsub.f32 %v1691_v36, %v1747_v43  ;;  %v1689_v36 = vld [vmem:[%s15798_s3 + $0x118] sm:$0xff] }
 0x239   : > { %16240 = vst [vmem:[#allocation18_spill] sm:$0xff] %v11966_v25  ;;  %v1694_v25 = vld [vmem:[%s15798_s3 + $0x140] sm:$0xff]  ;;  %v16248_v43 = vld [vmem:[#allocation81_spill] sm:$0xff]  ;;  %v1801_v20 = vsub.f32 %v1689_v36, %v1745_v44  ;;  %v16252_v44 = vld [vmem:[#allocation51_spill] sm:$0xff] }
 0x23a   : > { %2305 = vperm.xlu2 %9051, %v1795_v58   ;;  %2310 = vperm.xlu1 %9050, %v1796_v42   ;;  %v16245_v42 = vld [vmem:[#allocation55_spill] sm:$0xff]  ;;  %v1746_v53 = vmul.f32 %v16248_v43, %v16247_v37  ;;  %v1748_v37 = vmul.f32 %v11440_v48, %v16250_v14  ;;  %v1749_v36 = vmul.f32 %v11337_v34, %v16252_v44  ;;  %v1700_v34 = vld [vmem:[%s15798_s3 + $0x170] sm:$0xff] }
 0x23b   : > { %v1750_v63 = vmul.f32 %v11511_v61, %v16245_v42  ;;  %v1690_v61 = vld [vmem:[%s15798_s3 + $0x120] sm:$0xff] }
 0x23c   : > { %v11970_v24 = vpop.permute.xlu2 %2084  ;;  %v11980_v35 = vpop.permute.xlu1 %2044 }
 0x23d   : > { %v1806_v5 = vsub.f32 %v1694_v25, %v1750_v63  ;;  %v1692_v25 = vld [vmem:[%s15798_s3 + $0x130] sm:$0xff] }
 0x23e   : > { %2345 = vperm.xlu0 %9052, %v1803_v11   ;;  %v1802_v11 = vsub.f32 %v1690_v61, %v1746_v53  ;;  %v1804_v53 = vsub.f32 %v1692_v25, %v1748_v37  ;;  %v16255_v37 = vld [vmem:[#allocation54_spill] sm:$0xff] }
 0x23f   : > { %v1752_v25 = vmul.f32 %v11426_v41, %v16255_v37  ;;  %v1703_v41 = vld [vmem:[%s15798_s3 + $0x188] sm:$0xff] }
 0x240   : > { %v11985_v58 = vpop.permute.xlu0 %2079 }
 0x241   : > { %16244 = vst [vmem:[#allocation23_spill] sm:$0xff] %v11985_v58  ;;  %v1697_v58 = vld [vmem:[%s15798_s3 + $0x158] sm:$0xff] }
 0x242   : > { %2320 = vperm.xlu2 %9051, %v1798_v59   ;;  %2325 = vperm.xlu1 %9050, %v1799_v18   ;;  %v16249_v18 = vld [vmem:[#allocation56_spill] sm:$0xff] }
 0x243   : > { %v1753_v42 = vmul.f32 %v11587_v15, %v16249_v18  ;;  %v1693_v15 = vld [vmem:[%s15798_s3 + $0x138] sm:$0xff] }
 0x244   : > { %v11991_v2 = vpop.permute.xlu2 %2099  ;;  %v12001_v51 = vpop.permute.xlu1 %2059  ;;  %v1805_v61 = vsub.f32 %v1693_v15, %v1749_v36  ;;  %v16254_v18 = vld [vmem:[#allocation53_spill] sm:$0xff] }
 0x245   : > { %v1809_v48 = vsub.f32 %v1697_v58, %v1753_v42  ;;  %v1751_v14 = vmul.f32 %v11524_v6, %v16254_v18  ;;  %v1695_v58 = vld [vmem:[%s15798_s3 + $0x148] sm:$0xff] }
 0x246   : > { %2360 = vperm.xlu0 %9052, %v1806_v5  }
 0x247   : > { %v1807_v44 = vsub.f32 %v1695_v58, %v1751_v14 }
 0x248   : > { %v12006_v59 = vpop.permute.xlu0 %2094 }
 0x24a   : > { %2335 = vperm.xlu2 %9051, %v1801_v20   ;;  %2340 = vperm.xlu1 %9050, %v1802_v11   ;;  %v16253_v20 = vld [vmem:[#allocation4_spill] sm:$0xff] }
 0x24b   : > { %v1756_v11 = vmul.f32 %v11655_v9, %v16253_v20  ;;  %v1696_v9 = vld [vmem:[%s15798_s3 + $0x150] sm:$0xff] }
 0x24c   : > { %v12012_v43 = vpop.permute.xlu2 %2170  ;;  %v12020_v63 = vpop.permute.xlu1 %2074  ;;  %v1808_v36 = vsub.f32 %v1696_v9, %v1752_v25 }
 0x24d   : > { %16251 = vst [vmem:[#allocation61_spill] sm:$0xff] %v12020_v63  ;;  %v1812_v6 = vsub.f32 %v1700_v34, %v1756_v11  ;;  %v1698_v11 = vld [vmem:[%s15798_s3 + $0x160] sm:$0xff] }
 0x24e   : > { %2375 = vperm.xlu0 %9052, %v1809_v48   ;;  %v16256_v48 = vld [vmem:[#allocation7_spill] sm:$0xff]  ;;  %v16258_v34 = vld [vmem:[#allocation2_spill] sm:$0xff] }
 0x24f   : > { %v1755_v58 = vmul.f32 %v11509_v47, %v16258_v34  ;;  %v1706_v47 = vld [vmem:[%s15798_s3 + $0x1a0] sm:$0xff] }
 0x250   : > { %v12027_v5 = vpop.permute.xlu0 %2165 }
 0x252   : > { %2350 = vperm.xlu2 %9051, %v1804_v53   ;;  %2355 = vperm.xlu1 %9050, %v1805_v61   ;;  %v1759_v53 = vmul.f32 %v11700_v32, %v16256_v48  ;;  %v16257_v61 = vld [vmem:[#allocation5_spill] sm:$0xff]  ;;  %v1699_v32 = vld [vmem:[%s15798_s3 + $0x168] sm:$0xff] }
 0x253   : > { %v1754_v20 = vmul.f32 %v11597_v52, %v16257_v61  ;;  %v1811_v25 = vsub.f32 %v1699_v32, %v1755_v58 }
 0x254   : > { %v12033_v63 = vpop.permute.xlu2 %2185  ;;  %v12041_v42 = vpop.permute.xlu1 %2089  ;;  %v1815_v52 = vsub.f32 %v1703_v41, %v1759_v53  ;;  %v1701_v53 = vld [vmem:[%s15798_s3 + $0x178] sm:$0xff]  ;;  %v16261_v41 = vld [vmem:[#allocation8_spill] sm:$0xff] }
 0x255   : > { %v1810_v37 = vsub.f32 %v1698_v11, %v1754_v20  ;;  %v1758_v11 = vmul.f32 %v11585_v28, %v16261_v41  ;;  %v1709_v28 = vld [vmem:[%s15798_s3 + $0x1b8] sm:$0xff] }
 0x256   : > { %2390 = vperm.xlu0 %9052, %v1812_v6   ;;  %v16259_v6 = vld [vmem:[#allocation10_spill] sm:$0xff] }
 0x258   : > { %v12048_v15 = vpop.permute.xlu0 %2180 }
 0x25a   : > { %2365 = vperm.xlu2 %9051, %v1807_v44   ;;  %2370 = vperm.xlu1 %9050, %v1808_v36   ;;  %v1762_v44 = vmul.f32 %v11730_v62, %v16259_v6  ;;  %v16260_v36 = vld [vmem:[#allocation3_spill] sm:$0xff]  ;;  %v1702_v62 = vld [vmem:[%s15798_s3 + $0x180] sm:$0xff] }
 0x25b   : > { %v1757_v48 = vmul.f32 %v11664_v50, %v16260_v36  ;;  %v1814_v58 = vsub.f32 %v1702_v62, %v1758_v11 }
 0x25c   : > { %v12054_v18 = vpop.permute.xlu2 %2200  ;;  %v12062_v14 = vpop.permute.xlu1 %2160  ;;  %v1818_v50 = vsub.f32 %v1706_v47, %v1762_v44  ;;  %v1704_v44 = vld [vmem:[%s15798_s3 + $0x190] sm:$0xff]  ;;  %v16264_v47 = vld [vmem:[#allocation11_spill] sm:$0xff] }
 0x25d   : > { %v1813_v34 = vsub.f32 %v1701_v53, %v1757_v48  ;;  %v1761_v53 = vmul.f32 %v11653_v39, %v16264_v47  ;;  %v1707_v39 = vld [vmem:[%s15798_s3 + $0x1a8] sm:$0xff] }
 0x25e   : > { %2405 = vperm.xlu0 %9052, %v1815_v52   ;;  %v16262_v52 = vld [vmem:[#allocation13_spill] sm:$0xff] }
 0x260   : > { %v12069_v9 = vpop.permute.xlu0 %2195 }
 0x262   : > { %2380 = vperm.xlu2 %9051, %v1810_v37   ;;  %2385 = vperm.xlu1 %9050, %v1811_v25   ;;  %v1765_v37 = vmul.f32 %v11757_v33, %v16262_v52  ;;  %v16263_v25 = vld [vmem:[#allocation6_spill] sm:$0xff]  ;;  %v1705_v33 = vld [vmem:[%s15798_s3 + $0x198] sm:$0xff] }
 0x263   : > { %v1760_v6 = vmul.f32 %v11706_v7, %v16263_v25  ;;  %v1817_v11 = vsub.f32 %v1705_v33, %v1761_v53  ;;  %v16266_v25 = vld [vmem:[#allocation16_spill] sm:$0xff] }
 0x264   : > { %v12075_v61 = vpop.permute.xlu2 %2215  ;;  %v12083_v20 = vpop.permute.xlu1 %2175  ;;  %v1821_v41 = vsub.f32 %v1709_v28, %v1765_v37  ;;  %v1764_v47 = vmul.f32 %v11698_v0, %v16266_v25  ;;  %v1708_v37 = vld [vmem:[%s15798_s3 + $0x1b0] sm:$0xff]  ;;  %v9391_v0 = vld [vmem:[%s15795_s0 + $0x78] sm:$0xff]  ;;  %v9393_v25 = vld [vmem:[%s15795_s0 + $0x68] sm:$0xff] }
 0x265   : > { %v1816_v7 = vsub.f32 %v1704_v44, %v1760_v6 }
 0x266   : > { %2420 = vperm.xlu0 %9052, %v1818_v50   ;;  %v16265_v50 = vld [vmem:[#allocation9_spill] sm:$0xff]  ;;  %v1820_v28 = vsub.f32 %v1708_v37, %v1764_v47  ;;  %v2115_v47 = vmul.f32 %v9393_v25, %v11634_v22 }
 0x268   : > { %v2211_v32 = vpop.permute.xlu0 %2210 }
 0x26a   : > { %2395 = vperm.xlu2 %9051, %v1813_v34   ;;  %2400 = vperm.xlu1 %9050, %v1814_v58   ;;  %v1763_v34 = vmul.f32 %v11737_v3, %v16265_v50  ;;  %v9392_v50 = vld [vmem:[%s15795_s0 + $0x70] sm:$0xff] }
 0x26c   : > { %v2231_v36 = vpop.permute.xlu2 %2230  ;;  %v12100_v48 = vpop.permute.xlu1 %2190  ;;  %v1819_v6 = vsub.f32 %v1707_v39, %v1763_v34  ;;  %v2116_v34 = vmul.f32 %v9392_v50, %v11734_v40 }
 0x26e   : > { %2435 = vperm.xlu0 %9052, %v1821_v41   ;;  %v2452_v37 = vadd.f32 %v2231_v36, %v2116_v34  ;;  %v9397_v34 = vld [vmem:[%s15795_s0 + $0x48] sm:$0xff] }
 0x270   : > { %v2226_v62 = vpop.permute.xlu0 %2225 }
 0x272   : > { %2410 = vperm.xlu2 %9051, %v1816_v7   ;;  %2415 = vperm.xlu1 %9050, %v1817_v11   ;;  %v2117_v7 = vmul.f32 %v9391_v0, %v11686_v54  ;;  %v9394_v54 = vld [vmem:[%s15795_s0 + $0x60] sm:$0xff] }
 0x274   : > { %v12109_v58 = vpop.permute.xlu2 %2245  ;;  %v2206_v52 = vpop.permute.xlu1 %2205 }
 0x278   : > { %v12119_v44 = vpop.permute.xlu0 %2240 }
 0x27a   : > { %2425 = vperm.xlu2 %9051, %v1819_v6   ;;  %2430 = vperm.xlu1 %9050, %v1820_v28   ;;  %v2114_v6 = vmul.f32 %v9394_v54, %v11609_v55  ;;  %v2451_v28 = vadd.f32 %v2226_v62, %v2115_v47  ;;  %v9396_v55 = vld [vmem:[%s15795_s0 + $0x50] sm:$0xff] }
 0x27b   : > { %v2112_v62 = vmul.f32 %v9396_v55, %v11563_v30 }
 0x27c   : > { %v12121_v3 = vpop.permute.xlu2 %2260  ;;  %v2221_v53 = vpop.permute.xlu1 %2220 }
 0x27d   : > { %v2450_v36 = vadd.f32 %v2221_v53, %v2114_v6  ;;  %v9398_v53 = vld [vmem:[%s15795_s0 + $0x40] sm:$0xff] }
 0x27e   : > { %v2110_v25 = vmul.f32 %v9398_v53, %v11632_v8  ;;  %v9400_v8 = vld [vmem:[%s15795_s0 + $0x30] sm:$0xff] }
 0x280   : > { %v12123_v33 = vpop.permute.xlu0 %2255 }
 0x284   : > { %v12125_v41 = vpop.permute.xlu2 %2275  ;;  %v2236_v11 = vpop.permute.xlu1 %2235 }
 0x285   : > { %v2453_v39 = vadd.f32 %v2236_v11, %v2117_v7  ;;  %v9395_v7 = vld [vmem:[%s15795_s0 + $0x58] sm:$0xff] }
 0x286   : > { %v2113_v22 = vmul.f32 %v9395_v7, %v11696_v57  ;;  %v2448_v57 = vadd.f32 %v2211_v32, %v2112_v62  ;;  %v9402_v7 = vld [vmem:[%s15795_s0 + $0x20] sm:$0xff]  ;;  %v9403_v62 = vld [vmem:[%s15795_s0 + $0x18] sm:$0xff] }
 0x287   : > { %3279 = vmatpush.msra.mxu0 %v2453_v39  ;;  %v2111_v39 = vmul.f32 %v9397_v34, %v11517_v45  ;;  %v2446_v45 = vadd.f32 %v12054_v18, %v2110_v25  ;;  %v9405_v25 = vld [vmem:[%s15795_s0 + $0x8] sm:$0xff] }
 0x288   : > { %v12143_v0 = vpop.permute.xlu0 %2270  ;;  %v2449_v50 = vadd.f32 %v12075_v61, %v2113_v22  ;;  %v9399_v61 = vld [vmem:[%s15795_s0 + $0x38] sm:$0xff]  ;;  %v16267_v22 = vld [vmem:[#allocation86_spill] sm:$0xff] }
 0x289   : > { %3280 = vmatpush.msra.mxu0 %v2452_v37  ;;  %v2447_v47 = vadd.f32 %v2206_v52, %v2111_v39  ;;  %v2109_v54 = vmul.f32 %v9399_v61, %v11481_v60  ;;  %v2108_v52 = vmul.f32 %v9400_v8, %v11537_v17  ;;  %v9404_v39 = vld [vmem:[%s15795_s0 + $0x10] sm:$0xff] }
 0x28b   : > { %3281 = vmatpush.msra.mxu0 %v2451_v28  ;;  %v2445_v6 = vadd.f32 %v12069_v9, %v2109_v54  ;;  %v9401_v28 = vld [vmem:[%s15795_s0 + $0x28] sm:$0xff]  ;;  %v2444_v18 = vadd.f32 %v12100_v48, %v2108_v52  ;;  %v9407_v52 = vld [vmem:[%s15795_s0 + $0xf8] sm:$0xff] }
 0x28c   : > { %v12145_v40 = vpop.permute.xlu2 %2290  ;;  %v12151_v11 = vpop.permute.xlu1 %2250  ;;  %v2107_v60 = vmul.f32 %v9401_v28, %v11393_v29  ;;  %v16268_v29 = vld [vmem:[#allocation83_spill] sm:$0xff] }
 0x28d   : > { %3282 = vmatpush.msra.mxu0 %v2450_v36  ;;  %v2106_v36 = vmul.f32 %v9402_v7, %v16267_v22 }
 0x28e   : > { %v2443_v17 = vadd.f32 %v12033_v63, %v2107_v60 }
 0x28f   : > { %3283 = vmatpush.msra.mxu0 %v2449_v50  ;;  %v2105_v50 = vmul.f32 %v9403_v62, %v16268_v29  ;;  %v2442_v48 = vadd.f32 %v12048_v15, %v2106_v36  ;;  %v9406_v15 = vld [vmem:[%s15795_s0] sm:$0xff]  ;;  %v9409_v62 = vld [vmem:[%s15795_s0 + $0xe8] sm:$0xff] }
 0x290   : > { %v12166_v30 = vpop.permute.xlu0 %2285 }
 0x291   : > { %3284 = vmatpush.msra.mxu0 %v2448_v57  ;;  %v16269_v57 = vld [vmem:[#allocation85_spill] sm:$0xff]  ;;  %v2441_v63 = vadd.f32 %v12083_v20, %v2105_v50  ;;  %v2133_v20 = vmul.f32 %v9407_v52, %v11821_v31  ;;  %v9408_v31 = vld [vmem:[%s15795_s0 + $0xf0] sm:$0xff]  ;;  %v9410_v50 = vld [vmem:[%s15795_s0 + $0xe0] sm:$0xff] }
 0x292   : > { %v2104_v53 = vmul.f32 %v9404_v39, %v16269_v57 }
 0x293   : > { %3285 = vmatpush.msra.mxu0 %v2447_v47  ;;  %v16270_v47 = vld [vmem:[#allocation80_spill] sm:$0xff] }
 0x294   : > { %v2306_v37 = vpop.permute.xlu2 %2305  ;;  %v12173_v32 = vpop.permute.xlu1 %2265  ;;  %v2103_v61 = vmul.f32 %v9405_v25, %v16270_v47  ;;  %v2440_v54 = vadd.f32 %v12012_v43, %v2104_v53  ;;  %v9412_v25 = vld [vmem:[%s15795_s0 + $0xd0] sm:$0xff] }
 0x295   : > { %3286 = vmatpush.msra.mxu0 %v2446_v45  ;;  %v16271_v45 = vld [vmem:[#allocation84_spill] sm:$0xff] }
 0x296   : > { %v2102_v8 = vmul.f32 %v9406_v15, %v16271_v45  ;;  %v9415_v45 = vld [vmem:[%s15795_s0 + $0xb8] sm:$0xff] }
 0x297   : > { %3287 = vmatpush.msra.mxu0 %v2445_v6  ;;  %v2439_v6 = vadd.f32 %v12027_v5, %v2103_v61  ;;  %v2132_v5 = vmul.f32 %v9408_v31, %v11835_v19  ;;  %v9411_v19 = vld [vmem:[%s15795_s0 + $0xd8] sm:$0xff] }
 0x298   : > { %v2301_v55 = vpop.permute.xlu0 %2300  ;;  %v2438_v43 = vadd.f32 %v12062_v14, %v2102_v8  ;;  %v2131_v14 = vmul.f32 %v9409_v62, %v11861_v1  ;;  %v2129_v57 = vmul.f32 %v9411_v19, %v11809_v4  ;;  %v9413_v4 = vld [vmem:[%s15795_s0 + $0xc8] sm:$0xff]  ;;  %v2125_v8 = vmul.f32 %v9415_v45, %v11819_v27  ;;  %v16273_v62 = vld [vmem:[#allocation89_spill] sm:$0xff] }
 0x299   : > { %3288 = vmatpush.msra.mxu0 %v2444_v18  ;;  %v9417_v27 = vld [vmem:[%s15795_s0 + $0xa8] sm:$0xff] }
 0x29a   : > { %v2467_v39 = vadd.f32 %v2306_v37, %v2131_v14 }
 0x29b   : > { %3289 = vmatpush.msra.mxu0 %v2443_v17 }
 0x29c   : > { %v12190_v9 = vpop.permute.xlu2 %2320  ;;  %v2281_v34 = vpop.permute.xlu1 %2280 }
 0x29d   : > { %3290 = vmatpush.msra.mxu0 %v2442_v48  ;;  %v2130_v48 = vmul.f32 %v9410_v50, %v11800_v13  ;;  %v2128_v13 = vmul.f32 %v9412_v25, %v11840_v16 }
 0x29f   : > { %3291 = vmatpush.msra.mxu0 %v2441_v63  ;;  %v2466_v53 = vadd.f32 %v2301_v55, %v2130_v48  ;;  %v2127_v55 = vmul.f32 %v9413_v4, %v11779_v46  ;;  %v2464_v61 = vadd.f32 %v12145_v40, %v2128_v13  ;;  %v9424_v13 = vld [vmem:[%s15795_s0 + $0x170] sm:$0xff] }
 0x2a0   : > { %v2316_v28 = vpop.permute.xlu0 %2315 }
 0x2a1   : > { %3292 = vmatpush.msra.mxu0 %v2440_v54  ;;  %v2469_v18 = vadd.f32 %v2316_v28, %v2133_v20  ;;  %v9414_v54 = vld [vmem:[%s15795_s0 + $0xc0] sm:$0xff]  ;;  %v2463_v16 = vadd.f32 %v12166_v30, %v2127_v55  ;;  %v9416_v20 = vld [vmem:[%s15795_s0 + $0xb0] sm:$0xff]  ;;  %v2461_v30 = vadd.f32 %v12125_v41, %v2125_v8  ;;  %v9427_v8 = vld [vmem:[%s15795_s0 + $0x158] sm:$0xff] }
 0x2a2   : > { %v2126_v15 = vmul.f32 %v9414_v54, %v11781_v23  ;;  %v2124_v23 = vmul.f32 %v9416_v20, %v11750_v10 }
 0x2a3   : > { %3293 = vmatpush.msra.mxu0 %v2439_v6  ;;  %3632 = vmatpush.msra.mxu1 %v2469_v18  ;;  %v9418_v18 = vld [vmem:[%s15795_s0 + $0xa0] sm:$0xff] }
 0x2a4   : > { %v12216_v60 = vpop.permute.xlu2 %2335  ;;  %v2296_v7 = vpop.permute.xlu1 %2295  ;;  %v2462_v46 = vadd.f32 %v2281_v34, %v2126_v15  ;;  %v2123_v34 = vmul.f32 %v9417_v27, %v11759_v38  ;;  %v2460_v28 = vadd.f32 %v12143_v0, %v2124_v23  ;;  %v2122_v10 = vmul.f32 %v9418_v18, %v11793_v56  ;;  %v9420_v38 = vld [vmem:[%s15795_s0 + $0x178] sm:$0xff]  ;;  %v2495_v18 = vld [vmem:[%s12343_s20 + $0x8] sm:$0xff] }
 0x2a5   : > { %3294 = vmatpush.msra.mxu0 %v2438_v43  ;;  %v2465_v37 = vadd.f32 %v2296_v7, %v2129_v57  ;;  %v9419_v43 = vld [vmem:[%s15795_s0 + $0x98] sm:$0xff]  ;;  %v16272_v7 = vld [vmem:[#allocation88_spill] sm:$0xff]  ;;  %v2149_v0 = vmul.f32 %v9420_v38, %v12001_v51  ;;  %v9422_v51 = vld [vmem:[%s15795_s0 + $0x88] sm:$0xff] }
 0x2a6   : > { %v2459_v41 = vadd.f32 %v12173_v32, %v2123_v34  ;;  %v2121_v31 = vmul.f32 %v9419_v43, %v16272_v7  ;;  %v9421_v32 = vld [vmem:[%s15795_s0 + $0x90] sm:$0xff]  ;;  %v9423_v57 = vld [vmem:[%s15795_s0 + $0x80] sm:$0xff]  ;;  %v16278_v38 = vld [vmem:[#allocation21_spill] sm:$0xff] }
 0x2a7   : > { %v2120_v14 = vmul.f32 %v9421_v32, %v16273_v62  ;;  %v16276_v34 = vld [vmem:[#allocation22_spill] sm:$0xff] }
 0x2a8   : > { %v12219_v22 = vpop.permute.xlu0 %2330 }
 0x2ac   : > { %v12221_v36 = vpop.permute.xlu2 %2350  ;;  %v2311_v17 = vpop.permute.xlu1 %2310 }
 0x2ad   : > { %v2468_v29 = vadd.f32 %v2311_v17, %v2132_v5  ;;  %v2458_v5 = vadd.f32 %v12121_v3, %v2122_v10  ;;  %v2456_v3 = vadd.f32 %v12151_v11, %v2120_v14  ;;  %v9430_v10 = vld [vmem:[%s15795_s0 + $0x140] sm:$0xff] }
 0x2af   : > { %3633 = vmatpush.msra.mxu1 %v2468_v29  ;;  %v2457_v29 = vadd.f32 %v12123_v33, %v2121_v31  ;;  %v9431_v31 = vld [vmem:[%s15795_s0 + $0x138] sm:$0xff] }
 0x2b0   : > { %v12239_v63 = vpop.permute.xlu0 %2345 }
 0x2b1   : > { %3634 = vmatpush.msra.mxu1 %v2467_v39  ;;  %v16274_v39 = vld [vmem:[#allocation15_spill] sm:$0xff] }
 0x2b2   : > { %v2119_v19 = vmul.f32 %v9422_v51, %v16274_v39  ;;  %v16280_v51 = vld [vmem:[#allocation25_spill] sm:$0xff] }
 0x2b3   : > { %3635 = vmatpush.msra.mxu1 %v2466_v53  ;;  %v16275_v53 = vld [vmem:[#allocation87_spill] sm:$0xff] }
 0x2b4   : > { %v12241_v1 = vpop.permute.xlu2 %2365  ;;  %v12247_v47 = vpop.permute.xlu1 %2325  ;;  %v2118_v25 = vmul.f32 %v9423_v57, %v16275_v53  ;;  %v2455_v33 = vadd.f32 %v12109_v58, %v2119_v19  ;;  %v9425_v58 = vld [vmem:[%s15795_s0 + $0x168] sm:$0xff]  ;;  %v2498_v53 = vld [vmem:[%s12343_s20 + $0x20] sm:$0xff] }
 0x2b5   : > { %3636 = vmatpush.msra.mxu1 %v2465_v37  ;;  %v2148_v37 = vmul.f32 %v9424_v13, %v11928_v21  ;;  %v2147_v15 = vmul.f32 %v9425_v58, %v11945_v26  ;;  %v9428_v26 = vld [vmem:[%s15795_s0 + $0x150] sm:$0xff] }
 0x2b6   : > { %v2454_v4 = vadd.f32 %v12119_v44, %v2118_v25  ;;  %v9426_v44 = vld [vmem:[%s15795_s0 + $0x160] sm:$0xff]  ;;  %v2144_v23 = vmul.f32 %v9428_v26, %v11926_v49  ;;  %v2499_v25 = vld [vmem:[%s12343_s20 + $0x28] sm:$0xff] }
 0x2b7   : > { %3637 = vmatpush.msra.mxu1 %v2464_v61  ;;  %v2503_v26 = vld [vmem:[%s12343_s20 + $0x48] sm:$0xff] }
 0x2b8   : > { %v12263_v52 = vpop.permute.xlu0 %2360 }
 0x2b9   : > { %3638 = vmatpush.msra.mxu1 %v2463_v16  ;;  %v2146_v16 = vmul.f32 %v9426_v44, %v11980_v35  ;;  %v9429_v35 = vld [vmem:[%s15795_s0 + $0x148] sm:$0xff] }
 0x2bb   : > { %3639 = vmatpush.msra.mxu1 %v2462_v46  ;;  %v2145_v46 = vmul.f32 %v9427_v8, %v11907_v12 }
 0x2bc   : > { %v2381_v40 = vpop.permute.xlu2 %2380  ;;  %v12270_v6 = vpop.permute.xlu1 %2340 }
 0x2bd   : > { %3640 = vmatpush.msra.mxu1 %v2461_v30  ;;  %v2482_v20 = vadd.f32 %v2381_v40, %v2146_v16  ;;  %v2494_v40 = vld [vmem:[%s12343_s20] sm:$0xff]  ;;  %v9439_v16 = vld [vmem:[%s15795_s0 + $0x1b0] sm:$0xff] }
 0x2be   : > { %3295 = vmatmul.f32.vlgmr.msra.gmra.mxu0 %v2494_v40 }
 0x2bf   : > { %3641 = vmatpush.msra.mxu1 %v2460_v28  ;;  %v2143_v28 = vmul.f32 %v9429_v35, %v16276_v34  ;;  %v9441_v35 = vld [vmem:[%s15795_s0 + $0x1a8] sm:$0xff] }
 0x2c0   : > { %v2376_v17 = vpop.permute.xlu0 %2375 }
 0x2c1   : > { %3642 = vmatpush.msra.mxu1 %v2459_v41  ;;  %v2481_v30 = vadd.f32 %v2376_v17, %v2145_v46  ;;  %v16277_v41 = vld [vmem:[#allocation20_spill] sm:$0xff]  ;;  %v2479_v7 = vadd.f32 %v12241_v1, %v2143_v28  ;;  %v9433_v1 = vld [vmem:[%s15795_s0 + $0x1b8] sm:$0xff]  ;;  %v9442_v28 = vld [vmem:[%s15795_s0 + $0x1a0] sm:$0xff] }
 0x2c2   : > { %v2142_v43 = vmul.f32 %v9430_v10, %v16277_v41  ;;  %v9432_v17 = vld [vmem:[%s15795_s0 + $0x130] sm:$0xff]  ;;  %v2157_v62 = vmul.f32 %v9433_v1, %v11991_v2  ;;  %v9435_v2 = vld [vmem:[%s15795_s0 + $0x120] sm:$0xff]  ;;  %v16286_v10 = vld [vmem:[#allocation23_spill] sm:$0xff] }
 0x2c3   : > { %3643 = vmatpush.msra.mxu1 %v2458_v5  ;;  %v16289_v1 = vld [vmem:[#allocation18_spill] sm:$0xff] }
 0x2c4   : > { %v2396_v56 = vpop.permute.xlu2 %2395  ;;  %v2356_v48 = vpop.permute.xlu1 %2355  ;;  %v2478_v5 = vadd.f32 %v12263_v52, %v2142_v43  ;;  %v9434_v52 = vld [vmem:[%s15795_s0 + $0x128] sm:$0xff] }
 0x2c5   : > { %v2485_v50 = vadd.f32 %v2396_v56, %v2149_v0  ;;  %3644 = vmatpush.msra.mxu1 %v2457_v29  ;;  %v2141_v0 = vmul.f32 %v9431_v31, %v16278_v38  ;;  %v16279_v56 = vld [vmem:[#allocation28_spill] sm:$0xff]  ;;  %v2139_v39 = vmul.f32 %v9434_v52, %v16280_v51  ;;  %v2506_v38 = vld [vmem:[%s12343_s20 + $0x60] sm:$0xff]  ;;  %v2497_v52 = vld [vmem:[%s12343_s20 + $0x18] sm:$0xff] }
 0x2c6   : > { %v2140_v32 = vmul.f32 %v9432_v17, %v16279_v56  ;;  %3298 = vmatmul.f32.gmra.mxu0 %v2498_v53  ;;  %v16288_v17 = vld [vmem:[#allocation63_spill] sm:$0xff]  ;;  %v2510_v51 = vld [vmem:[%s12343_s20 + $0x80] sm:$0xff]  ;;  %v2505_v53 = vld [vmem:[%s12343_s20 + $0x58] sm:$0xff] }
 0x2c7   : > { %3985 = vmatpush.msra.mxu2 %v2485_v50  ;;  %3645 = vmatpush.msra.mxu1 %v2456_v3  ;;  %v2477_v14 = vadd.f32 %v2356_v48, %v2141_v0  ;;  %v16281_v48 = vld [vmem:[#allocation60_spill] sm:$0xff]  ;;  %v2475_v13 = vadd.f32 %v12239_v63, %v2139_v39  ;;  %v2507_v0 = vld [vmem:[%s12343_s20 + $0x68] sm:$0xff] }
 0x2c8   : > { %v2391_v11 = vpop.permute.xlu0 %2390  ;;  %v2476_v3 = vadd.f32 %v12221_v36, %v2140_v32  ;;  %v16282_v36 = vld [vmem:[#allocation58_spill] sm:$0xff]  ;;  %v2511_v39 = vld [vmem:[%s12343_s20 + $0x88] sm:$0xff] }
 0x2c9   : > { %3646 = vmatpush.msra.mxu1 %v2455_v33  ;;  %v2484_v55 = vadd.f32 %v2391_v11, %v2148_v37  ;;  %v2138_v33 = vmul.f32 %v9435_v2, %v16281_v48  ;;  %v9436_v37 = vld [vmem:[%s15795_s0 + $0x118] sm:$0xff]  ;;  %v9446_v32 = vld [vmem:[%s15795_s0 + $0x180] sm:$0xff]  ;;  %v2519_v2 = vld [vmem:[%s12343_s20 + $0xc8] sm:$0xff] }
 0x2ca   : > { %v2512_v48 = vld [vmem:[%s12343_s20 + $0x90] sm:$0xff] }
 0x2cb   : > { %3647 = vmatpush.msra.mxu1 %v2454_v4  ;;  %3986 = vmatpush.msra.mxu2 %v2484_v55  ;;  %v2137_v4 = vmul.f32 %v9436_v37, %v16282_v36  ;;  %v2474_v11 = vadd.f32 %v12270_v6, %v2138_v33  ;;  %v9437_v55 = vld [vmem:[%s15795_s0 + $0x110] sm:$0xff]  ;;  %v2156_v6 = vmul.f32 %v9439_v16, %v12006_v59  ;;  %v2509_v33 = vld [vmem:[%s12343_s20 + $0x78] sm:$0xff]  ;;  %v2523_v37 = vld [vmem:[%s12343_s20 + $0xe8] sm:$0xff] }
 0x2cc   : > { %v2371_v61 = vpop.permute.xlu1 %2370  ;;  %3648 = vmatmul.f32.vlgmr.msra.gmra.mxu1 %v2495_v18  ;;  %v12367_v29 = vpop.permute.xlu2 %2410  ;;  %v2155_v59 = vmul.f32 %v9441_v35, %v12041_v42  ;;  %v2496_v42 = vld [vmem:[%s12343_s20 + $0x10] sm:$0xff]  ;;  %v2534_v16 = vld [vmem:[%s12343_s20 + $0x140] sm:$0xff] }
 0x2cd   : > { %v2480_v12 = vadd.f32 %v2371_v61, %v2144_v23  ;;  %v16283_v61 = vld [vmem:[#allocation19_spill] sm:$0xff]  ;;  %v2473_v63 = vadd.f32 %v12216_v60, %v2137_v4  ;;  %v9440_v60 = vld [vmem:[%s15795_s0 + $0x100] sm:$0xff]  ;;  %v16285_v23 = vld [vmem:[#allocation17_spill] sm:$0xff] }
 0x2ce   : > { %v2136_v58 = vmul.f32 %v9437_v55, %v16283_v61  ;;  %v2516_v36 = vld [vmem:[%s12343_s20 + $0xb0] sm:$0xff]  ;;  %v2513_v4 = vld [vmem:[%s12343_s20 + $0x98] sm:$0xff]  ;;  %v2527_v55 = vld [vmem:[%s12343_s20 + $0x108] sm:$0xff] }
 0x2cf   : > { %v2520_v61 = vld [vmem:[%s12343_s20 + $0xd0] sm:$0xff] }
 0x2d0   : > { %v12313_v54 = vpop.permute.xlu0 %2405  ;;  %v2536_v35 = vld [vmem:[%s12343_s20 + $0x150] sm:$0xff] }
 0x2d4   : > { %v2386_v21 = vpop.permute.xlu1 %2385  ;;  %3651 = vmatmul.f32.gmra.mxu1 %v2499_v25  ;;  %v2426_v8 = vpop.permute.xlu2 %2425  ;;  %v2518_v25 = vld [vmem:[%s12343_s20 + $0xc0] sm:$0xff] }
 0x2d5   : > { %v2483_v45 = vadd.f32 %v2386_v21, %v2147_v15  ;;  %v9438_v15 = vld [vmem:[%s15795_s0 + $0x108] sm:$0xff]  ;;  %v16284_v21 = vld [vmem:[#allocation14_spill] sm:$0xff]  ;;  %v2491_v18 = vadd.f32 %v2426_v8, %v2155_v59  ;;  %v2525_v8 = vld [vmem:[%s12343_s20 + $0xf8] sm:$0xff] }
 0x2d6   : > { %v2135_v44 = vmul.f32 %v9438_v15, %v16284_v21  ;;  %v2531_v15 = vld [vmem:[%s12343_s20 + $0x128] sm:$0xff]  ;;  %v2524_v21 = vld [vmem:[%s12343_s20 + $0xf0] sm:$0xff]  ;;  %v2533_v59 = vld [vmem:[%s12343_s20 + $0x138] sm:$0xff] }
 0x2d7   : > { %3987 = vmatpush.msra.mxu2 %v2483_v45  ;;  %v2472_v45 = vadd.f32 %v12219_v22, %v2136_v58  ;;  %v2517_v58 = vld [vmem:[%s12343_s20 + $0xb8] sm:$0xff] }
 0x2d8   : > { %v12334_v27 = vpop.permute.xlu0 %2420  ;;  %v2471_v22 = vadd.f32 %v12247_v47, %v2135_v44  ;;  %v9443_v47 = vld [vmem:[%s15795_s0 + $0x198] sm:$0xff] }
 0x2d9   : > { %3988 = vmatpush.msra.mxu2 %v2482_v20  ;;  %v2502_v20 = vld [vmem:[%s12343_s20 + $0x40] sm:$0xff]  ;;  %v2153_v41 = vmul.f32 %v9443_v47, %v16286_v10  ;;  %v2521_v44 = vld [vmem:[%s12343_s20 + $0xd8] sm:$0xff] }
 0x2da   : > { %3301 = vmatmul.f32.gmra.mxu0 %v2502_v20  ;;  %v2539_v20 = vld [vmem:[%s12343_s20 + $0x168] sm:$0xff]  ;;  %v2541_v47 = vld [vmem:[%s12343_s20 + $0x178] sm:$0xff]  ;;  %v2554_v10 = vld [vmem:[%s12343_s20 + $0x1e0] sm:$0xff] }
 0x2db   : > { %3989 = vmatpush.msra.mxu2 %v2481_v30  ;;  %v2134_v30 = vmul.f32 %v9440_v60, %v16285_v23  ;;  %v2529_v60 = vld [vmem:[%s12343_s20 + $0x118] sm:$0xff]  ;;  %v2542_v23 = vld [vmem:[%s12343_s20 + $0x180] sm:$0xff] }
 0x2dc   : > { %v12345_v49 = vpop.permute.xlu1 %2400  ;;  %3654 = vmatmul.f32.gmra.mxu1 %v2503_v26  ;;  %v2532_v26 = vld [vmem:[%s12343_s20 + $0x130] sm:$0xff] }
 0x2dd   : > { %3990 = vmatpush.msra.mxu2 %v2480_v12  ;;  %v2154_v12 = vmul.f32 %v9442_v28, %v11970_v24  ;;  %v2470_v40 = vadd.f32 %v12190_v9, %v2134_v30  ;;  %v9444_v24 = vld [vmem:[%s15795_s0 + $0x190] sm:$0xff]  ;;  %v2543_v30 = vld [vmem:[%s12343_s20 + $0x188] sm:$0xff] }
 0x2de   : > { %v2540_v28 = vld [vmem:[%s12343_s20 + $0x170] sm:$0xff] }
 0x2df   : > { %3991 = vmatpush.msra.mxu2 %v2479_v7  ;;  %v2490_v43 = vadd.f32 %v12334_v27, %v2154_v12  ;;  %v16287_v7 = vld [vmem:[#allocation61_spill] sm:$0xff] }
 0x2e0   : > { %v2436_v50 = vpop.permute.xlu0 %2435  ;;  %v2152_v9 = vmul.f32 %v9444_v24, %v16287_v7  ;;  %v2537_v12 = vld [vmem:[%s12343_s20 + $0x158] sm:$0xff] }
 0x2e1   : > { %3992 = vmatpush.msra.mxu2 %v2478_v5  ;;  %v2493_v19 = vadd.f32 %v2436_v50, %v2157_v62  ;;  %v9445_v5 = vld [vmem:[%s15795_s0 + $0x188] sm:$0xff]  ;;  %v2150_v62 = vmul.f32 %v9446_v32, %v16289_v1  ;;  %v2500_v50 = vld [vmem:[%s12343_s20 + $0x30] sm:$0xff]  ;;  %v2545_v24 = vld [vmem:[%s12343_s20 + $0x198] sm:$0xff] }
 0x2e2   : > { %v2151_v56 = vmul.f32 %v9445_v5, %v16288_v17  ;;  %v2488_v27 = vadd.f32 %v12367_v29, %v2152_v9  ;;  %3304 = vmatmul.f32.gmra.mxu0 %v2506_v38  ;;  %v2559_v38 = vld [vmem:[%s12343_s20 + $0x208] sm:$0xff]  ;;  %v2549_v5 = vld [vmem:[%s12343_s20 + $0x1b8] sm:$0xff]  ;;  %v2556_v1 = vld [vmem:[%s12343_s20 + $0x1f0] sm:$0xff] }
 0x2e3   : > { %3993 = vmatpush.msra.mxu2 %v2477_v14  ;;  %4346 = vmatpush.msra.mxu3 %v2493_v19  ;;  %v2486_v29 = vadd.f32 %v12345_v49, %v2150_v62  ;;  %v2501_v19 = vld [vmem:[%s12343_s20 + $0x38] sm:$0xff]  ;;  %v2514_v49 = vld [vmem:[%s12343_s20 + $0xa0] sm:$0xff]  ;;  %v2563_v32 = vld [vmem:[%s12343_s20 + $0x228] sm:$0xff] }
 0x2e4   : > { %v2416_v57 = vpop.permute.xlu1 %2415  ;;  %3657 = vmatmul.f32.gmra.mxu1 %v2507_v0  ;;  %v2487_v14 = vadd.f32 %v12313_v54, %v2151_v56  ;;  %v2504_v54 = vld [vmem:[%s12343_s20 + $0x50] sm:$0xff]  ;;  %v2553_v62 = vld [vmem:[%s12343_s20 + $0x1d8] sm:$0xff] }
 0x2e5   : > { %3994 = vmatpush.msra.mxu2 %v2476_v3  ;;  %v2489_v31 = vadd.f32 %v2416_v57, %v2153_v41  ;;  %v2515_v3 = vld [vmem:[%s12343_s20 + $0xa8] sm:$0xff]  ;;  %v2508_v57 = vld [vmem:[%s12343_s20 + $0x70] sm:$0xff] }
 0x2e6   : > { %v2555_v41 = vld [vmem:[%s12343_s20 + $0x1e8] sm:$0xff]  ;;  %v2552_v0 = vld [vmem:[%s12343_s20 + $0x1d0] sm:$0xff] }
 0x2e7   : > { %3995 = vmatpush.msra.mxu2 %v2475_v13  ;;  %v2522_v13 = vld [vmem:[%s12343_s20 + $0xe0] sm:$0xff] }
 0x2e9   : > { %3996 = vmatpush.msra.mxu2 %v2474_v11  ;;  %v2526_v11 = vld [vmem:[%s12343_s20 + $0x100] sm:$0xff] }
 0x2ea   : > { %3307 = vmatmul.f32.gmra.mxu0 %v2510_v51  ;;  %v2560_v51 = vld [vmem:[%s12343_s20 + $0x210] sm:$0xff] }
 0x2eb   : > { %3997 = vmatpush.msra.mxu2 %v2473_v63  ;;  %v2530_v63 = vld [vmem:[%s12343_s20 + $0x120] sm:$0xff] }
 0x2ec   : > { %v2431_v46 = vpop.permute.xlu1 %2430  ;;  %3660 = vmatmul.f32.gmra.mxu1 %v2511_v39  ;;  %v2557_v39 = vld [vmem:[%s12343_s20 + $0x1f8] sm:$0xff] }
 0x2ed   : > { %3998 = vmatpush.msra.mxu2 %v2472_v45  ;;  %v2492_v34 = vadd.f32 %v2431_v46, %v2156_v6  ;;  %v2535_v6 = vld [vmem:[%s12343_s20 + $0x148] sm:$0xff]  ;;  %v2528_v45 = vld [vmem:[%s12343_s20 + $0x110] sm:$0xff]  ;;  %v2538_v46 = vld [vmem:[%s12343_s20 + $0x160] sm:$0xff] }
 0x2ef   : > { %3999 = vmatpush.msra.mxu2 %v2471_v22  ;;  %4347 = vmatpush.msra.mxu3 %v2492_v34  ;;  %v2546_v22 = vld [vmem:[%s12343_s20 + $0x1a0] sm:$0xff]  ;;  %v2547_v34 = vld [vmem:[%s12343_s20 + $0x1a8] sm:$0xff] }
 0x2f1   : > { %4000 = vmatpush.msra.mxu2 %v2470_v40  ;;  %4348 = vmatpush.msra.mxu3 %v2491_v18  ;;  %v2550_v40 = vld [vmem:[%s12343_s20 + $0x1c0] sm:$0xff]  ;;  %v2551_v18 = vld [vmem:[%s12343_s20 + $0x1c8] sm:$0xff] }
 0x2f2   : > { %4001 = vmatmul.f32.vlgmr.msra.gmra.mxu2 %v2496_v42  ;;  %3310 = vmatmul.f32.gmra.mxu0 %v2514_v49  ;;  %v2544_v42 = vld [vmem:[%s12343_s20 + $0x190] sm:$0xff]  ;;  %v2570_v49 = vld [vmem:[%s12343_s20 + $0x260] sm:$0xff] }
 0x2f3   : > { %4349 = vmatpush.msra.mxu3 %v2490_v43  ;;  %v2548_v43 = vld [vmem:[%s12343_s20 + $0x1b0] sm:$0xff] }
 0x2f4   : > { %3663 = vmatmul.f32.gmra.mxu1 %v2515_v3  ;;  %v2571_v3 = vld [vmem:[%s12343_s20 + $0x268] sm:$0xff] }
 0x2f5   : > { %4350 = vmatpush.msra.mxu3 %v2489_v31  ;;  %v2558_v31 = vld [vmem:[%s12343_s20 + $0x200] sm:$0xff] }
 0x2f7   : > { %4351 = vmatpush.msra.mxu3 %v2488_v27  ;;  %v2562_v27 = vld [vmem:[%s12343_s20 + $0x220] sm:$0xff] }
 0x2f9   : > { %4352 = vmatpush.msra.mxu3 %v2487_v14 }
 0x2fa   : > { %4004 = vmatmul.f32.gmra.mxu2 %v2500_v50  ;;  %3313 = vmatmul.f32.gmra.mxu0 %v2518_v25 }
 0x2fb   : > { %4353 = vmatpush.msra.mxu3 %v2486_v29  ;;  %v2566_v29 = vld [vmem:[%s12343_s20 + $0x240] sm:$0xff] }
 0x2fc   : > { %8925 = vmatmul.msk.f32.vlgmr.msra.gmra.mxu3 %vm2942_vm5, %v2497_v52  ;;  %3666 = vmatmul.f32.gmra.mxu1 %v2519_v2  ;;  %v2567_v52 = vld [vmem:[%s12343_s20 + $0x248] sm:$0xff]  ;;  %v2561_v2 = vld [vmem:[%s12343_s20 + $0x218] sm:$0xff] }
 0x302   : > { %4007 = vmatmul.f32.gmra.mxu2 %v2504_v54  ;;  %3316 = vmatmul.f32.gmra.mxu0 %v2522_v13 }
 0x304   : > { %8926 = vmatmul.msk.f32.gmra.mxu3 %vm2942_vm5, %v2501_v19  ;;  %3669 = vmatmul.f32.gmra.mxu1 %v2523_v37  ;;  %v2574_v37 = vld [vmem:[%s12343_s20 + $0x280] sm:$0xff] }
 0x30a   : > { %4010 = vmatmul.f32.gmra.mxu2 %v2508_v57  ;;  %3319 = vmatmul.f32.gmra.mxu0 %v2526_v11 }
 0x30c   : > { %8927 = vmatmul.msk.f32.gmra.mxu3 %vm2942_vm5, %v2505_v53  ;;  %3672 = vmatmul.f32.gmra.mxu1 %v2527_v55  ;;  %v2564_v53 = vld [vmem:[%s12343_s20 + $0x230] sm:$0xff] }
 0x30d   : > { %v2568_v55 = vld [vmem:[%s12343_s20 + $0x250] sm:$0xff] }
 0x312   : > { %4013 = vmatmul.f32.gmra.mxu2 %v2512_v48  ;;  %3322 = vmatmul.f32.gmra.mxu0 %v2530_v63  ;;  %v2565_v63 = vld [vmem:[%s12343_s20 + $0x238] sm:$0xff] }
 0x314   : > { %8928 = vmatmul.msk.f32.gmra.mxu3 %vm2942_vm5, %v2509_v33  ;;  %3675 = vmatmul.f32.gmra.mxu1 %v2531_v15 }
 0x31a   : > { %4016 = vmatmul.f32.gmra.mxu2 %v2516_v36  ;;  %3325 = vmatmul.f32.gmra.mxu0 %v2534_v16  ;;  %v2575_v36 = vld [vmem:[%s12343_s20 + $0x288] sm:$0xff] }
 0x31c   : > { %8929 = vmatmul.msk.f32.gmra.mxu3 %vm2942_vm5, %v2513_v4  ;;  %3678 = vmatmul.f32.gmra.mxu1 %v2535_v6  ;;  %v2578_v6 = vld [vmem:[%s12343_s20 + $0x2a0] sm:$0xff] }
 0x322   : > { %4019 = vmatmul.f32.gmra.mxu2 %v2520_v61  ;;  %3328 = vmatmul.f32.gmra.mxu0 %v2538_v46 }
 0x324   : > { %8930 = vmatmul.msk.f32.gmra.mxu3 %vm2942_vm5, %v2517_v58  ;;  %3681 = vmatmul.f32.gmra.mxu1 %v2539_v20  ;;  %v2572_v20 = vld [vmem:[%s12343_s20 + $0x270] sm:$0xff] }
 0x32a   : > { %4022 = vmatmul.f32.gmra.mxu2 %v2524_v21  ;;  %3331 = vmatmul.f32.gmra.mxu0 %v2542_v23  ;;  %v2569_v23 = vld [vmem:[%s12343_s20 + $0x258] sm:$0xff] }
 0x32c   : > { %8931 = vmatmul.msk.f32.gmra.mxu3 %vm2942_vm5, %v2521_v44  ;;  %3684 = vmatmul.f32.gmra.mxu1 %v2543_v30 }
 0x332   : > { %4025 = vmatmul.f32.gmra.mxu2 %v2528_v45  ;;  %3334 = vmatmul.f32.gmra.mxu0 %v2546_v22  ;;  %v2579_v45 = vld [vmem:[%s12343_s20 + $0x2a8] sm:$0xff] }
 0x334   : > { %8932 = vmatmul.msk.f32.gmra.mxu3 %vm2942_vm5, %v2525_v8  ;;  %3687 = vmatmul.f32.gmra.mxu1 %v2547_v34  ;;  %v2582_v34 = vld [vmem:[%s12343_s20 + $0x2c0] sm:$0xff] }
 0x33a   : > { %4028 = vmatmul.f32.gmra.mxu2 %v2532_v26  ;;  %3337 = vmatmul.f32.gmra.mxu0 %v2550_v40 }
 0x33b   : > { %v3296_v7 = vpop.f32.mrf.mxu0 }
 0x33c   : > { %8933 = vmatmul.msk.f32.gmra.mxu3 %vm2942_vm5, %v2529_v60  ;;  %3690 = vmatmul.f32.gmra.mxu1 %v2551_v18  ;;  %v2576_v18 = vld [vmem:[%s12343_s20 + $0x290] sm:$0xff] }
 0x342   : > { %4031 = vmatmul.f32.gmra.mxu2 %v2536_v35  ;;  %3340 = vmatmul.f32.gmra.mxu0 %v2554_v10  ;;  %v2573_v10 = vld [vmem:[%s12343_s20 + $0x278] sm:$0xff] }
 0x343   : > { %v3299_v56 = vpop.f32.mrf.mxu0 }
 0x344   : > { %8934 = vmatmul.msk.f32.gmra.mxu3 %vm2942_vm5, %v2533_v59  ;;  %3693 = vmatmul.f32.gmra.mxu1 %v2555_v41 }
 0x349   : > { %v3649_v9 = vpop.f32.mrf.mxu1 }
 0x34a   : > { %4034 = vmatmul.f32.gmra.mxu2 %v2540_v28  ;;  %3343 = vmatmul.f32.gmra.mxu0 %v2558_v31  ;;  %v3650_v25 = vadd.f32 %v3649_v9, %v3296_v7  ;;  %v2583_v28 = vld [vmem:[%s12343_s20 + $0x2c8] sm:$0xff] }
 0x34c   : > { %8935 = vmatmul.msk.f32.gmra.mxu3 %vm2942_vm5, %v2537_v12  ;;  %3696 = vmatmul.f32.gmra.mxu1 %v2559_v38  ;;  %v2580_v38 = vld [vmem:[%s12343_s20 + $0x2b0] sm:$0xff] }
 0x351   : > { %v3652_v17 = vpop.f32.mrf.mxu1 }
 0x352   : > { %4037 = vmatmul.f32.gmra.mxu2 %v2544_v42  ;;  %3346 = vmatmul.f32.gmra.mxu0 %v2562_v27  ;;  %v3653_v58 = vadd.f32 %v3652_v17, %v3299_v56  ;;  %v2586_v17 = vld [vmem:[%s12343_s20 + $0x2e0] sm:$0xff]  ;;  %v2587_v56 = vld [vmem:[%s12343_s20 + $0x2e8] sm:$0xff]  ;;  %v2577_v27 = vld [vmem:[%s12343_s20 + $0x298] sm:$0xff] }
 0x354   : > { %8936 = vmatmul.msk.f32.gmra.mxu3 %vm2942_vm5, %v2541_v47  ;;  %3699 = vmatmul.f32.gmra.mxu1 %v2563_v32 }
 0x357   : > { %v3302_v50 = vpop.f32.mrf.mxu0 }
 0x359   : > { %v3655_v14 = vpop.f32.mrf.mxu1 }
 0x35a   : > { %4040 = vmatmul.f32.gmra.mxu2 %v2548_v43  ;;  %3349 = vmatmul.f32.gmra.mxu0 %v2566_v29  ;;  %v3656_v60 = vadd.f32 %v3655_v14, %v3302_v50 }
 0x35c   : > { %8937 = vmatmul.msk.f32.gmra.mxu3 %vm2942_vm5, %v2545_v24  ;;  %3702 = vmatmul.f32.gmra.mxu1 %v2567_v52  ;;  %v2584_v52 = vld [vmem:[%s12343_s20 + $0x2d0] sm:$0xff] }
 0x35f   : > { %v3305_v19 = vpop.f32.mrf.mxu0 }
 0x361   : > { %v3658_v54 = vpop.f32.mrf.mxu1 }
 0x362   : > { %4043 = vmatmul.f32.gmra.mxu2 %v2552_v0  ;;  %3352 = vmatmul.f32.gmra.mxu0 %v2570_v49  ;;  %v3659_v47 = vadd.f32 %v3658_v54, %v3305_v19  ;;  %v2590_v54 = vld [vmem:[%s12343_s20 + $0x300] sm:$0xff]  ;;  %v2591_v19 = vld [vmem:[%s12343_s20 + $0x308] sm:$0xff]  ;;  %v2581_v49 = vld [vmem:[%s12343_s20 + $0x2b8] sm:$0xff] }
 0x364   : > { %8938 = vmatmul.msk.f32.gmra.mxu3 %vm2942_vm5, %v2549_v5  ;;  %3705 = vmatmul.f32.gmra.mxu1 %v2571_v3 }
 0x367   : > { %v3308_v33 = vpop.f32.mrf.mxu0 }
 0x369   : > { %v3661_v48 = vpop.f32.mrf.mxu1 }
 0x36a   : > { %4046 = vmatmul.f32.gmra.mxu2 %v2556_v1  ;;  %3355 = vmatmul.f32.gmra.mxu0 %v2574_v37  ;;  %v3662_v5 = vadd.f32 %v3661_v48, %v3308_v33  ;;  %v2588_v33 = vld [vmem:[%s12343_s20 + $0x2f0] sm:$0xff] }
 0x36c   : > { %8939 = vmatmul.msk.f32.gmra.mxu3 %vm2942_vm5, %v2553_v62  ;;  %3708 = vmatmul.f32.gmra.mxu1 %v2575_v36  ;;  %v2594_v36 = vld [vmem:[%s12343_s20 + $0x320] sm:$0xff] }
 0x36f   : > { %v3311_v44 = vpop.f32.mrf.mxu0 }
 0x371   : > { %v3664_v21 = vpop.f32.mrf.mxu1 }
 0x372   : > { %4049 = vmatmul.f32.gmra.mxu2 %v2560_v51  ;;  %3358 = vmatmul.f32.gmra.mxu0 %v2578_v6 }
 0x374   : > { %8940 = vmatmul.msk.f32.gmra.mxu3 %vm2942_vm5, %v2557_v39  ;;  %3711 = vmatmul.f32.gmra.mxu1 %v2579_v45  ;;  %v3665_v39 = vadd.f32 %v3664_v21, %v3311_v44 }
 0x375   : > { %v4002_v57 = vpop.f32.mrf.mxu2 }
 0x376   : > { %v4003_v13 = vadd.f32 %v4002_v57, %v3650_v25 }
 0x377   : > { %v3314_v59 = vpop.f32.mrf.mxu0 }
 0x379   : > { %v3667_v35 = vpop.f32.mrf.mxu1 }
 0x37a   : > { %4052 = vmatmul.f32.gmra.mxu2 %v2564_v53  ;;  %3361 = vmatmul.f32.gmra.mxu0 %v2582_v34  ;;  %v3668_v37 = vadd.f32 %v3667_v35, %v3314_v59  ;;  %v2596_v59 = vld [vmem:[%s12343_s20 + $0x330] sm:$0xff] }
 0x37c   : > { %8941 = vmatmul.msk.f32.gmra.mxu3 %vm2942_vm5, %v2561_v2  ;;  %3714 = vmatmul.f32.gmra.mxu1 %v2583_v28  ;;  %v2593_v28 = vld [vmem:[%s12343_s20 + $0x318] sm:$0xff] }
 0x37d   : > { %v4005_v4 = vpop.f32.mrf.mxu2 }
 0x37e   : > { %v4006_v16 = vadd.f32 %v4005_v4, %v3653_v58  ;;  %v2595_v4 = vld [vmem:[%s12343_s20 + $0x328] sm:$0xff] }
 0x37f   : > { %v4355_v11 = vpop.f32.mrf.mxu3  ;;  %v3317_v24 = vpop.f32.mrf.mxu0 }
 0x380   : > { %v12525_v61 = vadd.f32 %v4355_v11, %v4003_v13  ;;  %v2585_v11 = vld [vmem:[%s12343_s20 + $0x2d8] sm:$0xff] }
 0x381   : > { %v3670_v43 = vpop.f32.mrf.mxu1 }
 0x382   : > { %v4691_v15 = vsel %vm358_vm0, %v12525_v61, 0.0  ;;  %4055 = vmatmul.f32.gmra.mxu2 %v2568_v55  ;;  %3364 = vmatmul.f32.gmra.mxu0 %v2586_v17  ;;  %v3671_v45 = vadd.f32 %v3670_v43, %v3317_v24 }
 0x383   : > { %4692 = vadd.xlane.f32.xlu2 %v4691_v15 }
 0x384   : > { %8942 = vmatmul.msk.f32.gmra.mxu3 %vm2942_vm5, %v2565_v63  ;;  %3717 = vmatmul.f32.gmra.mxu1 %v2587_v56 }
 0x385   : > { %v4008_v8 = vpop.f32.mrf.mxu2 }
 0x386   : > { %v4009_v22 = vadd.f32 %v4008_v8, %v3656_v60  ;;  %v2589_v8 = vld [vmem:[%s12343_s20 + $0x2f8] sm:$0xff] }
 0x387   : > { %v4358_v46 = vpop.f32.mrf.mxu3  ;;  %v3320_v62 = vpop.f32.mrf.mxu0 }
 0x388   : > { %v12534_v26 = vadd.f32 %v4358_v46, %v4006_v16  ;;  %v2592_v16 = vld [vmem:[%s12343_s20 + $0x310] sm:$0xff] }
 0x389   : > { %v3673_v1 = vpop.f32.mrf.mxu1 }
 0x38a   : > { %v4694_v30 = vsel %vm358_vm0, %v12534_v26, 0.0  ;;  %4058 = vmatmul.f32.gmra.mxu2 %v2572_v20  ;;  %3367 = vmatmul.f32.gmra.mxu0 %v2590_v54  ;;  %v3674_v34 = vadd.f32 %v3673_v1, %v3320_v62  ;;  %v2600_v1 = vld [vmem:[%s12343_s20 + $0x350] sm:$0xff] }
 0x38b   : > { %4695 = vadd.xlane.f32.xlu1 %v4694_v30 }
 0x38c   : > { %8943 = vmatmul.msk.f32.gmra.mxu3 %vm2942_vm5, %v2569_v23  ;;  %3720 = vmatmul.f32.gmra.mxu1 %v2591_v19 }
 0x38d   : > { %v4011_v12 = vpop.f32.mrf.mxu2 }
 0x38e   : > { %v4012_v7 = vadd.f32 %v4011_v12, %v3659_v47 }
 0x38f   : > { %v4361_v40 = vpop.f32.mrf.mxu3  ;;  %v3323_v53 = vpop.f32.mrf.mxu0 }
 0x390   : > { %v12543_v42 = vadd.f32 %v4361_v40, %v4009_v22 }
 0x391   : > { %v3676_v57 = vpop.f32.mrf.mxu1 }
 0x392   : > { %v4697_v41 = vsel %vm358_vm0, %v12543_v42, 0.0  ;;  %4061 = vmatmul.f32.gmra.mxu2 %v2576_v18  ;;  %3370 = vmatmul.f32.gmra.mxu0 %v2594_v36  ;;  %v3677_v24 = vadd.f32 %v3676_v57, %v3323_v53  ;;  %v2604_v57 = vld [vmem:[%s12343_s20 + $0x370] sm:$0xff] }
 0x393   : > { %4698 = vadd.xlane.f32.xlu0 %v4697_v41 }
 0x394   : > { %8944 = vmatmul.msk.f32.gmra.mxu3 %vm2942_vm5, %v2573_v10  ;;  %3723 = vmatmul.f32.gmra.mxu1 %v2595_v4 }
 0x395   : > { %v4014_v9 = vpop.f32.mrf.mxu2 }
 0x396   : > { %v4015_v14 = vadd.f32 %v4014_v9, %v3662_v5 }
 0x397   : > { %v4364_v31 = vpop.f32.mrf.mxu3  ;;  %v3326_v63 = vpop.f32.mrf.mxu0 }
 0x398   : > { %v12550_v0 = vadd.f32 %v4364_v31, %v4012_v7  ;;  %v2597_v7 = vld [vmem:[%s12343_s20 + $0x338] sm:$0xff] }
 0x399   : > { %v3679_v58 = vpop.f32.mrf.mxu1 }
 0x39a   : > { %v4700_v32 = vsel %vm358_vm0, %v12550_v0, 0.0  ;;  %4064 = vmatmul.f32.gmra.mxu2 %v2580_v38 }
 0x39b   : > { %4701 = vadd.xlane.f32.xlu2 %v4700_v32  ;;  %v3680_v32 = vadd.f32 %v3679_v58, %v3326_v63  ;;  %v2608_v58 = vld [vmem:[%s12343_s20 + $0x390] sm:$0xff] }
 0x39c   : > { %8945 = vmatmul.msk.f32.gmra.mxu3 %vm2942_vm5, %v2577_v27 }
 0x39d   : > { %v4017_v50 = vpop.f32.mrf.mxu2 }
 0x39e   : > { %v4018_v25 = vadd.f32 %v4017_v50, %v3665_v39  ;;  %v2598_v50 = vld [vmem:[%s12343_s20 + $0x340] sm:$0xff] }
 0x39f   : > { %v4367_v29 = vpop.f32.mrf.mxu3  ;;  %v3329_v60 = vpop.f32.mrf.mxu0  ;;  %3373 = vmatmul.f32.gmra.mxu0 %v2598_v50  ;;  %v2615_v50 = vld [vmem:[%s12343_s20 + $0x3c8] sm:$0xff] }
 0x3a0   : > { %v12559_v51 = vadd.f32 %v4367_v29, %v4015_v14  ;;  %v2601_v14 = vld [vmem:[%s12343_s20 + $0x358] sm:$0xff]  ;;  %v2599_v29 = vld [vmem:[%s12343_s20 + $0x348] sm:$0xff] }
 0x3a1   : > { %v3682_v20 = vpop.f32.mrf.mxu1  ;;  %3726 = vmatmul.f32.gmra.mxu1 %v2599_v29  ;;  %v2620_v29 = vld [vmem:[%s12343_s20 + $0x3f0] sm:$0xff] }
 0x3a2   : > { %v4703_v3 = vsel %vm358_vm0, %v12559_v51, 0.0  ;;  %4067 = vmatmul.f32.gmra.mxu2 %v2584_v52 }
 0x3a3   : > { %4704 = vadd.xlane.f32.xlu1 %v4703_v3 }
 0x3a4   : > { %8946 = vmatmul.msk.f32.gmra.mxu3 %vm2942_vm5, %v2581_v49  ;;  %v3683_v49 = vadd.f32 %v3682_v20, %v3329_v60  ;;  %v2606_v60 = vld [vmem:[%s12343_s20 + $0x380] sm:$0xff] }
 0x3a5   : > { %v4020_v2 = vpop.f32.mrf.mxu2 }
 0x3a6   : > { %v4021_v15 = vadd.f32 %v4020_v2, %v3668_v37  ;;  %v2605_v2 = vld [vmem:[%s12343_s20 + $0x378] sm:$0xff] }
 0x3a7   : > { %v4370_v48 = vpop.f32.mrf.mxu3  ;;  %v3332_v10 = vpop.f32.mrf.mxu0 }
 0x3a8   : > { %v12568_v13 = vadd.f32 %v4370_v48, %v4018_v25 }
 0x3a9   : > { %v3685_v18 = vpop.f32.mrf.mxu1 }
 0x3aa   : > { %v4706_v55 = vsel %vm358_vm0, %v12568_v13, 0.0  ;;  %4070 = vmatmul.f32.gmra.mxu2 %v2588_v33  ;;  %v3686_v4 = vadd.f32 %v3685_v18, %v3332_v10 }
 0x3ab   : > { %4707 = vadd.xlane.f32.xlu2 %v4706_v55  ;;  %v2603_v55 = vld [vmem:[%s12343_s20 + $0x368] sm:$0xff] }
 0x3ac   : > { %8947 = vmatmul.msk.f32.gmra.mxu3 %vm2942_vm5, %v2585_v11  ;;  %v2602_v11 = vld [vmem:[%s12343_s20 + $0x360] sm:$0xff]  ;;  %3729 = vmatmul.f32.gmra.mxu1 %v2603_v55 }
 0x3ad   : > { %v4023_v21 = vpop.f32.mrf.mxu2  ;;  %3376 = vmatmul.f32.gmra.mxu0 %v2602_v11  ;;  %v2625_v11 = vld [vmem:[%s12343_s20 + $0x418] sm:$0xff] }
 0x3ae   : > { %v4024_v23 = vadd.f32 %v4023_v21, %v3671_v45 }
 0x3af   : > { %v4373_v44 = vpop.f32.mrf.mxu3  ;;  %v3335_v56 = vpop.f32.mrf.mxu0 }
 0x3b0   : > { %v12577_v6 = vadd.f32 %v4373_v44, %v4021_v15  ;;  %v2609_v44 = vld [vmem:[%s12343_s20 + $0x398] sm:$0xff] }
 0x3b1   : > { %v3688_v5 = vpop.f32.mrf.mxu1 }
 0x3b2   : > { %v4709_v46 = vsel %vm358_vm0, %v12577_v6, 0.0  ;;  %4073 = vmatmul.f32.gmra.mxu2 %v2592_v16  ;;  %v3689_v20 = vadd.f32 %v3688_v5, %v3335_v56 }
 0x3b3   : > { %4710 = vadd.xlane.f32.xlu0 %v4709_v46 }
 0x3b4   : > { %8948 = vmatmul.msk.f32.gmra.mxu3 %vm2942_vm5, %v2589_v8 }
 0x3b5   : > { %v4026_v30 = vpop.f32.mrf.mxu2  ;;  %3379 = vmatmul.f32.gmra.mxu0 %v2606_v60 }
 0x3b6   : > { %v4027_v40 = vadd.f32 %v4026_v30, %v3674_v34  ;;  %v2612_v30 = vld [vmem:[%s12343_s20 + $0x3b0] sm:$0xff] }
 0x3b7   : > { %v4376_v35 = vpop.f32.mrf.mxu3  ;;  %v3338_v53 = vpop.f32.mrf.mxu0 }
 0x3b8   : > { %v12584_v22 = vadd.f32 %v4376_v35, %v4024_v23  ;;  %v2607_v23 = vld [vmem:[%s12343_s20 + $0x388] sm:$0xff] }
 0x3b9   : > { %v3691_v3 = vpop.f32.mrf.mxu1  ;;  %3732 = vmatmul.f32.gmra.mxu1 %v2607_v23 }
 0x3ba   : > { %v4712_v12 = vsel %vm358_vm0, %v12584_v22, 0.0  ;;  %4076 = vmatmul.f32.gmra.mxu2 %v2596_v59  ;;  %v2613_v59 = vld [vmem:[%s12343_s20 + $0x3b8] sm:$0xff]  ;;  %v3692_v10 = vadd.f32 %v3691_v3, %v3338_v53 }
 0x3bb   : > { %4713 = vadd.xlane.f32.xlu1 %v4712_v12 }
 0x3bc   : > { %8949 = vmatmul.msk.f32.gmra.mxu3 %vm2942_vm5, %v2593_v28 }
 0x3bd   : > { %v4029_v47 = vpop.f32.mrf.mxu2 }
 0x3be   : > { %v4030_v31 = vadd.f32 %v4029_v47, %v3677_v24  ;;  %v2611_v24 = vld [vmem:[%s12343_s20 + $0x3a8] sm:$0xff] }
 0x3bf   : > { %v4379_v41 = vpop.f32.mrf.mxu3  ;;  %v3341_v21 = vpop.f32.mrf.mxu0 }
 0x3c0   : > { %v12590_v43 = vadd.f32 %v4379_v41, %v4027_v40  ;;  %v2610_v41 = vld [vmem:[%s12343_s20 + $0x3a0] sm:$0xff] }
 0x3c1   : > { %v3694_v15 = vpop.f32.mrf.mxu1  ;;  %3382 = vmatmul.f32.gmra.mxu0 %v2610_v41  ;;  %3735 = vmatmul.f32.gmra.mxu1 %v2611_v24  ;;  %v2627_v41 = vld [vmem:[%s12343_s20 + $0x428] sm:$0xff] }
 0x3c2   : > { %v4715_v9 = vsel %vm358_vm0, %v12590_v43, 0.0  ;;  %4079 = vmatmul.f32.gmra.mxu2 %v2600_v1 }
 0x3c3   : > { %4716 = vadd.xlane.f32.xlu2 %v4715_v9 }
 0x3c4   : > { %8950 = vmatmul.msk.f32.gmra.mxu3 %vm2942_vm5, %v2597_v7  ;;  %v2616_v7 = vld [vmem:[%s12343_s20 + $0x3d0] sm:$0xff] }
 0x3c5   : > { %v4032_v38 = vpop.f32.mrf.mxu2 }
 0x3c6   : > { %v4033_v52 = vadd.f32 %v4032_v38, %v3680_v32 }
 0x3c7   : > { %v4382_v17 = vpop.f32.mrf.mxu3  ;;  %v3344_v40 = vpop.f32.mrf.mxu0 }
 0x3c8   : > { %v12596_v27 = vadd.f32 %v4382_v17, %v4030_v31  ;;  %v2617_v31 = vld [vmem:[%s12343_s20 + $0x3d8] sm:$0xff] }
 0x3c9   : > { %v3697_v28 = vpop.f32.mrf.mxu1  ;;  %3738 = vmatmul.f32.gmra.mxu1 %v2615_v50 }
 0x3ca   : > { %v4718_v62 = vsel %vm358_vm0, %v12596_v27, 0.0  ;;  %4082 = vmatmul.f32.gmra.mxu2 %v2604_v57  ;;  %v3698_v53 = vadd.f32 %v3697_v28, %v3344_v40 }
 0x3cb   : > { %4719 = vadd.xlane.f32.xlu0 %v4718_v62  ;;  %v3695_v62 = vadd.f32 %v3694_v15, %v3341_v21 }
 0x3cc   : > { %8951 = vmatmul.msk.f32.gmra.mxu3 %vm2942_vm5, %v2601_v14  ;;  %v2614_v14 = vld [vmem:[%s12343_s20 + $0x3c0] sm:$0xff] }
 0x3cd   : > { %v4035_v39 = vpop.f32.mrf.mxu2  ;;  %3385 = vmatmul.f32.gmra.mxu0 %v2614_v14 }
 0x3ce   : > { %v4036_v48 = vadd.f32 %v4035_v39, %v3683_v49  ;;  %v2621_v39 = vld [vmem:[%s12343_s20 + $0x3f8] sm:$0xff] }
 0x3cf   : > { %v4385_v54 = vpop.f32.mrf.mxu3  ;;  %v3347_v32 = vpop.f32.mrf.mxu0 }
 0x3d0   : > { %v12605_v19 = vadd.f32 %v4385_v54, %v4033_v52 }
 0x3d1   : > { %v3700_v17 = vpop.f32.mrf.mxu1 }
 0x3d2   : > { %v4721_v25 = vsel %vm358_vm0, %v12605_v19, 0.0  ;;  %4085 = vmatmul.f32.gmra.mxu2 %v2608_v58  ;;  %v3701_v21 = vadd.f32 %v3700_v17, %v3347_v32 }
 0x3d3   : > { %4722 = vadd.xlane.f32.xlu1 %v4721_v25 }
 0x3d4   : > { %8952 = vmatmul.msk.f32.gmra.mxu3 %vm2942_vm5, %v2605_v2 }
 0x3d5   : > { %v4038_v33 = vpop.f32.mrf.mxu2 }
 0x3d6   : > { %v4039_v16 = vadd.f32 %v4038_v33, %v3686_v4  ;;  %v2619_v33 = vld [vmem:[%s12343_s20 + $0x3e8] sm:$0xff] }
 0x3d7   : > { %v4388_v37 = vpop.f32.mrf.mxu3  ;;  %v3350_v2 = vpop.f32.mrf.mxu0  ;;  %3741 = vmatmul.f32.gmra.mxu1 %v2619_v33 }
 0x3d8   : > { %v12612_v36 = vadd.f32 %v4388_v37, %v4036_v48  ;;  %v2618_v48 = vld [vmem:[%s12343_s20 + $0x3e0] sm:$0xff]  ;;  %v2624_v37 = vld [vmem:[%s12343_s20 + $0x410] sm:$0xff] }
 0x3d9   : > { %v3703_v25 = vpop.f32.mrf.mxu1  ;;  %3388 = vmatmul.f32.gmra.mxu0 %v2618_v48 }
 0x3da   : > { %v4724_v63 = vsel %vm358_vm0, %v12612_v36, 0.0  ;;  %4088 = vmatmul.f32.gmra.mxu2 %v2612_v30  ;;  %v2629_v30 = vld [vmem:[%s12343_s20 + $0x438] sm:$0xff] }
 0x3db   : > { %4725 = vadd.xlane.f32.xlu2 %v4724_v63 }
 0x3dc   : > { %8953 = vmatmul.msk.f32.gmra.mxu3 %vm2942_vm5, %v2609_v44  ;;  %v2622_v44 = vld [vmem:[%s12343_s20 + $0x400] sm:$0xff] }
 0x3dd   : > { %v4041_v45 = vpop.f32.mrf.mxu2 }
 0x3de   : > { %v4042_v34 = vadd.f32 %v4041_v45, %v3689_v20  ;;  %v2628_v45 = vld [vmem:[%s12343_s20 + $0x430] sm:$0xff] }
 0x3df   : > { %v4391_v8 = vpop.f32.mrf.mxu3  ;;  %v3353_v23 = vpop.f32.mrf.mxu0 }
 0x3e0   : > { %v12621_v46 = vadd.f32 %v4391_v8, %v4039_v16  ;;  %v2623_v16 = vld [vmem:[%s12343_s20 + $0x408] sm:$0xff] }
 0x3e1   : > { %v3706_v20 = vpop.f32.mrf.mxu1  ;;  %3391 = vmatmul.f32.gmra.mxu0 %v2622_v44  ;;  %3744 = vmatmul.f32.gmra.mxu1 %v2623_v16 }
 0x3e2   : > { %v4727_v35 = vsel %vm358_vm0, %v12621_v46, 0.0  ;;  %4091 = vmatmul.f32.gmra.mxu2 %v2616_v7  ;;  %v3707_v50 = vadd.f32 %v3706_v20, %v3353_v23 }
 0x3e3   : > { %4728 = vadd.xlane.f32.xlu0 %v4727_v35 }
 0x3e4   : > { %8954 = vmatmul.msk.f32.gmra.mxu3 %vm2942_vm5, %v2613_v59 }
 0x3e5   : > { %v4044_v12 = vpop.f32.mrf.mxu2 }
 0x3e6   : > { %v4045_v38 = vadd.f32 %v4044_v12, %v3692_v10  ;;  %v2626_v10 = vld [vmem:[%s12343_s20 + $0x420] sm:$0xff] }
 0x3e7   : > { %v4394_v18 = vpop.f32.mrf.mxu3  ;;  %v3356_v17 = vpop.f32.mrf.mxu0 }
 0x3e8   : > { %v12630_v47 = vadd.f32 %v4394_v18, %v4042_v34  ;;  %v16290_v34 = vld [vmem:[#allocation12_spill] sm:$0xff]  ;;  %v3704_v18 = vadd.f32 %v3703_v25, %v3350_v2 }
 0x3e9   : > { %3394 = vmatmul.f32.gmra.mxu0 %v2626_v10  ;;  %3747 = vmatmul.f32.gmra.mxu1 %v2627_v41 }
 0x3ea   : > { %v4730_v9 = vsel %vm358_vm0, %v12630_v47, 0.0  ;;  %4094 = vmatmul.f32.gmra.mxu2 %v2620_v29  ;;  %v2632_v29 = vld [vmem:[%s12343_s20 + $0x450] sm:$0xff] }
 0x3eb   : > { %4731 = vadd.xlane.f32.xlu1 %v4730_v9 }
 0x3ec   : > { %8955 = vmatmul.msk.f32.gmra.mxu3 %vm2942_vm5, %v2617_v31 }
 0x3ed   : > { %v4047_v5 = vpop.f32.mrf.mxu2 }
 0x3ee   : > { %v4048_v54 = vadd.f32 %v4047_v5, %v3695_v62 }
 0x3ef   : > { %v4397_v56 = vpop.f32.mrf.mxu3 }
 0x3f0   : > { %v12639_v1 = vadd.f32 %v4397_v56, %v4045_v38  ;;  %v3709_v38 = vpop.f32.mrf.mxu1 }
 0x3f2   : > { %v4733_v52 = vsel %vm358_vm0, %v12639_v1, 0.0  ;;  %4097 = vmatmul.f32.gmra.mxu2 %v2624_v37 }
 0x3f3   : > { %4734 = vadd.xlane.f32.xlu2 %v4733_v52  ;;  %v2633_v52 = vld [vmem:[%s12343_s20 + $0x458] sm:$0xff] }
 0x3f4   : > { %8956 = vmatmul.msk.f32.gmra.mxu3 %vm2942_vm5, %v2621_v39 }
 0x3f5   : > { %v4050_v49 = vpop.f32.mrf.mxu2 }
 0x3f6   : > { %v4051_v55 = vadd.f32 %v4050_v49, %v3698_v53  ;;  %v4693_v56 = vpop.xlane.xlu2 %4692  ;;  %v2631_v53 = vld [vmem:[%s12343_s20 + $0x448] sm:$0xff] }
 0x3f7   : > { %v4400_v3 = vpop.f32.mrf.mxu3  ;;  %3750 = vmatmul.f32.gmra.mxu1 %v2631_v53  ;;  %v5027_v48 = vmul.f32 %v4693_v56, %v16290_v34 }
 0x3f8   : > { %v12648_v57 = vadd.f32 %v4400_v3, %v4048_v54  ;;  %v2630_v3 = vld [vmem:[%s12343_s20 + $0x440] sm:$0xff]  ;;  %v3712_v37 = vpop.f32.mrf.mxu1 }
 0x3f9   : > { %3397 = vmatmul.f32.gmra.mxu0 %v2630_v3 }
 0x3fa   : > { %v4736_v4 = vsel %vm358_vm0, %v12648_v57, 0.0  ;;  %4100 = vmatmul.f32.gmra.mxu2 %v2628_v45 }
 0x3fb   : > { %4737 = vadd.xlane.f32.xlu0 %v4736_v4 }
 0x3fc   : > { %8957 = vmatmul.msk.f32.gmra.mxu3 %vm2942_vm5, %v2625_v11  ;;  %v3359_v11 = vpop.f32.mrf.mxu0 }
 0x3fd   : > { %v4053_v58 = vpop.f32.mrf.mxu2 }
 0x3fe   : > { %v4696_v60 = vpop.xlane.xlu1 %4695  ;;  %v4054_v35 = vadd.f32 %v4053_v58, %v3701_v21  ;;  %v3710_v58 = vadd.f32 %v3709_v38, %v3356_v17 }
 0x3ff   : > { %v4403_v63 = vpop.f32.mrf.mxu3  ;;  %v5028_v28 = vmul.f32 %v4696_v60, %v16290_v34 }
 0x400   : > { %v12657_v15 = vadd.f32 %v4403_v63, %v4051_v55  ;;  %v12698_v63 = vsub.f32 %v12525_v61, %v5027_v48 }
 0x401   : > { %v12672_v24 = vsub.f32 %v12534_v26, %v5028_v28  ;;  %v3713_v28 = vadd.f32 %v3712_v37, %v3359_v11 }
 0x402   : > { %v4739_v8 = vsel %vm358_vm0, %v12657_v15, 0.0  ;;  %4103 = vmatmul.f32.gmra.mxu2 %v2632_v29 }
 0x403   : > { %4740 = vadd.xlane.f32.xlu1 %v4739_v8  ;;  %v5252_v26 = vmul.f32 %v12672_v24, %v12672_v24 }
 0x404   : > { %8958 = vmatmul.msk.f32.gmra.mxu3 %vm2942_vm5, %v2629_v30  ;;  %v5251_v30 = vmul.f32 %v12698_v63, %v12698_v63  ;;  %v3362_v10 = vpop.f32.mrf.mxu0 }
 0x405   : > { %v4056_v59 = vpop.f32.mrf.mxu2  ;;  %v5366_v54 = vsel %vm358_vm0, %v5252_v26, 0.0 }
 0x406   : > { %v4699_v9 = vpop.xlane.xlu0 %4698  ;;  %v4057_v31 = vadd.f32 %v4056_v59, %v3704_v18  ;;  %v3715_v18 = vpop.f32.mrf.mxu1 }
 0x407   : > { %v4406_v12 = vpop.f32.mrf.mxu3  ;;  %v5029_v32 = vmul.f32 %v4699_v9, %v16290_v34  ;;  %v5363_v9 = vsel %vm358_vm0, %v5251_v30, 0.0  ;;  %v3716_v26 = vadd.f32 %v3715_v18, %v3362_v10 }
 0x408   : > { %v12667_v40 = vadd.f32 %v4406_v12, %v4054_v35 }
 0x409   : > { %v12684_v39 = vsub.f32 %v12543_v42, %v5029_v32 }
 0x40a   : > { %v4742_v7 = vsel %vm358_vm0, %v12667_v40, 0.0 }
 0x40b   : > { %4743 = vadd.xlane.f32.xlu2 %v4742_v7  ;;  %v5253_v33 = vmul.f32 %v12684_v39, %v12684_v39 }
 0x40c   : > { %8959 = vmatmul.msk.f32.gmra.mxu3 %vm2942_vm5, %v2633_v52 }
 0x40d   : > { %v4059_v5 = vpop.f32.mrf.mxu2  ;;  %v5369_v21 = vsel %vm358_vm0, %v5253_v33, 0.0 }
 0x40e   : > { %v4060_v25 = vadd.f32 %v4059_v5, %v3707_v50  ;;  %v4702_v42 = vpop.xlane.xlu2 %4701  ;;  %v3365_v50 = vpop.f32.mrf.mxu0 }
 0x40f   : > { %v4409_v62 = vpop.f32.mrf.mxu3  ;;  %v5030_v20 = vmul.f32 %v4702_v42, %v16290_v34 }
 0x410   : > { %v12679_v14 = vadd.f32 %v4409_v62, %v4057_v31  ;;  %v3718_v62 = vpop.f32.mrf.mxu1 }
 0x411   : > { %v12714_v41 = vsub.f32 %v12550_v0, %v5030_v20  ;;  %v3719_v37 = vadd.f32 %v3718_v62, %v3365_v50 }
 0x412   : > { %v4745_v49 = vsel %vm358_vm0, %v12679_v14, 0.0 }
 0x413   : > { %5367 = vadd.xlane.f32.xlu2 %v5366_v54  ;;  %4746 = vadd.xlane.f32.xlu0 %v4745_v49  ;;  %16291 = vst [vmem:[#allocation31_spill] sm:$0xff] %v12714_v41  ;;  %v5254_v0 = vmul.f32 %v12714_v41, %v12714_v41 }
 0x415   : > { %v4062_v2 = vpop.f32.mrf.mxu2  ;;  %v5372_v29 = vsel %vm358_vm0, %v5254_v0, 0.0 }
 0x416   : > { %v4705_v16 = vpop.xlane.xlu1 %4704  ;;  %v4063_v45 = vadd.f32 %v4062_v2, %v3710_v58 }
 0x417   : > { %v4412_v4 = vpop.f32.mrf.mxu3  ;;  %v5031_v60 = vmul.f32 %v4705_v16, %v16290_v34  ;;  %v3368_v16 = vpop.f32.mrf.mxu0 }
 0x418   : > { %v12695_v55 = vadd.f32 %v4412_v4, %v4060_v25 }
 0x419   : > { %v12717_v7 = vsub.f32 %v12559_v51, %v5031_v60 }
 0x41a   : > { %v4748_v44 = vsel %vm358_vm0, %v12695_v55, 0.0 }
 0x41b   : > { %5370 = vadd.xlane.f32.xlu0 %v5369_v21  ;;  %4749 = vadd.xlane.f32.xlu1 %v4748_v44  ;;  %16292 = vst [vmem:[#allocation66_spill] sm:$0xff] %v12717_v7  ;;  %v5255_v51 = vmul.f32 %v12717_v7, %v12717_v7  ;;  %v3721_v44 = vpop.f32.mrf.mxu1 }
 0x41d   : > { %v4065_v8 = vpop.f32.mrf.mxu2  ;;  %v5375_v52 = vsel %vm358_vm0, %v5255_v51, 0.0 }
 0x41e   : > { %v4708_v23 = vpop.xlane.xlu2 %4707 }
 0x41f   : > { %v5032_v61 = vmul.f32 %v4708_v23, %v16290_v34  ;;  %v4415_v35 = vpop.f32.mrf.mxu3 }
 0x420   : > { %v12708_v59 = vadd.f32 %v4415_v35, %v4063_v45 }
 0x421   : > { %v12711_v12 = vsub.f32 %v12568_v13, %v5032_v61  ;;  %v4066_v13 = vadd.f32 %v4065_v8, %v3713_v28  ;;  %v3722_v61 = vadd.f32 %v3721_v44, %v3368_v16  ;;  %v7941_v44 = vld [vmem:[%s12791_s15 + $0x10] sm:$0xff] }
 0x422   : > { %v4751_v31 = vsel %vm358_vm0, %v12708_v59, 0.0 }
 0x423   : > { %5364 = vadd.xlane.f32.xlu1 %v5363_v9  ;;  %4752 = vadd.xlane.f32.xlu2 %v4751_v31  ;;  %v5256_v38 = vmul.f32 %v12711_v12, %v12711_v12 }
 0x425   : > { %v5378_v5 = vsel %vm358_vm0, %v5256_v38, 0.0  ;;  %v4068_v17 = vpop.f32.mrf.mxu2  ;;  %v3724_v38 = vpop.f32.mrf.mxu1 }
 0x426   : > { %5379 = vadd.xlane.f32.xlu0 %v5378_v5  ;;  %v4711_v54 = vpop.xlane.xlu0 %4710  ;;  %v4069_v3 = vadd.f32 %v4068_v17, %v3716_v26 }
 0x427   : > { %v4418_v56 = vpop.f32.mrf.mxu3  ;;  %v5033_v25 = vmul.f32 %v4711_v54, %v16290_v34 }
 0x428   : > { %v12729_v32 = vadd.f32 %v4418_v56, %v4066_v13  ;;  %v3371_v13 = vpop.f32.mrf.mxu0 }
 0x429   : > { %v12743_v11 = vsub.f32 %v12577_v6, %v5033_v25  ;;  %v3725_v51 = vadd.f32 %v3724_v38, %v3371_v13  ;;  %v2635_v25 = vld [vmem:[%s12343_s20 + $0x468] sm:$0xff] }
 0x42a   : > { %v4754_v49 = vsel %vm358_vm0, %v12729_v32, 0.0  ;;  %3753 = vmatmul.f32.gmra.mxu1 %v2635_v25 }
 0x42b   : > { %5373 = vadd.xlane.f32.xlu1 %v5372_v29  ;;  %5376 = vadd.xlane.f32.xlu2 %v5375_v52  ;;  %16294 = vst [vmem:[#allocation57_spill] sm:$0xff] %v12743_v11 }
 0x42d   : > { %v4071_v53 = vpop.f32.mrf.mxu2 }
 0x42e   : > { %v4714_v2 = vpop.xlane.xlu1 %4713  ;;  %4755 = vadd.xlane.f32.xlu0 %v4754_v49  ;;  %v4072_v45 = vadd.f32 %v4071_v53, %v3719_v37  ;;  %v2634_v53 = vld [vmem:[%s12343_s20 + $0x460] sm:$0xff] }
 0x42f   : > { %v5034_v48 = vmul.f32 %v4714_v2, %v16290_v34  ;;  %v4421_v42 = vpop.f32.mrf.mxu3  ;;  %3400 = vmatmul.f32.gmra.mxu0 %v2634_v53  ;;  %v7939_v37 = vld [vmem:[%s12791_s15] sm:$0xff] }
 0x430   : > { %v12737_v33 = vadd.f32 %v4421_v42, %v4069_v3  ;;  %v2637_v3 = vld [vmem:[%s12343_s20 + $0x478] sm:$0xff] }
 0x431   : > { %v12740_v4 = vsub.f32 %v12584_v22, %v5034_v48  ;;  %v5257_v22 = vmul.f32 %v12743_v11, %v12743_v11  ;;  %8960 = vmatmul.msk.f32.gmra.mxu3 %vm2942_vm5, %v2637_v3  ;;  %v2640_v48 = vld [vmem:[%s12343_s20 + $0x490] sm:$0xff]  ;;  %v2641_v42 = vld [vmem:[%s12343_s20 + $0x498] sm:$0xff] }
 0x432   : > { %v4757_v58 = vsel %vm358_vm0, %v12737_v33, 0.0 }
 0x433   : > { %16293 = vst [vmem:[#allocation24_spill] sm:$0xff] %v12740_v4  ;;  %4758 = vadd.xlane.f32.xlu1 %v4757_v58  ;;  %v5258_v21 = vmul.f32 %v12740_v4, %v12740_v4  ;;  %v5381_v28 = vsel %vm358_vm0, %v5257_v22, 0.0  ;;  %v3374_v58 = vpop.f32.mrf.mxu0  ;;  %v2645_v22 = vld [vmem:[%s12343_s20 + $0x4b8] sm:$0xff] }
 0x435   : > { %v5384_v8 = vsel %vm358_vm0, %v5258_v21, 0.0  ;;  %v4074_v23 = vpop.f32.mrf.mxu2  ;;  %v3727_v21 = vpop.f32.mrf.mxu1 }
 0x436   : > { %v4717_v20 = vpop.xlane.xlu2 %4716  ;;  %5385 = vadd.xlane.f32.xlu2 %v5384_v8  ;;  %v4075_v9 = vadd.f32 %v4074_v23, %v3722_v61  ;;  %v2639_v8 = vld [vmem:[%s12343_s20 + $0x488] sm:$0xff]  ;;  %v2642_v61 = vld [vmem:[%s12343_s20 + $0x4a0] sm:$0xff] }
 0x437   : > { %v5035_v6 = vmul.f32 %v4717_v20, %v16290_v34  ;;  %v4424_v60 = vpop.f32.mrf.mxu3  ;;  %v2644_v20 = vld [vmem:[%s12343_s20 + $0x4b0] sm:$0xff]  ;;  %3756 = vmatmul.f32.gmra.mxu1 %v2639_v8 }
 0x438   : > { %v12753_v30 = vadd.f32 %v4424_v60, %v4072_v45  ;;  %v2638_v45 = vld [vmem:[%s12343_s20 + $0x480] sm:$0xff] }
 0x439   : > { %v12756_v35 = vsub.f32 %v12590_v43, %v5035_v6  ;;  %8961 = vmatmul.msk.f32.gmra.mxu3 %vm2942_vm5, %v2641_v42  ;;  %3403 = vmatmul.f32.gmra.mxu0 %v2638_v45 }
 0x43a   : > { %v4760_v10 = vsel %vm358_vm0, %v12753_v30, 0.0 }
 0x43b   : > { %16295 = vst [vmem:[#allocation26_spill] sm:$0xff] %v12756_v35  ;;  %5382 = vadd.xlane.f32.xlu1 %v5381_v28  ;;  %v5259_v18 = vmul.f32 %v12756_v35, %v12756_v35  ;;  %v3377_v60 = vpop.f32.mrf.mxu0  ;;  %v2643_v28 = vld [vmem:[%s12343_s20 + $0x4a8] sm:$0xff] }
 0x43d   : > { %v5387_v31 = vsel %vm358_vm0, %v5259_v18, 0.0  ;;  %v4077_v26 = vpop.f32.mrf.mxu2  ;;  %v3730_v23 = vpop.f32.mrf.mxu1 }
 0x43e   : > { %v4720_v5 = vpop.xlane.xlu0 %4719  ;;  %5388 = vadd.xlane.f32.xlu0 %v5387_v31  ;;  %4761 = vadd.xlane.f32.xlu2 %v4760_v10  ;;  %v4078_v29 = vadd.f32 %v4077_v26, %v3725_v51  ;;  %v7940_v10 = vld [vmem:[%s12791_s15 + $0x8] sm:$0xff] }
 0x43f   : > { %v5036_v43 = vmul.f32 %v4720_v5, %v16290_v34  ;;  %v4427_v17 = vpop.f32.mrf.mxu3  ;;  %3759 = vmatmul.f32.gmra.mxu1 %v2643_v28 }
 0x440   : > { %v12765_v0 = vadd.f32 %v4427_v17, %v4075_v9 }
 0x441   : > { %v12768_v56 = vsub.f32 %v12596_v27, %v5036_v43  ;;  %v2636_v27 = vld [vmem:[%s12343_s20 + $0x470] sm:$0xff]  ;;  %8962 = vmatmul.msk.f32.gmra.mxu3 %vm2942_vm5, %v2645_v22  ;;  %3406 = vmatmul.f32.gmra.mxu0 %v2642_v61 }
 0x442   : > { %v4763_v50 = vsel %vm358_vm0, %v12765_v0, 0.0  ;;  %4106 = vmatmul.f32.gmra.mxu2 %v2636_v27 }
 0x443   : > { %16296 = vst [vmem:[#allocation64_spill] sm:$0xff] %v12768_v56  ;;  %v5260_v62 = vmul.f32 %v12768_v56, %v12768_v56  ;;  %v3380_v31 = vpop.f32.mrf.mxu0 }
 0x445   : > { %v5390_v52 = vsel %vm358_vm0, %v5260_v62, 0.0  ;;  %v4080_v16 = vpop.f32.mrf.mxu2  ;;  %v3733_v38 = vpop.f32.mrf.mxu1 }
 0x446   : > { %5391 = vadd.xlane.f32.xlu1 %v5390_v52  ;;  %4764 = vadd.xlane.f32.xlu0 %v4763_v50  ;;  %v4723_v5 = vpop.xlane.xlu1 %4722 }
 0x447   : > { %v4430_v54 = vpop.f32.mrf.mxu3  ;;  %v5037_v17 = vmul.f32 %v4723_v5, %v16290_v34 }
 0x448   : > { %v12775_v49 = vadd.f32 %v4430_v54, %v4078_v29  ;;  %v3728_v54 = vadd.f32 %v3727_v21, %v3374_v58 }
 0x449   : > { %v12810_v50 = vsub.f32 %v12605_v19, %v5037_v17 }
 0x44a   : > { %v4766_v2 = vsel %vm358_vm0, %v12775_v49, 0.0  ;;  %4109 = vmatmul.f32.gmra.mxu2 %v2640_v48  ;;  %v4081_v42 = vadd.f32 %v4080_v16, %v3728_v54 }
 0x44b   : > { %v3383_v26 = vpop.f32.mrf.mxu0  ;;  %16297 = vst [vmem:[#allocation34_spill] sm:$0xff] %v12810_v50  ;;  %v5261_v27 = vmul.f32 %v12810_v50, %v12810_v50  ;;  %v2663_v50 = vld [vmem:[%s12343_s20 + $0x548] sm:$0xff] }
 0x44d   : > { %v4083_v18 = vpop.f32.mrf.mxu2  ;;  %v3736_v51 = vpop.f32.mrf.mxu1 }
 0x44e   : > { %4767 = vadd.xlane.f32.xlu1 %v4766_v2  ;;  %v4726_v62 = vpop.xlane.xlu2 %4725 }
 0x44f   : > { %v4433_v6 = vpop.f32.mrf.mxu3  ;;  %v5038_v52 = vmul.f32 %v4726_v62, %v16290_v34 }
 0x451   : > { %v12816_v53 = vsub.f32 %v12612_v36, %v5038_v52  ;;  %v3737_v52 = vadd.f32 %v3736_v51, %v3383_v26 }
 0x452   : > { %4112 = vmatmul.f32.gmra.mxu2 %v2644_v20  ;;  %v12822_v20 = vadd.f32 %v4433_v6, %v4081_v42  ;;  %v3734_v42 = vadd.f32 %v3733_v38, %v3380_v31 }
 0x453   : > { %16298 = vst [vmem:[#allocation69_spill] sm:$0xff] %v12816_v53  ;;  %v3386_v2 = vpop.f32.mrf.mxu0  ;;  %v5262_v19 = vmul.f32 %v12816_v53, %v12816_v53 }
 0x455   : > { %v4086_v13 = vpop.f32.mrf.mxu2  ;;  %v3739_v25 = vpop.f32.mrf.mxu1  ;;  %v5396_v22 = vsel %vm358_vm0, %v5262_v19, 0.0 }
 0x456   : > { %8053 = vperm.xlu2 %9051, %v7939_v37   ;;  %v5393_v37 = vsel %vm358_vm0, %v5261_v27, 0.0  ;;  %v4729_v58 = vpop.xlane.xlu0 %4728  ;;  %v4087_v19 = vadd.f32 %v4086_v13, %v3734_v42 }
 0x457   : > { %v4436_v9 = vpop.f32.mrf.mxu3  ;;  %v5039_v61 = vmul.f32 %v4729_v58, %v16290_v34 }
 0x45a   : > { %8063 = vperm.xlu0 %9052, %v7941_v44   ;;  %v3731_v44 = vadd.f32 %v3730_v23, %v3377_v60  ;;  %v4769_v23 = vsel %vm358_vm0, %v12822_v20, 0.0 }
 0x45b   : > { %v3389_v5 = vpop.f32.mrf.mxu0 }
 0x45c   : > { %v4084_v36 = vadd.f32 %v4083_v18, %v3731_v44  ;;  %v12835_v18 = vsub.f32 %v12621_v46, %v5039_v61  ;;  %v3740_v44 = vadd.f32 %v3739_v25, %v3386_v2 }
 0x45d   : > { %v4089_v29 = vpop.f32.mrf.mxu2 }
 0x45e   : > { %v4732_v48 = vpop.xlane.xlu1 %4731  ;;  %v12832_v6 = vadd.f32 %v4436_v9, %v4084_v36  ;;  %16300 = vst [vmem:[#allocation59_spill] sm:$0xff] %v12835_v18  ;;  %v5263_v9 = vmul.f32 %v12835_v18, %v12835_v18 }
 0x45f   : > { %v12806_v43 = vpop.f32.mrf.mxu3  ;;  %v5040_v8 = vmul.f32 %v4732_v48, %v16290_v34 }
 0x460   : > { %v4772_v48 = vsel %vm358_vm0, %v12832_v6, 0.0  ;;  %v5399_v58 = vsel %vm358_vm0, %v5263_v9, 0.0  ;;  %v12860_v2 = vadd.f32 %v12806_v43, %v4087_v19 }
 0x461   : > { %v12827_v60 = vsub.f32 %v12630_v47, %v5040_v8 }
 0x463   : > { %16299 = vst [vmem:[#allocation27_spill] sm:$0xff] %v12827_v60  ;;  %v5264_v54 = vmul.f32 %v12827_v60, %v12827_v60  ;;  %v3392_v38 = vpop.f32.mrf.mxu0  ;;  %v2664_v60 = vld [vmem:[%s12343_s20 + $0x550] sm:$0xff] }
 0x465   : > { %v4092_v45 = vpop.f32.mrf.mxu2  ;;  %v5402_v51 = vsel %vm358_vm0, %v5264_v54, 0.0 }
 0x466   : > { %v4735_v21 = vpop.xlane.xlu2 %4734 }
 0x467   : > { %8058 = vperm.xlu1 %9050, %v7940_v10   ;;  %v4442_v3 = vpop.f32.mrf.mxu3  ;;  %v3742_v10 = vpop.f32.mrf.mxu1  ;;  %v5041_v17 = vmul.f32 %v4735_v21, %v16290_v34 }
 0x468   : > { %v3743_v19 = vadd.f32 %v3742_v10, %v3389_v5 }
 0x469   : > { %v12840_v27 = vsub.f32 %v12639_v1, %v5041_v17 }
 0x46b   : > { %16301 = vst [vmem:[#allocation29_spill] sm:$0xff] %v12840_v27  ;;  %v5265_v1 = vmul.f32 %v12840_v27, %v12840_v27 }
 0x46d   : > { %v4095_v47 = vpop.f32.mrf.mxu2  ;;  %v5405_v61 = vsel %vm358_vm0, %v5265_v1, 0.0 }
 0x46e   : > { %v4738_v21 = vpop.xlane.xlu0 %4737 }
 0x46f   : > { %v4445_v16 = vpop.f32.mrf.mxu3  ;;  %v3745_v31 = vpop.f32.mrf.mxu1  ;;  %v5042_v25 = vmul.f32 %v4738_v21, %v16290_v34 }
 0x471   : > { %v12873_v43 = vsub.f32 %v12648_v57, %v5042_v25  ;;  %v2648_v25 = vld [vmem:[%s12343_s20 + $0x4d0] sm:$0xff] }
 0x472   : > { %4115 = vmatmul.f32.gmra.mxu2 %v2648_v25 }
 0x473   : > { %16303 = vst [vmem:[#allocation37_spill] sm:$0xff] %v12873_v43 }
 0x475   : > { %v4098_v13 = vpop.f32.mrf.mxu2 }
 0x476   : > { %v4741_v28 = vpop.xlane.xlu1 %4740 }
 0x477   : > { %v12849_v26 = vpop.f32.mrf.mxu3 }
 0x47e   : > { %v4744_v62 = vpop.xlane.xlu2 %4743 }
 0x47f   : > { %5394 = vadd.xlane.f32.xlu2 %v5393_v37  ;;  %v4090_v37 = vadd.f32 %v4089_v29, %v3737_v52  ;;  %v5043_v29 = vmul.f32 %v4741_v28, %v16290_v34  ;;  %v4451_v42 = vpop.f32.mrf.mxu3 }
 0x481   : > { %v12855_v8 = vadd.f32 %v4442_v3, %v4090_v37 }
 0x483   : > { %v4778_v3 = vsel %vm358_vm0, %v12855_v8, 0.0 }
 0x484   : > { %5397 = vadd.xlane.f32.xlu0 %v5396_v22  ;;  %v4093_v22 = vadd.f32 %v4092_v45, %v3740_v44  ;;  %v5044_v45 = vmul.f32 %v4744_v62, %v16290_v34  ;;  %v3748_v62 = vpop.f32.mrf.mxu1 }
 0x486   : > { %v5368_v36 = vpop.xlane.xlu2 %5367  ;;  %v12869_v28 = vadd.f32 %v4445_v16, %v4093_v22  ;;  %v12884_v44 = vsub.f32 %v12667_v40, %v5044_v45  ;;  %v4747_v57 = vpop.xlane.xlu0 %4746 }
 0x487   : > { %4770 = vadd.xlane.f32.xlu2 %v4769_v23  ;;  %v12863_v23 = vsub.f32 %v12657_v15, %v5043_v29  ;;  %v5700_v17 = vmul.f32 %v5368_v36, %v16290_v34  ;;  %v4775_v15 = vsel %vm358_vm0, %v12860_v2, 0.0  ;;  %v4101_v40 = vpop.f32.mrf.mxu2  ;;  %v4096_v36 = vadd.f32 %v4095_v47, %v3743_v19 }
 0x488   : > { %16304 = vst [vmem:[#allocation72_spill] sm:$0xff] %v12884_v44  ;;  %v4781_v1 = vsel %vm358_vm0, %v12869_v28, 0.0  ;;  %v5268_v29 = vmul.f32 %v12884_v44, %v12884_v44  ;;  %v5045_v47 = vmul.f32 %v4747_v57, %v16290_v34  ;;  %v2662_v44 = vld [vmem:[%s12343_s20 + $0x540] sm:$0xff] }
 0x489   : > { %16302 = vst [vmem:[#allocation67_spill] sm:$0xff] %v12863_v23  ;;  %v12879_v37 = vadd.f32 1e-05, %v5700_v17  ;;  %v5267_v16 = vmul.f32 %v12863_v23, %v12863_v23 }
 0x48a   : > { %v5414_v17 = vsel %vm358_vm0, %v5268_v29, 0.0 }
 0x48b   : > { %v5411_v21 = vsel %vm358_vm0, %v5267_v16, 0.0  ;;  %v2647_v16 = vld [vmem:[%s12343_s20 + $0x4c8] sm:$0xff]  ;;  %vm6051_vm9 = vweird.f32 %v12879_v37 }
 0x48c   : > { %4773 = vadd.xlane.f32.xlu0 %v4772_v48  ;;  %v3746_v48 = vadd.f32 %v3745_v31, %v3392_v38  ;;  %v5266_v31 = vmul.f32 %v12873_v43, %v12873_v43  ;;  %3762 = vmatmul.f32.gmra.mxu1 %v2647_v16 }
 0x48e   : > { %v12846_v46 = vpop.xlane.xlu1 %4749  ;;  %v5408_v5 = vsel %vm358_vm0, %v5266_v31, 0.0 }
 0x48f   : > { %5403 = vadd.xlane.f32.xlu2 %v5402_v51  ;;  %v3395_v51 = vpop.f32.mrf.mxu0  ;;  %v4104_v29 = vpop.f32.mrf.mxu2 }
 0x490   : > { %v3749_v38 = vadd.f32 %v3748_v62, %v3395_v51  ;;  %v3751_v51 = vpop.f32.mrf.mxu1 }
 0x491   : > { %5400 = vadd.xlane.f32.xlu1 %v5399_v58  ;;  %v4099_v58 = vadd.f32 %v4098_v13, %v3746_v48  ;;  %v2649_v48 = vld [vmem:[%s12343_s20 + $0x4d8] sm:$0xff] }
 0x492   : > { %v4102_v22 = vadd.f32 %v4101_v40, %v3749_v38  ;;  %8963 = vmatmul.msk.f32.gmra.mxu3 %vm2942_vm5, %v2649_v48 }
 0x493   : > { %v12895_v10 = vadd.f32 %v4451_v42, %v4099_v58  ;;  %v2646_v42 = vld [vmem:[%s12343_s20 + $0x4c0] sm:$0xff] }
 0x494   : > { %5406 = vadd.xlane.f32.xlu0 %v5405_v61  ;;  %v4454_v61 = vpop.f32.mrf.mxu3  ;;  %3409 = vmatmul.f32.gmra.mxu0 %v2646_v42 }
 0x495   : > { %v4787_v45 = vsel %vm358_vm0, %v12895_v10, 0.0 }
 0x496   : > { %v5365_v52 = vpop.xlane.xlu1 %5364 }
 0x497   : > { %v5699_v54 = vmul.f32 %v5365_v52, %v16290_v34  ;;  %4779 = vadd.xlane.f32.xlu2 %v4778_v3  ;;  %v12906_v3 = vadd.f32 %v12849_v26, %v4096_v36  ;;  %v3398_v57 = vpop.f32.mrf.mxu0 }
 0x499   : > { %v12877_v9 = vadd.f32 1e-05, %v5699_v54  ;;  %4776 = vadd.xlane.f32.xlu1 %v4775_v15  ;;  %v5371_v54 = vpop.xlane.xlu0 %5370  ;;  %v12910_v15 = vadd.f32 %v4454_v61, %v4102_v22  ;;  %v4784_v58 = vsel %vm358_vm0, %v12906_v3, 0.0  ;;  %v2653_v22 = vld [vmem:[%s12343_s20 + $0x4f8] sm:$0xff] }
 0x49a   : > { %v5701_v19 = vmul.f32 %v5371_v54, %v16290_v34  ;;  %8964 = vmatmul.msk.f32.gmra.mxu3 %vm2942_vm5, %v2653_v22 }
 0x49b   : > { %9167 = vrsqrt.f32 %v12877_v9  ;;  %v4790_v31 = vsel %vm358_vm0, %v12910_v15, 0.0  ;;  %vm6041_vm8 = vweird.f32 %v12877_v9 }
 0x49c   : > { %4782 = vadd.xlane.f32.xlu0 %v4781_v1  ;;  %9169 = vrsqrt.f32 %v12879_v37  ;;  %v12921_v1 = vsub.f32 %v12679_v14, %v5045_v47  ;;  %v5925_v36 = vadd.f32 1e-05, %v5701_v19  ;;  %v2651_v47 = vld [vmem:[%s12343_s20 + $0x4e8] sm:$0xff]  ;;  %v4457_v54 = vpop.f32.mrf.mxu3 }
 0x49d   : > { %3765 = vmatmul.f32.gmra.mxu1 %v2651_v47  ;;  %v2655_v19 = vld [vmem:[%s12343_s20 + $0x508] sm:$0xff] }
 0x49e   : > { %16305 = vst [vmem:[#allocation30_spill] sm:$0xff] %v12921_v1  ;;  %v5269_v14 = vmul.f32 %v12921_v1, %v12921_v1  ;;  %9171 = vrsqrt.f32 %v5925_v36  ;;  %vm6061_vm13 = vweird.f32 %v5925_v36 }
 0x49f   : > { %5412 = vadd.xlane.f32.xlu2 %v5411_v21  ;;  %v3752_v21 = vadd.f32 %v3751_v51, %v3398_v57  ;;  %v2657_v51 = vld [vmem:[%s12343_s20 + $0x518] sm:$0xff]  ;;  %v2654_v57 = vld [vmem:[%s12343_s20 + $0x500] sm:$0xff] }
 0x4a0   : > { %v5417_v48 = vsel %vm358_vm0, %v5269_v14, 0.0 }
 0x4a1   : > { %5409 = vadd.xlane.f32.xlu1 %v5408_v5  ;;  %v12899_v13 = vpop.eup %9167  ;;  %v2652_v5 = vld [vmem:[%s12343_s20 + $0x4f0] sm:$0xff]  ;;  %v4105_v25 = vadd.f32 %v4104_v29, %v3752_v21  ;;  %v5811_v29 = vld [vmem:[%s12955_s17] sm:$0xff] }
 0x4a2   : > { %v12902_v52 = vpop.eup %9169  ;;  %v6036_v62 = vmul.f32 %v12899_v13, %v12877_v9  ;;  %4118 = vmatmul.f32.gmra.mxu2 %v2652_v5  ;;  %vm6042_vm6 = vweird.f32 %v12899_v13  ;;  %8965 = vmatmul.msk.f32.gmra.mxu3 %vm2942_vm5, %v2657_v51  ;;  %v5812_v5 = vld [vmem:[%s12955_s17 + $0x8] sm:$0xff]  ;;  %v4753_v9 = vpop.xlane.xlu2 %4752 }
 0x4a3   : > { %v6046_v26 = vmul.f32 %v12902_v52, %v12879_v37  ;;  %v12938_v16 = vadd.f32 %v4457_v54, %v4105_v25  ;;  %vm6052_vm7 = vweird.f32 %v12902_v52  ;;  %vm6043_vm10 = vmor %vm6041_vm8, %vm6042_vm6  ;;  %v12963_v54 = vpop.xlane.xlu0 %5379 }
 0x4a4   : > { %5415 = vadd.xlane.f32.xlu0 %v5414_v17  ;;  %v6037_v38 = vmul.f32 %v12899_v13, %v6036_v62  ;;  %v2650_v17 = vld [vmem:[%s12343_s20 + $0x4e0] sm:$0xff]  ;;  %vm6053_vm11 = vmor %vm6051_vm9, %vm6052_vm7 }
 0x4a5   : > { %v6047_v40 = vmul.f32 %v12902_v52, %v6046_v26  ;;  %3412 = vmatmul.f32.gmra.mxu0 %v2650_v17  ;;  %v2656_v26 = vld [vmem:[%s12343_s20 + $0x510] sm:$0xff]  ;;  %3768 = vmatmul.f32.gmra.mxu1 %v2655_v19 }
 0x4a6   : > { %v6038_v61 = vmul.f32 0.5, %v6037_v38  ;;  %v4793_v38 = vsel %vm358_vm0, %v12938_v16, 0.0 }
 0x4a7   : > { %4788 = vadd.xlane.f32.xlu2 %v4787_v45  ;;  %v6048_v45 = vmul.f32 0.5, %v6047_v40 }
 0x4a8   : > { %v6039_v42 = vsub.f32 1.5, %v6038_v61 }
 0x4a9   : > { %4785 = vadd.xlane.f32.xlu1 %v4784_v58  ;;  %v6049_v62 = vsub.f32 1.5, %v6048_v45  ;;  %v9172_v58 = vpop.eup %9171 }
 0x4aa   : > { %4121 = vmatmul.f32.gmra.mxu2 %v2656_v26  ;;  %v6056_v40 = vmul.f32 %v9172_v58, %v5925_v36  ;;  %vm6062_vm12 = vweird.f32 %v9172_v58  ;;  %v5374_v26 = vpop.xlane.xlu1 %5373  ;;  %v5047_v36 = vmul.f32 %v4753_v9, %v16290_v34 }
 0x4ab   : > { %v6050_v21 = vmul.f32 %v12902_v52, %v6049_v62  ;;  %vm6063_vm14 = vmor %vm6061_vm13, %vm6062_vm12  ;;  %v4756_v51 = vpop.xlane.xlu0 %4755 }
 0x4ac   : > { %4791 = vadd.xlane.f32.xlu0 %v4790_v31  ;;  %v6040_v31 = vmul.f32 %v12899_v13, %v6039_v42  ;;  %v6057_v61 = vmul.f32 %v9172_v58, %v6056_v40  ;;  %v5377_v42 = vpop.xlane.xlu2 %5376  ;;  %v3754_v40 = vpop.f32.mrf.mxu1 }
 0x4ad   : > { %3415 = vmatmul.f32.gmra.mxu0 %v2654_v57  ;;  %v6054_v22 = vsel %vm6053_vm11, %v12902_v52, %v6050_v21  ;;  %v5702_v52 = vmul.f32 %v5374_v26, %v16290_v34  ;;  %v5703_v21 = vmul.f32 %v5377_v42, %v16290_v34 }
 0x4ae   : > { %v6044_v14 = vsel %vm6043_vm10, %v12899_v13, %v6040_v31  ;;  %v7156_v17 = vmul.f32 %v6054_v22, %v5812_v5  ;;  %v6058_v47 = vmul.f32 0.5, %v6057_v61  ;;  %v5046_v31 = vmul.f32 %v12846_v46, %v16290_v34 }
 0x4af   : > { %v7155_v25 = vmul.f32 %v6044_v14, %v5811_v29  ;;  %v12969_v19 = vadd.f32 1e-05, %v5702_v52  ;;  %v3401_v29 = vpop.f32.mrf.mxu0  ;;  %v12986_v22 = vsub.f32 %v12708_v59, %v5047_v36 }
 0x4b0   : > { %v6059_v45 = vsub.f32 1.5, %v6058_v47  ;;  %v12981_v14 = vsub.f32 %v12695_v55, %v5046_v31  ;;  %v3755_v46 = vadd.f32 %v3754_v40, %v3401_v29  ;;  %v2661_v40 = vld [vmem:[%s12343_s20 + $0x538] sm:$0xff]  ;;  %v2658_v29 = vld [vmem:[%s12343_s20 + $0x520] sm:$0xff] }
 0x4b1   : > { %5418 = vadd.xlane.f32.xlu1 %v5417_v48  ;;  %v5813_v48 = vld [vmem:[%s12955_s17 + $0x10] sm:$0xff]  ;;  %9173 = vrsqrt.f32 %v12969_v19  ;;  %16307 = vst [vmem:[#allocation32_spill] sm:$0xff] %v12986_v22  ;;  %8966 = vmatmul.msk.f32.gmra.mxu3 %vm2942_vm5, %v2661_v40  ;;  %vm6071_vm1 = vweird.f32 %v12969_v19 }
 0x4b2   : > { %v6060_v37 = vmul.f32 %v9172_v58, %v6059_v45  ;;  %16306 = vst [vmem:[#allocation62_spill] sm:$0xff] %v12981_v14  ;;  %v5270_v47 = vmul.f32 %v12981_v14, %v12981_v14  ;;  %v5271_v45 = vmul.f32 %v12986_v22, %v12986_v22 }
 0x4b4   : > { %v6064_v13 = vsel %vm6063_vm14, %v9172_v58, %v6060_v37  ;;  %v12967_v57 = vpop.xlane.xlu2 %5385  ;;  %v12977_v58 = vpop.xlane.xlu0 %5388  ;;  %v5423_v52 = vsel %vm358_vm0, %v5271_v45, 0.0  ;;  %v5048_v45 = vmul.f32 %v4756_v51, %v16290_v34 }
 0x4b5   : > { %v7157_v62 = vmul.f32 %v6064_v13, %v5813_v48  ;;  %v4460_v59 = vpop.f32.mrf.mxu3  ;;  %v5420_v48 = vsel %vm358_vm0, %v5270_v47, 0.0  ;;  %v13002_v13 = vpop.f32.mrf.mxu1  ;;  %v2659_v47 = vld [vmem:[%s12343_s20 + $0x528] sm:$0xff]  ;;  %3418 = vmatmul.f32.gmra.mxu0 %v2658_v29  ;;  %v5704_v29 = vmul.f32 %v12963_v54, %v16290_v34 }
 0x4b6   : > { %3771 = vmatmul.f32.gmra.mxu1 %v2659_v47  ;;  %v13040_v51 = vsub.f32 %v12729_v32, %v5048_v45 }
 0x4b7   : > { %v12988_v61 = vpop.eup %9173 }
 0x4b8   : > { %v6066_v9 = vmul.f32 %v12988_v61, %v12969_v19  ;;  %16308 = vst [vmem:[#allocation70_spill] sm:$0xff] %v13040_v51  ;;  %vm6072_vm15 = vweird.f32 %v12988_v61  ;;  %v5272_v54 = vmul.f32 %v13040_v51, %v13040_v51  ;;  %v2665_v51 = vld [vmem:[%s12343_s20 + $0x558] sm:$0xff] }
 0x4b9   : > { %4794 = vadd.xlane.f32.xlu1 %v4793_v38  ;;  %v12975_v38 = vpop.xlane.xlu1 %4758  ;;  %vm6073_vm2 = vmor %vm6071_vm1, %vm6072_vm15  ;;  %8967 = vmatmul.msk.f32.gmra.mxu3 %vm2942_vm5, %v2665_v51 }
 0x4ba   : > { %v6067_v26 = vmul.f32 %v12988_v61, %v6066_v9 }
 0x4bc   : > { %v12983_v5 = vpop.xlane.xlu2 %4761  ;;  %v13004_v42 = vpop.xlane.xlu0 %4764 }
 0x4bd   : > { %v3760_v14 = vpop.f32.mrf.mxu1  ;;  %3421 = vmatmul.f32.gmra.mxu0 %v2662_v44 }
 0x4be   : > { %3774 = vmatmul.f32.gmra.mxu1 %v2663_v50 }
 0x4bf   : > { %7269 = vperm.xlu2 %9051, %v7155_v25   ;;  %v12990_v25 = vadd.f32 1e-05, %v5703_v21  ;;  %v2660_v21 = vld [vmem:[%s12343_s20 + $0x530] sm:$0xff] }
 0x4c0   : > { %7274 = vperm.xlu0 %9052, %v7156_v17   ;;  %4124 = vmatmul.f32.gmra.mxu2 %v2660_v21  ;;  %v13032_v21 = vpop.f32.mrf.mxu3 }
 0x4c1   : > { %9175 = vrsqrt.f32 %v12990_v25  ;;  %v12999_v37 = vpop.xlane.xlu1 %5382  ;;  %vm6081_vm4 = vweird.f32 %v12990_v25 }
 0x4c4   : > { %v13012_v36 = vpop.permute.xlu2 %8053 }
 0x4c5   : > { %v4107_v17 = vpop.f32.mrf.mxu2 }
 0x4c6   : > { %v4108_v55 = vadd.f32 %v4107_v17, %v3755_v46 }
 0x4c7   : > { %v13017_v46 = vpop.eup %9175 }
 0x4c8   : > { %v13010_v31 = vadd.f32 %v4460_v59, %v4108_v55  ;;  %v6076_v55 = vmul.f32 %v13017_v46, %v12990_v25  ;;  %4127 = vmatmul.f32.gmra.mxu2 %v2664_v60  ;;  %vm6082_vm3 = vweird.f32 %v13017_v46 }
 0x4c9   : > { %v13028_v59 = vpop.xlane.xlu1 %5391  ;;  %vm6083_vm6 = vmor %vm6081_vm4, %vm6082_vm3 }
 0x4ca   : > { %v4796_v9 = vsel %vm358_vm0, %v13010_v31, 0.0  ;;  %v6077_v47 = vmul.f32 %v13017_v46, %v6076_v55 }
 0x4cc   : > { %v6078_v22 = vmul.f32 0.5, %v6077_v47  ;;  %v5426_v47 = vsel %vm358_vm0, %v5272_v54, 0.0 }
 0x4cd   : > { %v13019_v17 = vpop.f32.mrf.mxu2 }
 0x4ce   : > { %v6079_v19 = vsub.f32 1.5, %v6078_v22 }
 0x4d1   : > { %v13049_v32 = vpop.xlane.xlu1 %4767 }
 0x4d2   : > { %7279 = vperm.xlu1 %9050, %v7157_v62   ;;  %v13006_v62 = vpop.f32.mrf.mxu0 }
 0x4d5   : > { %v4113_v43 = vpop.f32.mrf.mxu2 }
 0x4da   : > { %v3407_v23 = vpop.f32.mrf.mxu0 }
 0x4e8   : > { %5421 = vadd.xlane.f32.xlu2 %v5420_v48  ;;  %v6068_v48 = vmul.f32 0.5, %v6067_v26 }
 0x4ea   : > { %5424 = vadd.xlane.f32.xlu0 %v5423_v52  ;;  %v13030_v52 = vpop.permute.xlu0 %8063  ;;  %v6069_v40 = vsub.f32 1.5, %v6068_v48  ;;  %v5928_v48 = vadd.f32 1e-05, %v5704_v29  ;;  %v4466_v29 = vpop.f32.mrf.mxu3 }
 0x4ec   : > { %v6070_v1 = vmul.f32 %v12988_v61, %v6069_v40  ;;  %v5814_v40 = vld [vmem:[%s12955_s17 + $0x18] sm:$0xff]  ;;  %9177 = vrsqrt.f32 %v5928_v48  ;;  %vm6091_vm8 = vweird.f32 %v5928_v48 }
 0x4f0   : > { %4797 = vadd.xlane.f32.xlu2 %v4796_v9  ;;  %v3761_v9 = vadd.f32 %v3760_v14, %v3407_v23  ;;  %v6074_v23 = vsel %vm6073_vm2, %v12988_v61, %v6070_v1  ;;  %v6080_v1 = vmul.f32 %v13017_v46, %v6079_v19  ;;  %v13066_v61 = vpop.permute.xlu1 %8058 }
 0x4f1   : > { %v7158_v18 = vmul.f32 %v6074_v23, %v5814_v40  ;;  %v2666_v23 = vld [vmem:[%s12343_s20 + $0x560] sm:$0xff] }
 0x4f2   : > { %v13034_v26 = vpop.xlane.xlu2 %5394  ;;  %v4114_v45 = vadd.f32 %v4113_v43, %v3761_v9  ;;  %v9178_v22 = vpop.eup %9177  ;;  %v2668_v9 = vld [vmem:[%s12343_s20 + $0x570] sm:$0xff]  ;;  %v6084_v51 = vsel %vm6083_vm6, %v13017_v46, %v6080_v1  ;;  %3424 = vmatmul.f32.gmra.mxu0 %v2666_v23 }
 0x4f3   : > { %v6086_v54 = vmul.f32 %v9178_v22, %v5928_v48  ;;  %4130 = vmatmul.f32.gmra.mxu2 %v2668_v9  ;;  %vm6092_vm7 = vweird.f32 %v9178_v22  ;;  %v2672_v23 = vld [vmem:[%s12343_s20 + $0x590] sm:$0xff] }
 0x4f4   : > { %v13060_v43 = vadd.f32 %v4466_v29, %v4114_v45  ;;  %v2669_v45 = vld [vmem:[%s12343_s20 + $0x578] sm:$0xff]  ;;  %v2667_v29 = vld [vmem:[%s12343_s20 + $0x568] sm:$0xff]  ;;  %vm6093_vm9 = vmor %vm6091_vm8, %vm6092_vm7 }
 0x4f5   : > { %8968 = vmatmul.msk.f32.gmra.mxu3 %vm2942_vm5, %v2669_v45  ;;  %v6087_v40 = vmul.f32 %v9178_v22, %v6086_v54  ;;  %3777 = vmatmul.f32.gmra.mxu1 %v2667_v29  ;;  %v2673_v29 = vld [vmem:[%s12343_s20 + $0x598] sm:$0xff] }
 0x4f6   : > { %v4802_v60 = vsel %vm358_vm0, %v13060_v43, 0.0 }
 0x4f7   : > { %v13047_v55 = vpop.xlane.xlu0 %5397  ;;  %v6088_v46 = vmul.f32 0.5, %v6087_v40  ;;  %v5705_v40 = vmul.f32 %v12999_v37, %v16290_v34 }
 0x4fa   : > { %v13053_v14 = vpop.xlane.xlu2 %4770 }
 0x4fb   : > { %4133 = vmatmul.f32.gmra.mxu2 %v2672_v23  ;;  %v5050_v23 = vmul.f32 %v12983_v5, %v16290_v34  ;;  %v5706_v5 = vmul.f32 %v12967_v57, %v16290_v34  ;;  %v2671_v57 = vld [vmem:[%s12343_s20 + $0x588] sm:$0xff] }
 0x4fc   : > { %5427 = vadd.xlane.f32.xlu1 %v5426_v47 }
 0x4fd   : > { %8969 = vmatmul.msk.f32.gmra.mxu3 %vm2942_vm5, %v2673_v29  ;;  %3780 = vmatmul.f32.gmra.mxu1 %v2671_v57 }
 0x4fe   : > { %7284 = vperm.xlu0 %9052, %v7158_v18   ;;  %v5815_v18 = vld [vmem:[%s12955_s17 + $0x20] sm:$0xff] }
 0x4ff   : > { %v13071_v44 = vpop.xlane.xlu0 %4773  ;;  %v7159_v25 = vmul.f32 %v6084_v51, %v5815_v18 }
 0x502   : > { %v13073_v50 = vpop.xlane.xlu2 %5403 }
 0x504   : > { %4803 = vadd.xlane.f32.xlu1 %v4802_v60  ;;  %v13081_v19 = vpop.xlane.xlu1 %5400  ;;  %v6089_v60 = vsub.f32 1.5, %v6088_v46  ;;  %v3758_v46 = vadd.f32 %v13002_v13, %v13006_v62  ;;  %v5049_v62 = vmul.f32 %v12975_v38, %v16290_v34 }
 0x506   : > { %v6090_v18 = vmul.f32 %v9178_v22, %v6089_v60  ;;  %v13103_v60 = vadd.f32 1e-05, %v5705_v40  ;;  %v13138_v40 = vsub.f32 %v12737_v33, %v5049_v62 }
 0x507   : > { %v13085_v1 = vpop.xlane.xlu0 %5406 }
 0x508   : > { %7289 = vperm.xlu2 %9051, %v7159_v25   ;;  %v5816_v25 = vld [vmem:[%s12955_s17 + $0x28] sm:$0xff]  ;;  %v6094_v45 = vsel %vm6093_vm9, %v9178_v22, %v6090_v18  ;;  %v4111_v22 = vadd.f32 %v13019_v17, %v3758_v46  ;;  %9179 = vrsqrt.f32 %v13103_v60  ;;  %16310 = vst [vmem:[#allocation75_spill] sm:$0xff] %v13138_v40  ;;  %vm6101_vm11 = vweird.f32 %v13103_v60 }
 0x509   : > { %v7160_v48 = vmul.f32 %v6094_v45, %v5816_v25  ;;  %v3763_v38 = vpop.f32.mrf.mxu1 }
 0x50a   : > { %v13083_v47 = vpop.xlane.xlu2 %4779  ;;  %v13114_v29 = vadd.f32 %v13032_v21, %v4111_v22  ;;  %v13129_v21 = vsub.f32 %v12753_v30, %v5050_v23  ;;  %v13146_v22 = vadd.f32 1e-05, %v5706_v5  ;;  %v4116_v23 = vpop.f32.mrf.mxu2 }
 0x50c   : > { %v13089_v51 = vpop.xlane.xlu1 %4776  ;;  %16309 = vst [vmem:[#allocation40_spill] sm:$0xff] %v13129_v21  ;;  %v5274_v33 = vmul.f32 %v13129_v21, %v13129_v21  ;;  %9181 = vrsqrt.f32 %v13146_v22  ;;  %vm6111_vm14 = vweird.f32 %v13146_v22 }
 0x50e   : > { %v13135_v45 = vpop.eup %9179  ;;  %v5432_v5 = vsel %vm358_vm0, %v5274_v33, 0.0 }
 0x50f   : > { %v13091_v54 = vpop.xlane.xlu0 %4782  ;;  %vm6102_vm10 = vweird.f32 %v13135_v45 }
 0x510   : > { %vm6103_vm12 = vmor %vm6101_vm11, %vm6102_vm10 }
 0x511   : > { %v3410_v25 = vpop.f32.mrf.mxu0 }
 0x512   : > { %v13087_v9 = vpop.xlane.xlu2 %5412  ;;  %v3764_v30 = vadd.f32 %v3763_v38, %v3410_v25  ;;  %v2676_v25 = vld [vmem:[%s12343_s20 + $0x5b0] sm:$0xff] }
 0x513   : > { %4136 = vmatmul.f32.gmra.mxu2 %v2676_v25 }
 0x514   : > { %v13105_v27 = vpop.xlane.xlu1 %5409  ;;  %v4117_v62 = vadd.f32 %v4116_v23, %v3764_v30  ;;  %v2674_v30 = vld [vmem:[%s12343_s20 + $0x5a0] sm:$0xff] }
 0x517   : > { %v13108_v18 = vpop.xlane.xlu0 %5415 }
 0x51a   : > { %v13098_v56 = vpop.xlane.xlu2 %4788 }
 0x51c   : > { %v13140_v46 = vpop.xlane.xlu1 %4785 }
 0x51d   : > { %7294 = vperm.xlu1 %9050, %v7160_v48  }
 0x51f   : > { %v13144_v48 = vpop.xlane.xlu0 %4791 }
 0x522   : > { %v7270_v37 = vpop.permute.xlu2 %7269 }
 0x523   : > { %v7827_v13 = vmul.f32 %v7270_v37, %v12698_v63  ;;  %v4799_v63 = vsel %vm358_vm0, %v13114_v29, 0.0  ;;  %v6096_v37 = vmul.f32 %v13135_v45, %v13103_v60 }
 0x524   : > { %v13160_v57 = vpop.xlane.xlu1 %5418 }
 0x525   : > { %v8611_v17 = vadd.f32 %v13012_v36, %v7827_v13  ;;  %v2670_v36 = vld [vmem:[%s12343_s20 + $0x580] sm:$0xff]  ;;  %v5273_v13 = vmul.f32 %v13138_v40, %v13138_v40  ;;  %v13177_v25 = vpop.f32.mrf.mxu2 }
 0x526   : > { %3427 = vmatmul.f32.gmra.mxu0 %v2670_v36  ;;  %v2677_v36 = vld [vmem:[%s12343_s20 + $0x5b8] sm:$0xff] }
 0x527   : > { %8723 = vst.msk [vmem:[%s13123_s23] sm:$0xff] %vm358_vm0, %v8611_v17  ;;  %v6097_v17 = vmul.f32 %v13135_v45, %v6096_v37  ;;  %v5429_v38 = vsel %vm358_vm0, %v5273_v13, 0.0  ;;  %8970 = vmatmul.msk.f32.gmra.mxu3 %vm2942_vm5, %v2677_v36  ;;  %v2675_v37 = vld [vmem:[%s12343_s20 + $0x5a8] sm:$0xff]  ;;  %v13170_v13 = vpop.f32.mrf.mxu1 }
 0x528   : > { %4800 = vadd.xlane.f32.xlu0 %v4799_v63  ;;  %v4469_v63 = vpop.f32.mrf.mxu3  ;;  %3783 = vmatmul.f32.gmra.mxu1 %v2675_v37 }
 0x529   : > { %v13162_v40 = vadd.f32 %v4469_v63, %v4117_v62  ;;  %v6098_v23 = vmul.f32 0.5, %v6097_v17 }
 0x52b   : > { %v4805_v62 = vsel %vm358_vm0, %v13162_v40, 0.0  ;;  %v6099_v63 = vsub.f32 1.5, %v6098_v23  ;;  %v5707_v23 = vmul.f32 %v12977_v58, %v16290_v34 }
 0x52d   : > { %v6100_v17 = vmul.f32 %v13135_v45, %v6099_v63  ;;  %v4122_v53 = vpop.f32.mrf.mxu2 }
 0x52e   : > { %3430 = vmatmul.f32.gmra.mxu0 %v2674_v30  ;;  %v13186_v30 = vpop.xlane.xlu1 %4794 }
 0x530   : > { %5433 = vadd.xlane.f32.xlu0 %v5432_v5  ;;  %v13168_v5 = vpop.f32.mrf.mxu0 }
 0x531   : > { %5430 = vadd.xlane.f32.xlu2 %v5429_v38  ;;  %v9182_v38 = vpop.eup %9181 }
 0x532   : > { %v7275_v21 = vpop.permute.xlu0 %7274  ;;  %vm6112_vm13 = vweird.f32 %v9182_v38 }
 0x533   : > { %v7828_v33 = vmul.f32 %v7275_v21, %v12672_v24  ;;  %v6106_v24 = vmul.f32 %v9182_v38, %v13146_v22  ;;  %v5051_v21 = vmul.f32 %v13004_v42, %v16290_v34  ;;  %v5817_v42 = vld [vmem:[%s12955_s17 + $0x30] sm:$0xff]  ;;  %vm6113_vm15 = vmor %vm6111_vm14, %vm6112_vm13 }
 0x535   : > { %v8612_v4 = vadd.f32 %v13066_v61, %v7828_v33  ;;  %v13184_v61 = vpop.f32.mrf.mxu3  ;;  %v6107_v36 = vmul.f32 %v9182_v38, %v6106_v24  ;;  %v13192_v33 = vsub.f32 %v12765_v0, %v5051_v21  ;;  %v5931_v24 = vadd.f32 1e-05, %v5707_v23  ;;  %v2678_v23 = vld [vmem:[%s12343_s20 + $0x5c0] sm:$0xff] }
 0x536   : > { %3433 = vmatmul.f32.gmra.mxu0 %v2678_v23 }
 0x537   : > { %8724 = vst.msk [vmem:[%s13123_s23 + $0x8] sm:$0xff] %vm358_vm0, %v8612_v4  ;;  %v3769_v4 = vpop.f32.mrf.mxu1  ;;  %v6108_v63 = vmul.f32 0.5, %v6107_v36  ;;  %v5275_v60 = vmul.f32 %v13192_v33, %v13192_v33  ;;  %9183 = vrsqrt.f32 %v5931_v24  ;;  %vm6121_vm2 = vweird.f32 %v5931_v24 }
 0x538   : > { %v3416_v37 = vpop.f32.mrf.mxu0  ;;  %16311 = vst [vmem:[#allocation33_spill] sm:$0xff] %v13192_v33  ;;  %v2878_v33 = vld [vmem:[%s12343_s20 + $0xc00] sm:$0xff] }
 0x539   : > { %4806 = vadd.xlane.f32.xlu2 %v4805_v62  ;;  %v6104_v62 = vsel %vm6103_vm12, %v13135_v45, %v6100_v17  ;;  %v3770_v11 = vadd.f32 %v3769_v4, %v3416_v37  ;;  %v6109_v41 = vsub.f32 1.5, %v6108_v63  ;;  %v5435_v45 = vsel %vm358_vm0, %v5275_v60, 0.0  ;;  %v2681_v37 = vld [vmem:[%s12343_s20 + $0x5d8] sm:$0xff] }
 0x53a   : > { %v7161_v7 = vmul.f32 %v6104_v62, %v5817_v42  ;;  %v2679_v42 = vld [vmem:[%s12343_s20 + $0x5c8] sm:$0xff]  ;;  %8971 = vmatmul.msk.f32.gmra.mxu3 %vm2942_vm5, %v2681_v37 }
 0x53b   : > { %v4123_v58 = vadd.f32 %v4122_v53, %v3770_v11  ;;  %v6110_v36 = vmul.f32 %v9182_v38, %v6109_v41  ;;  %v5818_v11 = vld [vmem:[%s12955_s17 + $0x38] sm:$0xff]  ;;  %3786 = vmatmul.f32.gmra.mxu1 %v2679_v42 }
 0x53d   : > { %v4475_v21 = vpop.f32.mrf.mxu3 }
 0x53e   : > { %v13201_v4 = vadd.f32 %v4475_v21, %v4123_v58  ;;  %v3767_v58 = vadd.f32 %v13170_v13, %v13168_v5  ;;  %v2682_v5 = vld [vmem:[%s12343_s20 + $0x5e0] sm:$0xff]  ;;  %v2683_v13 = vld [vmem:[%s12343_s20 + $0x5e8] sm:$0xff] }
 0x53f   : > { %3436 = vmatmul.f32.gmra.mxu0 %v2682_v5 }
 0x543   : > { %3789 = vmatmul.f32.gmra.mxu1 %v2683_v13  ;;  %v4125_v42 = vpop.f32.mrf.mxu2  ;;  %v2687_v13 = vld [vmem:[%s12343_s20 + $0x608] sm:$0xff] }
 0x544   : > { %v7280_v35 = vpop.permute.xlu1 %7279  ;;  %7299 = vperm.xlu0 %9052, %v7161_v7   ;;  %v4811_v7 = vsel %vm358_vm0, %v13201_v4, 0.0 }
 0x545   : > { %v7829_v0 = vmul.f32 %v7280_v35, %v12684_v39  ;;  %v9184_v39 = vpop.eup %9183  ;;  %v6114_v35 = vsel %vm6113_vm15, %v9182_v38, %v6110_v36  ;;  %v5708_v38 = vmul.f32 %v13028_v59, %v16290_v34 }
 0x546   : > { %v6116_v53 = vmul.f32 %v9184_v39, %v5931_v24  ;;  %v7162_v41 = vmul.f32 %v6114_v35, %v5818_v11  ;;  %vm6122_vm1 = vweird.f32 %v9184_v39  ;;  %v2684_v24 = vld [vmem:[%s12343_s20 + $0x5f0] sm:$0xff]  ;;  %v2685_v11 = vld [vmem:[%s12343_s20 + $0x5f8] sm:$0xff]  ;;  %v5709_v35 = vmul.f32 %v13034_v26, %v16290_v34 }
 0x547   : > { %v8613_v17 = vadd.f32 %v13030_v52, %v7829_v0  ;;  %5436 = vadd.xlane.f32.xlu1 %v5435_v45  ;;  %v2680_v52 = vld [vmem:[%s12343_s20 + $0x5d0] sm:$0xff]  ;;  %vm6123_vm3 = vmor %vm6121_vm2, %vm6122_vm1  ;;  %v5819_v0 = vld [vmem:[%s12955_s17 + $0x40] sm:$0xff]  ;;  %v5932_v45 = vadd.f32 1e-05, %v5708_v38  ;;  %8972 = vmatmul.msk.f32.gmra.mxu3 %vm2942_vm5, %v2685_v11 }
 0x548   : > { %4139 = vmatmul.f32.gmra.mxu2 %v2680_v52  ;;  %v6117_v22 = vmul.f32 %v9184_v39, %v6116_v53  ;;  %v3772_v53 = vpop.f32.mrf.mxu1  ;;  %v2686_v11 = vld [vmem:[%s12343_s20 + $0x600] sm:$0xff] }
 0x549   : > { %8725 = vst.msk [vmem:[%s13123_s23 + $0x10] sm:$0xff] %vm358_vm0, %v8613_v17  ;;  %v4120_v17 = vadd.f32 %v13177_v25, %v3767_v58  ;;  %9185 = vrsqrt.f32 %v5932_v45  ;;  %v5052_v25 = vmul.f32 %v13049_v32, %v16290_v34  ;;  %3439 = vmatmul.f32.gmra.mxu0 %v2686_v11  ;;  %vm6131_vm6 = vweird.f32 %v5932_v45  ;;  %v5821_v11 = vld [vmem:[%s12955_s17 + $0x50] sm:$0xff] }
 0x54a   : > { %v6118_v62 = vmul.f32 0.5, %v6117_v22 }
 0x54b   : > { %v13223_v59 = vadd.f32 %v13184_v61, %v4120_v17  ;;  %v13240_v37 = vsub.f32 %v12775_v49, %v5052_v25  ;;  %v4478_v49 = vpop.f32.mrf.mxu3  ;;  %3792 = vmatmul.f32.gmra.mxu1 %v2687_v13 }
 0x54c   : > { %v6119_v63 = vsub.f32 1.5, %v6118_v62 }
 0x54d   : > { %16313 = vst [vmem:[#allocation35_spill] sm:$0xff] %v13240_v37  ;;  %v5276_v26 = vmul.f32 %v13240_v37, %v13240_v37 }
 0x54e   : > { %v6120_v60 = vmul.f32 %v9184_v39, %v6119_v63 }
 0x54f   : > { %4812 = vadd.xlane.f32.xlu1 %v4811_v7  ;;  %v5053_v7 = vmul.f32 %v13053_v14, %v16290_v34  ;;  %v4808_v14 = vsel %vm358_vm0, %v13223_v59, 0.0  ;;  %v9186_v61 = vpop.eup %9185  ;;  %v5438_v38 = vsel %vm358_vm0, %v5276_v26, 0.0 }
 0x550   : > { %v6124_v21 = vsel %vm6123_vm3, %v9184_v39, %v6120_v60  ;;  %4142 = vmatmul.f32.gmra.mxu2 %v2684_v24  ;;  %v6126_v52 = vmul.f32 %v9186_v61, %v5932_v45  ;;  %v13250_v17 = vpop.f32.mrf.mxu1  ;;  %v2689_v24 = vld [vmem:[%s12343_s20 + $0x618] sm:$0xff]  ;;  %vm6132_vm4 = vweird.f32 %v9186_v61 }
 0x551   : > { %7304 = vperm.xlu2 %9051, %v7162_v41   ;;  %v7163_v36 = vmul.f32 %v6124_v21, %v5819_v0  ;;  %v13233_v39 = vsub.f32 %v12822_v20, %v5053_v7  ;;  %v3419_v41 = vpop.f32.mrf.mxu0  ;;  %v5933_v20 = vadd.f32 1e-05, %v5709_v35  ;;  %v2688_v7 = vld [vmem:[%s12343_s20 + $0x610] sm:$0xff]  ;;  %8973 = vmatmul.msk.f32.gmra.mxu3 %vm2942_vm5, %v2689_v24  ;;  %v4128_v35 = vpop.f32.mrf.mxu2  ;;  %vm6133_vm7 = vmor %vm6131_vm6, %vm6132_vm4 }
 0x552   : > { %v3773_v23 = vadd.f32 %v3772_v53, %v3419_v41  ;;  %v6127_v22 = vmul.f32 %v9186_v61, %v6126_v52  ;;  %v5054_v41 = vmul.f32 %v13071_v44, %v16290_v34  ;;  %v5820_v52 = vld [vmem:[%s12955_s17 + $0x48] sm:$0xff] }
 0x553   : > { %16312 = vst [vmem:[#allocation65_spill] sm:$0xff] %v13233_v39  ;;  %v5277_v32 = vmul.f32 %v13233_v39, %v13233_v39  ;;  %9187 = vrsqrt.f32 %v5933_v20  ;;  %vm6141_vm9 = vweird.f32 %v5933_v20 }
 0x554   : > { %v4126_v63 = vadd.f32 %v4125_v42, %v3773_v23  ;;  %v6128_v60 = vmul.f32 0.5, %v6127_v22  ;;  %v4481_v23 = vpop.f32.mrf.mxu3 }
 0x555   : > { %v5441_v62 = vsel %vm358_vm0, %v5277_v32, 0.0 }
 0x556   : > { %v13248_v58 = vadd.f32 %v4478_v49, %v4126_v63  ;;  %v6129_v0 = vsub.f32 1.5, %v6128_v60  ;;  %v5710_v63 = vmul.f32 %v13047_v55, %v16290_v34  ;;  %v13267_v49 = vsub.f32 %v12832_v6, %v5054_v41  ;;  %v2693_v41 = vld [vmem:[%s12343_s20 + $0x638] sm:$0xff] }
 0x558   : > { %v4814_v5 = vsel %vm358_vm0, %v13248_v58, 0.0  ;;  %4145 = vmatmul.f32.gmra.mxu2 %v2688_v7  ;;  %v6130_v25 = vmul.f32 %v9186_v61, %v6129_v0  ;;  %16314 = vst [vmem:[#allocation73_spill] sm:$0xff] %v13267_v49  ;;  %v5934_v0 = vadd.f32 1e-05, %v5710_v63  ;;  %v5278_v44 = vmul.f32 %v13267_v49, %v13267_v49 }
 0x559   : > { %v9188_v21 = vpop.eup %9187  ;;  %8974 = vmatmul.msk.f32.gmra.mxu3 %vm2942_vm5, %v2693_v41 }
 0x55a   : > { %v6134_v32 = vsel %vm6133_vm7, %v9186_v61, %v6130_v25  ;;  %vm6142_vm8 = vweird.f32 %v9188_v21  ;;  %9189 = vrsqrt.f32 %v5934_v0  ;;  %v5444_v6 = vsel %vm358_vm0, %v5278_v44, 0.0 }
 0x55b   : > { %v7164_v42 = vmul.f32 %v6134_v32, %v5820_v52  ;;  %vm6143_vm10 = vmor %vm6141_vm9, %vm6142_vm8  ;;  %v2690_v52 = vld [vmem:[%s12343_s20 + $0x620] sm:$0xff]  ;;  %v2691_v32 = vld [vmem:[%s12343_s20 + $0x628] sm:$0xff]  ;;  %vm6151_vm12 = vweird.f32 %v5934_v0 }
 0x55c   : > { %3442 = vmatmul.f32.gmra.mxu0 %v2690_v52  ;;  %3795 = vmatmul.f32.gmra.mxu1 %v2691_v32 }
 0x560   : > { %v9190_v13 = vpop.eup %9189 }
 0x561   : > { %vm6152_vm11 = vweird.f32 %v9190_v13 }
 0x562   : > { %vm6153_vm13 = vmor %vm6151_vm12, %vm6152_vm11 }
 0x568   : > { %7309 = vperm.xlu1 %9050, %v7163_v36   ;;  %v13252_v36 = vpop.f32.mrf.mxu0 }
 0x56e   : > { %4809 = vadd.xlane.f32.xlu0 %v4808_v14  ;;  %v6136_v14 = vmul.f32 %v9188_v21, %v5933_v20 }
 0x570   : > { %v6137_v53 = vmul.f32 %v9188_v21, %v6136_v14 }
 0x572   : > { %v3778_v22 = vpop.f32.mrf.mxu1  ;;  %v6138_v26 = vmul.f32 0.5, %v6137_v53  ;;  %v2692_v53 = vld [vmem:[%s12343_s20 + $0x630] sm:$0xff] }
 0x573   : > { %4148 = vmatmul.f32.gmra.mxu2 %v2692_v53 }
 0x576   : > { %5442 = vadd.xlane.f32.xlu0 %v5441_v62  ;;  %v3425_v62 = vpop.f32.mrf.mxu0  ;;  %v4131_v60 = vpop.f32.mrf.mxu2 }
 0x577   : > { %v3779_v45 = vadd.f32 %v3778_v22, %v3425_v62  ;;  %v5711_v62 = vmul.f32 %v13081_v19, %v16290_v34  ;;  %v2696_v19 = vld [vmem:[%s12343_s20 + $0x650] sm:$0xff] }
 0x578   : > { %v4484_v7 = vpop.f32.mrf.mxu3 }
 0x579   : > { %v4132_v61 = vadd.f32 %v4131_v60, %v3779_v45  ;;  %v5935_v45 = vadd.f32 1e-05, %v5711_v62 }
 0x57a   : > { %5439 = vadd.xlane.f32.xlu2 %v5438_v38  ;;  %v6139_v38 = vsub.f32 1.5, %v6138_v26  ;;  %v3776_v26 = vadd.f32 %v13250_v17, %v13252_v36  ;;  %v2694_v17 = vld [vmem:[%s12343_s20 + $0x640] sm:$0xff]  ;;  %v2695_v36 = vld [vmem:[%s12343_s20 + $0x648] sm:$0xff] }
 0x57b   : > { %v13272_v55 = vadd.f32 %v4484_v7, %v4132_v61  ;;  %9191 = vrsqrt.f32 %v5935_v45  ;;  %v5056_v61 = vmul.f32 %v13083_v47, %v16290_v34  ;;  %4151 = vmatmul.f32.gmra.mxu2 %v2696_v19  ;;  %3445 = vmatmul.f32.gmra.mxu0 %v2694_v17  ;;  %vm6161_vm15 = vweird.f32 %v5935_v45  ;;  %v5823_v19 = vld [vmem:[%s12955_s17 + $0x60] sm:$0xff] }
 0x57c   : > { %v6140_v24 = vmul.f32 %v9188_v21, %v6139_v38  ;;  %v4129_v60 = vadd.f32 %v4128_v35, %v3776_v26  ;;  %v5822_v38 = vld [vmem:[%s12955_s17 + $0x58] sm:$0xff]  ;;  %3798 = vmatmul.f32.gmra.mxu1 %v2695_v36 }
 0x57d   : > { %v4820_v25 = vsel %vm358_vm0, %v13272_v55, 0.0  ;;  %v13297_v35 = vsub.f32 %v12855_v8, %v5056_v61 }
 0x57e   : > { %v13289_v7 = vadd.f32 %v4481_v23, %v4129_v60  ;;  %v5055_v23 = vmul.f32 %v13089_v51, %v16290_v34 }
 0x57f   : > { %16315 = vst [vmem:[#allocation43_spill] sm:$0xff] %v13297_v35 }
 0x580   : > { %v13308_v8 = vsub.f32 %v12860_v2, %v5055_v23 }
 0x581   : > { %v9192_v47 = vpop.eup %9191 }
 0x582   : > { %4815 = vadd.xlane.f32.xlu2 %v4814_v5  ;;  %v6144_v5 = vsel %vm6143_vm10, %v9188_v21, %v6140_v24  ;;  %v2697_v24 = vld [vmem:[%s12343_s20 + $0x658] sm:$0xff]  ;;  %16316 = vst [vmem:[#allocation78_spill] sm:$0xff] %v13308_v8  ;;  %v5279_v51 = vmul.f32 %v13308_v8, %v13308_v8  ;;  %vm6162_vm14 = vweird.f32 %v9192_v47 }
 0x583   : > { %v7165_v14 = vmul.f32 %v6144_v5, %v5821_v11  ;;  %8975 = vmatmul.msk.f32.gmra.mxu3 %vm2942_vm5, %v2697_v24  ;;  %v6156_v11 = vmul.f32 %v9192_v47, %v5935_v45  ;;  %v5280_v5 = vmul.f32 %v13297_v35, %v13297_v35  ;;  %vm6163_vm1 = vmor %vm6161_vm15, %vm6162_vm14  ;;  %v5713_v45 = vmul.f32 %v13085_v1, %v16290_v34  ;;  %v2700_v1 = vld [vmem:[%s12343_s20 + $0x670] sm:$0xff]  ;;  %v2927_v35 = vld [vmem:[%s12343_s20 + $0xd88] sm:$0xff] }
 0x584   : > { %4154 = vmatmul.f32.gmra.mxu2 %v2700_v1 }
 0x585   : > { %v6157_v53 = vmul.f32 %v9192_v47, %v6156_v11  ;;  %v5450_v41 = vsel %vm358_vm0, %v5280_v5, 0.0 }
 0x58a   : > { %7314 = vperm.xlu0 %9052, %v7164_v42   ;;  %v6146_v42 = vmul.f32 %v9190_v13, %v5934_v0  ;;  %v4817_v0 = vsel %vm358_vm0, %v13289_v7, 0.0 }
 0x58c   : > { %v6147_v20 = vmul.f32 %v9190_v13, %v6146_v42  ;;  %v4134_v42 = vpop.f32.mrf.mxu2 }
 0x58e   : > { %v6148_v21 = vmul.f32 0.5, %v6147_v20  ;;  %v6158_v20 = vmul.f32 0.5, %v6157_v53 }
 0x590   : > { %v6149_v22 = vsub.f32 1.5, %v6148_v21  ;;  %v6159_v62 = vsub.f32 1.5, %v6158_v20  ;;  %v2701_v20 = vld [vmem:[%s12343_s20 + $0x678] sm:$0xff] }
 0x591   : > { %8976 = vmatmul.msk.f32.gmra.mxu3 %vm2942_vm5, %v2701_v20  ;;  %v2707_v20 = vld [vmem:[%s12343_s20 + $0x6a8] sm:$0xff] }
 0x592   : > { %5445 = vadd.xlane.f32.xlu1 %v5444_v6  ;;  %v6150_v63 = vmul.f32 %v9190_v13, %v6149_v22  ;;  %v5447_v22 = vsel %vm358_vm0, %v5279_v51, 0.0 }
 0x594   : > { %v6154_v44 = vsel %vm6153_vm13, %v9190_v13, %v6150_v63  ;;  %v5712_v13 = vmul.f32 %v13073_v50, %v16290_v34  ;;  %v4487_v50 = vpop.f32.mrf.mxu3  ;;  %v6160_v63 = vmul.f32 %v9192_v47, %v6159_v62 }
 0x595   : > { %v7166_v6 = vmul.f32 %v6154_v44, %v5822_v38 }
 0x596   : > { %v5936_v32 = vadd.f32 1e-05, %v5712_v13  ;;  %v6164_v24 = vsel %vm6163_vm1, %v9192_v47, %v6160_v63  ;;  %v2699_v63 = vld [vmem:[%s12343_s20 + $0x668] sm:$0xff] }
 0x597   : > { %v7167_v36 = vmul.f32 %v6164_v24, %v5823_v19  ;;  %3801 = vmatmul.f32.gmra.mxu1 %v2699_v63  ;;  %v2704_v19 = vld [vmem:[%s12343_s20 + $0x690] sm:$0xff]  ;;  %v2705_v24 = vld [vmem:[%s12343_s20 + $0x698] sm:$0xff] }
 0x598   : > { %9193 = vrsqrt.f32 %v5936_v32  ;;  %vm6171_vm3 = vweird.f32 %v5936_v32  ;;  %4157 = vmatmul.f32.gmra.mxu2 %v2704_v19 }
 0x599   : > { %8977 = vmatmul.msk.f32.gmra.mxu3 %vm2942_vm5, %v2705_v24 }
 0x59a   : > { %7319 = vperm.xlu2 %9051, %v7165_v14   ;;  %4821 = vadd.xlane.f32.xlu1 %v4820_v25  ;;  %v3781_v25 = vpop.f32.mrf.mxu1 }
 0x59e   : > { %v9194_v26 = vpop.eup %9193 }
 0x59f   : > { %v6166_v61 = vmul.f32 %v9194_v26, %v5936_v32  ;;  %vm6172_vm2 = vweird.f32 %v9194_v26  ;;  %v2698_v32 = vld [vmem:[%s12343_s20 + $0x660] sm:$0xff] }
 0x5a0   : > { %vm6173_vm4 = vmor %vm6171_vm3, %vm6172_vm2  ;;  %3448 = vmatmul.f32.gmra.mxu0 %v2698_v32 }
 0x5a1   : > { %v6167_v17 = vmul.f32 %v9194_v26, %v6166_v61 }
 0x5a3   : > { %v3428_v14 = vpop.f32.mrf.mxu0  ;;  %v6168_v11 = vmul.f32 0.5, %v6167_v17 }
 0x5a4   : > { %v3782_v52 = vadd.f32 %v3781_v25, %v3428_v14 }
 0x5a5   : > { %v3784_v44 = vpop.f32.mrf.mxu1  ;;  %v6169_v47 = vsub.f32 1.5, %v6168_v11  ;;  %v5714_v11 = vmul.f32 %v13105_v27, %v16290_v34  ;;  %v5825_v27 = vld [vmem:[%s12955_s17 + $0x70] sm:$0xff] }
 0x5a6   : > { %v4135_v21 = vadd.f32 %v4134_v42, %v3782_v52 }
 0x5a7   : > { %v6170_v52 = vmul.f32 %v9194_v26, %v6169_v47 }
 0x5a8   : > { %v13314_v2 = vadd.f32 %v4487_v50, %v4135_v21  ;;  %v5824_v50 = vld [vmem:[%s12955_s17 + $0x68] sm:$0xff] }
 0x5aa   : > { %v4823_v60 = vsel %vm358_vm0, %v13314_v2, 0.0  ;;  %v4490_v23 = vpop.f32.mrf.mxu3 }
 0x5ab   : > { %v3431_v38 = vpop.f32.mrf.mxu0 }
 0x5b3   : > { %7324 = vperm.xlu1 %9050, %v7166_v6   ;;  %v4137_v6 = vpop.f32.mrf.mxu2  ;;  %v3434_v13 = vpop.f32.mrf.mxu0 }
 0x5b4   : > { %4818 = vadd.xlane.f32.xlu0 %v4817_v0  ;;  %v5057_v0 = vmul.f32 %v13091_v54, %v16290_v34 }
 0x5b6   : > { %v13324_v25 = vsub.f32 %v12869_v28, %v5057_v0 }
 0x5b8   : > { %v3787_v5 = vpop.f32.mrf.mxu1  ;;  %16317 = vst [vmem:[#allocation36_spill] sm:$0xff] %v13324_v25  ;;  %v5281_v54 = vmul.f32 %v13324_v25, %v13324_v25 }
 0x5b9   : > { %v3788_v14 = vadd.f32 %v3787_v5, %v3434_v13  ;;  %v3785_v13 = vadd.f32 %v3784_v44, %v3431_v38 }
 0x5ba   : > { %v5453_v28 = vsel %vm358_vm0, %v5281_v54, 0.0  ;;  %v5059_v54 = vmul.f32 %v13098_v56, %v16290_v34 }
 0x5bc   : > { %5451 = vadd.xlane.f32.xlu0 %v5450_v41  ;;  %v5937_v41 = vadd.f32 1e-05, %v5713_v45  ;;  %v5938_v45 = vadd.f32 1e-05, %v5714_v11  ;;  %v3437_v63 = vpop.f32.mrf.mxu0 }
 0x5bd   : > { %v4493_v51 = vpop.f32.mrf.mxu3 }
 0x5be   : > { %9195 = vrsqrt.f32 %v5937_v41  ;;  %vm6181_vm7 = vweird.f32 %v5937_v41  ;;  %vm6191_vm10 = vweird.f32 %v5938_v45 }
 0x5bf   : > { %9197 = vrsqrt.f32 %v5938_v45 }
 0x5c0   : > { %v3790_v32 = vpop.f32.mrf.mxu1 }
 0x5c1   : > { %v3791_v19 = vadd.f32 %v3790_v32, %v3437_v63  ;;  %v2712_v32 = vld [vmem:[%s12343_s20 + $0x6d0] sm:$0xff] }
 0x5c3   : > { %5448 = vadd.xlane.f32.xlu2 %v5447_v22  ;;  %v6174_v22 = vsel %vm6173_vm4, %v9194_v26, %v6170_v52  ;;  %v2702_v26 = vld [vmem:[%s12343_s20 + $0x680] sm:$0xff] }
 0x5c4   : > { %v7168_v62 = vmul.f32 %v6174_v22, %v5824_v50  ;;  %3451 = vmatmul.f32.gmra.mxu0 %v2702_v26 }
 0x5cb   : > { %4824 = vadd.xlane.f32.xlu2 %v4823_v60  ;;  %v4140_v53 = vpop.f32.mrf.mxu2  ;;  %v9196_v60 = vpop.eup %9195 }
 0x5cc   : > { %v4141_v42 = vadd.f32 %v4140_v53, %v3788_v14  ;;  %v6176_v17 = vmul.f32 %v9196_v60, %v5937_v41  ;;  %v4138_v14 = vadd.f32 %v4137_v6, %v3785_v13  ;;  %vm6182_vm6 = vweird.f32 %v9196_v60  ;;  %v2708_v6 = vld [vmem:[%s12343_s20 + $0x6b0] sm:$0xff]  ;;  %v9198_v1 = vpop.eup %9197 }
 0x5cd   : > { %vm6183_vm8 = vmor %vm6181_vm7, %vm6182_vm6  ;;  %4160 = vmatmul.f32.gmra.mxu2 %v2708_v6  ;;  %v5058_v41 = vmul.f32 %v13140_v46, %v16290_v34  ;;  %vm6192_vm9 = vweird.f32 %v9198_v1 }
 0x5ce   : > { %v13331_v21 = vadd.f32 %v4493_v51, %v4141_v42  ;;  %v6177_v0 = vmul.f32 %v9196_v60, %v6176_v17  ;;  %v13348_v52 = vadd.f32 %v4490_v23, %v4138_v14  ;;  %v13352_v42 = vsub.f32 %v12895_v10, %v5059_v54  ;;  %v2709_v51 = vld [vmem:[%s12343_s20 + $0x6b8] sm:$0xff]  ;;  %vm6193_vm11 = vmor %vm6191_vm10, %vm6192_vm9 }
 0x5cf   : > { %8978 = vmatmul.msk.f32.gmra.mxu3 %vm2942_vm5, %v2709_v51  ;;  %v6186_v23 = vmul.f32 %v9198_v1, %v5938_v45  ;;  %v5060_v45 = vmul.f32 %v13144_v48, %v16290_v34 }
 0x5d0   : > { %7329 = vperm.xlu0 %9052, %v7167_v36   ;;  %v4829_v61 = vsel %vm358_vm0, %v13331_v21, 0.0  ;;  %v2703_v36 = vld [vmem:[%s12343_s20 + $0x688] sm:$0xff]  ;;  %v6178_v5 = vmul.f32 0.5, %v6177_v0  ;;  %16318 = vst [vmem:[#allocation68_spill] sm:$0xff] %v13352_v42  ;;  %v4826_v38 = vsel %vm358_vm0, %v13348_v52, 0.0  ;;  %v5283_v10 = vmul.f32 %v13352_v42, %v13352_v42  ;;  %v4496_v0 = vpop.f32.mrf.mxu3 }
 0x5d1   : > { %3804 = vmatmul.f32.gmra.mxu1 %v2703_v36  ;;  %v6187_v50 = vmul.f32 %v9198_v1, %v6186_v23 }
 0x5d2   : > { %v6179_v47 = vsub.f32 1.5, %v6178_v5  ;;  %v5459_v22 = vsel %vm358_vm0, %v5283_v10, 0.0  ;;  %v13384_v10 = vsub.f32 %v12910_v15, %v5060_v45 }
 0x5d3   : > { %v4143_v17 = vpop.f32.mrf.mxu2 }
 0x5d4   : > { %v6180_v53 = vmul.f32 %v9196_v60, %v6179_v47  ;;  %v4144_v36 = vadd.f32 %v4143_v17, %v3791_v19  ;;  %v5826_v47 = vld [vmem:[%s12955_s17 + $0x78] sm:$0xff]  ;;  %16320 = vst [vmem:[#allocation76_spill] sm:$0xff] %v13384_v10  ;;  %v5284_v48 = vmul.f32 %v13384_v10, %v13384_v10 }
 0x5d5   : > { %4163 = vmatmul.f32.gmra.mxu2 %v2712_v32 }
 0x5d6   : > { %v6184_v44 = vsel %vm6183_vm8, %v9196_v60, %v6180_v53  ;;  %v13369_v60 = vsub.f32 %v12906_v3, %v5058_v41  ;;  %v13374_v5 = vadd.f32 %v4496_v0, %v4144_v36  ;;  %v5462_v15 = vsel %vm358_vm0, %v5284_v48, 0.0  ;;  %v2710_v36 = vld [vmem:[%s12343_s20 + $0x6c0] sm:$0xff]  ;;  %v2711_v0 = vld [vmem:[%s12343_s20 + $0x6c8] sm:$0xff] }
 0x5d7   : > { %v7169_v56 = vmul.f32 %v6184_v44, %v5825_v27  ;;  %v3440_v27 = vpop.f32.mrf.mxu0  ;;  %v5828_v48 = vld [vmem:[%s12955_s17 + $0x88] sm:$0xff] }
 0x5d8   : > { %16319 = vst [vmem:[#allocation38_spill] sm:$0xff] %v13369_v60  ;;  %v5282_v46 = vmul.f32 %v13369_v60, %v13369_v60  ;;  %v4832_v13 = vsel %vm358_vm0, %v13374_v5, 0.0 }
 0x5d9   : > { %3807 = vmatmul.f32.gmra.mxu1 %v2707_v20 }
 0x5db   : > { %v4146_v6 = vpop.f32.mrf.mxu2 }
 0x5dd   : > { %5454 = vadd.xlane.f32.xlu1 %v5453_v28  ;;  %v2706_v28 = vld [vmem:[%s12343_s20 + $0x6a0] sm:$0xff] }
 0x5de   : > { %3454 = vmatmul.f32.gmra.mxu0 %v2706_v28  ;;  %v4499_v28 = vpop.f32.mrf.mxu3 }
 0x5e1   : > { %3810 = vmatmul.f32.gmra.mxu1 %v2711_v0 }
 0x5e3   : > { %7334 = vperm.xlu2 %9051, %v7168_v62   ;;  %v5715_v62 = vmul.f32 %v13087_v9, %v16290_v34  ;;  %v5456_v9 = vsel %vm358_vm0, %v5282_v46, 0.0 }
 0x5e5   : > { %4830 = vadd.xlane.f32.xlu1 %v4829_v61  ;;  %v6188_v61 = vmul.f32 0.5, %v6187_v50  ;;  %v5939_v24 = vadd.f32 1e-05, %v5715_v62 }
 0x5e6   : > { %v4502_v63 = vpop.f32.mrf.mxu3  ;;  %3457 = vmatmul.f32.gmra.mxu0 %v2710_v36 }
 0x5e7   : > { %v6189_v26 = vsub.f32 1.5, %v6188_v61  ;;  %9199 = vrsqrt.f32 %v5939_v24  ;;  %vm6201_vm13 = vweird.f32 %v5939_v24  ;;  %v5827_v61 = vld [vmem:[%s12955_s17 + $0x80] sm:$0xff] }
 0x5e9   : > { %v6190_v11 = vmul.f32 %v9198_v1, %v6189_v26  ;;  %v2713_v26 = vld [vmem:[%s12343_s20 + $0x6d8] sm:$0xff] }
 0x5ea   : > { %8979 = vmatmul.msk.f32.gmra.mxu3 %vm2942_vm5, %v2713_v26 }
 0x5eb   : > { %v6194_v14 = vsel %vm6193_vm11, %v9198_v1, %v6190_v11  ;;  %v5716_v1 = vmul.f32 %v13108_v18, %v16290_v34 }
 0x5ec   : > { %v7170_v54 = vmul.f32 %v6194_v14, %v5826_v47  ;;  %v2717_v47 = vld [vmem:[%s12343_s20 + $0x6f8] sm:$0xff]  ;;  %v2714_v14 = vld [vmem:[%s12343_s20 + $0x6e0] sm:$0xff] }
 0x5ed   : > { %v9200_v3 = vpop.eup %9199  ;;  %v5940_v62 = vadd.f32 1e-05, %v5716_v1 }
 0x5ee   : > { %v6196_v53 = vmul.f32 %v9200_v3, %v5939_v24  ;;  %vm6202_vm12 = vweird.f32 %v9200_v3  ;;  %v2716_v24 = vld [vmem:[%s12343_s20 + $0x6f0] sm:$0xff]  ;;  %3460 = vmatmul.f32.gmra.mxu0 %v2714_v14 }
 0x5ef   : > { %vm6203_vm14 = vmor %vm6201_vm13, %vm6202_vm12  ;;  %9201 = vrsqrt.f32 %v5940_v62  ;;  %4166 = vmatmul.f32.gmra.mxu2 %v2716_v24  ;;  %vm6211_vm1 = vweird.f32 %v5940_v62 }
 0x5f0   : > { %v6197_v44 = vmul.f32 %v9200_v3, %v6196_v53  ;;  %v2715_v53 = vld [vmem:[%s12343_s20 + $0x6e8] sm:$0xff] }
 0x5f1   : > { %3813 = vmatmul.f32.gmra.mxu1 %v2715_v53 }
 0x5f2   : > { %v6198_v51 = vmul.f32 0.5, %v6197_v44  ;;  %8980 = vmatmul.msk.f32.gmra.mxu3 %vm2942_vm5, %v2717_v47 }
 0x5f4   : > { %v6199_v23 = vsub.f32 1.5, %v6198_v51 }
 0x5f6   : > { %v4149_v50 = vpop.f32.mrf.mxu2 }
 0x5fa   : > { %4827 = vadd.xlane.f32.xlu0 %v4826_v38  ;;  %v3793_v38 = vpop.f32.mrf.mxu1 }
 0x5fb   : > { %v3794_v44 = vadd.f32 %v3793_v38, %v3440_v27 }
 0x5fe   : > { %7339 = vperm.xlu1 %9050, %v7169_v56   ;;  %v3443_v56 = vpop.f32.mrf.mxu0  ;;  %v4152_v14 = vpop.f32.mrf.mxu2 }
 0x602   : > { %5460 = vadd.xlane.f32.xlu0 %v5459_v22  ;;  %v3796_v20 = vpop.f32.mrf.mxu1  ;;  %v6200_v22 = vmul.f32 %v9200_v3, %v6199_v23 }
 0x603   : > { %v3797_v41 = vadd.f32 %v3796_v20, %v3443_v56  ;;  %v4147_v20 = vadd.f32 %v4146_v6, %v3794_v44  ;;  %v5425_v44 = vpop.xlane.xlu0 %5424 }
 0x604   : > { %v6204_v19 = vsel %vm6203_vm14, %v9200_v3, %v6200_v22  ;;  %v5422_v3 = vpop.xlane.xlu2 %5421 }
 0x605   : > { %v4150_v18 = vadd.f32 %v4149_v50, %v3797_v41  ;;  %v7171_v46 = vmul.f32 %v6204_v19, %v5827_v61  ;;  %v13407_v41 = vadd.f32 %v4499_v28, %v4147_v20  ;;  %v5718_v36 = vmul.f32 %v5422_v3, %v16290_v34  ;;  %v5829_v20 = vld [vmem:[%s12955_s17 + $0x90] sm:$0xff] }
 0x606   : > { %v3446_v24 = vpop.f32.mrf.mxu0 }
 0x607   : > { %v13391_v17 = vadd.f32 %v4502_v63, %v4150_v18  ;;  %v4835_v38 = vsel %vm358_vm0, %v13407_v41, 0.0  ;;  %v2720_v18 = vld [vmem:[%s12343_s20 + $0x710] sm:$0xff]  ;;  %v2721_v63 = vld [vmem:[%s12343_s20 + $0x718] sm:$0xff]  ;;  %v5942_v47 = vadd.f32 1e-05, %v5718_v36 }
 0x608   : > { %4169 = vmatmul.f32.gmra.mxu2 %v2720_v18  ;;  %8981 = vmatmul.msk.f32.gmra.mxu3 %vm2942_vm5, %v2721_v63 }
 0x609   : > { %v4838_v11 = vsel %vm358_vm0, %v13391_v17, 0.0  ;;  %vm6231_vm8 = vweird.f32 %v5942_v47 }
 0x60a   : > { %v3799_v0 = vpop.f32.mrf.mxu1 }
 0x60c   : > { %5457 = vadd.xlane.f32.xlu2 %v5456_v9  ;;  %v9202_v9 = vpop.eup %9201  ;;  %v4798_v23 = vpop.xlane.xlu2 %4797 }
 0x60d   : > { %v5062_v1 = vmul.f32 %v4798_v23, %v16290_v34  ;;  %vm6212_vm15 = vweird.f32 %v9202_v9 }
 0x60e   : > { %vm6213_vm2 = vmor %vm6211_vm1, %vm6212_vm15 }
 0x60f   : > { %v13410_v27 = vsub.f32 %v13010_v31, %v5062_v1  ;;  %v2718_v31 = vld [vmem:[%s12343_s20 + $0x700] sm:$0xff] }
 0x610   : > { %3463 = vmatmul.f32.gmra.mxu0 %v2718_v31 }
 0x611   : > { %16321 = vst [vmem:[#allocation46_spill] sm:$0xff] %v13410_v27  ;;  %v5286_v28 = vmul.f32 %v13410_v27, %v13410_v27 }
 0x613   : > { %v5468_v19 = vsel %vm358_vm0, %v5286_v28, 0.0 }
 0x614   : > { %4833 = vadd.xlane.f32.xlu2 %v4832_v13  ;;  %v6206_v13 = vmul.f32 %v9202_v9, %v5940_v62  ;;  %v3802_v28 = vpop.f32.mrf.mxu1 }
 0x616   : > { %7344 = vperm.xlu0 %9052, %v7170_v54   ;;  %v5717_v54 = vmul.f32 %v13160_v57, %v16290_v34  ;;  %v6207_v51 = vmul.f32 %v9202_v9, %v6206_v13 }
 0x618   : > { %v5941_v45 = vadd.f32 1e-05, %v5717_v54  ;;  %v6208_v56 = vmul.f32 0.5, %v6207_v51  ;;  %v4505_v51 = vpop.f32.mrf.mxu3 }
 0x61a   : > { %9203 = vrsqrt.f32 %v5941_v45  ;;  %v6209_v57 = vsub.f32 1.5, %v6208_v56  ;;  %vm6221_vm4 = vweird.f32 %v5941_v45 }
 0x61b   : > { %9205 = vrsqrt.f32 %v5942_v47 }
 0x61c   : > { %v6210_v50 = vmul.f32 %v9202_v9, %v6209_v57 }
 0x61e   : > { %v6214_v32 = vsel %vm6213_vm2, %v9202_v9, %v6210_v50 }
 0x61f   : > { %v7172_v62 = vmul.f32 %v6214_v32, %v5828_v48  ;;  %v4155_v32 = vpop.f32.mrf.mxu2 }
 0x620   : > { %v9204_v6 = vpop.eup %9203  ;;  %v4508_v31 = vpop.f32.mrf.mxu3 }
 0x621   : > { %v6216_v22 = vmul.f32 %v9204_v6, %v5941_v45  ;;  %vm6222_vm3 = vweird.f32 %v9204_v6  ;;  %v9206_v23 = vpop.eup %9205 }
 0x622   : > { %vm6223_vm6 = vmor %vm6221_vm4, %vm6222_vm3  ;;  %v6226_v50 = vmul.f32 %v9206_v23, %v5942_v47  ;;  %vm6232_vm7 = vweird.f32 %v9206_v23  ;;  %v2722_v47 = vld [vmem:[%s12343_s20 + $0x720] sm:$0xff] }
 0x623   : > { %v6217_v61 = vmul.f32 %v9204_v6, %v6216_v22  ;;  %v3449_v22 = vpop.f32.mrf.mxu0  ;;  %vm6233_vm9 = vmor %vm6231_vm8, %vm6232_vm7  ;;  %3466 = vmatmul.f32.gmra.mxu0 %v2722_v47  ;;  %v2732_v47 = vld [vmem:[%s12343_s20 + $0x770] sm:$0xff] }
 0x624   : > { %v6227_v48 = vmul.f32 %v9206_v23, %v6226_v50 }
 0x625   : > { %v6218_v26 = vmul.f32 0.5, %v6217_v61 }
 0x626   : > { %v6228_v18 = vmul.f32 0.5, %v6227_v48  ;;  %v3803_v48 = vadd.f32 %v3802_v28, %v3449_v22 }
 0x627   : > { %v6219_v13 = vsub.f32 1.5, %v6218_v26  ;;  %v13444_v26 = vpop.permute.xlu2 %7289 }
 0x628   : > { %5463 = vadd.xlane.f32.xlu1 %v5462_v15  ;;  %v2719_v15 = vld [vmem:[%s12343_s20 + $0x708] sm:$0xff] }
 0x629   : > { %3816 = vmatmul.f32.gmra.mxu1 %v2719_v15 }
 0x62c   : > { %7349 = vperm.xlu2 %9051, %v7171_v46   ;;  %v5061_v46 = vmul.f32 %v13186_v30, %v16290_v34  ;;  %v6220_v30 = vmul.f32 %v9204_v6, %v6219_v13 }
 0x62e   : > { %v13427_v9 = vsub.f32 %v12938_v16, %v5061_v46  ;;  %v6224_v56 = vsel %vm6223_vm6, %v9204_v6, %v6220_v30  ;;  %v6229_v6 = vsub.f32 1.5, %v6228_v18  ;;  %v2729_v18 = vld [vmem:[%s12343_s20 + $0x758] sm:$0xff] }
 0x62f   : > { %v7173_v1 = vmul.f32 %v6224_v56, %v5829_v20  ;;  %v2723_v56 = vld [vmem:[%s12343_s20 + $0x728] sm:$0xff] }
 0x630   : > { %4839 = vadd.xlane.f32.xlu1 %v4838_v11  ;;  %16322 = vst [vmem:[#allocation39_spill] sm:$0xff] %v13427_v9  ;;  %v3800_v11 = vadd.f32 %v3799_v0, %v3446_v24  ;;  %v5285_v53 = vmul.f32 %v13427_v9, %v13427_v9  ;;  %v6230_v46 = vmul.f32 %v9206_v23, %v6229_v6  ;;  %v4158_v0 = vpop.f32.mrf.mxu2 }
 0x631   : > { %3819 = vmatmul.f32.gmra.mxu1 %v2723_v56  ;;  %v2733_v56 = vld [vmem:[%s12343_s20 + $0x778] sm:$0xff] }
 0x632   : > { %v4153_v54 = vadd.f32 %v4152_v14, %v3800_v11  ;;  %v5465_v3 = vsel %vm358_vm0, %v5285_v53, 0.0  ;;  %v5830_v14 = vld [vmem:[%s12955_s17 + $0x98] sm:$0xff]  ;;  %v4511_v53 = vpop.f32.mrf.mxu3 }
 0x634   : > { %v13432_v16 = vadd.f32 %v4505_v51, %v4153_v54  ;;  %v2725_v51 = vld [vmem:[%s12343_s20 + $0x738] sm:$0xff] }
 0x635   : > { %8982 = vmatmul.msk.f32.gmra.mxu3 %vm2942_vm5, %v2725_v51 }
 0x636   : > { %v4841_v57 = vsel %vm358_vm0, %v13432_v16, 0.0 }
 0x63d   : > { %8983 = vmatmul.msk.f32.gmra.mxu3 %vm2942_vm5, %v2729_v18 }
 0x640   : > { %4836 = vadd.xlane.f32.xlu0 %v4835_v38  ;;  %v13437_v38 = vpop.permute.xlu0 %7284 }
 0x641   : > { %v3452_v61 = vpop.f32.mrf.mxu0 }
 0x645   : > { %8984 = vmatmul.msk.f32.gmra.mxu3 %vm2942_vm5, %v2733_v56 }
 0x648   : > { %5469 = vadd.xlane.f32.xlu0 %v5468_v19  ;;  %v4801_v45 = vpop.xlane.xlu0 %4800  ;;  %v5719_v19 = vmul.f32 %v5425_v44, %v16290_v34  ;;  %v2724_v44 = vld [vmem:[%s12343_s20 + $0x730] sm:$0xff] }
 0x649   : > { %7354 = vperm.xlu1 %9050, %v7172_v62   ;;  %v5063_v63 = vmul.f32 %v4801_v45, %v16290_v34  ;;  %4172 = vmatmul.f32.gmra.mxu2 %v2724_v44  ;;  %v2728_v45 = vld [vmem:[%s12343_s20 + $0x750] sm:$0xff]  ;;  %v5831_v44 = vld [vmem:[%s12955_s17 + $0xa0] sm:$0xff] }
 0x64a   : > { %v5943_v24 = vadd.f32 1e-05, %v5719_v19  ;;  %v4156_v19 = vadd.f32 %v4155_v32, %v3803_v48 }
 0x64b   : > { %v13442_v62 = vsub.f32 %v13114_v29, %v5063_v63  ;;  %v6234_v29 = vsel %vm6233_vm9, %v9206_v23, %v6230_v46  ;;  %v5428_v23 = vpop.xlane.xlu1 %5427  ;;  %v2726_v63 = vld [vmem:[%s12343_s20 + $0x740] sm:$0xff] }
 0x64c   : > { %9207 = vrsqrt.f32 %v5943_v24  ;;  %v7174_v30 = vmul.f32 %v6234_v29, %v5830_v14  ;;  %3469 = vmatmul.f32.gmra.mxu0 %v2726_v63  ;;  %vm6241_vm11 = vweird.f32 %v5943_v24 }
 0x64d   : > { %16323 = vst [vmem:[#allocation71_spill] sm:$0xff] %v13442_v62  ;;  %v5287_v11 = vmul.f32 %v13442_v62, %v13442_v62 }
 0x64e   : > { %v3805_v15 = vpop.f32.mrf.mxu1 }
 0x64f   : > { %v3806_v36 = vadd.f32 %v3805_v15, %v3452_v61  ;;  %v5471_v54 = vsel %vm358_vm0, %v5287_v11, 0.0  ;;  %v2727_v15 = vld [vmem:[%s12343_s20 + $0x748] sm:$0xff]  ;;  %v13466_v11 = vadd.f32 %v4508_v31, %v4156_v19 }
 0x650   : > { %3822 = vmatmul.f32.gmra.mxu1 %v2727_v15 }
 0x651   : > { %v4159_v13 = vadd.f32 %v4158_v0, %v3806_v36  ;;  %4175 = vmatmul.f32.gmra.mxu2 %v2728_v45 }
 0x653   : > { %v13453_v20 = vadd.f32 %v4511_v53, %v4159_v13  ;;  %v4844_v13 = vsel %vm358_vm0, %v13466_v11, 0.0 }
 0x655   : > { %5466 = vadd.xlane.f32.xlu2 %v5465_v3  ;;  %v5431_v3 = vpop.xlane.xlu2 %5430  ;;  %v4847_v50 = vsel %vm358_vm0, %v13453_v20, 0.0 }
 0x656   : > { %v5721_v45 = vmul.f32 %v5431_v3, %v16290_v34  ;;  %v3808_v18 = vpop.f32.mrf.mxu1  ;;  %v4514_v3 = vpop.f32.mrf.mxu3 }
 0x658   : > { %v5945_v19 = vadd.f32 1e-05, %v5721_v45 }
 0x659   : > { %4178 = vmatmul.f32.gmra.mxu2 %v2732_v47 }
 0x65a   : > { %vm6261_vm2 = vweird.f32 %v5945_v19 }
 0x65b   : > { %v3455_v63 = vpop.f32.mrf.mxu0 }
 0x65c   : > { %7359 = vperm.xlu0 %9052, %v7173_v1   ;;  %v9208_v1 = vpop.eup %9207  ;;  %v3809_v15 = vadd.f32 %v3808_v18, %v3455_v63 }
 0x65d   : > { %4842 = vadd.xlane.f32.xlu2 %v4841_v57  ;;  %v5720_v57 = vmul.f32 %v5428_v23, %v16290_v34  ;;  %v6236_v6 = vmul.f32 %v9208_v1, %v5943_v24  ;;  %v4807_v46 = vpop.xlane.xlu2 %4806  ;;  %vm6242_vm10 = vweird.f32 %v9208_v1  ;;  %v2730_v23 = vld [vmem:[%s12343_s20 + $0x760] sm:$0xff] }
 0x65e   : > { %v5065_v0 = vmul.f32 %v4807_v46, %v16290_v34  ;;  %vm6243_vm12 = vmor %vm6241_vm11, %vm6242_vm10  ;;  %3472 = vmatmul.f32.gmra.mxu0 %v2730_v23  ;;  %v4161_v46 = vpop.f32.mrf.mxu2  ;;  %v3811_v47 = vpop.f32.mrf.mxu1 }
 0x65f   : > { %v5944_v61 = vadd.f32 1e-05, %v5720_v57  ;;  %v6237_v36 = vmul.f32 %v9208_v1, %v6236_v6  ;;  %v2731_v57 = vld [vmem:[%s12343_s20 + $0x768] sm:$0xff] }
 0x660   : > { %v13469_v28 = vsub.f32 %v13162_v40, %v5065_v0  ;;  %3825 = vmatmul.f32.gmra.mxu1 %v2731_v57 }
 0x661   : > { %9209 = vrsqrt.f32 %v5944_v61  ;;  %v6238_v22 = vmul.f32 0.5, %v6237_v36  ;;  %vm6251_vm14 = vweird.f32 %v5944_v61 }
 0x662   : > { %16324 = vst [vmem:[#allocation41_spill] sm:$0xff] %v13469_v28  ;;  %v5289_v53 = vmul.f32 %v13469_v28, %v13469_v28  ;;  %9211 = vrsqrt.f32 %v5945_v19 }
 0x663   : > { %v6239_v32 = vsub.f32 1.5, %v6238_v22  ;;  %v4162_v22 = vadd.f32 %v4161_v46, %v3809_v15 }
 0x664   : > { %v5477_v40 = vsel %vm358_vm0, %v5289_v53, 0.0  ;;  %v5434_v53 = vpop.xlane.xlu0 %5433 }
 0x665   : > { %v6240_v31 = vmul.f32 %v9208_v1, %v6239_v32  ;;  %v5832_v32 = vld [vmem:[%s12955_s17 + $0xa8] sm:$0xff] }
 0x667   : > { %v9210_v14 = vpop.eup %9209  ;;  %v6244_v51 = vsel %vm6243_vm12, %v9208_v1, %v6240_v31 }
 0x668   : > { %v6246_v29 = vmul.f32 %v9210_v14, %v5944_v61  ;;  %v7175_v24 = vmul.f32 %v6244_v51, %v5831_v44  ;;  %vm6252_vm13 = vweird.f32 %v9210_v14  ;;  %v3458_v51 = vpop.f32.mrf.mxu0 }
 0x669   : > { %vm6253_vm15 = vmor %vm6251_vm14, %vm6252_vm13 }
 0x66c   : > { %v13495_v61 = vpop.permute.xlu0 %7299 }
 0x66e   : > { %v3814_v18 = vpop.f32.mrf.mxu1 }
 0x670   : > { %v3461_v63 = vpop.f32.mrf.mxu0 }
 0x673   : > { %5472 = vadd.xlane.f32.xlu1 %v5471_v54  ;;  %v6247_v54 = vmul.f32 %v9210_v14, %v6246_v29 }
 0x674   : > { %v4810_v23 = vpop.xlane.xlu0 %4809 }
 0x675   : > { %7364 = vperm.xlu2 %9051, %v7174_v30   ;;  %v4804_v30 = vpop.xlane.xlu1 %4803 }
 0x676   : > { %v5064_v48 = vmul.f32 %v4804_v30, %v16290_v34 }
 0x678   : > { %v13485_v6 = vsub.f32 %v13060_v43, %v5064_v48  ;;  %v13491_v43 = vadd.f32 %v4514_v3, %v4162_v22  ;;  %v13498_v48 = vpop.permute.xlu2 %7304 }
 0x67a   : > { %16325 = vst [vmem:[#allocation79_spill] sm:$0xff] %v13485_v6  ;;  %v5288_v0 = vmul.f32 %v13485_v6, %v13485_v6  ;;  %v2748_v6 = vld [vmem:[%s12343_s20 + $0x7f0] sm:$0xff] }
 0x67b   : > { %4848 = vadd.xlane.f32.xlu1 %v4847_v50  ;;  %v6248_v50 = vmul.f32 0.5, %v6247_v54  ;;  %v9212_v54 = vpop.eup %9211 }
 0x67c   : > { %v6256_v30 = vmul.f32 %v9212_v54, %v5945_v19  ;;  %vm6262_vm1 = vweird.f32 %v9212_v54  ;;  %v2734_v19 = vld [vmem:[%s12343_s20 + $0x780] sm:$0xff] }
 0x67d   : > { %v6249_v1 = vsub.f32 1.5, %v6248_v50  ;;  %v5066_v50 = vmul.f32 %v4810_v23, %v16290_v34  ;;  %v13500_v45 = vpop.permute.xlu1 %7294  ;;  %vm6263_vm3 = vmor %vm6261_vm2, %vm6262_vm1  ;;  %v2735_v23 = vld [vmem:[%s12343_s20 + $0x788] sm:$0xff]  ;;  %3475 = vmatmul.f32.gmra.mxu0 %v2734_v19 }
 0x67e   : > { %v6257_v44 = vmul.f32 %v9212_v54, %v6256_v30  ;;  %3828 = vmatmul.f32.gmra.mxu1 %v2735_v23 }
 0x67f   : > { %v6250_v36 = vmul.f32 %v9210_v14, %v6249_v1  ;;  %v5722_v1 = vmul.f32 %v5434_v53, %v16290_v34  ;;  %v13504_v46 = vsub.f32 %v13223_v59, %v5066_v50  ;;  %v2736_v59 = vld [vmem:[%s12343_s20 + $0x790] sm:$0xff] }
 0x680   : > { %v6258_v56 = vmul.f32 0.5, %v6257_v44  ;;  %v2737_v44 = vld [vmem:[%s12343_s20 + $0x798] sm:$0xff]  ;;  %4181 = vmatmul.f32.gmra.mxu2 %v2736_v59 }
 0x681   : > { %v6254_v29 = vsel %vm6253_vm15, %v9210_v14, %v6250_v36  ;;  %v4164_v14 = vpop.f32.mrf.mxu2  ;;  %16326 = vst [vmem:[#allocation49_spill] sm:$0xff] %v13504_v46  ;;  %v3815_v36 = vadd.f32 %v3814_v18, %v3461_v63  ;;  %v5946_v22 = vadd.f32 1e-05, %v5722_v1  ;;  %v5290_v3 = vmul.f32 %v13504_v46, %v13504_v46  ;;  %8985 = vmatmul.msk.f32.gmra.mxu3 %vm2942_vm5, %v2737_v44  ;;  %v2740_v63 = vld [vmem:[%s12343_s20 + $0x7b0] sm:$0xff]  ;;  %v2741_v1 = vld [vmem:[%s12343_s20 + $0x7b8] sm:$0xff] }
 0x682   : > { %v7176_v31 = vmul.f32 %v6254_v29, %v5832_v32  ;;  %v6259_v57 = vsub.f32 1.5, %v6258_v56  ;;  %v13509_v29 = vpop.xlane.xlu2 %5439  ;;  %v2761_v46 = vld [vmem:[%s12343_s20 + $0x858] sm:$0xff] }
 0x683   : > { %9213 = vrsqrt.f32 %v5946_v22  ;;  %v5480_v56 = vsel %vm358_vm0, %v5290_v3, 0.0  ;;  %vm6271_vm6 = vweird.f32 %v5946_v22 }
 0x684   : > { %v6260_v15 = vmul.f32 %v9212_v54, %v6259_v57  ;;  %v3812_v57 = vadd.f32 %v3811_v47, %v3458_v51 }
 0x685   : > { %v5437_v53 = vpop.xlane.xlu1 %5436 }
 0x686   : > { %4845 = vadd.xlane.f32.xlu0 %v4844_v13  ;;  %v5474_v13 = vsel %vm358_vm0, %v5288_v0, 0.0  ;;  %v6264_v32 = vsel %vm6263_vm3, %v9212_v54, %v6260_v15  ;;  %v5723_v54 = vmul.f32 %v5437_v53, %v16290_v34 }
 0x688   : > { %v5947_v18 = vadd.f32 1e-05, %v5723_v54  ;;  %4184 = vmatmul.f32.gmra.mxu2 %v2740_v63 }
 0x689   : > { %v4167_v0 = vpop.f32.mrf.mxu2  ;;  %v9214_v15 = vpop.eup %9213  ;;  %8986 = vmatmul.msk.f32.gmra.mxu3 %vm2942_vm5, %v2741_v1  ;;  %v5834_v1 = vld [vmem:[%s12955_s17 + $0xb8] sm:$0xff] }
 0x68a   : > { %v4816_v3 = vpop.xlane.xlu2 %4815  ;;  %v6266_v53 = vmul.f32 %v9214_v15, %v5946_v22  ;;  %9215 = vrsqrt.f32 %v5947_v18  ;;  %vm6272_vm4 = vweird.f32 %v9214_v15  ;;  %vm6281_vm9 = vweird.f32 %v5947_v18 }
 0x68b   : > { %v5068_v51 = vmul.f32 %v4816_v3, %v16290_v34  ;;  %vm6273_vm7 = vmor %vm6271_vm6, %vm6272_vm4 }
 0x68e   : > { %5478 = vadd.xlane.f32.xlu0 %v5477_v40  ;;  %v4850_v40 = vsel %vm358_vm0, %v13491_v43, 0.0 }
 0x694   : > { %7369 = vperm.xlu1 %9050, %v7175_v24   ;;  %v4517_v24 = vpop.f32.mrf.mxu3 }
 0x69c   : > { %v4520_v30 = vpop.f32.mrf.mxu3 }
 0x69e   : > { %5475 = vadd.xlane.f32.xlu2 %v5474_v13  ;;  %v5833_v13 = vld [vmem:[%s12955_s17 + $0xb0] sm:$0xff] }
 0x6a2   : > { %7374 = vperm.xlu0 %9052, %v7176_v31   ;;  %v4168_v31 = vadd.f32 %v4167_v0, %v3815_v36  ;;  %v4165_v36 = vadd.f32 %v4164_v14, %v3812_v57  ;;  %v13531_v14 = vsub.f32 %v13248_v58, %v5068_v51  ;;  %v4813_v57 = vpop.xlane.xlu1 %4812  ;;  %v5724_v51 = vmul.f32 %v13509_v29, %v16290_v34 }
 0x6a3   : > { %v5067_v63 = vmul.f32 %v4813_v57, %v16290_v34 }
 0x6a4   : > { %v13518_v50 = vadd.f32 %v4520_v30, %v4168_v31  ;;  %v13528_v47 = vadd.f32 %v4517_v24, %v4165_v36  ;;  %v6267_v31 = vmul.f32 %v9214_v15, %v6266_v53  ;;  %16327 = vst [vmem:[#allocation42_spill] sm:$0xff] %v13531_v14  ;;  %v9216_v30 = vpop.eup %9215  ;;  %v5292_v19 = vmul.f32 %v13531_v14, %v13531_v14  ;;  %v2743_v53 = vld [vmem:[%s12343_s20 + $0x7c8] sm:$0xff] }
 0x6a5   : > { %v6276_v44 = vmul.f32 %v9216_v30, %v5947_v18  ;;  %v13548_v22 = vsub.f32 %v13201_v4, %v5067_v63  ;;  %vm6282_vm8 = vweird.f32 %v9216_v30  ;;  %v2799_v14 = vld [vmem:[%s12343_s20 + $0x988] sm:$0xff] }
 0x6a6   : > { %4851 = vadd.xlane.f32.xlu2 %v4850_v40  ;;  %v7177_v40 = vmul.f32 %v6264_v32, %v5833_v13  ;;  %v4856_v0 = vsel %vm358_vm0, %v13518_v50, 0.0  ;;  %v2738_v13 = vld [vmem:[%s12343_s20 + $0x7a0] sm:$0xff]  ;;  %v2739_v32 = vld [vmem:[%s12343_s20 + $0x7a8] sm:$0xff]  ;;  %v6268_v59 = vmul.f32 0.5, %v6267_v31  ;;  %v5486_v23 = vsel %vm358_vm0, %v5292_v19, 0.0  ;;  %vm6283_vm10 = vmor %vm6281_vm9, %vm6282_vm8 }
 0x6a7   : > { %3478 = vmatmul.f32.gmra.mxu0 %v2738_v13  ;;  %3831 = vmatmul.f32.gmra.mxu1 %v2739_v32  ;;  %v2745_v13 = vld [vmem:[%s12343_s20 + $0x7d8] sm:$0xff]  ;;  %v2742_v32 = vld [vmem:[%s12343_s20 + $0x7c0] sm:$0xff]  ;;  %16328 = vst [vmem:[#allocation74_spill] sm:$0xff] %v13548_v22  ;;  %v5948_v19 = vadd.f32 1e-05, %v5724_v51  ;;  %v5291_v29 = vmul.f32 %v13548_v22, %v13548_v22 }
 0x6a8   : > { %v6269_v24 = vsub.f32 1.5, %v6268_v59  ;;  %v3464_v59 = vpop.f32.mrf.mxu0  ;;  %8987 = vmatmul.msk.f32.gmra.mxu3 %vm2942_vm5, %v2745_v13 }
 0x6a9   : > { %9217 = vrsqrt.f32 %v5948_v19  ;;  %v5483_v4 = vsel %vm358_vm0, %v5291_v29, 0.0  ;;  %vm6291_vm12 = vweird.f32 %v5948_v19 }
 0x6aa   : > { %v6270_v58 = vmul.f32 %v9214_v15, %v6269_v24  ;;  %v4170_v24 = vpop.f32.mrf.mxu2  ;;  %v13560_v51 = vpop.permute.xlu1 %7309 }
 0x6ac   : > { %v6274_v36 = vsel %vm6273_vm7, %v9214_v15, %v6270_v58 }
 0x6ad   : > { %v7178_v31 = vmul.f32 %v6274_v36, %v5834_v1  ;;  %v5443_v1 = vpop.xlane.xlu0 %5442 }
 0x6af   : > { %3481 = vmatmul.f32.gmra.mxu0 %v2742_v32  ;;  %3834 = vmatmul.f32.gmra.mxu1 %v2743_v53  ;;  %v9218_v18 = vpop.eup %9217 }
 0x6b0   : > { %v3467_v32 = vpop.f32.mrf.mxu0  ;;  %vm6292_vm11 = vweird.f32 %v9218_v18 }
 0x6b1   : > { %vm6293_vm13 = vmor %vm6291_vm12, %vm6292_vm11 }
 0x6be   : > { %5481 = vadd.xlane.f32.xlu1 %v5480_v56  ;;  %7379 = vperm.xlu2 %9051, %v7177_v40   ;;  %v4853_v40 = vsel %vm358_vm0, %v13528_v47, 0.0  ;;  %v6277_v56 = vmul.f32 %v9216_v30, %v6276_v44 }
 0x6c0   : > { %v6278_v54 = vmul.f32 0.5, %v6277_v56  ;;  %v5835_v56 = vld [vmem:[%s12955_s17 + $0xc0] sm:$0xff] }
 0x6c2   : > { %v6279_v3 = vsub.f32 1.5, %v6278_v54  ;;  %v4523_v54 = vpop.f32.mrf.mxu3 }
 0x6c4   : > { %v6280_v15 = vmul.f32 %v9216_v30, %v6279_v3  ;;  %v13558_v3 = vpop.permute.xlu0 %7314 }
 0x6c6   : > { %4857 = vadd.xlane.f32.xlu1 %v4856_v0  ;;  %v2744_v0 = vld [vmem:[%s12343_s20 + $0x7d0] sm:$0xff] }
 0x6c7   : > { %4187 = vmatmul.f32.gmra.mxu2 %v2744_v0  ;;  %v6286_v0 = vmul.f32 %v9218_v18, %v5948_v19 }
 0x6cc   : > { %4854 = vadd.xlane.f32.xlu0 %v4853_v40  ;;  %v3817_v40 = vpop.f32.mrf.mxu1 }
 0x6cd   : > { %v3818_v44 = vadd.f32 %v3817_v40, %v3464_v59  ;;  %v4819_v40 = vpop.xlane.xlu0 %4818  ;;  %v4173_v59 = vpop.f32.mrf.mxu2 }
 0x6cf   : > { %v4171_v58 = vadd.f32 %v4170_v24, %v3818_v44  ;;  %v5069_v44 = vmul.f32 %v4819_v40, %v16290_v34  ;;  %v4526_v24 = vpop.f32.mrf.mxu3  ;;  %4190 = vmatmul.f32.gmra.mxu2 %v2748_v6  ;;  %v2753_v6 = vld [vmem:[%s12343_s20 + $0x818] sm:$0xff] }
 0x6d1   : > { %v13554_v63 = vadd.f32 %v4523_v54, %v4171_v58  ;;  %v5725_v58 = vmul.f32 %v5443_v1, %v16290_v34  ;;  %v13567_v54 = vsub.f32 %v13289_v7, %v5069_v44  ;;  %v2749_v7 = vld [vmem:[%s12343_s20 + $0x7f8] sm:$0xff]  ;;  %v2746_v44 = vld [vmem:[%s12343_s20 + $0x7e0] sm:$0xff] }
 0x6d2   : > { %8988 = vmatmul.msk.f32.gmra.mxu3 %vm2942_vm5, %v2749_v7  ;;  %3484 = vmatmul.f32.gmra.mxu0 %v2746_v44 }
 0x6d3   : > { %v4859_v36 = vsel %vm358_vm0, %v13554_v63, 0.0  ;;  %16329 = vst [vmem:[#allocation44_spill] sm:$0xff] %v13567_v54  ;;  %v5949_v40 = vadd.f32 1e-05, %v5725_v58  ;;  %v5293_v1 = vmul.f32 %v13567_v54, %v13567_v54 }
 0x6d4   : > { %5487 = vadd.xlane.f32.xlu0 %v5486_v23  ;;  %v6284_v23 = vsel %vm6283_vm10, %v9216_v30, %v6280_v15  ;;  %v6287_v30 = vmul.f32 %v9218_v18, %v6286_v0  ;;  %v3820_v13 = vpop.f32.mrf.mxu1 }
 0x6d5   : > { %v7179_v57 = vmul.f32 %v6284_v23, %v5835_v56  ;;  %v3470_v23 = vpop.f32.mrf.mxu0  ;;  %v3821_v19 = vadd.f32 %v3820_v13, %v3467_v32  ;;  %9219 = vrsqrt.f32 %v5949_v40  ;;  %v5489_v13 = vsel %vm358_vm0, %v5293_v1, 0.0 }
 0x6d6   : > { %v6288_v53 = vmul.f32 0.5, %v6287_v30  ;;  %vm6301_vm15 = vweird.f32 %v5949_v40 }
 0x6d7   : > { %v4174_v32 = vadd.f32 %v4173_v59, %v3821_v19 }
 0x6d8   : > { %v6289_v15 = vsub.f32 1.5, %v6288_v53  ;;  %v4176_v53 = vpop.f32.mrf.mxu2 }
 0x6da   : > { %v6290_v29 = vmul.f32 %v9218_v18, %v6289_v15  ;;  %8989 = vmatmul.msk.f32.gmra.mxu3 %vm2942_vm5, %v2753_v6 }
 0x6dc   : > { %v3823_v56 = vpop.f32.mrf.mxu1  ;;  %v6294_v0 = vsel %vm6293_vm13, %v9218_v18, %v6290_v29  ;;  %v2747_v18 = vld [vmem:[%s12343_s20 + $0x7e8] sm:$0xff]  ;;  %v4529_v29 = vpop.f32.mrf.mxu3 }
 0x6dd   : > { %v3824_v30 = vadd.f32 %v3823_v56, %v3470_v23  ;;  %3837 = vmatmul.f32.gmra.mxu1 %v2747_v18 }
 0x6df   : > { %7384 = vperm.xlu1 %9050, %v7178_v31   ;;  %v13562_v31 = vpop.permute.xlu2 %7319  ;;  %v4177_v9 = vadd.f32 %v4176_v53, %v3824_v30  ;;  %v2751_v30 = vld [vmem:[%s12343_s20 + $0x808] sm:$0xff]  ;;  %v9220_v53 = vpop.eup %9219 }
 0x6e0   : > { %vm6302_vm14 = vweird.f32 %v9220_v53 }
 0x6e1   : > { %v13581_v58 = vadd.f32 %v4529_v29, %v4177_v9  ;;  %v6296_v9 = vmul.f32 %v9220_v53, %v5949_v40  ;;  %vm13602_vm1 = vmor %vm6301_vm15, %vm6302_vm14 }
 0x6e3   : > { %v6297_v19 = vmul.f32 %v9220_v53, %v6296_v9 }
 0x6e4   : > { %v3826_v40 = vpop.f32.mrf.mxu1 }
 0x6e5   : > { %3840 = vmatmul.f32.gmra.mxu1 %v2751_v30  ;;  %v6298_v18 = vmul.f32 0.5, %v6297_v19  ;;  %v5837_v30 = vld [vmem:[%s12955_s17 + $0xd0] sm:$0xff]  ;;  %v2757_v19 = vld [vmem:[%s12343_s20 + $0x838] sm:$0xff] }
 0x6e6   : > { %8990 = vmatmul.msk.f32.gmra.mxu3 %vm2942_vm5, %v2757_v19 }
 0x6e7   : > { %5484 = vadd.xlane.f32.xlu2 %v5483_v4  ;;  %v13569_v4 = vpop.xlane.xlu2 %5448 }
 0x6e8   : > { %7389 = vperm.xlu0 %9052, %v7179_v57   ;;  %v5446_v57 = vpop.xlane.xlu1 %5445 }
 0x6e9   : > { %v5726_v15 = vmul.f32 %v5446_v57, %v16290_v34  ;;  %v2752_v57 = vld [vmem:[%s12343_s20 + $0x810] sm:$0xff] }
 0x6ea   : > { %4193 = vmatmul.f32.gmra.mxu2 %v2752_v57 }
 0x6eb   : > { %v5950_v56 = vadd.f32 1e-05, %v5726_v15  ;;  %v4865_v15 = vsel %vm358_vm0, %v13581_v58, 0.0 }
 0x6ed   : > { %9221 = vrsqrt.f32 %v5950_v56  ;;  %vm6311_vm3 = vweird.f32 %v5950_v56 }
 0x6ee   : > { %8991 = vmatmul.msk.f32.gmra.mxu3 %vm2942_vm5, %v2761_v46  ;;  %v2765_v46 = vld [vmem:[%s12343_s20 + $0x878] sm:$0xff] }
 0x6ef   : > { %4860 = vadd.xlane.f32.xlu2 %v4859_v36  ;;  %v5836_v36 = vld [vmem:[%s12955_s17 + $0xc8] sm:$0xff]  ;;  %v4825_v23 = vpop.xlane.xlu2 %4824 }
 0x6f0   : > { %v7180_v22 = vmul.f32 %v6294_v0, %v5836_v36  ;;  %v2750_v36 = vld [vmem:[%s12343_s20 + $0x800] sm:$0xff]  ;;  %v5071_v0 = vmul.f32 %v4825_v23, %v16290_v34  ;;  %v4822_v23 = vpop.xlane.xlu1 %4821 }
 0x6f1   : > { %3487 = vmatmul.f32.gmra.mxu0 %v2750_v36  ;;  %v5070_v36 = vmul.f32 %v4822_v23, %v16290_v34 }
 0x6f2   : > { %v13594_v59 = vsub.f32 %v13314_v2, %v5071_v0  ;;  %v6299_v2 = vsub.f32 1.5, %v6298_v18  ;;  %v3473_v18 = vpop.f32.mrf.mxu0 }
 0x6f3   : > { %v3827_v23 = vadd.f32 %v3826_v40, %v3473_v18 }
 0x6f4   : > { %16330 = vst [vmem:[#allocation82_spill] sm:$0xff] %v13594_v59  ;;  %v5295_v44 = vmul.f32 %v13594_v59, %v13594_v59  ;;  %v6300_v57 = vmul.f32 %v9220_v53, %v6299_v2  ;;  %v5838_v2 = vld [vmem:[%s12955_s17 + $0xd8] sm:$0xff]  ;;  %v2758_v59 = vld [vmem:[%s12343_s20 + $0x840] sm:$0xff] }
 0x6f6   : > { %v6304_v9 = vsel %vm13602_vm1, %v9220_v53, %v6300_v57  ;;  %8992 = vmatmul.msk.f32.gmra.mxu3 %vm2942_vm5, %v2765_v46 }
 0x6f7   : > { %v7181_v53 = vmul.f32 %v6304_v9, %v5837_v30  ;;  %v5452_v9 = vpop.xlane.xlu0 %5451 }
 0x6f8   : > { %v13632_v40 = vpop.permute.xlu1 %7324 }
 0x707   : > { %7394 = vperm.xlu2 %9051, %v7180_v22   ;;  %v13587_v22 = vadd.f32 %v4526_v24, %v4174_v32  ;;  %v9222_v24 = vpop.eup %9221 }
 0x708   : > { %v6306_v7 = vmul.f32 %v9222_v24, %v5950_v56  ;;  %vm6312_vm2 = vweird.f32 %v9222_v24 }
 0x709   : > { %5490 = vadd.xlane.f32.xlu1 %v5489_v13  ;;  %v4862_v1 = vsel %vm358_vm0, %v13587_v22, 0.0  ;;  %v5495_v13 = vsel %vm358_vm0, %v5295_v44, 0.0  ;;  %v5727_v44 = vmul.f32 %v13569_v4, %v16290_v34  ;;  %vm6313_vm4 = vmor %vm6311_vm3, %vm6312_vm2  ;;  %v4179_v4 = vpop.f32.mrf.mxu2 }
 0x70a   : > { %v6307_v29 = vmul.f32 %v9222_v24, %v6306_v7  ;;  %v2754_v7 = vld [vmem:[%s12343_s20 + $0x820] sm:$0xff] }
 0x70b   : > { %3490 = vmatmul.f32.gmra.mxu0 %v2754_v7  ;;  %v5951_v57 = vadd.f32 1e-05, %v5727_v44  ;;  %v13628_v7 = vpop.permute.xlu0 %7329  ;;  %v13630_v44 = vpop.permute.xlu2 %7334 }
 0x70c   : > { %v6308_v32 = vmul.f32 0.5, %v6307_v29  ;;  %v2755_v29 = vld [vmem:[%s12343_s20 + $0x828] sm:$0xff] }
 0x70d   : > { %3843 = vmatmul.f32.gmra.mxu1 %v2755_v29  ;;  %9223 = vrsqrt.f32 %v5951_v57  ;;  %v3476_v29 = vpop.f32.mrf.mxu0  ;;  %vm6321_vm7 = vweird.f32 %v5951_v57 }
 0x70e   : > { %v6309_v6 = vsub.f32 1.5, %v6308_v32 }
 0x711   : > { %4866 = vadd.xlane.f32.xlu1 %v4865_v15  ;;  %v6310_v15 = vmul.f32 %v9222_v24, %v6309_v6 }
 0x712   : > { %4863 = vadd.xlane.f32.xlu0 %v4862_v1  ;;  %v2756_v1 = vld [vmem:[%s12343_s20 + $0x830] sm:$0xff] }
 0x713   : > { %4196 = vmatmul.f32.gmra.mxu2 %v2756_v1  ;;  %v6314_v32 = vsel %vm6313_vm4, %v9222_v24, %v6310_v15  ;;  %v4180_v1 = vadd.f32 %v4179_v4, %v3827_v23  ;;  %v9224_v30 = vpop.eup %9223  ;;  %v4182_v23 = vpop.f32.mrf.mxu2  ;;  %3493 = vmatmul.f32.gmra.mxu0 %v2758_v59 }
 0x714   : > { %v7182_v0 = vmul.f32 %v6314_v32, %v5838_v2  ;;  %v6316_v15 = vmul.f32 %v9224_v30, %v5951_v57  ;;  %v4828_v32 = vpop.xlane.xlu0 %4827  ;;  %v13634_v4 = vpop.xlane.xlu2 %5457  ;;  %vm6322_vm6 = vweird.f32 %v9224_v30  ;;  %v2760_v57 = vld [vmem:[%s12343_s20 + $0x850] sm:$0xff] }
 0x715   : > { %vm6323_vm8 = vmor %vm6321_vm7, %vm6322_vm6  ;;  %v5730_v46 = vmul.f32 %v13634_v4, %v16290_v34 }
 0x716   : > { %v6317_v19 = vmul.f32 %v9224_v30, %v6316_v15 }
 0x718   : > { %v6318_v18 = vmul.f32 0.5, %v6317_v19  ;;  %v5728_v19 = vmul.f32 %v5452_v9, %v16290_v34 }
 0x71a   : > { %5496 = vadd.xlane.f32.xlu0 %v5495_v13  ;;  %v13617_v13 = vsub.f32 %v13272_v55, %v5070_v36  ;;  %v4532_v55 = vpop.f32.mrf.mxu3  ;;  %v6319_v2 = vsub.f32 1.5, %v6318_v18  ;;  %v5952_v62 = vadd.f32 1e-05, %v5728_v19 }
 0x71b   : > { %v13624_v36 = vadd.f32 %v4532_v55, %v4180_v1  ;;  %v5072_v1 = vmul.f32 %v4828_v32, %v16290_v34  ;;  %v4185_v54 = vpop.f32.mrf.mxu2  ;;  %4199 = vmatmul.f32.gmra.mxu2 %v2760_v57 }
 0x71c   : > { %16333 = vst [vmem:[#allocation52_spill] sm:$0xff] %v13617_v13  ;;  %v5294_v6 = vmul.f32 %v13617_v13, %v13617_v13  ;;  %v5839_v13 = vld [vmem:[%s12955_s17 + $0xe0] sm:$0xff]  ;;  %vm6331_vm12 = vweird.f32 %v5952_v62 }
 0x71d   : > { %v4868_v24 = vsel %vm358_vm0, %v13624_v36, 0.0  ;;  %v13640_v18 = vsub.f32 %v13348_v52, %v5072_v1  ;;  %v2759_v52 = vld [vmem:[%s12343_s20 + $0x848] sm:$0xff]  ;;  %v2762_v1 = vld [vmem:[%s12343_s20 + $0x860] sm:$0xff] }
 0x71e   : > { %v5492_v56 = vsel %vm358_vm0, %v5294_v6, 0.0  ;;  %v6320_v6 = vmul.f32 %v9224_v30, %v6319_v2  ;;  %3846 = vmatmul.f32.gmra.mxu1 %v2759_v52  ;;  %3496 = vmatmul.f32.gmra.mxu0 %v2762_v1  ;;  %v5841_v1 = vld [vmem:[%s12955_s17 + $0xf0] sm:$0xff] }
 0x71f   : > { %16334 = vst [vmem:[#allocation45_spill] sm:$0xff] %v13640_v18  ;;  %v5296_v10 = vmul.f32 %v13640_v18, %v13640_v18  ;;  %v2776_v18 = vld [vmem:[%s12343_s20 + $0x8d0] sm:$0xff] }
 0x720   : > { %v6324_v60 = vsel %vm6323_vm8, %v9224_v30, %v6320_v6  ;;  %v4834_v30 = vpop.xlane.xlu2 %4833 }
 0x721   : > { %v7183_v37 = vmul.f32 %v6324_v60, %v5839_v13  ;;  %v5074_v9 = vmul.f32 %v4834_v30, %v16290_v34 }
 0x722   : > { %v4535_v55 = vpop.f32.mrf.mxu3 }
 0x724   : > { %v3479_v15 = vpop.f32.mrf.mxu0 }
 0x72a   : > { %7399 = vperm.xlu1 %9050, %v7181_v53   ;;  %v3829_v53 = vpop.f32.mrf.mxu1  ;;  %v4538_v13 = vpop.f32.mrf.mxu3 }
 0x72b   : > { %v3830_v2 = vadd.f32 %v3829_v53, %v3476_v29  ;;  %v5498_v53 = vsel %vm358_vm0, %v5296_v10, 0.0 }
 0x72e   : > { %7404 = vperm.xlu0 %9052, %v7182_v0   ;;  %v5455_v0 = vpop.xlane.xlu1 %5454 }
 0x730   : > { %5493 = vadd.xlane.f32.xlu2 %v5492_v56  ;;  %v5729_v56 = vmul.f32 %v5455_v0, %v16290_v34  ;;  %v4183_v0 = vadd.f32 %v4182_v23, %v3830_v2  ;;  %v2764_v23 = vld [vmem:[%s12343_s20 + $0x870] sm:$0xff] }
 0x731   : > { %4202 = vmatmul.f32.gmra.mxu2 %v2764_v23  ;;  %v2767_v23 = vld [vmem:[%s12343_s20 + $0x888] sm:$0xff] }
 0x732   : > { %v5953_v8 = vadd.f32 1e-05, %v5729_v56  ;;  %v13651_v29 = vadd.f32 %v4535_v55, %v4183_v0  ;;  %v2763_v56 = vld [vmem:[%s12343_s20 + $0x868] sm:$0xff] }
 0x733   : > { %3849 = vmatmul.f32.gmra.mxu1 %v2763_v56 }
 0x734   : > { %9225 = vrsqrt.f32 %v5953_v8  ;;  %vm6341_vm11 = vweird.f32 %v5953_v8 }
 0x735   : > { %9227 = vrsqrt.f32 %v5952_v62 }
 0x738   : > { %4869 = vadd.xlane.f32.xlu2 %v4868_v24  ;;  %v3832_v24 = vpop.f32.mrf.mxu1 }
 0x739   : > { %v3833_v32 = vadd.f32 %v3832_v24, %v3479_v15 }
 0x73a   : > { %v9226_v59 = vpop.eup %9225 }
 0x73b   : > { %v4186_v60 = vadd.f32 %v4185_v54, %v3833_v32  ;;  %v4871_v54 = vsel %vm358_vm0, %v13651_v29, 0.0  ;;  %v9228_v10 = vpop.eup %9227  ;;  %v6336_v24 = vmul.f32 %v9226_v59, %v5953_v8  ;;  %vm6342_vm9 = vweird.f32 %v9226_v59  ;;  %3852 = vmatmul.f32.gmra.mxu1 %v2767_v23 }
 0x73c   : > { %vm6332_vm10 = vweird.f32 %v9228_v10  ;;  %vm6343_vm13 = vmor %vm6341_vm11, %vm6342_vm9 }
 0x73d   : > { %v13656_v6 = vadd.f32 %v4538_v13, %v4186_v60  ;;  %v6337_v19 = vmul.f32 %v9226_v59, %v6336_v24  ;;  %v4831_v60 = vpop.xlane.xlu1 %4830  ;;  %vm13672_vm14 = vmor %vm6331_vm12, %vm6332_vm10 }
 0x73f   : > { %v4874_v55 = vsel %vm358_vm0, %v13656_v6, 0.0  ;;  %v6338_v57 = vmul.f32 0.5, %v6337_v19 }
 0x741   : > { %v6339_v52 = vsub.f32 1.5, %v6338_v57 }
 0x743   : > { %v6340_v13 = vmul.f32 %v9226_v59, %v6339_v52 }
 0x745   : > { %v6344_v56 = vsel %vm6343_vm13, %v9226_v59, %v6340_v13  ;;  %v5461_v13 = vpop.xlane.xlu0 %5460 }
 0x746   : > { %v7185_v19 = vmul.f32 %v6344_v56, %v5841_v1  ;;  %v2773_v1 = vld [vmem:[%s12343_s20 + $0x8b8] sm:$0xff] }
 0x74a   : > { %v4188_v59 = vpop.f32.mrf.mxu2 }
 0x750   : > { %7409 = vperm.xlu2 %9051, %v7183_v37   ;;  %v13661_v37 = vsub.f32 %v13374_v5, %v5074_v9  ;;  %v6326_v5 = vmul.f32 %v9228_v10, %v5952_v62  ;;  %v2768_v62 = vld [vmem:[%s12343_s20 + $0x890] sm:$0xff] }
 0x751   : > { %4205 = vmatmul.f32.gmra.mxu2 %v2768_v62 }
 0x752   : > { %16335 = vst [vmem:[#allocation77_spill] sm:$0xff] %v13661_v37  ;;  %v5298_v15 = vmul.f32 %v13661_v37, %v13661_v37  ;;  %v6327_v32 = vmul.f32 %v9228_v10, %v6326_v5  ;;  %v2769_v5 = vld [vmem:[%s12343_s20 + $0x898] sm:$0xff] }
 0x753   : > { %8993 = vmatmul.msk.f32.gmra.mxu3 %vm2942_vm5, %v2769_v5 }
 0x754   : > { %5499 = vadd.xlane.f32.xlu1 %v5498_v53  ;;  %v5504_v2 = vsel %vm358_vm0, %v5298_v15, 0.0  ;;  %v6328_v0 = vmul.f32 0.5, %v6327_v32  ;;  %v5073_v53 = vmul.f32 %v4831_v60, %v16290_v34  ;;  %v5840_v15 = vld [vmem:[%s12955_s17 + $0xe8] sm:$0xff]  ;;  %v5954_v32 = vadd.f32 1e-05, %v5730_v46  ;;  %v2772_v46 = vld [vmem:[%s12343_s20 + $0x8b0] sm:$0xff] }
 0x756   : > { %v6329_v30 = vsub.f32 1.5, %v6328_v0  ;;  %v13680_v24 = vsub.f32 %v13331_v21, %v5073_v53  ;;  %9229 = vrsqrt.f32 %v5954_v32  ;;  %v2766_v53 = vld [vmem:[%s12343_s20 + $0x880] sm:$0xff]  ;;  %vm6351_vm1 = vweird.f32 %v5954_v32 }
 0x757   : > { %3499 = vmatmul.f32.gmra.mxu0 %v2766_v53 }
 0x758   : > { %4872 = vadd.xlane.f32.xlu0 %v4871_v54  ;;  %v6330_v9 = vmul.f32 %v9228_v10, %v6329_v30  ;;  %v3835_v54 = vpop.f32.mrf.mxu1  ;;  %16338 = vst [vmem:[#allocation55_spill] sm:$0xff] %v13680_v24  ;;  %v5297_v21 = vmul.f32 %v13680_v24, %v13680_v24  ;;  %v2771_v24 = vld [vmem:[%s12343_s20 + $0x8a8] sm:$0xff] }
 0x759   : > { %4208 = vmatmul.f32.gmra.mxu2 %v2772_v46  ;;  %v5842_v46 = vld [vmem:[%s12955_s17 + $0xf8] sm:$0xff]  ;;  %3855 = vmatmul.f32.gmra.mxu1 %v2771_v24 }
 0x75a   : > { %v6334_v8 = vsel %vm13672_vm14, %v9228_v10, %v6330_v9  ;;  %v4541_v10 = vpop.f32.mrf.mxu3  ;;  %v5501_v0 = vsel %vm358_vm0, %v5297_v21, 0.0 }
 0x75b   : > { %v7184_v4 = vmul.f32 %v6334_v8, %v5840_v15  ;;  %8994 = vmatmul.msk.f32.gmra.mxu3 %vm2942_vm5, %v2773_v1  ;;  %v13704_v15 = vpop.permute.xlu0 %7344 }
 0x75c   : > { %4875 = vadd.xlane.f32.xlu1 %v4874_v55  ;;  %v3482_v55 = vpop.f32.mrf.mxu0  ;;  %v9230_v30 = vpop.eup %9229 }
 0x75d   : > { %v6346_v9 = vmul.f32 %v9230_v30, %v5954_v32  ;;  %vm6352_vm15 = vweird.f32 %v9230_v30 }
 0x75e   : > { %vm6353_vm2 = vmor %vm6351_vm1, %vm6352_vm15 }
 0x75f   : > { %v6347_v56 = vmul.f32 %v9230_v30, %v6346_v9 }
 0x760   : > { %5505 = vadd.xlane.f32.xlu0 %v5504_v2  ;;  %v3836_v2 = vadd.f32 %v3835_v54, %v3482_v55  ;;  %v13700_v54 = vpop.permute.xlu2 %7349  ;;  %v13702_v55 = vpop.permute.xlu1 %7339 }
 0x761   : > { %16339 = vst [vmem:[#allocation47_spill] sm:$0xff] %v13700_v54  ;;  %v6348_v8 = vmul.f32 0.5, %v6347_v56  ;;  %v3838_v5 = vpop.f32.mrf.mxu1  ;;  %4211 = vmatmul.f32.gmra.mxu2 %v2776_v18 }
 0x762   : > { %v4189_v57 = vadd.f32 %v4188_v59, %v3836_v2  ;;  %v4544_v53 = vpop.f32.mrf.mxu3 }
 0x763   : > { %v4837_v59 = vpop.xlane.xlu0 %4836 }
 0x764   : > { %v13691_v52 = vadd.f32 %v4541_v10, %v4189_v57  ;;  %v3485_v62 = vpop.f32.mrf.mxu0  ;;  %v4191_v57 = vpop.f32.mrf.mxu2 }
 0x765   : > { %v3839_v21 = vadd.f32 %v3838_v5, %v3485_v62  ;;  %v5731_v62 = vmul.f32 %v5461_v13, %v16290_v34 }
 0x766   : > { %v4877_v60 = vsel %vm358_vm0, %v13691_v52, 0.0 }
 0x767   : > { %v4192_v9 = vadd.f32 %v4191_v57, %v3839_v21 }
 0x768   : > { %v13706_v2 = vpop.xlane.xlu2 %5466 }
 0x769   : > { %v3841_v56 = vpop.f32.mrf.mxu1 }
 0x76a   : > { %v4547_v24 = vpop.f32.mrf.mxu3 }
 0x76d   : > { %v4194_v13 = vpop.f32.mrf.mxu2 }
 0x774   : > { %7419 = vperm.xlu0 %9052, %v7185_v19   ;;  %v6349_v19 = vsub.f32 1.5, %v6348_v8  ;;  %v3488_v8 = vpop.f32.mrf.mxu0 }
 0x775   : > { %7414 = vperm.xlu1 %9050, %v7184_v4   ;;  %v5464_v4 = vpop.xlane.xlu1 %5463  ;;  %v3842_v21 = vadd.f32 %v3841_v56, %v3488_v8 }
 0x776   : > { %v6350_v10 = vmul.f32 %v9230_v30, %v6349_v19  ;;  %v4843_v19 = vpop.xlane.xlu2 %4842 }
 0x777   : > { %v5077_v57 = vmul.f32 %v4843_v19, %v16290_v34 }
 0x778   : > { %v6354_v1 = vsel %vm6353_vm2, %v9230_v30, %v6350_v10  ;;  %v2777_v30 = vld [vmem:[%s12343_s20 + $0x8d8] sm:$0xff] }
 0x779   : > { %5502 = vadd.xlane.f32.xlu2 %v5501_v0  ;;  %v5732_v0 = vmul.f32 %v5464_v4, %v16290_v34  ;;  %v7186_v32 = vmul.f32 %v6354_v1, %v5842_v46  ;;  %v13715_v4 = vadd.f32 %v4544_v53, %v4192_v9  ;;  %8995 = vmatmul.msk.f32.gmra.mxu3 %vm2942_vm5, %v2777_v30  ;;  %v2774_v53 = vld [vmem:[%s12343_s20 + $0x8c0] sm:$0xff]  ;;  %v2775_v46 = vld [vmem:[%s12343_s20 + $0x8c8] sm:$0xff] }
 0x77a   : > { %v13728_v9 = vsub.f32 %v13432_v16, %v5077_v57  ;;  %3858 = vmatmul.f32.gmra.mxu1 %v2775_v46  ;;  %v5844_v46 = vld [vmem:[%s12955_s17 + $0x108] sm:$0xff] }
 0x77b   : > { %v5956_v23 = vadd.f32 1e-05, %v5732_v0  ;;  %v4880_v0 = vsel %vm358_vm0, %v13715_v4, 0.0 }
 0x77c   : > { %16341 = vst [vmem:[#allocation81_spill] sm:$0xff] %v13728_v9 }
 0x77d   : > { %9231 = vrsqrt.f32 %v5956_v23  ;;  %vm6371_vm4 = vweird.f32 %v5956_v23 }
 0x781   : > { %4878 = vadd.xlane.f32.xlu2 %v4877_v60  ;;  %v5075_v60 = vmul.f32 %v4837_v59, %v16290_v34  ;;  %v2770_v59 = vld [vmem:[%s12343_s20 + $0x8a0] sm:$0xff] }
 0x782   : > { %3502 = vmatmul.f32.gmra.mxu0 %v2770_v59 }
 0x783   : > { %v13713_v5 = vsub.f32 %v13407_v41, %v5075_v60  ;;  %v5955_v41 = vadd.f32 1e-05, %v5731_v62  ;;  %v4195_v60 = vadd.f32 %v4194_v13, %v3842_v21  ;;  %v9232_v1 = vpop.eup %9231  ;;  %v5301_v62 = vmul.f32 %v13728_v9, %v13728_v9 }
 0x784   : > { %v6366_v8 = vmul.f32 %v9232_v1, %v5956_v23  ;;  %vm6372_vm3 = vweird.f32 %v9232_v1  ;;  %v5843_v23 = vld [vmem:[%s12955_s17 + $0x100] sm:$0xff] }
 0x785   : > { %16340 = vst [vmem:[#allocation48_spill] sm:$0xff] %v13713_v5  ;;  %v5299_v10 = vmul.f32 %v13713_v5, %v13713_v5  ;;  %9233 = vrsqrt.f32 %v5955_v41  ;;  %v13733_v56 = vadd.f32 %v4547_v24, %v4195_v60  ;;  %v5513_v59 = vsel %vm358_vm0, %v5301_v62, 0.0  ;;  %v4840_v60 = vpop.xlane.xlu1 %4839  ;;  %vm6373_vm6 = vmor %vm6371_vm4, %vm6372_vm3 }
 0x786   : > { %v5733_v62 = vmul.f32 %v13706_v2, %v16290_v34  ;;  %vm6361_vm8 = vweird.f32 %v5955_v41 }
 0x787   : > { %v5507_v18 = vsel %vm358_vm0, %v5299_v10, 0.0  ;;  %v4883_v16 = vsel %vm358_vm0, %v13733_v56, 0.0 }
 0x78a   : > { %3505 = vmatmul.f32.gmra.mxu0 %v2774_v53  ;;  %v5076_v53 = vmul.f32 %v4840_v60, %v16290_v34 }
 0x78b   : > { %v9234_v19 = vpop.eup %9233 }
 0x78c   : > { %v6356_v21 = vmul.f32 %v9234_v19, %v5955_v41  ;;  %vm6362_vm7 = vweird.f32 %v9234_v19 }
 0x78d   : > { %vm6363_vm9 = vmor %vm6361_vm8, %vm6362_vm7 }
 0x78e   : > { %v6357_v57 = vmul.f32 %v9234_v19, %v6356_v21  ;;  %v13745_v21 = vsub.f32 %v13391_v17, %v5076_v53  ;;  %v4550_v17 = vpop.f32.mrf.mxu3 }
 0x790   : > { %v6358_v10 = vmul.f32 0.5, %v6357_v57  ;;  %16342 = vst [vmem:[#allocation56_spill] sm:$0xff] %v13745_v21  ;;  %v5300_v2 = vmul.f32 %v13745_v21, %v13745_v21 }
 0x792   : > { %v6359_v24 = vsub.f32 1.5, %v6358_v10  ;;  %v5510_v60 = vsel %vm358_vm0, %v5300_v2, 0.0 }
 0x796   : > { %v4197_v10 = vpop.f32.mrf.mxu2 }
 0x799   : > { %7424 = vperm.xlu2 %9051, %v7186_v32   ;;  %v6367_v32 = vmul.f32 %v9232_v1, %v6366_v8  ;;  %v6360_v8 = vmul.f32 %v9234_v19, %v6359_v24 }
 0x79b   : > { %v6368_v30 = vmul.f32 0.5, %v6367_v32  ;;  %v3844_v32 = vpop.f32.mrf.mxu1 }
 0x79d   : > { %v6369_v13 = vsub.f32 1.5, %v6368_v30  ;;  %v6364_v30 = vsel %vm6363_vm9, %v9234_v19, %v6360_v8  ;;  %v2779_v8 = vld [vmem:[%s12343_s20 + $0x8e8] sm:$0xff] }
 0x79e   : > { %4881 = vadd.xlane.f32.xlu0 %v4880_v0  ;;  %v7187_v41 = vmul.f32 %v6364_v30, %v5843_v23  ;;  %3861 = vmatmul.f32.gmra.mxu1 %v2779_v8  ;;  %v13763_v23 = vpop.permute.xlu1 %7354 }
 0x79f   : > { %5508 = vadd.xlane.f32.xlu1 %v5507_v18  ;;  %v6370_v0 = vmul.f32 %v9232_v1, %v6369_v13  ;;  %v2780_v13 = vld [vmem:[%s12343_s20 + $0x8f0] sm:$0xff] }
 0x7a0   : > { %4214 = vmatmul.f32.gmra.mxu2 %v2780_v13  ;;  %v2782_v13 = vld [vmem:[%s12343_s20 + $0x900] sm:$0xff] }
 0x7a1   : > { %v6374_v18 = vsel %vm6373_vm6, %v9232_v1, %v6370_v0  ;;  %v5957_v1 = vadd.f32 1e-05, %v5733_v62  ;;  %v2784_v62 = vld [vmem:[%s12343_s20 + $0x910] sm:$0xff] }
 0x7a3   : > { %9235 = vrsqrt.f32 %v5957_v1  ;;  %vm6381_vm11 = vweird.f32 %v5957_v1 }
 0x7a6   : > { %5514 = vadd.xlane.f32.xlu0 %v5513_v59  ;;  %v3491_v59 = vpop.f32.mrf.mxu0 }
 0x7a7   : > { %4884 = vadd.xlane.f32.xlu1 %v4883_v16  ;;  %v7188_v16 = vmul.f32 %v6374_v18, %v5844_v46  ;;  %v3845_v57 = vadd.f32 %v3844_v32, %v3491_v59  ;;  %v2781_v46 = vld [vmem:[%s12343_s20 + $0x8f8] sm:$0xff]  ;;  %v2778_v18 = vld [vmem:[%s12343_s20 + $0x8e0] sm:$0xff]  ;;  %v13761_v59 = vpop.permute.xlu2 %7364 }
 0x7a8   : > { %8996 = vmatmul.msk.f32.gmra.mxu3 %vm2942_vm5, %v2781_v46  ;;  %3508 = vmatmul.f32.gmra.mxu0 %v2778_v18  ;;  %16343 = vst [vmem:[#allocation50_spill] sm:$0xff] %v13761_v59  ;;  %v5473_v46 = vpop.xlane.xlu1 %5472 }
 0x7a9   : > { %v4198_v0 = vadd.f32 %v4197_v10, %v3845_v57  ;;  %v9236_v24 = vpop.eup %9235  ;;  %4217 = vmatmul.f32.gmra.mxu2 %v2784_v62  ;;  %v2785_v57 = vld [vmem:[%s12343_s20 + $0x918] sm:$0xff]  ;;  %v2783_v10 = vld [vmem:[%s12343_s20 + $0x908] sm:$0xff]  ;;  %v5735_v8 = vmul.f32 %v5473_v46, %v16290_v34  ;;  %v4200_v62 = vpop.f32.mrf.mxu2 }
 0x7aa   : > { %v6376_v32 = vmul.f32 %v9236_v24, %v5957_v1  ;;  %3864 = vmatmul.f32.gmra.mxu1 %v2783_v10  ;;  %vm6382_vm10 = vweird.f32 %v9236_v24 }
 0x7ab   : > { %v13752_v19 = vadd.f32 %v4550_v17, %v4198_v0  ;;  %vm6383_vm12 = vmor %vm6381_vm11, %vm6382_vm10 }
 0x7ac   : > { %v6377_v30 = vmul.f32 %v9236_v24, %v6376_v32 }
 0x7ad   : > { %v4886_v53 = vsel %vm358_vm0, %v13752_v19, 0.0 }
 0x7ae   : > { %v6378_v2 = vmul.f32 0.5, %v6377_v30  ;;  %v3494_v17 = vpop.f32.mrf.mxu0 }
 0x7af   : > { %v13771_v0 = vpop.xlane.xlu2 %5475 }
 0x7b0   : > { %8997 = vmatmul.msk.f32.gmra.mxu3 %vm2942_vm5, %v2785_v57  ;;  %3511 = vmatmul.f32.gmra.mxu0 %v2782_v13  ;;  %v5959_v57 = vadd.f32 1e-05, %v5735_v8  ;;  %v4553_v13 = vpop.f32.mrf.mxu3  ;;  %v2788_v8 = vld [vmem:[%s12343_s20 + $0x930] sm:$0xff] }
 0x7b1   : > { %4220 = vmatmul.f32.gmra.mxu2 %v2788_v8 }
 0x7b2   : > { %9237 = vrsqrt.f32 %v5959_v57  ;;  %vm6401_vm14 = vweird.f32 %v5959_v57 }
 0x7b7   : > { %v4852_v10 = vpop.xlane.xlu2 %4851 }
 0x7ba   : > { %7434 = vperm.xlu0 %9052, %v7188_v16   ;;  %v5470_v16 = vpop.xlane.xlu0 %5469 }
 0x7bb   : > { %v5734_v1 = vmul.f32 %v5470_v16, %v16290_v34  ;;  %v4203_v16 = vpop.f32.mrf.mxu2 }
 0x7c0   : > { %7429 = vperm.xlu1 %9050, %v7187_v41  }
 0x7c2   : > { %5511 = vadd.xlane.f32.xlu2 %v5510_v60  ;;  %v13769_v41 = vpop.permute.xlu0 %7359  ;;  %v3847_v60 = vpop.f32.mrf.mxu1 }
 0x7c3   : > { %16344 = vst [vmem:[#allocation51_spill] sm:$0xff] %v13769_v41  ;;  %v3848_v18 = vadd.f32 %v3847_v60, %v3494_v17  ;;  %v5080_v60 = vmul.f32 %v4852_v10, %v16290_v34  ;;  %v9238_v10 = vpop.eup %9237 }
 0x7c4   : > { %vm6402_vm13 = vweird.f32 %v9238_v10 }
 0x7c5   : > { %v4201_v21 = vadd.f32 %v4200_v62, %v3848_v18  ;;  %v3497_v18 = vpop.f32.mrf.mxu0  ;;  %v2789_v62 = vld [vmem:[%s12343_s20 + $0x938] sm:$0xff]  ;;  %vm6403_vm15 = vmor %vm6401_vm14, %vm6402_vm13 }
 0x7c6   : > { %8998 = vmatmul.msk.f32.gmra.mxu3 %vm2942_vm5, %v2789_v62  ;;  %v4556_v62 = vpop.f32.mrf.mxu3 }
 0x7c7   : > { %v13775_v5 = vadd.f32 %v4553_v13, %v4201_v21 }
 0x7c9   : > { %v4889_v21 = vsel %vm358_vm0, %v13775_v5, 0.0 }
 0x7ca   : > { %4887 = vadd.xlane.f32.xlu2 %v4886_v53  ;;  %v6379_v53 = vsub.f32 1.5, %v6378_v2  ;;  %v4846_v30 = vpop.xlane.xlu0 %4845  ;;  %v5845_v2 = vld [vmem:[%s12955_s17 + $0x110] sm:$0xff] }
 0x7cb   : > { %v5078_v9 = vmul.f32 %v4846_v30, %v16290_v34  ;;  %v13791_v30 = vsub.f32 %v13491_v43, %v5080_v60 }
 0x7cc   : > { %v6380_v32 = vmul.f32 %v9236_v24, %v6379_v53  ;;  %v3850_v53 = vpop.f32.mrf.mxu1 }
 0x7cd   : > { %v13783_v37 = vsub.f32 %v13466_v11, %v5078_v9  ;;  %16346 = vst [vmem:[#allocation53_spill] sm:$0xff] %v13791_v30  ;;  %v3851_v13 = vadd.f32 %v3850_v53, %v3497_v18  ;;  %v5958_v11 = vadd.f32 1e-05, %v5734_v1  ;;  %v5304_v8 = vmul.f32 %v13791_v30, %v13791_v30 }
 0x7ce   : > { %v6384_v17 = vsel %vm6383_vm12, %v9236_v24, %v6380_v32  ;;  %v2786_v24 = vld [vmem:[%s12343_s20 + $0x920] sm:$0xff]  ;;  %v2787_v32 = vld [vmem:[%s12343_s20 + $0x928] sm:$0xff] }
 0x7cf   : > { %v7189_v46 = vmul.f32 %v6384_v17, %v5845_v2  ;;  %16345 = vst [vmem:[#allocation4_spill] sm:$0xff] %v13783_v37  ;;  %3514 = vmatmul.f32.gmra.mxu0 %v2786_v24  ;;  %3867 = vmatmul.f32.gmra.mxu1 %v2787_v32  ;;  %v5302_v9 = vmul.f32 %v13783_v37, %v13783_v37  ;;  %9239 = vrsqrt.f32 %v5958_v11  ;;  %v5522_v60 = vsel %vm358_vm0, %v5304_v8, 0.0  ;;  %v5847_v8 = vld [vmem:[%s12955_s17 + $0x120] sm:$0xff] }
 0x7d0   : > { %v6396_v2 = vmul.f32 %v9238_v10, %v5959_v57  ;;  %v4204_v17 = vadd.f32 %v4203_v16, %v3851_v13  ;;  %vm6391_vm2 = vweird.f32 %v5958_v11 }
 0x7d2   : > { %v6397_v43 = vmul.f32 %v9238_v10, %v6396_v2  ;;  %v13799_v53 = vadd.f32 %v4556_v62, %v4204_v17  ;;  %v4849_v2 = vpop.xlane.xlu1 %4848 }
 0x7d3   : > { %v5079_v62 = vmul.f32 %v4849_v2, %v16290_v34 }
 0x7d4   : > { %v6398_v1 = vmul.f32 0.5, %v6397_v43 }
 0x7d5   : > { %v9240_v18 = vpop.eup %9239  ;;  %v13808_v57 = vsub.f32 %v13453_v20, %v5079_v62  ;;  %v2793_v62 = vld [vmem:[%s12343_s20 + $0x958] sm:$0xff] }
 0x7d6   : > { %v6386_v24 = vmul.f32 %v9240_v18, %v5958_v11  ;;  %v6399_v32 = vsub.f32 1.5, %v6398_v1  ;;  %v3500_v1 = vpop.f32.mrf.mxu0  ;;  %vm6392_vm1 = vweird.f32 %v9240_v18  ;;  %8999 = vmatmul.msk.f32.gmra.mxu3 %vm2942_vm5, %v2793_v62 }
 0x7d7   : > { %16347 = vst [vmem:[#allocation54_spill] sm:$0xff] %v13808_v57  ;;  %vm6393_vm3 = vmor %vm6391_vm2, %vm6392_vm1 }
 0x7d8   : > { %v6387_v13 = vmul.f32 %v9240_v18, %v6386_v24  ;;  %v6400_v16 = vmul.f32 %v9238_v10, %v6399_v32 }
 0x7e2   : > { %7439 = vperm.xlu2 %9051, %v7189_v46   ;;  %v5516_v46 = vsel %vm358_vm0, %v5302_v9, 0.0  ;;  %v6388_v9 = vmul.f32 0.5, %v6387_v13  ;;  %v4206_v13 = vpop.f32.mrf.mxu2 }
 0x7e4   : > { %4890 = vadd.xlane.f32.xlu0 %v4889_v21  ;;  %v4892_v21 = vsel %vm358_vm0, %v13799_v53, 0.0  ;;  %v6389_v17 = vsub.f32 1.5, %v6388_v9 }
 0x7e6   : > { %v6390_v24 = vmul.f32 %v9240_v18, %v6389_v17  ;;  %v2792_v17 = vld [vmem:[%s12343_s20 + $0x950] sm:$0xff] }
 0x7e7   : > { %4223 = vmatmul.f32.gmra.mxu2 %v2792_v17 }
 0x7e8   : > { %v6394_v9 = vsel %vm6393_vm3, %v9240_v18, %v6390_v24  ;;  %v2791_v18 = vld [vmem:[%s12343_s20 + $0x948] sm:$0xff]  ;;  %v13825_v24 = vpop.permute.xlu1 %7369 }
 0x7e9   : > { %3870 = vmatmul.f32.gmra.mxu1 %v2791_v18 }
 0x7ea   : > { %5517 = vadd.xlane.f32.xlu1 %v5516_v46  ;;  %v6404_v46 = vsel %vm6403_vm15, %v9238_v10, %v6400_v16  ;;  %v5303_v16 = vmul.f32 %v13808_v57, %v13808_v57  ;;  %v4209_v57 = vpop.f32.mrf.mxu2 }
 0x7eb   : > { %v7191_v43 = vmul.f32 %v6404_v46, %v5847_v8  ;;  %v4559_v46 = vpop.f32.mrf.mxu3 }
 0x7ec   : > { %5523 = vadd.xlane.f32.xlu0 %v5522_v60  ;;  %v5736_v60 = vmul.f32 %v13771_v0, %v16290_v34  ;;  %v5846_v0 = vld [vmem:[%s12955_s17 + $0x118] sm:$0xff]  ;;  %v5519_v20 = vsel %vm358_vm0, %v5303_v16, 0.0 }
 0x7ed   : > { %v7190_v8 = vmul.f32 %v6394_v9, %v5846_v0  ;;  %v2797_v16 = vld [vmem:[%s12343_s20 + $0x978] sm:$0xff]  ;;  %v2794_v0 = vld [vmem:[%s12343_s20 + $0x960] sm:$0xff]  ;;  %v2795_v9 = vld [vmem:[%s12343_s20 + $0x968] sm:$0xff] }
 0x7ee   : > { %v5960_v10 = vadd.f32 1e-05, %v5736_v60  ;;  %9000 = vmatmul.msk.f32.gmra.mxu3 %vm2942_vm5, %v2797_v16 }
 0x7f0   : > { %9241 = vrsqrt.f32 %v5960_v10  ;;  %v5482_v62 = vpop.xlane.xlu1 %5481  ;;  %vm6411_vm6 = vweird.f32 %v5960_v10 }
 0x7f1   : > { %3873 = vmatmul.f32.gmra.mxu1 %v2795_v9 }
 0x7f2   : > { %4893 = vadd.xlane.f32.xlu1 %v4892_v21  ;;  %v3853_v21 = vpop.f32.mrf.mxu1 }
 0x7f3   : > { %v3854_v32 = vadd.f32 %v3853_v21, %v3500_v1  ;;  %v13821_v21 = vpop.permute.xlu2 %7379 }
 0x7f4   : > { %16348 = vst [vmem:[#allocation7_spill] sm:$0xff] %v13821_v21  ;;  %v4562_v21 = vpop.f32.mrf.mxu3 }
 0x7f5   : > { %v4207_v2 = vadd.f32 %v4206_v13, %v3854_v32  ;;  %v2796_v13 = vld [vmem:[%s12343_s20 + $0x970] sm:$0xff] }
 0x7f6   : > { %v9242_v60 = vpop.eup %9241  ;;  %4226 = vmatmul.f32.gmra.mxu2 %v2796_v13 }
 0x7f7   : > { %v13814_v11 = vadd.f32 %v4559_v46, %v4207_v2  ;;  %v6406_v32 = vmul.f32 %v9242_v60, %v5960_v10  ;;  %v5479_v2 = vpop.xlane.xlu0 %5478  ;;  %vm6412_vm4 = vweird.f32 %v9242_v60  ;;  %v2798_v10 = vld [vmem:[%s12343_s20 + $0x980] sm:$0xff] }
 0x7f8   : > { %vm6413_vm7 = vmor %vm6411_vm6, %vm6412_vm4 }
 0x7f9   : > { %v4895_v1 = vsel %vm358_vm0, %v13814_v11, 0.0  ;;  %3876 = vmatmul.f32.gmra.mxu1 %v2799_v14 }
 0x7fa   : > { %v3856_v17 = vpop.f32.mrf.mxu1 }
 0x7fb   : > { %v13832_v46 = vpop.xlane.xlu2 %5484 }
 0x7ff   : > { %v13835_v30 = vpop.permute.xlu0 %7374 }
 0x800   : > { %7449 = vperm.xlu0 %9052, %v7191_v43   ;;  %v2790_v43 = vld [vmem:[%s12343_s20 + $0x940] sm:$0xff]  ;;  %16349 = vst [vmem:[#allocation5_spill] sm:$0xff] %v13835_v30  ;;  %v2879_v30 = vld [vmem:[%s12343_s20 + $0xc08] sm:$0xff] }
 0x801   : > { %3517 = vmatmul.f32.gmra.mxu0 %v2790_v43 }
 0x809   : > { %3520 = vmatmul.f32.gmra.mxu0 %v2794_v0  ;;  %v4861_v0 = vpop.xlane.xlu2 %4860 }
 0x80b   : > { %5520 = vadd.xlane.f32.xlu2 %v5519_v20  ;;  %7444 = vperm.xlu1 %9050, %v7190_v8   ;;  %v6407_v8 = vmul.f32 %v9242_v60, %v6406_v32  ;;  %v3503_v20 = vpop.f32.mrf.mxu0 }
 0x80c   : > { %v3857_v18 = vadd.f32 %v3856_v17, %v3503_v20  ;;  %v5083_v20 = vmul.f32 %v4861_v0, %v16290_v34  ;;  %v5848_v17 = vld [vmem:[%s12955_s17 + $0x128] sm:$0xff]  ;;  %v3859_v0 = vpop.f32.mrf.mxu1 }
 0x80d   : > { %v6408_v43 = vmul.f32 0.5, %v6407_v8  ;;  %v4855_v8 = vpop.xlane.xlu0 %4854 }
 0x80e   : > { %v4210_v32 = vadd.f32 %v4209_v57, %v3857_v18 }
 0x80f   : > { %v6409_v37 = vsub.f32 1.5, %v6408_v43  ;;  %v13845_v43 = vsub.f32 %v13554_v63, %v5083_v20 }
 0x810   : > { %v13837_v9 = vadd.f32 %v4562_v21, %v4210_v32  ;;  %v2800_v21 = vld [vmem:[%s12343_s20 + $0x990] sm:$0xff] }
 0x811   : > { %v6410_v16 = vmul.f32 %v9242_v60, %v6409_v37  ;;  %v5081_v37 = vmul.f32 %v4855_v8, %v16290_v34  ;;  %16350 = vst [vmem:[#allocation2_spill] sm:$0xff] %v13845_v43  ;;  %4229 = vmatmul.f32.gmra.mxu2 %v2800_v21  ;;  %3523 = vmatmul.f32.gmra.mxu0 %v2798_v10 }
 0x812   : > { %v4898_v57 = vsel %vm358_vm0, %v13837_v9, 0.0  ;;  %v5307_v8 = vmul.f32 %v13845_v43, %v13845_v43 }
 0x813   : > { %4896 = vadd.xlane.f32.xlu2 %v4895_v1  ;;  %v5738_v1 = vmul.f32 %v5482_v62, %v16290_v34  ;;  %v6414_v62 = vsel %vm6413_vm7, %v9242_v60, %v6410_v16  ;;  %v3506_v28 = vpop.f32.mrf.mxu0  ;;  %v5737_v60 = vmul.f32 %v5479_v2, %v16290_v34  ;;  %v13854_v16 = vsub.f32 %v13528_v47, %v5081_v37 }
 0x814   : > { %v7192_v18 = vmul.f32 %v6414_v62, %v5848_v17  ;;  %v3860_v20 = vadd.f32 %v3859_v0, %v3506_v28  ;;  %v4212_v17 = vpop.f32.mrf.mxu2  ;;  %v5531_v21 = vsel %vm358_vm0, %v5307_v8, 0.0 }
 0x815   : > { %v5962_v13 = vadd.f32 1e-05, %v5738_v1  ;;  %v2801_v1 = vld [vmem:[%s12343_s20 + $0x998] sm:$0xff]  ;;  %16351 = vst [vmem:[#allocation10_spill] sm:$0xff] %v13854_v16  ;;  %v5961_v62 = vadd.f32 1e-05, %v5737_v60 }
 0x816   : > { %9001 = vmatmul.msk.f32.gmra.mxu3 %vm2942_vm5, %v2801_v1  ;;  %v4213_v2 = vadd.f32 %v4212_v17, %v3860_v20  ;;  %v4565_v1 = vpop.f32.mrf.mxu3  ;;  %v5850_v20 = vld [vmem:[%s12955_s17 + $0x138] sm:$0xff] }
 0x817   : > { %9243 = vrsqrt.f32 %v5962_v13  ;;  %vm6431_vm9 = vweird.f32 %v5962_v13  ;;  %vm6421_vm12 = vweird.f32 %v5961_v62 }
 0x818   : > { %9245 = vrsqrt.f32 %v5961_v62  ;;  %v13862_v37 = vadd.f32 %v4565_v1, %v4213_v2 }
 0x81a   : > { %v4901_v0 = vsel %vm358_vm0, %v13862_v37, 0.0 }
 0x81d   : > { %v9244_v32 = vpop.eup %9243 }
 0x81e   : > { %v6426_v63 = vmul.f32 %v9244_v32, %v5962_v13  ;;  %v9246_v10 = vpop.eup %9245  ;;  %vm6432_vm8 = vweird.f32 %v9244_v32 }
 0x81f   : > { %v6416_v60 = vmul.f32 %v9246_v10, %v5961_v62  ;;  %vm6433_vm10 = vmor %vm6431_vm9, %vm6432_vm8  ;;  %vm6422_vm11 = vweird.f32 %v9246_v10  ;;  %v2803_v62 = vld [vmem:[%s12343_s20 + $0x9a8] sm:$0xff] }
 0x820   : > { %vm6423_vm13 = vmor %vm6421_vm12, %vm6422_vm11  ;;  %3879 = vmatmul.f32.gmra.mxu1 %v2803_v62 }
 0x821   : > { %v6417_v8 = vmul.f32 %v9246_v10, %v6416_v60 }
 0x82a   : > { %4899 = vadd.xlane.f32.xlu0 %v4898_v57  ;;  %v5305_v57 = vmul.f32 %v13854_v16, %v13854_v16 }
 0x82b   : > { %7454 = vperm.xlu2 %9051, %v7192_v18   ;;  %v6427_v18 = vmul.f32 %v9244_v32, %v6426_v63 }
 0x82c   : > { %v5525_v47 = vsel %vm358_vm0, %v5305_v57, 0.0 }
 0x82d   : > { %v6428_v14 = vmul.f32 0.5, %v6427_v18  ;;  %v6418_v18 = vmul.f32 0.5, %v6417_v8 }
 0x82f   : > { %v6429_v28 = vsub.f32 1.5, %v6428_v14  ;;  %v6419_v1 = vsub.f32 1.5, %v6418_v18  ;;  %v3862_v14 = vpop.f32.mrf.mxu1  ;;  %v2805_v18 = vld [vmem:[%s12343_s20 + $0x9b8] sm:$0xff] }
 0x830   : > { %9002 = vmatmul.msk.f32.gmra.mxu3 %vm2942_vm5, %v2805_v18 }
 0x831   : > { %v6430_v63 = vmul.f32 %v9244_v32, %v6429_v28  ;;  %v3509_v28 = vpop.f32.mrf.mxu0 }
 0x832   : > { %5532 = vadd.xlane.f32.xlu0 %v5531_v21  ;;  %v4858_v21 = vpop.xlane.xlu1 %4857 }
 0x833   : > { %v6434_v17 = vsel %vm6433_vm10, %v9244_v32, %v6430_v63  ;;  %v5082_v2 = vmul.f32 %v4858_v21, %v16290_v34  ;;  %v3863_v32 = vadd.f32 %v3862_v14, %v3509_v28  ;;  %v4215_v63 = vpop.f32.mrf.mxu2  ;;  %v4568_v21 = vpop.f32.mrf.mxu3 }
 0x834   : > { %v7194_v57 = vmul.f32 %v6434_v17, %v5850_v20  ;;  %v5849_v20 = vld [vmem:[%s12955_s17 + $0x130] sm:$0xff] }
 0x835   : > { %5526 = vadd.xlane.f32.xlu1 %v5525_v47  ;;  %v5739_v47 = vmul.f32 %v13832_v46, %v16290_v34  ;;  %v13871_v13 = vsub.f32 %v13518_v50, %v5082_v2  ;;  %v4216_v46 = vadd.f32 %v4215_v63, %v3863_v32  ;;  %v2802_v2 = vld [vmem:[%s12343_s20 + $0x9a0] sm:$0xff]  ;;  %v2808_v32 = vld [vmem:[%s12343_s20 + $0x9d0] sm:$0xff]  ;;  %v2809_v63 = vld [vmem:[%s12343_s20 + $0x9d8] sm:$0xff] }
 0x836   : > { %3526 = vmatmul.f32.gmra.mxu0 %v2802_v2  ;;  %v5488_v2 = vpop.xlane.xlu0 %5487 }
 0x837   : > { %16352 = vst [vmem:[#allocation3_spill] sm:$0xff] %v13871_v13  ;;  %v5963_v60 = vadd.f32 1e-05, %v5739_v47  ;;  %v5306_v8 = vmul.f32 %v13871_v13, %v13871_v13  ;;  %v13881_v47 = vpop.permute.xlu2 %7394  ;;  %v13883_v14 = vadd.f32 %v4568_v21, %v4216_v46 }
 0x838   : > { %16353 = vst [vmem:[#allocation8_spill] sm:$0xff] %v13881_v47  ;;  %9003 = vmatmul.msk.f32.gmra.mxu3 %vm2942_vm5, %v2809_v63 }
 0x839   : > { %9247 = vrsqrt.f32 %v5963_v60  ;;  %v5528_v50 = vsel %vm358_vm0, %v5306_v8, 0.0  ;;  %v2806_v8 = vld [vmem:[%s12343_s20 + $0x9c0] sm:$0xff]  ;;  %v3512_v21 = vpop.f32.mrf.mxu0  ;;  %vm6441_vm15 = vweird.f32 %v5963_v60 }
 0x83b   : > { %v4218_v13 = vpop.f32.mrf.mxu2 }
 0x83d   : > { %4902 = vadd.xlane.f32.xlu1 %v4901_v0  ;;  %v6420_v0 = vmul.f32 %v9246_v10, %v6419_v1 }
 0x83e   : > { %3529 = vmatmul.f32.gmra.mxu0 %v2806_v8  ;;  %v13898_v25 = vpop.permute.xlu0 %7389 }
 0x83f   : > { %v6424_v17 = vsel %vm6423_vm13, %v9246_v10, %v6420_v0  ;;  %v13886_v10 = vpop.permute.xlu1 %7384  ;;  %v9248_v28 = vpop.eup %9247  ;;  %v4904_v0 = vsel %vm358_vm0, %v13883_v14, 0.0  ;;  %16354 = vst [vmem:[#allocation13_spill] sm:$0xff] %v13898_v25 }
 0x840   : > { %v7193_v1 = vmul.f32 %v6424_v17, %v5849_v20  ;;  %v6436_v20 = vmul.f32 %v9248_v28, %v5963_v60  ;;  %v2807_v17 = vld [vmem:[%s12343_s20 + $0x9c8] sm:$0xff]  ;;  %v13894_v46 = vpop.xlane.xlu2 %5493  ;;  %vm6442_vm14 = vweird.f32 %v9248_v28 }
 0x841   : > { %3882 = vmatmul.f32.gmra.mxu1 %v2807_v17  ;;  %vm6443_vm1 = vmor %vm6441_vm15, %vm6442_vm14 }
 0x846   : > { %7464 = vperm.xlu0 %9052, %v7194_v57   ;;  %v2804_v57 = vld [vmem:[%s12343_s20 + $0x9b0] sm:$0xff] }
 0x847   : > { %4232 = vmatmul.f32.gmra.mxu2 %v2804_v57  ;;  %v6437_v57 = vmul.f32 %v9248_v28, %v6436_v20  ;;  %v5491_v18 = vpop.xlane.xlu1 %5490 }
 0x848   : > { %v5741_v62 = vmul.f32 %v5491_v18, %v16290_v34  ;;  %v4870_v63 = vpop.xlane.xlu2 %4869 }
 0x849   : > { %v6438_v43 = vmul.f32 0.5, %v6437_v57  ;;  %v5086_v17 = vmul.f32 %v4870_v63, %v16290_v34  ;;  %v4864_v57 = vpop.xlane.xlu0 %4863 }
 0x84a   : > { %v5084_v60 = vmul.f32 %v4864_v57, %v16290_v34 }
 0x84b   : > { %v6439_v47 = vsub.f32 1.5, %v6438_v43  ;;  %v13906_v43 = vsub.f32 %v13624_v36, %v5086_v17  ;;  %v2811_v36 = vld [vmem:[%s12343_s20 + $0x9e8] sm:$0xff]  ;;  %v5740_v17 = vmul.f32 %v5488_v2, %v16290_v34 }
 0x84c   : > { %3885 = vmatmul.f32.gmra.mxu1 %v2811_v36 }
 0x84d   : > { %v6440_v20 = vmul.f32 %v9248_v28, %v6439_v47  ;;  %16355 = vst [vmem:[#allocation6_spill] sm:$0xff] %v13906_v43  ;;  %v2813_v47 = vld [vmem:[%s12343_s20 + $0x9f8] sm:$0xff]  ;;  %v5310_v63 = vmul.f32 %v13906_v43, %v13906_v43  ;;  %v4221_v43 = vpop.f32.mrf.mxu2 }
 0x84e   : > { %9004 = vmatmul.msk.f32.gmra.mxu3 %vm2942_vm5, %v2813_v47 }
 0x84f   : > { %4235 = vmatmul.f32.gmra.mxu2 %v2808_v32  ;;  %v4571_v32 = vpop.f32.mrf.mxu3 }
 0x854   : > { %5529 = vadd.xlane.f32.xlu2 %v5528_v50  ;;  %v3865_v50 = vpop.f32.mrf.mxu1 }
 0x856   : > { %7459 = vperm.xlu1 %9050, %v7193_v1   ;;  %v3866_v1 = vadd.f32 %v3865_v50, %v3512_v21  ;;  %v5851_v21 = vld [vmem:[%s12955_s17 + $0x140] sm:$0xff]  ;;  %v6444_v50 = vsel %vm6443_vm1, %v9248_v28, %v6440_v20  ;;  %v3515_v20 = vpop.f32.mrf.mxu0 }
 0x857   : > { %v7195_v18 = vmul.f32 %v6444_v50, %v5851_v21  ;;  %v13919_v21 = vsub.f32 %v13587_v22, %v5084_v60  ;;  %v5540_v50 = vsel %vm358_vm0, %v5310_v63, 0.0  ;;  %v4574_v36 = vpop.f32.mrf.mxu3 }
 0x858   : > { %v4219_v16 = vadd.f32 %v4218_v13, %v3866_v1  ;;  %v2812_v1 = vld [vmem:[%s12343_s20 + $0x9f0] sm:$0xff] }
 0x859   : > { %4238 = vmatmul.f32.gmra.mxu2 %v2812_v1  ;;  %16356 = vst [vmem:[#allocation11_spill] sm:$0xff] %v13919_v21  ;;  %v5964_v1 = vadd.f32 1e-05, %v5740_v17 }
 0x85a   : > { %v13900_v8 = vadd.f32 %v4571_v32, %v4219_v16 }
 0x85b   : > { %vm6451_vm7 = vweird.f32 %v5964_v1 }
 0x85c   : > { %4905 = vadd.xlane.f32.xlu2 %v4904_v0  ;;  %v5965_v0 = vadd.f32 1e-05, %v5741_v62  ;;  %v4907_v13 = vsel %vm358_vm0, %v13900_v8, 0.0  ;;  %v2810_v62 = vld [vmem:[%s12343_s20 + $0x9e0] sm:$0xff]  ;;  %v3868_v28 = vpop.f32.mrf.mxu1 }
 0x85d   : > { %3532 = vmatmul.f32.gmra.mxu0 %v2810_v62  ;;  %v3869_v57 = vadd.f32 %v3868_v28, %v3515_v20  ;;  %v5853_v28 = vld [vmem:[%s12955_s17 + $0x150] sm:$0xff] }
 0x85e   : > { %9249 = vrsqrt.f32 %v5965_v0  ;;  %vm6461_vm3 = vweird.f32 %v5965_v0 }
 0x85f   : > { %v4222_v62 = vadd.f32 %v4221_v43, %v3869_v57  ;;  %9251 = vrsqrt.f32 %v5964_v1 }
 0x861   : > { %v13925_v22 = vadd.f32 %v4574_v36, %v4222_v62 }
 0x863   : > { %v4910_v63 = vsel %vm358_vm0, %v13925_v22, 0.0 }
 0x864   : > { %v9250_v16 = vpop.eup %9249 }
 0x865   : > { %v6456_v32 = vmul.f32 %v9250_v16, %v5965_v0  ;;  %vm6462_vm2 = vweird.f32 %v9250_v16  ;;  %v9252_v60 = vpop.eup %9251 }
 0x866   : > { %vm6463_vm4 = vmor %vm6461_vm3, %vm6462_vm2  ;;  %v6446_v17 = vmul.f32 %v9252_v60, %v5964_v1  ;;  %vm6452_vm6 = vweird.f32 %v9252_v60  ;;  %v2814_v1 = vld [vmem:[%s12343_s20 + $0xa00] sm:$0xff] }
 0x867   : > { %vm13940_vm8 = vmor %vm6451_vm7, %vm6452_vm6  ;;  %3535 = vmatmul.f32.gmra.mxu0 %v2814_v1 }
 0x870   : > { %4908 = vadd.xlane.f32.xlu0 %v4907_v13  ;;  %v6457_v13 = vmul.f32 %v9250_v16, %v6456_v32 }
 0x872   : > { %v6458_v47 = vmul.f32 0.5, %v6457_v13  ;;  %v6447_v13 = vmul.f32 %v9252_v60, %v6446_v17  ;;  %v4577_v17 = vpop.f32.mrf.mxu3 }
 0x874   : > { %7469 = vperm.xlu2 %9051, %v7195_v18   ;;  %v5308_v18 = vmul.f32 %v13919_v21, %v13919_v21  ;;  %v6459_v49 = vsub.f32 1.5, %v6458_v47  ;;  %v6448_v57 = vmul.f32 0.5, %v6447_v13 }
 0x876   : > { %v5534_v2 = vsel %vm358_vm0, %v5308_v18, 0.0  ;;  %v6460_v32 = vmul.f32 %v9250_v16, %v6459_v49  ;;  %v5742_v49 = vmul.f32 %v13894_v46, %v16290_v34  ;;  %v3871_v18 = vpop.f32.mrf.mxu1  ;;  %v6449_v62 = vsub.f32 1.5, %v6448_v57  ;;  %v2816_v57 = vld [vmem:[%s12343_s20 + $0xa10] sm:$0xff] }
 0x877   : > { %4241 = vmatmul.f32.gmra.mxu2 %v2816_v57 }
 0x878   : > { %5541 = vadd.xlane.f32.xlu0 %v5540_v50  ;;  %v6464_v20 = vsel %vm6463_vm4, %v9250_v16, %v6460_v32  ;;  %v4867_v50 = vpop.xlane.xlu1 %4866  ;;  %v4224_v32 = vpop.f32.mrf.mxu2 }
 0x879   : > { %v7197_v43 = vmul.f32 %v6464_v20, %v5853_v28  ;;  %v5085_v47 = vmul.f32 %v4867_v50, %v16290_v34  ;;  %v2818_v20 = vld [vmem:[%s12343_s20 + $0xa20] sm:$0xff] }
 0x87a   : > { %3538 = vmatmul.f32.gmra.mxu0 %v2818_v20  ;;  %v4580_v27 = vpop.f32.mrf.mxu3 }
 0x87b   : > { %v13934_v36 = vsub.f32 %v13581_v58, %v5085_v47  ;;  %v13945_v58 = vpop.permute.xlu2 %7409  ;;  %v2817_v47 = vld [vmem:[%s12343_s20 + $0xa18] sm:$0xff] }
 0x87c   : > { %16360 = vst [vmem:[#allocation16_spill] sm:$0xff] %v13945_v58  ;;  %9005 = vmatmul.msk.f32.gmra.mxu3 %vm2942_vm5, %v2817_v47 }
 0x87d   : > { %16357 = vst [vmem:[#allocation9_spill] sm:$0xff] %v13934_v36  ;;  %v5309_v28 = vmul.f32 %v13934_v36, %v13934_v36 }
 0x87e   : > { %v3518_v0 = vpop.f32.mrf.mxu0 }
 0x87f   : > { %v3872_v16 = vadd.f32 %v3871_v18, %v3518_v0  ;;  %v5537_v13 = vsel %vm358_vm0, %v5309_v28, 0.0  ;;  %v2815_v18 = vld [vmem:[%s12343_s20 + $0xa08] sm:$0xff]  ;;  %v2821_v28 = vld [vmem:[%s12343_s20 + $0xa38] sm:$0xff] }
 0x880   : > { %5535 = vadd.xlane.f32.xlu1 %v5534_v2  ;;  %v13936_v2 = vadd.f32 1e-05, %v5742_v49  ;;  %v13954_v49 = vpop.permute.xlu1 %7399  ;;  %3888 = vmatmul.f32.gmra.mxu1 %v2815_v18  ;;  %v4227_v1 = vpop.f32.mrf.mxu2 }
 0x881   : > { %v4225_v46 = vadd.f32 %v4224_v32, %v3872_v16  ;;  %16361 = vst [vmem:[#allocation86_spill] sm:$0xff] %v13954_v49  ;;  %v2820_v32 = vld [vmem:[%s12343_s20 + $0xa30] sm:$0xff]  ;;  %v5497_v18 = vpop.xlane.xlu0 %5496 }
 0x882   : > { %9253 = vrsqrt.f32 %v13936_v2  ;;  %4244 = vmatmul.f32.gmra.mxu2 %v2820_v32  ;;  %vm6471_vm10 = vweird.f32 %v13936_v2 }
 0x883   : > { %v13957_v0 = vadd.f32 %v4577_v17, %v4225_v46  ;;  %v3874_v46 = vpop.f32.mrf.mxu1  ;;  %v2819_v17 = vld [vmem:[%s12343_s20 + $0xa28] sm:$0xff] }
 0x884   : > { %9006 = vmatmul.msk.f32.gmra.mxu3 %vm2942_vm5, %v2821_v28 }
 0x885   : > { %v4913_v16 = vsel %vm358_vm0, %v13957_v0, 0.0 }
 0x886   : > { %v3521_v57 = vpop.f32.mrf.mxu0 }
 0x888   : > { %4911 = vadd.xlane.f32.xlu1 %v4910_v63  ;;  %v6450_v63 = vmul.f32 %v9252_v60, %v6449_v62  ;;  %v5500_v36 = vpop.xlane.xlu1 %5499  ;;  %3891 = vmatmul.f32.gmra.mxu1 %v2819_v17 }
 0x889   : > { %v5744_v47 = vmul.f32 %v5500_v36, %v16290_v34  ;;  %v13974_v28 = vpop.permute.xlu0 %7404 }
 0x88a   : > { %v6454_v50 = vsel %vm13940_vm8, %v9252_v60, %v6450_v63  ;;  %v9254_v60 = vpop.eup %9253  ;;  %v13963_v63 = vpop.xlane.xlu2 %5502  ;;  %16362 = vst [vmem:[#allocation83_spill] sm:$0xff] %v13974_v28  ;;  %v2834_v28 = vld [vmem:[%s12343_s20 + $0xaa0] sm:$0xff] }
 0x88b   : > { %v5968_v58 = vadd.f32 1e-05, %v5744_v47  ;;  %vm6472_vm9 = vweird.f32 %v9254_v60  ;;  %v2825_v47 = vld [vmem:[%s12343_s20 + $0xa58] sm:$0xff] }
 0x88c   : > { %7479 = vperm.xlu0 %9052, %v7197_v43   ;;  %v5852_v43 = vld [vmem:[%s12955_s17 + $0x148] sm:$0xff]  ;;  %vm6473_vm11 = vmor %vm6471_vm10, %vm6472_vm9  ;;  %9007 = vmatmul.msk.f32.gmra.mxu3 %vm2942_vm5, %v2825_v47 }
 0x88d   : > { %v7196_v62 = vmul.f32 %v6454_v50, %v5852_v43  ;;  %v3875_v43 = vadd.f32 %v3874_v46, %v3521_v57  ;;  %9255 = vrsqrt.f32 %v5968_v58  ;;  %vm6491_vm13 = vweird.f32 %v5968_v58 }
 0x891   : > { %v4873_v17 = vpop.xlane.xlu0 %4872 }
 0x892   : > { %v4879_v59 = vpop.xlane.xlu2 %4878 }
 0x893   : > { %v5089_v32 = vmul.f32 %v4879_v59, %v16290_v34  ;;  %v9256_v57 = vpop.eup %9255 }
 0x894   : > { %v6486_v59 = vmul.f32 %v9256_v57, %v5968_v58  ;;  %vm6492_vm12 = vweird.f32 %v9256_v57  ;;  %v5745_v58 = vmul.f32 %v13963_v63, %v16290_v34 }
 0x895   : > { %vm6493_vm14 = vmor %vm6491_vm13, %vm6492_vm12 }
 0x89d   : > { %5538 = vadd.xlane.f32.xlu2 %v5537_v13  ;;  %v6466_v13 = vmul.f32 %v9254_v60, %v13936_v2 }
 0x89f   : > { %v6467_v50 = vmul.f32 %v9254_v60, %v6466_v13  ;;  %v13979_v13 = vsub.f32 %v13691_v52, %v5089_v32  ;;  %v6487_v52 = vmul.f32 %v9256_v57, %v6486_v59  ;;  %v5743_v32 = vmul.f32 %v5497_v18, %v16290_v34 }
 0x8a1   : > { %7474 = vperm.xlu1 %9050, %v7196_v62   ;;  %v4228_v62 = vadd.f32 %v4227_v1, %v3875_v43  ;;  %v6468_v21 = vmul.f32 0.5, %v6467_v50  ;;  %16363 = vst [vmem:[#allocation85_spill] sm:$0xff] %v13979_v13  ;;  %v5313_v46 = vmul.f32 %v13979_v13, %v13979_v13  ;;  %v2824_v50 = vld [vmem:[%s12343_s20 + $0xa50] sm:$0xff]  ;;  %v5087_v1 = vmul.f32 %v4873_v17, %v16290_v34 }
 0x8a2   : > { %4247 = vmatmul.f32.gmra.mxu2 %v2824_v50  ;;  %v5967_v50 = vadd.f32 1e-05, %v5743_v32 }
 0x8a3   : > { %v13971_v42 = vadd.f32 %v4580_v27, %v4228_v62  ;;  %v5854_v27 = vld [vmem:[%s12955_s17 + $0x158] sm:$0xff]  ;;  %v5549_v2 = vsel %vm358_vm0, %v5313_v46, 0.0  ;;  %v3877_v62 = vpop.f32.mrf.mxu1  ;;  %v2822_v46 = vld [vmem:[%s12343_s20 + $0xa40] sm:$0xff] }
 0x8a4   : > { %3541 = vmatmul.f32.gmra.mxu0 %v2822_v46  ;;  %9257 = vrsqrt.f32 %v5967_v50  ;;  %vm6481_vm1 = vweird.f32 %v5967_v50 }
 0x8a5   : > { %4914 = vadd.xlane.f32.xlu2 %v4913_v16  ;;  %v6469_v16 = vsub.f32 1.5, %v6468_v21  ;;  %v4916_v36 = vsel %vm358_vm0, %v13971_v42, 0.0 }
 0x8a7   : > { %v6470_v20 = vmul.f32 %v9254_v60, %v6469_v16  ;;  %v3524_v16 = vpop.f32.mrf.mxu0 }
 0x8a9   : > { %v6474_v21 = vsel %vm6473_vm11, %v9254_v60, %v6470_v20  ;;  %v6488_v60 = vmul.f32 0.5, %v6487_v52  ;;  %v3878_v20 = vadd.f32 %v3877_v62, %v3524_v16  ;;  %v4583_v52 = vpop.f32.mrf.mxu3 }
 0x8aa   : > { %v7198_v43 = vmul.f32 %v6474_v21, %v5854_v27  ;;  %v4230_v21 = vpop.f32.mrf.mxu2 }
 0x8ab   : > { %v6489_v27 = vsub.f32 1.5, %v6488_v60  ;;  %v4231_v17 = vadd.f32 %v4230_v21, %v3878_v20  ;;  %v9258_v60 = vpop.eup %9257  ;;  %v4876_v20 = vpop.xlane.xlu1 %4875 }
 0x8ac   : > { %v6476_v32 = vmul.f32 %v9258_v60, %v5967_v50  ;;  %v5088_v21 = vmul.f32 %v4876_v20, %v16290_v34  ;;  %v3880_v46 = vpop.f32.mrf.mxu1  ;;  %vm6482_vm15 = vweird.f32 %v9258_v60  ;;  %v5855_v20 = vld [vmem:[%s12955_s17 + $0x160] sm:$0xff] }
 0x8ad   : > { %v6490_v47 = vmul.f32 %v9256_v57, %v6489_v27  ;;  %v13999_v18 = vadd.f32 %v4583_v52, %v4231_v17  ;;  %v14010_v52 = vadd.f32 1e-05, %v5745_v58  ;;  %vm6483_vm2 = vmor %vm6481_vm1, %vm6482_vm15  ;;  %v2829_v58 = vld [vmem:[%s12343_s20 + $0xa78] sm:$0xff] }
 0x8ae   : > { %v6477_v27 = vmul.f32 %v9258_v60, %v6476_v32  ;;  %9008 = vmatmul.msk.f32.gmra.mxu3 %vm2942_vm5, %v2829_v58 }
 0x8af   : > { %v4919_v16 = vsel %vm358_vm0, %v13999_v18, 0.0  ;;  %9259 = vrsqrt.f32 %v14010_v52  ;;  %vm6501_vm4 = vweird.f32 %v14010_v52 }
 0x8b5   : > { %v9260_v50 = vpop.eup %9259 }
 0x8b6   : > { %4917 = vadd.xlane.f32.xlu0 %v4916_v36  ;;  %v13992_v36 = vsub.f32 %v13651_v29, %v5087_v1  ;;  %v6494_v1 = vsel %vm6493_vm14, %v9256_v57, %v6490_v47  ;;  %v14008_v57 = vsub.f32 %v13656_v6, %v5088_v21  ;;  %vm6502_vm3 = vweird.f32 %v9260_v50 }
 0x8b7   : > { %vm6503_vm6 = vmor %vm6501_vm4, %vm6502_vm3 }
 0x8b8   : > { %16364 = vst [vmem:[#allocation80_spill] sm:$0xff] %v13992_v36  ;;  %v5311_v59 = vmul.f32 %v13992_v36, %v13992_v36 }
 0x8b9   : > { %16365 = vst [vmem:[#allocation84_spill] sm:$0xff] %v14008_v57 }
 0x8ba   : > { %v5543_v29 = vsel %vm358_vm0, %v5311_v59, 0.0  ;;  %v6478_v59 = vmul.f32 0.5, %v6477_v27 }
 0x8bc   : > { %v6479_v17 = vsub.f32 1.5, %v6478_v59  ;;  %v2828_v59 = vld [vmem:[%s12343_s20 + $0xa70] sm:$0xff] }
 0x8bd   : > { %7484 = vperm.xlu2 %9051, %v7198_v43   ;;  %v2823_v43 = vld [vmem:[%s12343_s20 + $0xa48] sm:$0xff]  ;;  %4250 = vmatmul.f32.gmra.mxu2 %v2828_v59  ;;  %v2833_v59 = vld [vmem:[%s12343_s20 + $0xa98] sm:$0xff] }
 0x8be   : > { %5550 = vadd.xlane.f32.xlu0 %v5549_v2  ;;  %3894 = vmatmul.f32.gmra.mxu1 %v2823_v43  ;;  %v5856_v2 = vld [vmem:[%s12955_s17 + $0x168] sm:$0xff]  ;;  %v3527_v43 = vpop.f32.mrf.mxu0  ;;  %v6480_v63 = vmul.f32 %v9258_v60, %v6479_v17 }
 0x8bf   : > { %v7200_v62 = vmul.f32 %v6494_v1, %v5856_v2  ;;  %v3881_v47 = vadd.f32 %v3880_v46, %v3527_v43  ;;  %v14012_v2 = vpop.permute.xlu2 %7424  ;;  %v5312_v1 = vmul.f32 %v14008_v57, %v14008_v57  ;;  %v2826_v46 = vld [vmem:[%s12343_s20 + $0xa60] sm:$0xff]  ;;  %v2827_v43 = vld [vmem:[%s12343_s20 + $0xa68] sm:$0xff]  ;;  %9009 = vmatmul.msk.f32.gmra.mxu3 %vm2942_vm5, %v2833_v59 }
 0x8c0   : > { %16366 = vst [vmem:[#allocation88_spill] sm:$0xff] %v14012_v2  ;;  %v6484_v21 = vsel %vm6483_vm2, %v9258_v60, %v6480_v63  ;;  %3544 = vmatmul.f32.gmra.mxu0 %v2826_v46  ;;  %v2831_v57 = vld [vmem:[%s12343_s20 + $0xa88] sm:$0xff] }
 0x8c1   : > { %v5546_v32 = vsel %vm358_vm0, %v5312_v1, 0.0  ;;  %v3883_v1 = vpop.f32.mrf.mxu1 }
 0x8c6   : > { %3897 = vmatmul.f32.gmra.mxu1 %v2827_v43  ;;  %v2830_v43 = vld [vmem:[%s12343_s20 + $0xa80] sm:$0xff] }
 0x8c7   : > { %v14028_v17 = vpop.xlane.xlu2 %5511 }
 0x8c8   : > { %3547 = vmatmul.f32.gmra.mxu0 %v2830_v43 }
 0x8cb   : > { %5544 = vadd.xlane.f32.xlu1 %v5543_v29  ;;  %v4233_v29 = vpop.f32.mrf.mxu2 }
 0x8cc   : > { %v4234_v6 = vadd.f32 %v4233_v29, %v3881_v47  ;;  %v7199_v47 = vmul.f32 %v6484_v21, %v5855_v20  ;;  %v3530_v29 = vpop.f32.mrf.mxu0 }
 0x8ce   : > { %3900 = vmatmul.f32.gmra.mxu1 %v2831_v57 }
 0x8cf   : > { %v4888_v36 = vpop.xlane.xlu2 %4887 }
 0x8d0   : > { %3550 = vmatmul.f32.gmra.mxu0 %v2834_v28 }
 0x8d2   : > { %7494 = vperm.xlu0 %9052, %v7200_v62   ;;  %v14016_v62 = vpop.permute.xlu1 %7414 }
 0x8d3   : > { %4920 = vadd.xlane.f32.xlu1 %v4919_v16  ;;  %16367 = vst [vmem:[#allocation89_spill] sm:$0xff] %v14016_v62  ;;  %v4586_v16 = vpop.f32.mrf.mxu3  ;;  %v4236_v46 = vpop.f32.mrf.mxu2 }
 0x8d4   : > { %v14021_v27 = vadd.f32 %v4586_v16, %v4234_v6  ;;  %v6496_v6 = vmul.f32 %v9260_v50, %v14010_v52  ;;  %v3884_v16 = vadd.f32 %v3883_v1, %v3530_v29  ;;  %v5506_v1 = vpop.xlane.xlu0 %5505 }
 0x8d5   : > { %v5746_v25 = vmul.f32 %v5506_v1, %v16290_v34 }
 0x8d6   : > { %v4922_v63 = vsel %vm358_vm0, %v14021_v27, 0.0  ;;  %v6497_v20 = vmul.f32 %v9260_v50, %v6496_v6  ;;  %v4237_v21 = vadd.f32 %v4236_v46, %v3884_v16 }
 0x8d8   : > { %v6498_v2 = vmul.f32 0.5, %v6497_v20 }
 0x8da   : > { %v5509_v60 = vpop.xlane.xlu1 %5508 }
 0x8db   : > { %v5747_v58 = vmul.f32 %v5509_v60, %v16290_v34  ;;  %v5092_v60 = vmul.f32 %v4888_v36, %v16290_v34 }
 0x8dc   : > { %v14047_v59 = vpop.permute.xlu0 %7419 }
 0x8dd   : > { %v5971_v13 = vadd.f32 1e-05, %v5747_v58  ;;  %v14045_v6 = vsub.f32 %v13752_v19, %v5092_v60  ;;  %16369 = vst [vmem:[#allocation87_spill] sm:$0xff] %v14047_v59  ;;  %v2837_v59 = vld [vmem:[%s12343_s20 + $0xab8] sm:$0xff] }
 0x8de   : > { %9010 = vmatmul.msk.f32.gmra.mxu3 %vm2942_vm5, %v2837_v59 }
 0x8df   : > { %9261 = vrsqrt.f32 %v5971_v13  ;;  %16368 = vst [vmem:[#allocation15_spill] sm:$0xff] %v14045_v6  ;;  %v5316_v36 = vmul.f32 %v14045_v6, %v14045_v6  ;;  %v2836_v6 = vld [vmem:[%s12343_s20 + $0xab0] sm:$0xff]  ;;  %vm6521_vm8 = vweird.f32 %v5971_v13 }
 0x8e1   : > { %v5558_v43 = vsel %vm358_vm0, %v5316_v36, 0.0 }
 0x8e5   : > { %v9262_v16 = vpop.eup %9261 }
 0x8e6   : > { %5547 = vadd.xlane.f32.xlu2 %v5546_v32  ;;  %v2832_v32 = vld [vmem:[%s12343_s20 + $0xa90] sm:$0xff]  ;;  %v6516_v58 = vmul.f32 %v9262_v16, %v5971_v13  ;;  %vm6522_vm7 = vweird.f32 %v9262_v16 }
 0x8e7   : > { %4253 = vmatmul.f32.gmra.mxu2 %v2832_v32  ;;  %vm6523_vm9 = vmor %vm6521_vm8, %vm6522_vm7 }
 0x8e8   : > { %v6517_v19 = vmul.f32 %v9262_v16, %v6516_v58 }
 0x8ec   : > { %7489 = vperm.xlu1 %9050, %v7199_v47   ;;  %v4589_v47 = vpop.f32.mrf.mxu3 }
 0x8ed   : > { %v14039_v29 = vadd.f32 %v4589_v47, %v4237_v21  ;;  %v4882_v21 = vpop.xlane.xlu0 %4881  ;;  %v6518_v47 = vmul.f32 0.5, %v6517_v19 }
 0x8ee   : > { %4923 = vadd.xlane.f32.xlu2 %v4922_v63  ;;  %v6499_v63 = vsub.f32 1.5, %v6498_v2  ;;  %v5857_v2 = vld [vmem:[%s12955_s17 + $0x170] sm:$0xff]  ;;  %v5090_v52 = vmul.f32 %v4882_v21, %v16290_v34 }
 0x8ef   : > { %v4925_v32 = vsel %vm358_vm0, %v14039_v29, 0.0  ;;  %v6519_v60 = vsub.f32 1.5, %v6518_v47  ;;  %4256 = vmatmul.f32.gmra.mxu2 %v2836_v6  ;;  %v4885_v47 = vpop.xlane.xlu1 %4884 }
 0x8f0   : > { %v6500_v57 = vmul.f32 %v9260_v50, %v6499_v63  ;;  %v3886_v63 = vpop.f32.mrf.mxu1 }
 0x8f1   : > { %v6520_v58 = vmul.f32 %v9262_v16, %v6519_v60  ;;  %v5748_v60 = vmul.f32 %v14028_v17, %v16290_v34 }
 0x8f2   : > { %v6504_v46 = vsel %vm6503_vm6, %v9260_v50, %v6500_v57  ;;  %v14060_v50 = vsub.f32 %v13715_v4, %v5090_v52  ;;  %v2835_v57 = vld [vmem:[%s12343_s20 + $0xaa8] sm:$0xff] }
 0x8f3   : > { %v7201_v20 = vmul.f32 %v6504_v46, %v5857_v2  ;;  %3903 = vmatmul.f32.gmra.mxu1 %v2835_v57  ;;  %v4239_v2 = vpop.f32.mrf.mxu2  ;;  %v5970_v46 = vadd.f32 1e-05, %v5746_v25  ;;  %v6524_v4 = vsel %vm6523_vm9, %v9262_v16, %v6520_v58  ;;  %v5091_v16 = vmul.f32 %v4885_v47, %v16290_v34  ;;  %v2840_v57 = vld [vmem:[%s12343_s20 + $0xad0] sm:$0xff] }
 0x8f4   : > { %16370 = vst [vmem:[#allocation22_spill] sm:$0xff] %v14060_v50  ;;  %v5314_v19 = vmul.f32 %v14060_v50, %v14060_v50 }
 0x8f5   : > { %9263 = vrsqrt.f32 %v5970_v46  ;;  %vm6511_vm11 = vweird.f32 %v5970_v46 }
 0x8f6   : > { %v5552_v6 = vsel %vm358_vm0, %v5314_v19, 0.0 }
 0x8f7   : > { %4259 = vmatmul.f32.gmra.mxu2 %v2840_v57 }
 0x8fb   : > { %v9264_v21 = vpop.eup %9263 }
 0x8fc   : > { %4926 = vadd.xlane.f32.xlu0 %v4925_v32  ;;  %v3533_v32 = vpop.f32.mrf.mxu0  ;;  %v6506_v13 = vmul.f32 %v9264_v21, %v5970_v46  ;;  %vm6512_vm10 = vweird.f32 %v9264_v21  ;;  %v2844_v46 = vld [vmem:[%s12343_s20 + $0xaf0] sm:$0xff] }
 0x8fd   : > { %v3887_v36 = vadd.f32 %v3886_v63, %v3533_v32  ;;  %v3889_v63 = vpop.f32.mrf.mxu1  ;;  %vm14093_vm12 = vmor %vm6511_vm11, %vm6512_vm10 }
 0x8fe   : > { %v6507_v52 = vmul.f32 %v9264_v21, %v6506_v13 }
 0x8ff   : > { %v4240_v1 = vadd.f32 %v4239_v2, %v3887_v36  ;;  %v14077_v36 = vsub.f32 %v13733_v56, %v5091_v16  ;;  %v14079_v2 = vpop.permute.xlu2 %7439  ;;  %4262 = vmatmul.f32.gmra.mxu2 %v2844_v46 }
 0x900   : > { %v6508_v58 = vmul.f32 0.5, %v6507_v52  ;;  %16372 = vst [vmem:[#allocation21_spill] sm:$0xff] %v14079_v2 }
 0x901   : > { %16371 = vst [vmem:[#allocation20_spill] sm:$0xff] %v14077_v36  ;;  %v5315_v17 = vmul.f32 %v14077_v36, %v14077_v36  ;;  %v2843_v36 = vld [vmem:[%s12343_s20 + $0xae8] sm:$0xff] }
 0x904   : > { %5559 = vadd.xlane.f32.xlu0 %v5558_v43  ;;  %v5859_v43 = vld [vmem:[%s12955_s17 + $0x180] sm:$0xff]  ;;  %v3536_v32 = vpop.f32.mrf.mxu0 }
 0x905   : > { %v7203_v28 = vmul.f32 %v6524_v4, %v5859_v43  ;;  %v3890_v19 = vadd.f32 %v3889_v63, %v3536_v32  ;;  %v14083_v43 = vadd.f32 1e-05, %v5748_v60  ;;  %v4242_v4 = vpop.f32.mrf.mxu2  ;;  %v3892_v16 = vpop.f32.mrf.mxu1  ;;  %v5858_v32 = vld [vmem:[%s12955_s17 + $0x178] sm:$0xff] }
 0x906   : > { %7499 = vperm.xlu2 %9051, %v7201_v20   ;;  %v4592_v20 = vpop.f32.mrf.mxu3 }
 0x907   : > { %v14068_v59 = vadd.f32 %v4592_v20, %v4240_v1  ;;  %v14081_v1 = vpop.permute.xlu1 %7429  ;;  %v6509_v20 = vsub.f32 1.5, %v6508_v58  ;;  %9265 = vrsqrt.f32 %v14083_v43  ;;  %v14089_v13 = vpop.xlane.xlu2 %5520  ;;  %v2841_v58 = vld [vmem:[%s12343_s20 + $0xad8] sm:$0xff]  ;;  %vm6531_vm14 = vweird.f32 %v14083_v43 }
 0x908   : > { %16373 = vst [vmem:[#allocation28_spill] sm:$0xff] %v14081_v1  ;;  %9011 = vmatmul.msk.f32.gmra.mxu3 %vm2942_vm5, %v2841_v58  ;;  %v2845_v58 = vld [vmem:[%s12343_s20 + $0xaf8] sm:$0xff] }
 0x909   : > { %v4928_v25 = vsel %vm358_vm0, %v14068_v59, 0.0 }
 0x90c   : > { %v3539_v52 = vpop.f32.mrf.mxu0 }
 0x90e   : > { %v4595_v56 = vpop.f32.mrf.mxu3 }
 0x90f   : > { %v5518_v63 = vpop.xlane.xlu1 %5517  ;;  %v4897_v2 = vpop.xlane.xlu2 %4896 }
 0x910   : > { %9012 = vmatmul.msk.f32.gmra.mxu3 %vm2942_vm5, %v2845_v58 }
 0x916   : > { %5553 = vadd.xlane.f32.xlu1 %v5552_v6  ;;  %v4243_v6 = vadd.f32 %v4242_v4, %v3890_v19  ;;  %v2838_v19 = vld [vmem:[%s12343_s20 + $0xac0] sm:$0xff]  ;;  %v2839_v4 = vld [vmem:[%s12343_s20 + $0xac8] sm:$0xff]  ;;  %v4598_v60 = vpop.f32.mrf.mxu3 }
 0x917   : > { %3553 = vmatmul.f32.gmra.mxu0 %v2838_v19  ;;  %3906 = vmatmul.f32.gmra.mxu1 %v2839_v4  ;;  %v2842_v19 = vld [vmem:[%s12343_s20 + $0xae0] sm:$0xff] }
 0x918   : > { %7509 = vperm.xlu0 %9052, %v7203_v28   ;;  %v6510_v28 = vmul.f32 %v9264_v21, %v6509_v20  ;;  %v14091_v47 = vadd.f32 %v4595_v56, %v4243_v6  ;;  %v9266_v20 = vpop.eup %9265  ;;  %v5750_v6 = vmul.f32 %v5518_v63, %v16290_v34 }
 0x919   : > { %vm6532_vm13 = vweird.f32 %v9266_v20 }
 0x91a   : > { %v6514_v57 = vsel %vm14093_vm12, %v9264_v21, %v6510_v28  ;;  %v4931_v56 = vsel %vm358_vm0, %v14091_v47, 0.0  ;;  %v6526_v28 = vmul.f32 %v9266_v20, %v14083_v43  ;;  %vm6533_vm15 = vmor %vm6531_vm14, %vm6532_vm13 }
 0x91b   : > { %v7202_v21 = vmul.f32 %v6514_v57, %v5858_v32  ;;  %v5095_v32 = vmul.f32 %v4897_v2, %v16290_v34 }
 0x91c   : > { %v6527_v50 = vmul.f32 %v9266_v20, %v6526_v28 }
 0x91d   : > { %v14119_v46 = vsub.f32 %v13814_v11, %v5095_v32  ;;  %v5860_v11 = vld [vmem:[%s12955_s17 + $0x188] sm:$0xff] }
 0x91e   : > { %4929 = vadd.xlane.f32.xlu1 %v4928_v25  ;;  %v5555_v25 = vsel %vm358_vm0, %v5315_v17, 0.0  ;;  %v3893_v17 = vadd.f32 %v3892_v16, %v3539_v52  ;;  %v5974_v16 = vadd.f32 1e-05, %v5750_v6  ;;  %v6528_v57 = vmul.f32 0.5, %v6527_v50 }
 0x91f   : > { %3556 = vmatmul.f32.gmra.mxu0 %v2842_v19  ;;  %3909 = vmatmul.f32.gmra.mxu1 %v2843_v36  ;;  %16376 = vst [vmem:[#allocation25_spill] sm:$0xff] %v14119_v46 }
 0x920   : > { %9267 = vrsqrt.f32 %v5974_v16  ;;  %vm6551_vm2 = vweird.f32 %v5974_v16 }
 0x926   : > { %v9268_v6 = vpop.eup %9267 }
 0x927   : > { %vm6552_vm1 = vweird.f32 %v9268_v6 }
 0x928   : > { %vm6553_vm3 = vmor %vm6551_vm2, %vm6552_vm1 }
 0x92f   : > { %5556 = vadd.xlane.f32.xlu2 %v5555_v25  ;;  %v4245_v25 = vpop.f32.mrf.mxu2 }
 0x930   : > { %v4246_v52 = vadd.f32 %v4245_v25, %v3893_v17  ;;  %v5515_v17 = vpop.xlane.xlu0 %5514  ;;  %v6546_v25 = vmul.f32 %v9268_v6, %v5974_v16 }
 0x932   : > { %v14112_v63 = vadd.f32 %v4598_v60, %v4246_v52  ;;  %v6547_v2 = vmul.f32 %v9268_v6, %v6546_v25  ;;  %v3542_v25 = vpop.f32.mrf.mxu0 }
 0x934   : > { %v4934_v4 = vsel %vm358_vm0, %v14112_v63, 0.0  ;;  %v6548_v60 = vmul.f32 0.5, %v6547_v2 }
 0x936   : > { %v6549_v32 = vsub.f32 1.5, %v6548_v60 }
 0x937   : > { %7504 = vperm.xlu1 %9050, %v7202_v21   ;;  %4932 = vadd.xlane.f32.xlu2 %v4931_v56  ;;  %v6529_v56 = vsub.f32 1.5, %v6528_v57  ;;  %v5319_v21 = vmul.f32 %v14119_v46, %v14119_v46  ;;  %v2848_v57 = vld [vmem:[%s12343_s20 + $0xb10] sm:$0xff] }
 0x938   : > { %v14124_v50 = vpop.permute.xlu0 %7434  ;;  %4265 = vmatmul.f32.gmra.mxu2 %v2848_v57  ;;  %v6550_v43 = vmul.f32 %v9268_v6, %v6549_v32  ;;  %v4894_v57 = vpop.xlane.xlu1 %4893 }
 0x939   : > { %v6530_v36 = vmul.f32 %v9266_v20, %v6529_v56  ;;  %16377 = vst [vmem:[#allocation60_spill] sm:$0xff] %v14124_v50  ;;  %v5567_v28 = vsel %vm358_vm0, %v5319_v21, 0.0  ;;  %v5749_v21 = vmul.f32 %v5515_v17, %v16290_v34 }
 0x93b   : > { %v6534_v52 = vsel %vm6533_vm15, %v9266_v20, %v6530_v36  ;;  %v3895_v56 = vpop.f32.mrf.mxu1  ;;  %v5862_v20 = vld [vmem:[%s12955_s17 + $0x198] sm:$0xff]  ;;  %v6554_v36 = vsel %vm6553_vm3, %v9268_v6, %v6550_v43  ;;  %v5094_v43 = vmul.f32 %v4894_v57, %v16290_v34 }
 0x93c   : > { %v7204_v58 = vmul.f32 %v6534_v52, %v5860_v11  ;;  %v3896_v2 = vadd.f32 %v3895_v56, %v3542_v25  ;;  %v4248_v11 = vpop.f32.mrf.mxu2  ;;  %v5973_v52 = vadd.f32 1e-05, %v5749_v21  ;;  %v7206_v60 = vmul.f32 %v6554_v36, %v5862_v20  ;;  %v2849_v56 = vld [vmem:[%s12343_s20 + $0xb18] sm:$0xff]  ;;  %v2846_v25 = vld [vmem:[%s12343_s20 + $0xb00] sm:$0xff]  ;;  %v2847_v21 = vld [vmem:[%s12343_s20 + $0xb08] sm:$0xff] }
 0x93d   : > { %9013 = vmatmul.msk.f32.gmra.mxu3 %vm2942_vm5, %v2849_v56  ;;  %v3545_v36 = vpop.f32.mrf.mxu0  ;;  %3559 = vmatmul.f32.gmra.mxu0 %v2846_v25  ;;  %v2853_v56 = vld [vmem:[%s12343_s20 + $0xb38] sm:$0xff]  ;;  %v2850_v25 = vld [vmem:[%s12343_s20 + $0xb20] sm:$0xff] }
 0x93e   : > { %v4249_v16 = vadd.f32 %v4248_v11, %v3896_v2  ;;  %9269 = vrsqrt.f32 %v5973_v52  ;;  %v2852_v2 = vld [vmem:[%s12343_s20 + $0xb30] sm:$0xff]  ;;  %3912 = vmatmul.f32.gmra.mxu1 %v2847_v21  ;;  %vm6541_vm6 = vweird.f32 %v5973_v52 }
 0x940   : > { %v4891_v19 = vpop.xlane.xlu0 %4890  ;;  %4268 = vmatmul.f32.gmra.mxu2 %v2852_v2 }
 0x942   : > { %4935 = vadd.xlane.f32.xlu0 %v4934_v4  ;;  %v5093_v4 = vmul.f32 %v4891_v19, %v16290_v34  ;;  %v4601_v19 = vpop.f32.mrf.mxu3 }
 0x943   : > { %v14138_v17 = vadd.f32 %v4601_v19, %v4249_v16  ;;  %v3898_v20 = vpop.f32.mrf.mxu1  ;;  %v14157_v16 = vsub.f32 %v13799_v53, %v5094_v43  ;;  %v14159_v19 = vpop.permute.xlu1 %7444 }
 0x944   : > { %v14140_v6 = vpop.eup %9269  ;;  %16381 = vst [vmem:[#allocation17_spill] sm:$0xff] %v14159_v19  ;;  %v3899_v57 = vadd.f32 %v3898_v20, %v3545_v36  ;;  %v2869_v19 = vld [vmem:[%s12343_s20 + $0xbb8] sm:$0xff] }
 0x945   : > { %v4937_v32 = vsel %vm358_vm0, %v14138_v17, 0.0  ;;  %16380 = vst [vmem:[#allocation14_spill] sm:$0xff] %v14157_v16  ;;  %v5318_v21 = vmul.f32 %v14157_v16, %v14157_v16  ;;  %9014 = vmatmul.msk.f32.gmra.mxu3 %vm2942_vm5, %v2853_v56  ;;  %3562 = vmatmul.f32.gmra.mxu0 %v2850_v25  ;;  %v3548_v36 = vpop.f32.mrf.mxu0  ;;  %vm6542_vm4 = vweird.f32 %v14140_v6 }
 0x946   : > { %vm14178_vm7 = vmor %vm6541_vm6, %vm6542_vm4 }
 0x94a   : > { %5568 = vadd.xlane.f32.xlu0 %v5567_v28  ;;  %v14132_v28 = vsub.f32 %v13775_v5, %v5093_v4  ;;  %v6536_v4 = vmul.f32 %v14140_v6, %v5973_v52  ;;  %v4604_v2 = vpop.f32.mrf.mxu3  ;;  %v2855_v52 = vld [vmem:[%s12343_s20 + $0xb48] sm:$0xff] }
 0x94b   : > { %v3901_v20 = vpop.f32.mrf.mxu1 }
 0x94c   : > { %16378 = vst [vmem:[#allocation58_spill] sm:$0xff] %v14132_v28  ;;  %v6537_v11 = vmul.f32 %v14140_v6, %v6536_v4  ;;  %v2851_v4 = vld [vmem:[%s12343_s20 + $0xb28] sm:$0xff] }
 0x94d   : > { %3915 = vmatmul.f32.gmra.mxu1 %v2851_v4 }
 0x94f   : > { %7514 = vperm.xlu2 %9051, %v7204_v58   ;;  %v5317_v58 = vmul.f32 %v14132_v28, %v14132_v28 }
 0x951   : > { %v5561_v5 = vsel %vm358_vm0, %v5317_v58, 0.0  ;;  %v5751_v58 = vmul.f32 %v14089_v13, %v16290_v34 }
 0x952   : > { %v4607_v28 = vpop.f32.mrf.mxu3 }
 0x953   : > { %v14163_v46 = vadd.f32 1e-05, %v5751_v58  ;;  %v5564_v58 = vsel %vm358_vm0, %v5318_v21, 0.0  ;;  %v5861_v21 = vld [vmem:[%s12955_s17 + $0x190] sm:$0xff] }
 0x955   : > { %9271 = vrsqrt.f32 %v14163_v46  ;;  %3918 = vmatmul.f32.gmra.mxu1 %v2855_v52  ;;  %vm6561_vm9 = vweird.f32 %v14163_v46 }
 0x95b   : > { %v9272_v4 = vpop.eup %9271 }
 0x95c   : > { %vm6562_vm8 = vweird.f32 %v9272_v4 }
 0x95d   : > { %vm6563_vm10 = vmor %vm6561_vm9, %vm6562_vm8 }
 0x95e   : > { %7524 = vperm.xlu0 %9052, %v7206_v60   ;;  %v14152_v60 = vpop.permute.xlu2 %7454 }
 0x95f   : > { %16379 = vst [vmem:[#allocation19_spill] sm:$0xff] %v14152_v60  ;;  %v6556_v60 = vmul.f32 %v9272_v4, %v14163_v46 }
 0x961   : > { %5562 = vadd.xlane.f32.xlu1 %v5561_v5  ;;  %v4251_v5 = vpop.f32.mrf.mxu2 }
 0x962   : > { %v4252_v43 = vadd.f32 %v4251_v5, %v3899_v57  ;;  %v3902_v5 = vadd.f32 %v3901_v20, %v3548_v36  ;;  %v2857_v20 = vld [vmem:[%s12343_s20 + $0xb58] sm:$0xff]  ;;  %v2854_v36 = vld [vmem:[%s12343_s20 + $0xb40] sm:$0xff] }
 0x963   : > { %9015 = vmatmul.msk.f32.gmra.mxu3 %vm2942_vm5, %v2857_v20  ;;  %3565 = vmatmul.f32.gmra.mxu0 %v2854_v36 }
 0x966   : > { %v14169_v53 = vpop.xlane.xlu2 %5529 }
 0x969   : > { %4938 = vadd.xlane.f32.xlu1 %v4937_v32  ;;  %v6538_v32 = vmul.f32 0.5, %v6537_v11  ;;  %v5527_v11 = vpop.xlane.xlu1 %5526 }
 0x96a   : > { %v5753_v57 = vmul.f32 %v5527_v11, %v16290_v34  ;;  %v4254_v25 = vpop.f32.mrf.mxu2 }
 0x96b   : > { %v6539_v13 = vsub.f32 1.5, %v6538_v32  ;;  %v14175_v32 = vadd.f32 %v4604_v2, %v4252_v43  ;;  %v2856_v43 = vld [vmem:[%s12343_s20 + $0xb50] sm:$0xff] }
 0x96c   : > { %v5977_v11 = vadd.f32 1e-05, %v5753_v57  ;;  %4271 = vmatmul.f32.gmra.mxu2 %v2856_v43 }
 0x96d   : > { %v6540_v56 = vmul.f32 %v14140_v6, %v6539_v13  ;;  %v4255_v13 = vadd.f32 %v4254_v25, %v3902_v5 }
 0x96e   : > { %v4906_v50 = vpop.xlane.xlu2 %4905  ;;  %9273 = vrsqrt.f32 %v5977_v11  ;;  %vm6581_vm12 = vweird.f32 %v5977_v11 }
 0x96f   : > { %v6544_v2 = vsel %vm14178_vm7, %v14140_v6, %v6540_v56  ;;  %v14194_v25 = vadd.f32 %v4607_v28, %v4255_v13  ;;  %v6557_v6 = vmul.f32 %v9272_v4, %v6556_v60  ;;  %v5098_v16 = vmul.f32 %v4906_v50, %v16290_v34 }
 0x970   : > { %v7205_v5 = vmul.f32 %v6544_v2, %v5861_v21  ;;  %v5524_v21 = vpop.xlane.xlu0 %5523  ;;  %v5863_v2 = vld [vmem:[%s12955_s17 + $0x1a0] sm:$0xff]  ;;  %v3904_v46 = vpop.f32.mrf.mxu1 }
 0x971   : > { %v4943_v56 = vsel %vm358_vm0, %v14194_v25, 0.0  ;;  %v6558_v57 = vmul.f32 0.5, %v6557_v6  ;;  %v14200_v43 = vsub.f32 %v13883_v14, %v5098_v16 }
 0x973   : > { %16384 = vst [vmem:[#allocation23_spill] sm:$0xff] %v14200_v43  ;;  %v6559_v36 = vsub.f32 1.5, %v6558_v57  ;;  %v5322_v28 = vmul.f32 %v14200_v43, %v14200_v43  ;;  %v3551_v43 = vpop.f32.mrf.mxu0 }
 0x974   : > { %v9274_v20 = vpop.eup %9273 }
 0x975   : > { %v6560_v13 = vmul.f32 %v9272_v4, %v6559_v36  ;;  %v5576_v50 = vsel %vm358_vm0, %v5322_v28, 0.0  ;;  %vm6582_vm11 = vweird.f32 %v9274_v20 }
 0x976   : > { %vm6583_vm13 = vmor %vm6581_vm12, %vm6582_vm11 }
 0x977   : > { %v6564_v52 = vsel %vm6563_vm10, %v9272_v4, %v6560_v13  ;;  %v3905_v13 = vadd.f32 %v3904_v46, %v3551_v43  ;;  %v14232_v46 = vpop.permute.xlu2 %7469 }
 0x978   : > { %5565 = vadd.xlane.f32.xlu2 %v5564_v58  ;;  %v4940_v58 = vsel %vm358_vm0, %v14175_v32, 0.0  ;;  %v7207_v6 = vmul.f32 %v6564_v52, %v5863_v2  ;;  %v4610_v52 = vpop.f32.mrf.mxu3  ;;  %16387 = vst [vmem:[#allocation18_spill] sm:$0xff] %v14232_v46 }
 0x980   : > { %4941 = vadd.xlane.f32.xlu2 %v4940_v58  ;;  %v6576_v58 = vmul.f32 %v9274_v20, %v5977_v11 }
 0x982   : > { %7519 = vperm.xlu1 %9050, %v7205_v5   ;;  %v6577_v60 = vmul.f32 %v9274_v20, %v6576_v58  ;;  %v14207_v5 = vpop.permute.xlu0 %7449  ;;  %v5865_v58 = vld [vmem:[%s12955_s17 + $0x1b0] sm:$0xff] }
 0x983   : > { %16385 = vst [vmem:[#allocation61_spill] sm:$0xff] %v14207_v5 }
 0x984   : > { %v6578_v14 = vmul.f32 0.5, %v6577_v60  ;;  %v5752_v60 = vmul.f32 %v5524_v21, %v16290_v34 }
 0x986   : > { %v6579_v16 = vsub.f32 1.5, %v6578_v14  ;;  %v4257_v14 = vpop.f32.mrf.mxu2  ;;  %v14215_v11 = vadd.f32 1e-05, %v5752_v60 }
 0x988   : > { %4944 = vadd.xlane.f32.xlu0 %v4943_v56  ;;  %v6580_v56 = vmul.f32 %v9274_v20, %v6579_v16  ;;  %9275 = vrsqrt.f32 %v14215_v11  ;;  %vm6571_vm15 = vweird.f32 %v14215_v11 }
 0x98a   : > { %v4900_v57 = vpop.xlane.xlu0 %4899  ;;  %v6584_v28 = vsel %vm6583_vm13, %v9274_v20, %v6580_v56  ;;  %v4258_v20 = vadd.f32 %v4257_v14, %v3905_v13  ;;  %v2860_v56 = vld [vmem:[%s12343_s20 + $0xb70] sm:$0xff] }
 0x98b   : > { %v5096_v36 = vmul.f32 %v4900_v57, %v16290_v34  ;;  %v2861_v57 = vld [vmem:[%s12343_s20 + $0xb78] sm:$0xff]  ;;  %4274 = vmatmul.f32.gmra.mxu2 %v2860_v56  ;;  %v4613_v46 = vpop.f32.mrf.mxu3 }
 0x98c   : > { %9016 = vmatmul.msk.f32.gmra.mxu3 %vm2942_vm5, %v2861_v57 }
 0x98d   : > { %v14213_v4 = vsub.f32 %v13837_v9, %v5096_v36  ;;  %v4903_v9 = vpop.xlane.xlu1 %4902  ;;  %v2858_v36 = vld [vmem:[%s12343_s20 + $0xb60] sm:$0xff] }
 0x98e   : > { %v14223_v16 = vpop.eup %9275  ;;  %3568 = vmatmul.f32.gmra.mxu0 %v2858_v36  ;;  %v5097_v13 = vmul.f32 %v4903_v9, %v16290_v34  ;;  %v2862_v36 = vld [vmem:[%s12343_s20 + $0xb80] sm:$0xff] }
 0x98f   : > { %16386 = vst [vmem:[#allocation63_spill] sm:$0xff] %v14213_v4  ;;  %v5320_v2 = vmul.f32 %v14213_v4, %v14213_v4  ;;  %v6566_v60 = vmul.f32 %v14223_v16, %v14215_v11  ;;  %vm6572_vm14 = vweird.f32 %v14223_v16 }
 0x990   : > { %5577 = vadd.xlane.f32.xlu0 %v5576_v50  ;;  %v7209_v50 = vmul.f32 %v6584_v28, %v5865_v58  ;;  %v14245_v57 = vsub.f32 %v13862_v37, %v5097_v13  ;;  %vm6573_vm1 = vmor %vm6571_vm15, %vm6572_vm14 }
 0x991   : > { %v5570_v21 = vsel %vm358_vm0, %v5320_v2, 0.0  ;;  %v4260_v2 = vpop.f32.mrf.mxu2  ;;  %v6567_v56 = vmul.f32 %v14223_v16, %v6566_v60 }
 0x992   : > { %16389 = vst [vmem:[#allocation90_spill] sm:$0xff] %v14245_v57  ;;  %v5321_v60 = vmul.f32 %v14245_v57, %v14245_v57 }
 0x994   : > { %v3554_v58 = vpop.f32.mrf.mxu0  ;;  %v3907_v28 = vpop.f32.mrf.mxu1 }
 0x995   : > { %v14237_v14 = vpop.permute.xlu1 %7459  ;;  %v3908_v4 = vadd.f32 %v3907_v28, %v3554_v58  ;;  %v2868_v28 = vld [vmem:[%s12343_s20 + $0xbb0] sm:$0xff] }
 0x996   : > { %16388 = vst [vmem:[#allocation12_spill] sm:$0xff] %v14237_v14  ;;  %3571 = vmatmul.f32.gmra.mxu0 %v2862_v36 }
 0x997   : > { %v4261_v14 = vadd.f32 %v4260_v2, %v3908_v4 }
 0x998   : > { %7529 = vperm.xlu2 %9051, %v7207_v6   ;;  %v14221_v6 = vadd.f32 %v4610_v52, %v4258_v20  ;;  %v5754_v20 = vmul.f32 %v14169_v53, %v16290_v34  ;;  %v2864_v52 = vld [vmem:[%s12343_s20 + $0xb90] sm:$0xff]  ;;  %v6568_v53 = vmul.f32 0.5, %v6567_v56 }
 0x999   : > { %4277 = vmatmul.f32.gmra.mxu2 %v2864_v52  ;;  %v4263_v1 = vpop.f32.mrf.mxu2  ;;  %v14258_v36 = vadd.f32 %v4613_v46, %v4261_v14 }
 0x99a   : > { %v4946_v43 = vsel %vm358_vm0, %v14221_v6, 0.0  ;;  %v5978_v9 = vadd.f32 1e-05, %v5754_v20  ;;  %v6569_v52 = vsub.f32 1.5, %v6568_v53  ;;  %v5573_v20 = vsel %vm358_vm0, %v5321_v60, 0.0 }
 0x99b   : > { %v4949_v46 = vsel %vm358_vm0, %v14258_v36, 0.0 }
 0x99c   : > { %v3557_v37 = vpop.f32.mrf.mxu0  ;;  %v3910_v13 = vpop.f32.mrf.mxu1  ;;  %9277 = vrsqrt.f32 %v5978_v9  ;;  %v6570_v4 = vmul.f32 %v14223_v16, %v6569_v52  ;;  %vm6591_vm3 = vweird.f32 %v5978_v9 }
 0x99d   : > { %v5536_v5 = vpop.xlane.xlu1 %5535  ;;  %v3911_v58 = vadd.f32 %v3910_v13, %v3557_v37  ;;  %v2866_v37 = vld [vmem:[%s12343_s20 + $0xba0] sm:$0xff]  ;;  %v2867_v13 = vld [vmem:[%s12343_s20 + $0xba8] sm:$0xff] }
 0x99e   : > { %v6574_v60 = vsel %vm6573_vm1, %v14223_v16, %v6570_v4  ;;  %3574 = vmatmul.f32.gmra.mxu0 %v2866_v37 }
 0x99f   : > { %v4264_v56 = vadd.f32 %v4263_v1, %v3911_v58  ;;  %v5864_v1 = vld [vmem:[%s12955_s17 + $0x1a8] sm:$0xff] }
 0x9a0   : > { %v7208_v11 = vmul.f32 %v6574_v60, %v5864_v1  ;;  %v5533_v1 = vpop.xlane.xlu0 %5532  ;;  %v5866_v60 = vld [vmem:[%s12955_s17 + $0x1b8] sm:$0xff] }
 0x9a1   : > { %4280 = vmatmul.f32.gmra.mxu2 %v2868_v28 }
 0x9a4   : > { %7539 = vperm.xlu0 %9052, %v7209_v50   ;;  %v2859_v50 = vld [vmem:[%s12343_s20 + $0xb68] sm:$0xff] }
 0x9a5   : > { %3921 = vmatmul.f32.gmra.mxu1 %v2859_v50  ;;  %v2863_v50 = vld [vmem:[%s12343_s20 + $0xb88] sm:$0xff] }
 0x9ac   : > { %5571 = vadd.xlane.f32.xlu1 %v5570_v21  ;;  %v2865_v21 = vld [vmem:[%s12343_s20 + $0xb98] sm:$0xff] }
 0x9ad   : > { %9017 = vmatmul.msk.f32.gmra.mxu3 %vm2942_vm5, %v2865_v21  ;;  %3924 = vmatmul.f32.gmra.mxu1 %v2863_v50  ;;  %v5756_v21 = vmul.f32 %v5536_v5, %v16290_v34  ;;  %v4616_v50 = vpop.f32.mrf.mxu3  ;;  %v9278_v5 = vpop.eup %9277 }
 0x9ae   : > { %v14266_v14 = vadd.f32 %v4616_v50, %v4264_v56  ;;  %vm6592_vm2 = vweird.f32 %v9278_v5 }
 0x9af   : > { %v5980_v2 = vadd.f32 1e-05, %v5756_v21  ;;  %vm6593_vm4 = vmor %vm6591_vm3, %vm6592_vm2 }
 0x9b0   : > { %v4952_v28 = vsel %vm358_vm0, %v14266_v14, 0.0 }
 0x9b1   : > { %9279 = vrsqrt.f32 %v5980_v2  ;;  %vm6611_vm7 = vweird.f32 %v5980_v2 }
 0x9b4   : > { %4947 = vadd.xlane.f32.xlu1 %v4946_v43  ;;  %v14250_v43 = vpop.xlane.xlu2 %5538 }
 0x9b5   : > { %9018 = vmatmul.msk.f32.gmra.mxu3 %vm2942_vm5, %v2869_v19  ;;  %v6586_v19 = vmul.f32 %v9278_v5, %v5978_v9  ;;  %3927 = vmatmul.f32.gmra.mxu1 %v2867_v13 }
 0x9b7   : > { %v6587_v52 = vmul.f32 %v9278_v5, %v6586_v19 }
 0x9b9   : > { %v6588_v16 = vmul.f32 0.5, %v6587_v52  ;;  %v5868_v52 = vld [vmem:[%s12955_s17 + $0x1c8] sm:$0xff] }
 0x9bb   : > { %v6589_v50 = vsub.f32 1.5, %v6588_v16  ;;  %v3913_v9 = vpop.f32.mrf.mxu1 }
 0x9bc   : > { %v4915_v53 = vpop.xlane.xlu2 %4914 }
 0x9bd   : > { %v5101_v58 = vmul.f32 %v4915_v53, %v16290_v34  ;;  %v6590_v19 = vmul.f32 %v9278_v5, %v6589_v50 }
 0x9bf   : > { %v14276_v21 = vsub.f32 %v13957_v0, %v5101_v58  ;;  %v6594_v37 = vsel %vm6593_vm4, %v9278_v5, %v6590_v19  ;;  %v14282_v58 = vpop.permute.xlu0 %7464  ;;  %v3560_v5 = vpop.f32.mrf.mxu0 }
 0x9c0   : > { %16391 = vst [vmem:[#allocation92_spill] sm:$0xff] %v14282_v58  ;;  %v3914_v19 = vadd.f32 %v3913_v9, %v3560_v5  ;;  %v2880_v58 = vld [vmem:[%s12343_s20 + $0xc10] sm:$0xff] }
 0x9c1   : > { %5574 = vadd.xlane.f32.xlu2 %v5573_v20  ;;  %16390 = vst [vmem:[#allocation91_spill] sm:$0xff] %v14276_v21  ;;  %v9280_v20 = vpop.eup %9279  ;;  %v5325_v4 = vmul.f32 %v14276_v21, %v14276_v21 }
 0x9c2   : > { %v6606_v56 = vmul.f32 %v9280_v20, %v5980_v2  ;;  %vm6612_vm6 = vweird.f32 %v9280_v20  ;;  %v4266_v2 = vpop.f32.mrf.mxu2 }
 0x9c3   : > { %vm6613_vm8 = vmor %vm6611_vm7, %vm6612_vm6 }
 0x9c4   : > { %v6607_v53 = vmul.f32 %v9280_v20, %v6606_v56 }
 0x9c6   : > { %v6608_v0 = vmul.f32 0.5, %v6607_v53  ;;  %v5755_v53 = vmul.f32 %v5533_v1, %v16290_v34  ;;  %v2872_v1 = vld [vmem:[%s12343_s20 + $0xbd0] sm:$0xff] }
 0x9c7   : > { %v4909_v56 = vpop.xlane.xlu0 %4908  ;;  %4283 = vmatmul.f32.gmra.mxu2 %v2872_v1 }
 0x9c8   : > { %v6609_v13 = vsub.f32 1.5, %v6608_v0  ;;  %v5099_v50 = vmul.f32 %v4909_v56, %v16290_v34  ;;  %v14290_v0 = vadd.f32 1e-05, %v5755_v53 }
 0x9c9   : > { %4950 = vadd.xlane.f32.xlu2 %v4949_v46  ;;  %v5585_v46 = vsel %vm358_vm0, %v5325_v4, 0.0 }
 0x9ca   : > { %9281 = vrsqrt.f32 %v14290_v0  ;;  %v3916_v56 = vpop.f32.mrf.mxu1  ;;  %vm6601_vm10 = vweird.f32 %v14290_v0 }
 0x9cd   : > { %7534 = vperm.xlu1 %9050, %v7208_v11   ;;  %v7210_v11 = vmul.f32 %v6594_v37, %v5866_v60  ;;  %v4912_v60 = vpop.xlane.xlu1 %4911  ;;  %v4267_v37 = vadd.f32 %v4266_v2, %v3914_v19  ;;  %v4269_v19 = vpop.f32.mrf.mxu2 }
 0x9ce   : > { %4953 = vadd.xlane.f32.xlu0 %v4952_v28  ;;  %v6610_v28 = vmul.f32 %v9280_v20, %v6609_v13  ;;  %v4619_v13 = vpop.f32.mrf.mxu3  ;;  %v5100_v2 = vmul.f32 %v4912_v60, %v16290_v34 }
 0x9d0   : > { %v6614_v16 = vsel %vm6613_vm8, %v9280_v20, %v6610_v28  ;;  %v2873_v28 = vld [vmem:[%s12343_s20 + $0xbd8] sm:$0xff]  ;;  %v14307_v5 = vpop.eup %9281 }
 0x9d1   : > { %v7212_v4 = vmul.f32 %v6614_v16, %v5868_v52  ;;  %v14299_v52 = vadd.f32 %v4619_v13, %v4267_v37  ;;  %v3563_v16 = vpop.f32.mrf.mxu0  ;;  %9019 = vmatmul.msk.f32.gmra.mxu3 %vm2942_vm5, %v2873_v28  ;;  %v2877_v37 = vld [vmem:[%s12343_s20 + $0xbf8] sm:$0xff]  ;;  %v2874_v13 = vld [vmem:[%s12343_s20 + $0xbe0] sm:$0xff]  ;;  %v6596_v1 = vmul.f32 %v14307_v5, %v14290_v0  ;;  %v5757_v28 = vmul.f32 %v14250_v43, %v16290_v34 }
 0x9d2   : > { %vm6602_vm9 = vweird.f32 %v14307_v5 }
 0x9d3   : > { %v4955_v53 = vsel %vm358_vm0, %v14299_v52, 0.0  ;;  %v6597_v21 = vmul.f32 %v14307_v5, %v6596_v1  ;;  %vm6603_vm11 = vmor %vm6601_vm10, %vm6602_vm9 }
 0x9d5   : > { %v14305_v9 = vpop.permute.xlu1 %7474 }
 0x9d6   : > { %5586 = vadd.xlane.f32.xlu0 %v5585_v46  ;;  %v14288_v46 = vsub.f32 %v13900_v8, %v5099_v50  ;;  %v2870_v8 = vld [vmem:[%s12343_s20 + $0xbc0] sm:$0xff]  ;;  %v14303_v50 = vpop.permute.xlu2 %7484  ;;  %16394 = vst [vmem:[#allocation95_spill] sm:$0xff] %v14305_v9 }
 0x9d7   : > { %16393 = vst [vmem:[#allocation94_spill] sm:$0xff] %v14303_v50  ;;  %3577 = vmatmul.f32.gmra.mxu0 %v2870_v8  ;;  %v4622_v8 = vpop.f32.mrf.mxu3  ;;  %v5981_v50 = vadd.f32 1e-05, %v5757_v28 }
 0x9d8   : > { %16392 = vst [vmem:[#allocation93_spill] sm:$0xff] %v14288_v46  ;;  %v5323_v20 = vmul.f32 %v14288_v46, %v14288_v46  ;;  %v3917_v46 = vadd.f32 %v3916_v56, %v3563_v16 }
 0x9d9   : > { %9020 = vmatmul.msk.f32.gmra.mxu3 %vm2942_vm5, %v2877_v37  ;;  %9283 = vrsqrt.f32 %v5981_v50  ;;  %vm6621_vm13 = vweird.f32 %v5981_v50 }
 0x9dd   : > { %v5545_v43 = vpop.xlane.xlu1 %5544 }
 0x9de   : > { %v14324_v60 = vpop.xlane.xlu2 %5547 }
 0x9df   : > { %3580 = vmatmul.f32.gmra.mxu0 %v2874_v13  ;;  %v6598_v13 = vmul.f32 0.5, %v6597_v21  ;;  %v9284_v21 = vpop.eup %9283 }
 0x9e0   : > { %v3566_v57 = vpop.f32.mrf.mxu0  ;;  %vm6622_vm12 = vweird.f32 %v9284_v21 }
 0x9e1   : > { %7544 = vperm.xlu2 %9051, %v7210_v11   ;;  %v5579_v11 = vsel %vm358_vm0, %v5323_v20, 0.0  ;;  %v2876_v20 = vld [vmem:[%s12343_s20 + $0xbf0] sm:$0xff]  ;;  %v6599_v28 = vsub.f32 1.5, %v6598_v13  ;;  %vm6623_vm14 = vmor %vm6621_vm13, %vm6622_vm12 }
 0x9e2   : > { %4286 = vmatmul.f32.gmra.mxu2 %v2876_v20 }
 0x9e7   : > { %3583 = vmatmul.f32.gmra.mxu0 %v2878_v33 }
 0x9ea   : > { %7554 = vperm.xlu0 %9052, %v7212_v4   ;;  %v2871_v4 = vld [vmem:[%s12343_s20 + $0xbc8] sm:$0xff]  ;;  %4289 = vmatmul.f32.gmra.mxu2 %v2880_v58  ;;  %v6600_v58 = vmul.f32 %v14307_v5, %v6599_v28 }
 0x9eb   : > { %3930 = vmatmul.f32.gmra.mxu1 %v2871_v4  ;;  %v14322_v4 = vsub.f32 %v13925_v22, %v5100_v2  ;;  %v2881_v22 = vld [vmem:[%s12343_s20 + $0xc18] sm:$0xff]  ;;  %v5759_v2 = vmul.f32 %v5545_v43, %v16290_v34  ;;  %v4924_v43 = vpop.xlane.xlu2 %4923 }
 0x9ec   : > { %9021 = vmatmul.msk.f32.gmra.mxu3 %vm2942_vm5, %v2881_v22 }
 0x9ed   : > { %16395 = vst [vmem:[#allocation96_spill] sm:$0xff] %v14322_v4  ;;  %v5324_v20 = vmul.f32 %v14322_v4, %v14322_v4  ;;  %v5983_v1 = vadd.f32 1e-05, %v5759_v2 }
 0x9ef   : > { %v4272_v9 = vpop.f32.mrf.mxu2  ;;  %v5582_v16 = vsel %vm358_vm0, %v5324_v20, 0.0  ;;  %9285 = vrsqrt.f32 %v5983_v1  ;;  %v6604_v20 = vsel %vm6603_vm11, %v14307_v5, %v6600_v58  ;;  %v5542_v5 = vpop.xlane.xlu0 %5541  ;;  %v5869_v58 = vld [vmem:[%s12955_s17 + $0x1d0] sm:$0xff]  ;;  %vm6641_vm1 = vweird.f32 %v5983_v1 }
 0x9f7   : > { %5580 = vadd.xlane.f32.xlu1 %v5579_v11  ;;  %v2875_v11 = vld [vmem:[%s12343_s20 + $0xbe8] sm:$0xff] }
 0x9f8   : > { %3933 = vmatmul.f32.gmra.mxu1 %v2875_v11  ;;  %v4270_v11 = vadd.f32 %v4269_v19, %v3917_v46  ;;  %v5104_v46 = vmul.f32 %v4924_v43, %v16290_v34 }
 0x9fa   : > { %v14349_v19 = vsub.f32 %v14021_v27, %v5104_v46 }
 0x9fc   : > { %16396 = vst [vmem:[#allocation97_spill] sm:$0xff] %v14349_v19  ;;  %v5328_v0 = vmul.f32 %v14349_v19, %v14349_v19  ;;  %v2893_v19 = vld [vmem:[%s12343_s20 + $0xc78] sm:$0xff] }
 0x9ff   : > { %4956 = vadd.xlane.f32.xlu1 %v4955_v53  ;;  %v3919_v53 = vpop.f32.mrf.mxu1 }
 0xa00   : > { %v3920_v37 = vadd.f32 %v3919_v53, %v3566_v57  ;;  %3936 = vmatmul.f32.gmra.mxu1 %v2879_v30  ;;  %v4625_v57 = vpop.f32.mrf.mxu3  ;;  %v14336_v53 = vadd.f32 %v4622_v8, %v4270_v11  ;;  %v6616_v30 = vmul.f32 %v9284_v21, %v5981_v50  ;;  %v5867_v8 = vld [vmem:[%s12955_s17 + $0x1c0] sm:$0xff] }
 0xa01   : > { %v7211_v2 = vmul.f32 %v6604_v20, %v5867_v8  ;;  %v5871_v8 = vld [vmem:[%s12955_s17 + $0x1e0] sm:$0xff] }
 0xa02   : > { %v4273_v56 = vadd.f32 %v4272_v9, %v3920_v37  ;;  %v4958_v33 = vsel %vm358_vm0, %v14336_v53, 0.0  ;;  %v9286_v37 = vpop.eup %9285  ;;  %v6617_v22 = vmul.f32 %v9284_v21, %v6616_v30 }
 0xa03   : > { %v6636_v13 = vmul.f32 %v9286_v37, %v5983_v1  ;;  %vm6642_vm15 = vweird.f32 %v9286_v37  ;;  %v5758_v1 = vmul.f32 %v5542_v5, %v16290_v34  ;;  %v14374_v5 = vpop.permute.xlu2 %7499 }
 0xa04   : > { %v14338_v4 = vadd.f32 %v4625_v57, %v4273_v56  ;;  %v6618_v11 = vmul.f32 0.5, %v6617_v22  ;;  %v5594_v56 = vsel %vm358_vm0, %v5328_v0, 0.0  ;;  %vm6643_vm2 = vmor %vm6641_vm1, %vm6642_vm15  ;;  %16399 = vst [vmem:[#allocation100_spill] sm:$0xff] %v14374_v5 }
 0xa06   : > { %v4961_v9 = vsel %vm358_vm0, %v14338_v4, 0.0  ;;  %v6619_v27 = vsub.f32 1.5, %v6618_v11 }
 0xa08   : > { %v6620_v28 = vmul.f32 %v9284_v21, %v6619_v27 }
 0xa0a   : > { %5583 = vadd.xlane.f32.xlu2 %v5582_v16  ;;  %v6637_v16 = vmul.f32 %v9286_v37, %v6636_v13  ;;  %v6624_v46 = vsel %vm6623_vm14, %v9284_v21, %v6620_v28  ;;  %v2884_v28 = vld [vmem:[%s12343_s20 + $0xc30] sm:$0xff] }
 0xa0b   : > { %v7213_v30 = vmul.f32 %v6624_v46, %v5869_v58  ;;  %v3569_v13 = vpop.f32.mrf.mxu0  ;;  %v2882_v58 = vld [vmem:[%s12343_s20 + $0xc20] sm:$0xff]  ;;  %4292 = vmatmul.f32.gmra.mxu2 %v2884_v28 }
 0xa0c   : > { %v6638_v57 = vmul.f32 0.5, %v6637_v16  ;;  %v4921_v16 = vpop.xlane.xlu1 %4920  ;;  %3586 = vmatmul.f32.gmra.mxu0 %v2882_v58 }
 0xa0d   : > { %v5103_v28 = vmul.f32 %v4921_v16, %v16290_v34  ;;  %v5760_v16 = vmul.f32 %v14324_v60, %v16290_v34 }
 0xa0e   : > { %v6639_v43 = vsub.f32 1.5, %v6638_v57  ;;  %v4275_v0 = vpop.f32.mrf.mxu2 }
 0xa0f   : > { %v4628_v27 = vpop.f32.mrf.mxu3 }
 0xa12   : > { %4959 = vadd.xlane.f32.xlu2 %v4958_v33  ;;  %v6640_v33 = vmul.f32 %v9286_v37, %v6639_v43  ;;  %v2885_v43 = vld [vmem:[%s12343_s20 + $0xc38] sm:$0xff] }
 0xa13   : > { %9022 = vmatmul.msk.f32.gmra.mxu3 %vm2942_vm5, %v2885_v43 }
 0xa14   : > { %4962 = vadd.xlane.f32.xlu0 %v4961_v9  ;;  %v14357_v9 = vpop.permute.xlu0 %7479  ;;  %v6644_v20 = vsel %vm6643_vm2, %v9286_v37, %v6640_v33  ;;  %v14365_v37 = vadd.f32 1e-05, %v5758_v1  ;;  %v3572_v33 = vpop.f32.mrf.mxu0  ;;  %v2887_v1 = vld [vmem:[%s12343_s20 + $0xc48] sm:$0xff] }
 0xa15   : > { %16397 = vst [vmem:[#allocation98_spill] sm:$0xff] %v14357_v9  ;;  %v7215_v22 = vmul.f32 %v6644_v20, %v5871_v8  ;;  %v14377_v8 = vpop.permute.xlu1 %7489  ;;  %v2891_v9 = vld [vmem:[%s12343_s20 + $0xc68] sm:$0xff] }
 0xa16   : > { %9287 = vrsqrt.f32 %v14365_v37  ;;  %16400 = vst [vmem:[#allocation101_spill] sm:$0xff] %v14377_v8  ;;  %v5984_v8 = vadd.f32 1e-05, %v5760_v16  ;;  %vm6631_vm4 = vweird.f32 %v14365_v37 }
 0xa18   : > { %7549 = vperm.xlu1 %9050, %v7211_v2   ;;  %9289 = vrsqrt.f32 %v5984_v8  ;;  %vm6651_vm8 = vweird.f32 %v5984_v8 }
 0xa1c   : > { %5595 = vadd.xlane.f32.xlu0 %v5594_v56  ;;  %v4918_v50 = vpop.xlane.xlu0 %4917 }
 0xa1d   : > { %v5102_v21 = vmul.f32 %v4918_v50, %v16290_v34 }
 0xa1f   : > { %v14363_v11 = vsub.f32 %v13971_v42, %v5102_v21  ;;  %v2883_v42 = vld [vmem:[%s12343_s20 + $0xc28] sm:$0xff]  ;;  %v2886_v21 = vld [vmem:[%s12343_s20 + $0xc40] sm:$0xff] }
 0xa20   : > { %3939 = vmatmul.f32.gmra.mxu1 %v2883_v42  ;;  %3589 = vmatmul.f32.gmra.mxu0 %v2886_v21  ;;  %v5554_v42 = vpop.xlane.xlu1 %5553 }
 0xa21   : > { %16398 = vst [vmem:[#allocation99_spill] sm:$0xff] %v14363_v11  ;;  %v5326_v57 = vmul.f32 %v14363_v11, %v14363_v11  ;;  %v5762_v11 = vmul.f32 %v5554_v42, %v16290_v34 }
 0xa22   : > { %v3922_v2 = vpop.f32.mrf.mxu1 }
 0xa23   : > { %v3923_v56 = vadd.f32 %v3922_v2, %v3569_v13  ;;  %v5588_v20 = vsel %vm358_vm0, %v5326_v57, 0.0  ;;  %v2888_v2 = vld [vmem:[%s12343_s20 + $0xc50] sm:$0xff]  ;;  %v2889_v13 = vld [vmem:[%s12343_s20 + $0xc58] sm:$0xff] }
 0xa24   : > { %4295 = vmatmul.f32.gmra.mxu2 %v2888_v2  ;;  %9023 = vmatmul.msk.f32.gmra.mxu3 %vm2942_vm5, %v2889_v13  ;;  %v2892_v13 = vld [vmem:[%s12343_s20 + $0xc70] sm:$0xff] }
 0xa28   : > { %3942 = vmatmul.f32.gmra.mxu1 %v2887_v1  ;;  %v2890_v1 = vld [vmem:[%s12343_s20 + $0xc60] sm:$0xff] }
 0xa29   : > { %3592 = vmatmul.f32.gmra.mxu0 %v2890_v1 }
 0xa2a   : > { %7559 = vperm.xlu2 %9051, %v7213_v30   ;;  %v3925_v46 = vpop.f32.mrf.mxu1  ;;  %v4276_v30 = vadd.f32 %v4275_v0, %v3923_v56  ;;  %v9288_v0 = vpop.eup %9287 }
 0xa2b   : > { %v14388_v56 = vpop.xlane.xlu2 %5556  ;;  %v3926_v21 = vadd.f32 %v3925_v46, %v3572_v33  ;;  %vm6632_vm3 = vweird.f32 %v9288_v0 }
 0xa2c   : > { %v14380_v50 = vadd.f32 %v4628_v27, %v4276_v30  ;;  %v3575_v27 = vpop.f32.mrf.mxu0  ;;  %v6626_v30 = vmul.f32 %v9288_v0, %v14365_v37  ;;  %4298 = vmatmul.f32.gmra.mxu2 %v2892_v13  ;;  %9024 = vmatmul.msk.f32.gmra.mxu3 %vm2942_vm5, %v2893_v19  ;;  %vm6633_vm6 = vmor %vm6631_vm4, %vm6632_vm3 }
 0xa2e   : > { %v4964_v57 = vsel %vm358_vm0, %v14380_v50, 0.0  ;;  %v6627_v54 = vmul.f32 %v9288_v0, %v6626_v30 }
 0xa30   : > { %7569 = vperm.xlu0 %9052, %v7215_v22   ;;  %v4278_v22 = vpop.f32.mrf.mxu2  ;;  %v4631_v43 = vpop.f32.mrf.mxu3  ;;  %3945 = vmatmul.f32.gmra.mxu1 %v2891_v9 }
 0xa32   : > { %v3928_v58 = vpop.f32.mrf.mxu1 }
 0xa33   : > { %v3929_v2 = vadd.f32 %v3928_v58, %v3575_v27  ;;  %v6628_v58 = vmul.f32 0.5, %v6627_v54  ;;  %v4933_v46 = vpop.xlane.xlu2 %4932 }
 0xa34   : > { %v5107_v30 = vmul.f32 %v4933_v46, %v16290_v34 }
 0xa35   : > { %v6629_v19 = vsub.f32 1.5, %v6628_v58 }
 0xa38   : > { %v4281_v5 = vpop.f32.mrf.mxu2  ;;  %v4634_v27 = vpop.f32.mrf.mxu3 }
 0xa42   : > { %5589 = vadd.xlane.f32.xlu1 %v5588_v20  ;;  %v14396_v20 = vsub.f32 %v13999_v18, %v5103_v28  ;;  %v4282_v18 = vadd.f32 %v4281_v5, %v3929_v2  ;;  %v5986_v28 = vadd.f32 1e-05, %v5762_v11  ;;  %v9290_v5 = vpop.eup %9289  ;;  %v14417_v11 = vsub.f32 %v14091_v47, %v5107_v30 }
 0xa43   : > { %v6630_v2 = vmul.f32 %v9288_v0, %v6629_v19  ;;  %v6646_v13 = vmul.f32 %v9290_v5, %v5984_v8  ;;  %vm6652_vm7 = vweird.f32 %v9290_v5  ;;  %v5551_v19 = vpop.xlane.xlu0 %5550 }
 0xa44   : > { %16401 = vst [vmem:[#allocation102_spill] sm:$0xff] %v14396_v20  ;;  %v5327_v60 = vmul.f32 %v14396_v20, %v14396_v20  ;;  %v14407_v16 = vadd.f32 %v4634_v27, %v4282_v18  ;;  %9291 = vrsqrt.f32 %v5986_v28  ;;  %vm6653_vm9 = vmor %vm6651_vm8, %vm6652_vm7  ;;  %vm6671_vm11 = vweird.f32 %v5986_v28  ;;  %v2904_v20 = vld [vmem:[%s12343_s20 + $0xcd0] sm:$0xff] }
 0xa45   : > { %16402 = vst [vmem:[#allocation103_spill] sm:$0xff] %v14417_v11  ;;  %v6647_v1 = vmul.f32 %v9290_v5, %v6646_v13  ;;  %v6634_v18 = vsel %vm6633_vm6, %v9288_v0, %v6630_v2  ;;  %v5872_v0 = vld [vmem:[%s12955_s17 + $0x1e8] sm:$0xff]  ;;  %v5874_v13 = vld [vmem:[%s12955_s17 + $0x1f8] sm:$0xff] }
 0xa46   : > { %v5591_v33 = vsel %vm358_vm0, %v5327_v60, 0.0  ;;  %v4970_v9 = vsel %vm358_vm0, %v14407_v16, 0.0  ;;  %v5870_v60 = vld [vmem:[%s12955_s17 + $0x1d8] sm:$0xff] }
 0xa47   : > { %v7214_v27 = vmul.f32 %v6634_v18, %v5870_v60  ;;  %v6648_v58 = vmul.f32 0.5, %v6647_v1 }
 0xa4a   : > { %4965 = vadd.xlane.f32.xlu1 %v4964_v57  ;;  %v4279_v57 = vadd.f32 %v4278_v22, %v3926_v21  ;;  %v9292_v22 = vpop.eup %9291  ;;  %v5331_v21 = vmul.f32 %v14417_v11, %v14417_v11 }
 0xa4b   : > { %vm6672_vm10 = vweird.f32 %v9292_v22  ;;  %v14426_v1 = vpop.permute.xlu0 %7494 }
 0xa4c   : > { %v14409_v42 = vadd.f32 %v4631_v43, %v4279_v57  ;;  %v6666_v43 = vmul.f32 %v9292_v22, %v5986_v28  ;;  %v5603_v47 = vsel %vm358_vm0, %v5331_v21, 0.0  ;;  %vm6673_vm12 = vmor %vm6671_vm11, %vm6672_vm10  ;;  %16403 = vst [vmem:[#allocation104_spill] sm:$0xff] %v14426_v1 }
 0xa4e   : > { %v4967_v54 = vsel %vm358_vm0, %v14409_v42, 0.0  ;;  %v6667_v57 = vmul.f32 %v9292_v22, %v6666_v43 }
 0xa50   : > { %v6668_v46 = vmul.f32 0.5, %v6667_v57  ;;  %v4284_v57 = vpop.f32.mrf.mxu2 }
 0xa52   : > { %v6669_v37 = vsub.f32 1.5, %v6668_v46  ;;  %v2894_v46 = vld [vmem:[%s12343_s20 + $0xc80] sm:$0xff] }
 0xa53   : > { %5592 = vadd.xlane.f32.xlu2 %v5591_v33  ;;  %v6649_v33 = vsub.f32 1.5, %v6648_v58  ;;  %v4927_v18 = vpop.xlane.xlu0 %4926  ;;  %v2897_v58 = vld [vmem:[%s12343_s20 + $0xc98] sm:$0xff]  ;;  %3595 = vmatmul.f32.gmra.mxu0 %v2894_v46 }
 0xa54   : > { %v3578_v8 = vpop.f32.mrf.mxu0  ;;  %v5105_v28 = vmul.f32 %v4927_v18, %v16290_v34  ;;  %9025 = vmatmul.msk.f32.gmra.mxu3 %vm2942_vm5, %v2897_v58 }
 0xa55   : > { %v6650_v30 = vmul.f32 %v9290_v5, %v6649_v33 }
 0xa56   : > { %v14434_v33 = vsub.f32 %v14039_v29, %v5105_v28  ;;  %v2898_v28 = vld [vmem:[%s12343_s20 + $0xca0] sm:$0xff] }
 0xa58   : > { %16404 = vst [vmem:[#allocation105_spill] sm:$0xff] %v14434_v33  ;;  %v5329_v29 = vmul.f32 %v14434_v33, %v14434_v33 }
 0xa5a   : > { %4971 = vadd.xlane.f32.xlu0 %v4970_v9  ;;  %v6670_v9 = vmul.f32 %v9292_v22, %v6669_v37  ;;  %v5597_v58 = vsel %vm358_vm0, %v5329_v29, 0.0  ;;  %v5763_v29 = vmul.f32 %v14388_v56, %v16290_v34 }
 0xa5b   : > { %4968 = vadd.xlane.f32.xlu2 %v4967_v54  ;;  %v6654_v54 = vsel %vm6653_vm9, %v9290_v5, %v6650_v30  ;;  %v4637_v5 = vpop.f32.mrf.mxu3  ;;  %3598 = vmatmul.f32.gmra.mxu0 %v2898_v28  ;;  %v2902_v28 = vld [vmem:[%s12343_s20 + $0xcc0] sm:$0xff] }
 0xa5c   : > { %v7216_v2 = vmul.f32 %v6654_v54, %v5872_v0  ;;  %v6674_v43 = vsel %vm6673_vm12, %v9292_v22, %v6670_v9  ;;  %v5761_v22 = vmul.f32 %v5551_v19, %v16290_v34  ;;  %v3581_v37 = vpop.f32.mrf.mxu0  ;;  %v2895_v9 = vld [vmem:[%s12343_s20 + $0xc88] sm:$0xff]  ;;  %v14438_v0 = vpop.permute.xlu2 %7514 }
 0xa5d   : > { %v7218_v21 = vmul.f32 %v6674_v43, %v5874_v13  ;;  %16405 = vst [vmem:[#allocation106_spill] sm:$0xff] %v14438_v0  ;;  %3948 = vmatmul.f32.gmra.mxu1 %v2895_v9  ;;  %v2900_v43 = vld [vmem:[%s12343_s20 + $0xcb0] sm:$0xff] }
 0xa5e   : > { %v14442_v19 = vadd.f32 1e-05, %v5761_v22 }
 0xa60   : > { %9293 = vrsqrt.f32 %v14442_v19  ;;  %vm6661_vm14 = vweird.f32 %v14442_v19 }
 0xa62   : > { %5604 = vadd.xlane.f32.xlu0 %v5603_v47  ;;  %v4930_v47 = vpop.xlane.xlu1 %4929 }
 0xa63   : > { %7564 = vperm.xlu1 %9050, %v7214_v27   ;;  %v2896_v27 = vld [vmem:[%s12343_s20 + $0xc90] sm:$0xff]  ;;  %v5106_v9 = vmul.f32 %v4930_v47, %v16290_v34  ;;  %v5987_v47 = vadd.f32 1e-05, %v5763_v29  ;;  %3601 = vmatmul.f32.gmra.mxu0 %v2902_v28 }
 0xa64   : > { %4301 = vmatmul.f32.gmra.mxu2 %v2896_v27  ;;  %v2899_v27 = vld [vmem:[%s12343_s20 + $0xca8] sm:$0xff] }
 0xa65   : > { %v4287_v13 = vpop.f32.mrf.mxu2  ;;  %3951 = vmatmul.f32.gmra.mxu1 %v2899_v27  ;;  %v14467_v33 = vsub.f32 %v14068_v59, %v5106_v9  ;;  %v2903_v27 = vld [vmem:[%s12343_s20 + $0xcc8] sm:$0xff]  ;;  %9295 = vrsqrt.f32 %v5987_v47  ;;  %vm6681_vm3 = vweird.f32 %v5987_v47 }
 0xa66   : > { %v9294_v11 = vpop.eup %9293 }
 0xa67   : > { %16407 = vst [vmem:[#allocation108_spill] sm:$0xff] %v14467_v33  ;;  %v6656_v56 = vmul.f32 %v9294_v11, %v14442_v19  ;;  %v5330_v1 = vmul.f32 %v14467_v33, %v14467_v33  ;;  %vm6662_vm13 = vweird.f32 %v9294_v11  ;;  %v5560_v19 = vpop.xlane.xlu0 %5559 }
 0xa68   : > { %v3931_v60 = vpop.f32.mrf.mxu1  ;;  %vm6663_vm15 = vmor %vm6661_vm14, %vm6662_vm13 }
 0xa69   : > { %v3932_v54 = vadd.f32 %v3931_v60, %v3578_v8  ;;  %v4640_v8 = vpop.f32.mrf.mxu3  ;;  %v14453_v60 = vpop.xlane.xlu2 %5565  ;;  %v6657_v59 = vmul.f32 %v9294_v11, %v6656_v56 }
 0xa6b   : > { %v4285_v18 = vadd.f32 %v4284_v57, %v3932_v54  ;;  %v3584_v57 = vpop.f32.mrf.mxu0 }
 0xa6c   : > { %4304 = vmatmul.f32.gmra.mxu2 %v2900_v43 }
 0xa6d   : > { %v14455_v46 = vadd.f32 %v4637_v5, %v4285_v18  ;;  %v4290_v18 = vpop.f32.mrf.mxu2  ;;  %3954 = vmatmul.f32.gmra.mxu1 %v2903_v27 }
 0xa6f   : > { %v4973_v5 = vsel %vm358_vm0, %v14455_v46, 0.0 }
 0xa71   : > { %v4643_v0 = vpop.f32.mrf.mxu3 }
 0xa73   : > { %7574 = vperm.xlu2 %9051, %v7216_v2   ;;  %v14440_v2 = vpop.permute.xlu1 %7504 }
 0xa74   : > { %16406 = vst [vmem:[#allocation107_spill] sm:$0xff] %v14440_v2  ;;  %4307 = vmatmul.f32.gmra.mxu2 %v2904_v20  ;;  %v4942_v2 = vpop.xlane.xlu2 %4941 }
 0xa75   : > { %v3934_v30 = vpop.f32.mrf.mxu1 }
 0xa76   : > { %7584 = vperm.xlu0 %9052, %v7218_v21   ;;  %v2901_v21 = vld [vmem:[%s12343_s20 + $0xcb8] sm:$0xff] }
 0xa77   : > { %9026 = vmatmul.msk.f32.gmra.mxu3 %vm2942_vm5, %v2901_v21  ;;  %v2905_v21 = vld [vmem:[%s12343_s20 + $0xcd8] sm:$0xff] }
 0xa7b   : > { %v5563_v54 = vpop.xlane.xlu1 %5562 }
 0xa7d   : > { %v3937_v22 = vpop.f32.mrf.mxu1 }
 0xa7e   : > { %v3938_v43 = vadd.f32 %v3937_v22, %v3584_v57  ;;  %v3935_v57 = vadd.f32 %v3934_v30, %v3581_v37  ;;  %v5600_v37 = vsel %vm358_vm0, %v5330_v1, 0.0  ;;  %v6658_v30 = vmul.f32 0.5, %v6657_v59 }
 0xa7f   : > { %9027 = vmatmul.msk.f32.gmra.mxu3 %vm2942_vm5, %v2905_v21  ;;  %v5110_v21 = vmul.f32 %v4942_v2, %v16290_v34 }
 0xa80   : > { %v4291_v22 = vadd.f32 %v4290_v18, %v3938_v43  ;;  %v4288_v9 = vadd.f32 %v4287_v13, %v3935_v57  ;;  %v5873_v57 = vld [vmem:[%s12955_s17 + $0x1f0] sm:$0xff] }
 0xa82   : > { %v14474_v20 = vadd.f32 %v4643_v0, %v4291_v22  ;;  %v14478_v29 = vadd.f32 %v4640_v8, %v4288_v9  ;;  %v6659_v0 = vsub.f32 1.5, %v6658_v30 }
 0xa84   : > { %v4979_v43 = vsel %vm358_vm0, %v14474_v20, 0.0  ;;  %v4976_v2 = vsel %vm358_vm0, %v14478_v29, 0.0  ;;  %v6660_v28 = vmul.f32 %v9294_v11, %v6659_v0 }
 0xa86   : > { %v6664_v22 = vsel %vm6663_vm15, %v9294_v11, %v6660_v28 }
 0xa8d   : > { %5598 = vadd.xlane.f32.xlu1 %v5597_v58  ;;  %v5765_v58 = vmul.f32 %v5563_v54, %v16290_v34 }
 0xa8f   : > { %v5989_v54 = vadd.f32 1e-05, %v5765_v58  ;;  %v9296_v58 = vpop.eup %9295 }
 0xa90   : > { %v6676_v13 = vmul.f32 %v9296_v58, %v5987_v47  ;;  %vm6682_vm1 = vweird.f32 %v9296_v58  ;;  %v3587_v47 = vpop.f32.mrf.mxu0 }
 0xa91   : > { %9297 = vrsqrt.f32 %v5989_v54  ;;  %vm6683_vm4 = vmor %vm6681_vm3, %vm6682_vm1  ;;  %vm6701_vm6 = vweird.f32 %v5989_v54 }
 0xa92   : > { %v6677_v27 = vmul.f32 %v9296_v58, %v6676_v13  ;;  %v5877_v13 = vld [vmem:[%s12955_s17 + $0x210] sm:$0xff] }
 0xa94   : > { %v6678_v59 = vmul.f32 0.5, %v6677_v27  ;;  %v14494_v27 = vpop.permute.xlu0 %7509 }
 0xa95   : > { %4974 = vadd.xlane.f32.xlu1 %v4973_v5  ;;  %v14483_v5 = vsub.f32 %v14175_v32, %v5110_v21  ;;  %v7217_v21 = vmul.f32 %v6664_v22, %v5873_v57  ;;  %16409 = vst [vmem:[#allocation110_spill] sm:$0xff] %v14494_v27 }
 0xa96   : > { %v4646_v22 = vpop.f32.mrf.mxu3 }
 0xa97   : > { %16408 = vst [vmem:[#allocation109_spill] sm:$0xff] %v14483_v5  ;;  %v9298_v18 = vpop.eup %9297  ;;  %v5334_v8 = vmul.f32 %v14483_v5, %v14483_v5 }
 0xa98   : > { %v6696_v1 = vmul.f32 %v9298_v18, %v5989_v54  ;;  %vm6702_vm2 = vweird.f32 %v9298_v18  ;;  %v4939_v54 = vpop.xlane.xlu1 %4938 }
 0xa99   : > { %v5612_v56 = vsel %vm358_vm0, %v5334_v8, 0.0  ;;  %vm6703_vm7 = vmor %vm6701_vm6, %vm6702_vm2  ;;  %v5109_v5 = vmul.f32 %v4939_v54, %v16290_v34 }
 0xa9a   : > { %v6697_v32 = vmul.f32 %v9298_v18, %v6696_v1 }
 0xa9c   : > { %5601 = vadd.xlane.f32.xlu2 %v5600_v37  ;;  %v6698_v9 = vmul.f32 0.5, %v6697_v32  ;;  %v6679_v37 = vsub.f32 1.5, %v6678_v59  ;;  %v4936_v57 = vpop.xlane.xlu0 %4935  ;;  %v2908_v59 = vld [vmem:[%s12343_s20 + $0xcf0] sm:$0xff] }
 0xa9d   : > { %v3940_v32 = vpop.f32.mrf.mxu1  ;;  %4310 = vmatmul.f32.gmra.mxu2 %v2908_v59  ;;  %v2911_v59 = vld [vmem:[%s12343_s20 + $0xd08] sm:$0xff] }
 0xa9e   : > { %v6699_v30 = vsub.f32 1.5, %v6698_v9  ;;  %v2909_v9 = vld [vmem:[%s12343_s20 + $0xcf8] sm:$0xff] }
 0xa9f   : > { %9028 = vmatmul.msk.f32.gmra.mxu3 %vm2942_vm5, %v2909_v9  ;;  %v3941_v9 = vadd.f32 %v3940_v32, %v3587_v47 }
 0xaa0   : > { %4980 = vadd.xlane.f32.xlu0 %v4979_v43  ;;  %v6680_v43 = vmul.f32 %v9296_v58, %v6679_v37  ;;  %v6700_v0 = vmul.f32 %v9298_v18, %v6699_v30  ;;  %v2907_v37 = vld [vmem:[%s12343_s20 + $0xce8] sm:$0xff]  ;;  %v5108_v30 = vmul.f32 %v4936_v57, %v16290_v34 }
 0xaa1   : > { %3957 = vmatmul.f32.gmra.mxu1 %v2907_v37 }
 0xaa2   : > { %v6684_v11 = vsel %vm6683_vm4, %v9296_v58, %v6680_v43  ;;  %v6704_v1 = vsel %vm6703_vm7, %v9298_v18, %v6700_v0  ;;  %v2906_v58 = vld [vmem:[%s12343_s20 + $0xce0] sm:$0xff]  ;;  %v14502_v43 = vpop.permute.xlu2 %7529  ;;  %v14504_v0 = vpop.permute.xlu1 %7519 }
 0xaa3   : > { %v7221_v28 = vmul.f32 %v6704_v1, %v5877_v13  ;;  %16410 = vst [vmem:[#allocation111_spill] sm:$0xff] %v14502_v43  ;;  %3604 = vmatmul.f32.gmra.mxu0 %v2906_v58  ;;  %v14508_v13 = vsub.f32 %v14112_v63, %v5108_v30  ;;  %v2912_v1 = vld [vmem:[%s12343_s20 + $0xd10] sm:$0xff] }
 0xaa4   : > { %4977 = vadd.xlane.f32.xlu2 %v4976_v2  ;;  %v5875_v2 = vld [vmem:[%s12955_s17 + $0x200] sm:$0xff]  ;;  %16411 = vst [vmem:[#allocation112_spill] sm:$0xff] %v14504_v0  ;;  %v2915_v0 = vld [vmem:[%s12343_s20 + $0xd28] sm:$0xff] }
 0xaa5   : > { %v7219_v8 = vmul.f32 %v6684_v11, %v5875_v2  ;;  %v3943_v18 = vpop.f32.mrf.mxu1  ;;  %v5764_v11 = vmul.f32 %v5560_v19, %v16290_v34  ;;  %16412 = vst [vmem:[#allocation113_spill] sm:$0xff] %v14508_v13  ;;  %4313 = vmatmul.f32.gmra.mxu2 %v2912_v1  ;;  %v5332_v19 = vmul.f32 %v14508_v13, %v14508_v13 }
 0xaa7   : > { %v4649_v33 = vpop.f32.mrf.mxu3  ;;  %v14515_v57 = vadd.f32 1e-05, %v5764_v11  ;;  %v5606_v30 = vsel %vm358_vm0, %v5332_v19, 0.0  ;;  %v2916_v11 = vld [vmem:[%s12343_s20 + $0xd30] sm:$0xff]  ;;  %v14535_v19 = vsub.f32 %v14138_v17, %v5109_v5 }
 0xaa8   : > { %5613 = vadd.xlane.f32.xlu0 %v5612_v56  ;;  %v4293_v56 = vpop.f32.mrf.mxu2 }
 0xaa9   : > { %3960 = vmatmul.f32.gmra.mxu1 %v2911_v59  ;;  %v4294_v47 = vadd.f32 %v4293_v56, %v3941_v9  ;;  %9299 = vrsqrt.f32 %v14515_v57  ;;  %v5766_v56 = vmul.f32 %v14453_v60, %v16290_v34  ;;  %16413 = vst [vmem:[#allocation114_spill] sm:$0xff] %v14535_v19  ;;  %v5333_v60 = vmul.f32 %v14535_v19, %v14535_v19 }
 0xaaa   : > { %v14517_v58 = vpop.xlane.xlu2 %5574  ;;  %v5572_v32 = vpop.xlane.xlu1 %5571  ;;  %vm6691_vm9 = vweird.f32 %v14515_v57 }
 0xaab   : > { %v5768_v43 = vmul.f32 %v5572_v32, %v16290_v34  ;;  %v14529_v59 = vadd.f32 %v4646_v22, %v4294_v47 }
 0xaad   : > { %v3946_v37 = vpop.f32.mrf.mxu1  ;;  %4316 = vmatmul.f32.gmra.mxu2 %v2916_v11  ;;  %v5992_v54 = vadd.f32 1e-05, %v5768_v43  ;;  %v4982_v32 = vsel %vm358_vm0, %v14529_v59, 0.0 }
 0xaae   : > { %7579 = vperm.xlu1 %9050, %v7217_v21   ;;  %v3590_v21 = vpop.f32.mrf.mxu0 }
 0xaaf   : > { %v3944_v47 = vadd.f32 %v3943_v18, %v3590_v21  ;;  %9301 = vrsqrt.f32 %v5992_v54  ;;  %v5609_v18 = vsel %vm358_vm0, %v5333_v60, 0.0  ;;  %vm6731_vm12 = vweird.f32 %v5992_v54 }
 0xab0   : > { %v4296_v2 = vpop.f32.mrf.mxu2 }
 0xab1   : > { %3963 = vmatmul.f32.gmra.mxu1 %v2915_v0  ;;  %v4297_v5 = vadd.f32 %v4296_v2, %v3944_v47 }
 0xab2   : > { %v4951_v22 = vpop.xlane.xlu2 %4950 }
 0xab3   : > { %v5113_v17 = vmul.f32 %v4951_v22, %v16290_v34 }
 0xab5   : > { %v14549_v21 = vsub.f32 %v14258_v36, %v5113_v17 }
 0xab6   : > { %v3593_v63 = vpop.f32.mrf.mxu0 }
 0xab7   : > { %v3947_v1 = vadd.f32 %v3946_v37, %v3593_v63  ;;  %v4652_v63 = vpop.f32.mrf.mxu3  ;;  %v9300_v37 = vpop.eup %9299  ;;  %16414 = vst [vmem:[#allocation115_spill] sm:$0xff] %v14549_v21  ;;  %v5337_v2 = vmul.f32 %v14549_v21, %v14549_v21 }
 0xab8   : > { %v4299_v13 = vpop.f32.mrf.mxu2  ;;  %vm6692_vm8 = vweird.f32 %v9300_v37 }
 0xab9   : > { %v4300_v9 = vadd.f32 %v4299_v13, %v3947_v1  ;;  %v9302_v13 = vpop.eup %9301  ;;  %v14551_v1 = vadd.f32 %v4649_v33, %v4297_v5  ;;  %v5621_v36 = vsel %vm358_vm0, %v5337_v2, 0.0  ;;  %vm6693_vm10 = vmor %vm6691_vm9, %vm6692_vm8  ;;  %v5876_v5 = vld [vmem:[%s12955_s17 + $0x208] sm:$0xff] }
 0xaba   : > { %vm6732_vm11 = vweird.f32 %v9302_v13 }
 0xabb   : > { %v14539_v11 = vadd.f32 %v4652_v63, %v4300_v9  ;;  %v6726_v9 = vmul.f32 %v9302_v13, %v5992_v54  ;;  %v4985_v63 = vsel %vm358_vm0, %v14551_v1, 0.0  ;;  %vm6733_vm14 = vmor %vm6731_vm12, %vm6732_vm11 }
 0xabc   : > { %7589 = vperm.xlu2 %9051, %v7219_v8   ;;  %7599 = vperm.xlu0 %9052, %v7221_v28   ;;  %v2913_v8 = vld [vmem:[%s12343_s20 + $0xd18] sm:$0xff]  ;;  %v2910_v28 = vld [vmem:[%s12343_s20 + $0xd00] sm:$0xff] }
 0xabd   : > { %9029 = vmatmul.msk.f32.gmra.mxu3 %vm2942_vm5, %v2913_v8  ;;  %3607 = vmatmul.f32.gmra.mxu0 %v2910_v28  ;;  %v2917_v8 = vld [vmem:[%s12343_s20 + $0xd38] sm:$0xff]  ;;  %v2914_v28 = vld [vmem:[%s12343_s20 + $0xd20] sm:$0xff]  ;;  %v4988_v43 = vsel %vm358_vm0, %v14539_v11, 0.0  ;;  %v6727_v47 = vmul.f32 %v9302_v13, %v6726_v9 }
 0xabf   : > { %v6728_v60 = vmul.f32 0.5, %v6727_v47  ;;  %v5569_v47 = vpop.xlane.xlu0 %5568 }
 0xac5   : > { %9030 = vmatmul.msk.f32.gmra.mxu3 %vm2942_vm5, %v2917_v8  ;;  %3610 = vmatmul.f32.gmra.mxu0 %v2914_v28  ;;  %v6686_v8 = vmul.f32 %v9300_v37, %v14515_v57 }
 0xac7   : > { %v6687_v0 = vmul.f32 %v9300_v37, %v6686_v8 }
 0xac9   : > { %v6688_v28 = vmul.f32 0.5, %v6687_v0  ;;  %v6729_v0 = vsub.f32 1.5, %v6728_v60  ;;  %v14562_v60 = vpop.permute.xlu0 %7524 }
 0xaca   : > { %16415 = vst [vmem:[#allocation116_spill] sm:$0xff] %v14562_v60  ;;  %v2928_v60 = vld [vmem:[%s12343_s20 + $0xd90] sm:$0xff] }
 0xacb   : > { %v6730_v9 = vmul.f32 %v9302_v13, %v6729_v0 }
 0xad8   : > { %5607 = vadd.xlane.f32.xlu1 %v5606_v30  ;;  %v5990_v30 = vadd.f32 1e-05, %v5766_v56 }
 0xada   : > { %9303 = vrsqrt.f32 %v5990_v30  ;;  %vm6711_vm15 = vweird.f32 %v5990_v30  ;;  %v3949_v54 = vpop.f32.mrf.mxu1 }
 0xae0   : > { %4983 = vadd.xlane.f32.xlu1 %v4982_v32  ;;  %v9304_v56 = vpop.eup %9303  ;;  %v6689_v32 = vsub.f32 1.5, %v6688_v28 }
 0xae1   : > { %v6706_v22 = vmul.f32 %v9304_v56, %v5990_v30  ;;  %vm6712_vm13 = vweird.f32 %v9304_v56  ;;  %v2920_v30 = vld [vmem:[%s12343_s20 + $0xd50] sm:$0xff] }
 0xae2   : > { %v6690_v33 = vmul.f32 %v9300_v37, %v6689_v32  ;;  %v6734_v32 = vsel %vm6733_vm14, %v9302_v13, %v6730_v9  ;;  %vm6713_vm1 = vmor %vm6711_vm15, %vm6712_vm13  ;;  %v4655_v13 = vpop.f32.mrf.mxu3  ;;  %v3952_v0 = vpop.f32.mrf.mxu1  ;;  %4319 = vmatmul.f32.gmra.mxu2 %v2920_v30 }
 0xae3   : > { %v6707_v8 = vmul.f32 %v9304_v56, %v6706_v22  ;;  %v4945_v9 = vpop.xlane.xlu0 %4944 }
 0xae5   : > { %5610 = vadd.xlane.f32.xlu2 %v5609_v18  ;;  %v6708_v17 = vmul.f32 0.5, %v6707_v8 }
 0xae6   : > { %4989 = vadd.xlane.f32.xlu0 %v4988_v43  ;;  %v6694_v43 = vsel %vm6693_vm10, %v9300_v37, %v6690_v33  ;;  %v5878_v37 = vld [vmem:[%s12955_s17 + $0x218] sm:$0xff]  ;;  %v3596_v33 = vpop.f32.mrf.mxu0 }
 0xae7   : > { %v7220_v18 = vmul.f32 %v6694_v43, %v5876_v5  ;;  %v6709_v28 = vsub.f32 1.5, %v6708_v17  ;;  %v4302_v8 = vpop.f32.mrf.mxu2  ;;  %v4948_v17 = vpop.xlane.xlu1 %4947  ;;  %v2921_v5 = vld [vmem:[%s12343_s20 + $0xd58] sm:$0xff]  ;;  %v2918_v43 = vld [vmem:[%s12343_s20 + $0xd40] sm:$0xff] }
 0xae8   : > { %9031 = vmatmul.msk.f32.gmra.mxu3 %vm2942_vm5, %v2921_v5  ;;  %3613 = vmatmul.f32.gmra.mxu0 %v2918_v43  ;;  %v5767_v43 = vmul.f32 %v5569_v47, %v16290_v34 }
 0xae9   : > { %v6710_v2 = vmul.f32 %v9304_v56, %v6709_v28  ;;  %v14569_v28 = vpop.permute.xlu2 %7544 }
 0xaea   : > { %16416 = vst [vmem:[#allocation117_spill] sm:$0xff] %v14569_v28  ;;  %v3955_v19 = vpop.f32.mrf.mxu1  ;;  %v3950_v28 = vadd.f32 %v3949_v54, %v3596_v33  ;;  %v5991_v27 = vadd.f32 1e-05, %v5767_v43  ;;  %v5769_v54 = vmul.f32 %v14517_v58, %v16290_v34 }
 0xaeb   : > { %v6714_v22 = vsel %vm6713_vm1, %v9304_v56, %v6710_v2 }
 0xaec   : > { %v4303_v47 = vadd.f32 %v4302_v8, %v3950_v28  ;;  %9305 = vrsqrt.f32 %v5991_v27  ;;  %v5993_v28 = vadd.f32 1e-05, %v5769_v54  ;;  %vm6721_vm3 = vweird.f32 %v5991_v27 }
 0xaed   : > { %4986 = vadd.xlane.f32.xlu2 %v4985_v63  ;;  %v5880_v63 = vld [vmem:[%s12955_s17 + $0x228] sm:$0xff] }
 0xaee   : > { %5622 = vadd.xlane.f32.xlu0 %v5621_v36  ;;  %v7224_v57 = vmul.f32 %v6734_v32, %v5880_v63  ;;  %v7222_v36 = vmul.f32 %v6714_v22, %v5878_v37  ;;  %v3599_v56 = vpop.f32.mrf.mxu0  ;;  %v2924_v32 = vld [vmem:[%s12343_s20 + $0xd70] sm:$0xff]  ;;  %v5111_v37 = vmul.f32 %v4945_v9, %v16290_v34  ;;  %v2922_v22 = vld [vmem:[%s12343_s20 + $0xd60] sm:$0xff]  ;;  %vm6741_vm10 = vweird.f32 %v5993_v28 }
 0xaef   : > { %v14571_v2 = vpop.permute.xlu1 %7534  ;;  %v4305_v63 = vpop.f32.mrf.mxu2  ;;  %4322 = vmatmul.f32.gmra.mxu2 %v2924_v32  ;;  %v2929_v32 = vld [vmem:[%s12343_s20 + $0xd98] sm:$0xff] }
 0xaf0   : > { %16417 = vst [vmem:[#allocation118_spill] sm:$0xff] %v14571_v2  ;;  %3616 = vmatmul.f32.gmra.mxu0 %v2922_v22 }
 0xaf1   : > { %v14579_v5 = vpop.xlane.xlu2 %5583 }
 0xaf6   : > { %v3602_v9 = vpop.f32.mrf.mxu0 }
 0xaf7   : > { %v5581_v21 = vpop.xlane.xlu1 %5580  ;;  %v3956_v2 = vadd.f32 %v3955_v19, %v3602_v9  ;;  %v4308_v62 = vpop.f32.mrf.mxu2  ;;  %4325 = vmatmul.f32.gmra.mxu2 %v2928_v60  ;;  %v14597_v9 = vadd.f32 %v4655_v13, %v4303_v47 }
 0xaf9   : > { %7594 = vperm.xlu1 %9050, %v7220_v18   ;;  %v2919_v18 = vld [vmem:[%s12343_s20 + $0xd48] sm:$0xff]  ;;  %v4960_v43 = vpop.xlane.xlu2 %4959 }
 0xafa   : > { %3966 = vmatmul.f32.gmra.mxu1 %v2919_v18  ;;  %v4658_v30 = vpop.f32.mrf.mxu3  ;;  %v14583_v18 = vsub.f32 %v14194_v25, %v5111_v37  ;;  %v5112_v25 = vmul.f32 %v4948_v17, %v16290_v34  ;;  %v4309_v37 = vadd.f32 %v4308_v62, %v3956_v2  ;;  %v3953_v62 = vadd.f32 %v3952_v0, %v3599_v56  ;;  %v9306_v17 = vpop.eup %9305 }
 0xafb   : > { %v4991_v2 = vsel %vm358_vm0, %v14597_v9, 0.0  ;;  %vm6722_vm2 = vweird.f32 %v9306_v17 }
 0xafc   : > { %16418 = vst [vmem:[#allocation119_spill] sm:$0xff] %v14583_v18  ;;  %v5335_v22 = vmul.f32 %v14583_v18, %v14583_v18  ;;  %v14600_v8 = vsub.f32 %v14221_v6, %v5112_v25  ;;  %vm6723_vm4 = vmor %vm6721_vm3, %vm6722_vm2 }
 0xafe   : > { %v5615_v33 = vsel %vm358_vm0, %v5335_v22, 0.0  ;;  %16419 = vst [vmem:[#allocation120_spill] sm:$0xff] %v14600_v8  ;;  %v5336_v13 = vmul.f32 %v14600_v8, %v14600_v8  ;;  %v2940_v8 = vld [vmem:[%s12343_s20 + $0xdf0] sm:$0xff] }
 0xb00   : > { %v5618_v56 = vsel %vm358_vm0, %v5336_v13, 0.0 }
 0xb02   : > { %7614 = vperm.xlu0 %9052, %v7224_v57   ;;  %v2925_v57 = vld [vmem:[%s12343_s20 + $0xd78] sm:$0xff] }
 0xb03   : > { %9032 = vmatmul.msk.f32.gmra.mxu3 %vm2942_vm5, %v2925_v57  ;;  %v5771_v57 = vmul.f32 %v5581_v21, %v16290_v34  ;;  %v4661_v21 = vpop.f32.mrf.mxu3 }
 0xb04   : > { %v14602_v60 = vadd.f32 %v4661_v21, %v4309_v37 }
 0xb05   : > { %7604 = vperm.xlu2 %9051, %v7222_v36   ;;  %v2923_v36 = vld [vmem:[%s12343_s20 + $0xd68] sm:$0xff]  ;;  %v5995_v19 = vadd.f32 1e-05, %v5771_v57  ;;  %v4306_v57 = vadd.f32 %v4305_v63, %v3953_v62 }
 0xb06   : > { %3969 = vmatmul.f32.gmra.mxu1 %v2923_v36  ;;  %v2926_v36 = vld [vmem:[%s12343_s20 + $0xd80] sm:$0xff]  ;;  %v4997_v58 = vsel %vm358_vm0, %v14602_v60, 0.0 }
 0xb07   : > { %3619 = vmatmul.f32.gmra.mxu0 %v2926_v36  ;;  %9307 = vrsqrt.f32 %v5995_v19  ;;  %v14615_v47 = vadd.f32 %v4658_v30, %v4306_v57  ;;  %vm6761_vm7 = vweird.f32 %v5995_v19 }
 0xb08   : > { %9309 = vrsqrt.f32 %v5993_v28 }
 0xb09   : > { %v4994_v63 = vsel %vm358_vm0, %v14615_v47, 0.0 }
 0xb0b   : > { %9033 = vmatmul.msk.f32.gmra.mxu3 %vm2942_vm5, %v2929_v32  ;;  %v6716_v32 = vmul.f32 %v9306_v17, %v5991_v27  ;;  %v5881_v27 = vld [vmem:[%s12955_s17 + $0x230] sm:$0xff] }
 0xb0d   : > { %v9308_v22 = vpop.eup %9307  ;;  %v6717_v0 = vmul.f32 %v9306_v17, %v6716_v32  ;;  %v5879_v32 = vld [vmem:[%s12955_s17 + $0x220] sm:$0xff] }
 0xb0e   : > { %3972 = vmatmul.f32.gmra.mxu1 %v2927_v35  ;;  %v5116_v35 = vmul.f32 %v4960_v43, %v16290_v34  ;;  %v6756_v36 = vmul.f32 %v9308_v22, %v5995_v19  ;;  %v9310_v37 = vpop.eup %9309  ;;  %vm6762_vm6 = vweird.f32 %v9308_v22 }
 0xb0f   : > { %v6736_v54 = vmul.f32 %v9310_v37, %v5993_v28  ;;  %vm6763_vm8 = vmor %vm6761_vm7, %vm6762_vm6  ;;  %vm6742_vm9 = vweird.f32 %v9310_v37  ;;  %v2932_v28 = vld [vmem:[%s12343_s20 + $0xdb0] sm:$0xff] }
 0xb10   : > { %v14612_v6 = vsub.f32 %v14336_v53, %v5116_v35  ;;  %v6757_v21 = vmul.f32 %v9308_v22, %v6756_v36  ;;  %v5883_v36 = vld [vmem:[%s12955_s17 + $0x240] sm:$0xff]  ;;  %vm6743_vm11 = vmor %vm6741_vm10, %vm6742_vm9  ;;  %4328 = vmatmul.f32.gmra.mxu2 %v2932_v28 }
 0xb11   : > { %v6737_v30 = vmul.f32 %v9310_v37, %v6736_v54  ;;  %v5578_v54 = vpop.xlane.xlu0 %5577 }
 0xb12   : > { %16420 = vst [vmem:[#allocation121_spill] sm:$0xff] %v14612_v6  ;;  %v5340_v25 = vmul.f32 %v14612_v6, %v14612_v6  ;;  %v6758_v35 = vmul.f32 0.5, %v6757_v21  ;;  %v2941_v6 = vld [vmem:[%s12343_s20 + $0xdf8] sm:$0xff] }
 0xb14   : > { %v5630_v53 = vsel %vm358_vm0, %v5340_v25, 0.0 }
 0xb1e   : > { %v3958_v19 = vpop.f32.mrf.mxu1 }
 0xb23   : > { %5616 = vadd.xlane.f32.xlu1 %v5615_v33  ;;  %v6718_v33 = vmul.f32 0.5, %v6717_v0 }
 0xb25   : > { %v6719_v43 = vsub.f32 1.5, %v6718_v33 }
 0xb27   : > { %v6720_v62 = vmul.f32 %v9306_v17, %v6719_v43  ;;  %v4311_v43 = vpop.f32.mrf.mxu2 }
 0xb29   : > { %v6724_v57 = vsel %vm6723_vm4, %v9306_v17, %v6720_v62  ;;  %v3605_v17 = vpop.f32.mrf.mxu0  ;;  %v2933_v62 = vld [vmem:[%s12343_s20 + $0xdb8] sm:$0xff] }
 0xb2a   : > { %v7223_v0 = vmul.f32 %v6724_v57, %v5879_v32  ;;  %9034 = vmatmul.msk.f32.gmra.mxu3 %vm2942_vm5, %v2933_v62  ;;  %v14632_v32 = vpop.permute.xlu2 %7559 }
 0xb2b   : > { %4992 = vadd.xlane.f32.xlu1 %v4991_v2  ;;  %v6759_v2 = vsub.f32 1.5, %v6758_v35  ;;  %v4664_v35 = vpop.f32.mrf.mxu3  ;;  %16422 = vst [vmem:[#allocation123_spill] sm:$0xff] %v14632_v32 }
 0xb2c   : > { %4998 = vadd.xlane.f32.xlu0 %v4997_v58  ;;  %v6738_v58 = vmul.f32 0.5, %v6737_v30  ;;  %v14625_v30 = vpop.permute.xlu0 %7539 }
 0xb2d   : > { %v6760_v13 = vmul.f32 %v9308_v22, %v6759_v2  ;;  %16421 = vst [vmem:[#allocation122_spill] sm:$0xff] %v14625_v30  ;;  %v2930_v2 = vld [vmem:[%s12343_s20 + $0xda0] sm:$0xff]  ;;  %v2939_v30 = vld [vmem:[%s12343_s20 + $0xde8] sm:$0xff] }
 0xb2e   : > { %5619 = vadd.xlane.f32.xlu2 %v5618_v56  ;;  %v6739_v56 = vsub.f32 1.5, %v6738_v58  ;;  %3622 = vmatmul.f32.gmra.mxu0 %v2930_v2 }
 0xb2f   : > { %v6764_v25 = vsel %vm6763_vm8, %v9308_v22, %v6760_v13  ;;  %v4957_v22 = vpop.xlane.xlu1 %4956  ;;  %v2931_v13 = vld [vmem:[%s12343_s20 + $0xda8] sm:$0xff] }
 0xb30   : > { %v6740_v33 = vmul.f32 %v9310_v37, %v6739_v56  ;;  %v7227_v21 = vmul.f32 %v6764_v25, %v5883_v36  ;;  %3975 = vmatmul.f32.gmra.mxu1 %v2931_v13  ;;  %v4314_v56 = vpop.f32.mrf.mxu2  ;;  %v2937_v36 = vld [vmem:[%s12343_s20 + $0xdd8] sm:$0xff]  ;;  %v2934_v25 = vld [vmem:[%s12343_s20 + $0xdc0] sm:$0xff]  ;;  %v5115_v49 = vmul.f32 %v4957_v22, %v16290_v34 }
 0xb32   : > { %9035 = vmatmul.msk.f32.gmra.mxu3 %vm2942_vm5, %v2937_v36 }
 0xb34   : > { %5631 = vadd.xlane.f32.xlu0 %v5630_v53  ;;  %v6744_v53 = vsel %vm6743_vm11, %v9310_v37, %v6740_v33  ;;  %v3961_v37 = vpop.f32.mrf.mxu1  ;;  %v2935_v33 = vld [vmem:[%s12343_s20 + $0xdc8] sm:$0xff] }
 0xb36   : > { %4995 = vadd.xlane.f32.xlu2 %v4994_v63  ;;  %v7225_v63 = vmul.f32 %v6744_v53, %v5881_v27  ;;  %v14641_v53 = vpop.xlane.xlu2 %5592  ;;  %3625 = vmatmul.f32.gmra.mxu0 %v2934_v25  ;;  %v3959_v25 = vadd.f32 %v3958_v19, %v3605_v17 }
 0xb37   : > { %v14634_v57 = vpop.permute.xlu1 %7549 }
 0xb38   : > { %16423 = vst [vmem:[#allocation124_spill] sm:$0xff] %v14634_v57  ;;  %3978 = vmatmul.f32.gmra.mxu1 %v2935_v33  ;;  %v4317_v18 = vpop.f32.mrf.mxu2  ;;  %v2938_v57 = vld [vmem:[%s12343_s20 + $0xde0] sm:$0xff] }
 0xb3a   : > { %v3608_v58 = vpop.f32.mrf.mxu0  ;;  %9036 = vmatmul.msk.f32.gmra.mxu3 %vm2942_vm5, %v2941_v6  ;;  %v14664_v6 = vsub.f32 %v14299_v52, %v5115_v49 }
 0xb3c   : > { %v3964_v28 = vpop.f32.mrf.mxu1  ;;  %16425 = vst [vmem:[#allocation126_spill] sm:$0xff] %v14664_v6 }
 0xb3e   : > { %3628 = vmatmul.f32.gmra.mxu0 %v2938_v57  ;;  %v4969_v39 = vpop.xlane.xlu2 %4968 }
 0xb3f   : > { %v5590_v2 = vpop.xlane.xlu1 %5589 }
 0xb40   : > { %v4667_v27 = vpop.f32.mrf.mxu3  ;;  %v5774_v32 = vmul.f32 %v5590_v2, %v16290_v34  ;;  %3981 = vmatmul.f32.gmra.mxu1 %v2939_v30 }
 0xb44   : > { %7609 = vperm.xlu1 %9050, %v7223_v0   ;;  %v2936_v0 = vld [vmem:[%s12343_s20 + $0xdd0] sm:$0xff] }
 0xb45   : > { %4331 = vmatmul.f32.gmra.mxu2 %v2936_v0  ;;  %v5770_v0 = vmul.f32 %v5578_v54, %v16290_v34  ;;  %v4312_v54 = vadd.f32 %v4311_v43, %v3959_v25  ;;  %v3962_v43 = vadd.f32 %v3961_v37, %v3608_v58 }
 0xb47   : > { %v14666_v17 = vadd.f32 %v4664_v35, %v4312_v54  ;;  %v4315_v52 = vadd.f32 %v4314_v56, %v3962_v43  ;;  %v5886_v43 = vld [vmem:[%s12955_s17 + $0x258] sm:$0xff] }
 0xb48   : > { %7629 = vperm.xlu0 %9052, %v7227_v21   ;;  %v4954_v21 = vpop.xlane.xlu0 %4953 }
 0xb49   : > { %v5114_v62 = vmul.f32 %v4954_v21, %v16290_v34  ;;  %v5998_v21 = vadd.f32 1e-05, %v5774_v32  ;;  %v5000_v49 = vsel %vm358_vm0, %v14666_v17, 0.0  ;;  %v14680_v37 = vadd.f32 %v4667_v27, %v4315_v52  ;;  %v5882_v52 = vld [vmem:[%s12955_s17 + $0x238] sm:$0xff] }
 0xb4b   : > { %v14651_v36 = vsub.f32 %v14266_v14, %v5114_v62  ;;  %9311 = vrsqrt.f32 %v5998_v21  ;;  %v5772_v14 = vmul.f32 %v14579_v5, %v16290_v34  ;;  %v5003_v56 = vsel %vm358_vm0, %v14680_v37, 0.0 }
 0xb4c   : > { %vm6791_vm13 = vweird.f32 %v5998_v21 }
 0xb4d   : > { %16424 = vst [vmem:[#allocation125_spill] sm:$0xff] %v14651_v36  ;;  %4334 = vmatmul.f32.gmra.mxu2 %v2940_v8  ;;  %v5338_v2 = vmul.f32 %v14651_v36, %v14651_v36  ;;  %v5996_v22 = vadd.f32 1e-05, %v5772_v14  ;;  %v7943_v36 = vld [vmem:[%s12791_s15 + $0x20] sm:$0xff] }
 0xb4e   : > { %7619 = vperm.xlu2 %9051, %v7225_v63   ;;  %v3611_v63 = vpop.f32.mrf.mxu0 }
 0xb4f   : > { %v3965_v13 = vadd.f32 %v3964_v28, %v3611_v63  ;;  %v4670_v63 = vpop.f32.mrf.mxu3  ;;  %v5994_v28 = vadd.f32 1e-05, %v5770_v0  ;;  %v5624_v8 = vsel %vm358_vm0, %v5338_v2, 0.0  ;;  %vm6771_vm3 = vweird.f32 %v5996_v22 }
 0xb51   : > { %v4318_v33 = vadd.f32 %v4317_v18, %v3965_v13  ;;  %9313 = vrsqrt.f32 %v5994_v28  ;;  %v5119_v18 = vmul.f32 %v4969_v39, %v16290_v34  ;;  %v9312_v32 = vpop.eup %9311  ;;  %v5339_v39 = vmul.f32 %v14664_v6, %v14664_v6 }
 0xb52   : > { %9315 = vrsqrt.f32 %v5996_v22  ;;  %v6786_v35 = vmul.f32 %v9312_v32, %v5998_v21  ;;  %vm6792_vm5 = vweird.f32 %v9312_v32  ;;  %vm6751_vm14 = vweird.f32 %v5994_v28 }
 0xb53   : > { %v14657_v41 = vadd.f32 %v4670_v63, %v4318_v33  ;;  %v14671_v30 = vsub.f32 %v14409_v42, %v5119_v18  ;;  %v5627_v42 = vsel %vm358_vm0, %v5339_v39, 0.0  ;;  %vm6793_vm15 = vmor %vm6791_vm13, %vm6792_vm5 }
 0xb54   : > { %v6787_v62 = vmul.f32 %v9312_v32, %v6786_v35 }
 0xb55   : > { %v5006_v19 = vsel %vm358_vm0, %v14657_v41, 0.0  ;;  %16426 = vst [vmem:[#allocation127_spill] sm:$0xff] %v14671_v30  ;;  %v5343_v57 = vmul.f32 %v14671_v30, %v14671_v30 }
 0xb56   : > { %v6788_v33 = vmul.f32 0.5, %v6787_v62  ;;  %v5884_v62 = vld [vmem:[%s12955_s17 + $0x248] sm:$0xff] }
 0xb57   : > { %v9314_v5 = vpop.eup %9313  ;;  %v5639_v13 = vsel %vm358_vm0, %v5343_v57, 0.0 }
 0xb58   : > { %v6746_v58 = vmul.f32 %v9314_v5, %v5994_v28  ;;  %v9316_v25 = vpop.eup %9315  ;;  %v6789_v54 = vsub.f32 1.5, %v6788_v33  ;;  %vm6752_vm12 = vweird.f32 %v9314_v5  ;;  %v4966_v33 = vpop.xlane.xlu1 %4965 }
 0xb59   : > { %v6766_v2 = vmul.f32 %v9316_v25, %v5996_v22  ;;  %vm6753_vm1 = vmor %vm6751_vm14, %vm6752_vm12  ;;  %vm6772_vm2 = vweird.f32 %v9316_v25 }
 0xb5a   : > { %v6747_v0 = vmul.f32 %v9314_v5, %v6746_v58  ;;  %v6790_v27 = vmul.f32 %v9312_v32, %v6789_v54  ;;  %vm6773_vm4 = vmor %vm6771_vm3, %vm6772_vm2  ;;  %v14688_v54 = vpop.permute.xlu2 %7574 }
 0xb5b   : > { %v6767_v18 = vmul.f32 %v9316_v25, %v6766_v2  ;;  %16427 = vst [vmem:[#allocation128_spill] sm:$0xff] %v14688_v54 }
 0xb5c   : > { %v6748_v63 = vmul.f32 0.5, %v6747_v0  ;;  %v6794_v39 = vsel %vm6793_vm15, %v9312_v32, %v6790_v27  ;;  %v5587_v32 = vpop.xlane.xlu0 %5586 }
 0xb5d   : > { %v7230_v57 = vmul.f32 %v6794_v39, %v5886_v43 }
 0xb5e   : > { %v6749_v14 = vsub.f32 1.5, %v6748_v63 }
 0xb64   : > { %v14692_v27 = vpop.permute.xlu0 %7554 }
 0xb65   : > { %v3614_v21 = vpop.f32.mrf.mxu0 }
 0xb6b   : > { %v4673_v63 = vpop.f32.mrf.mxu3 }
 0xb6c   : > { %v4963_v39 = vpop.xlane.xlu0 %4962 }
 0xb6d   : > { %v3617_v2 = vpop.f32.mrf.mxu0 }
 0xb6e   : > { %5625 = vadd.xlane.f32.xlu1 %v5624_v8  ;;  %v6750_v8 = vmul.f32 %v9314_v5, %v6749_v14  ;;  %v14690_v14 = vpop.permute.xlu1 %7564 }
 0xb6f   : > { %16428 = vst [vmem:[#allocation129_spill] sm:$0xff] %v14690_v14 }
 0xb70   : > { %v6754_v35 = vsel %vm6753_vm1, %v9314_v5, %v6750_v8  ;;  %v14694_v8 = vpop.xlane.xlu2 %5601 }
 0xb71   : > { %v7226_v58 = vmul.f32 %v6754_v35, %v5882_v52 }
 0xb72   : > { %5007 = vadd.xlane.f32.xlu0 %v5006_v19  ;;  %v6768_v19 = vmul.f32 0.5, %v6767_v18 }
 0xb76   : > { %5001 = vadd.xlane.f32.xlu1 %v5000_v49  ;;  %v6769_v49 = vsub.f32 1.5, %v6768_v19  ;;  %v5599_v43 = vpop.xlane.xlu1 %5598 }
 0xb77   : > { %5628 = vadd.xlane.f32.xlu2 %v5627_v42  ;;  %v3967_v28 = vpop.f32.mrf.mxu1  ;;  %v5777_v52 = vmul.f32 %v5599_v43, %v16290_v34 }
 0xb78   : > { %v6770_v42 = vmul.f32 %v9316_v25, %v6769_v49  ;;  %v4978_v6 = vpop.xlane.xlu2 %4977  ;;  %v3968_v54 = vadd.f32 %v3967_v28, %v3614_v21 }
 0xb7a   : > { %5640 = vadd.xlane.f32.xlu0 %v5639_v13  ;;  %v6774_v13 = vsel %vm6773_vm4, %v9316_v25, %v6770_v42  ;;  %v6001_v42 = vadd.f32 1e-05, %v5777_v52 }
 0xb7b   : > { %v7228_v0 = vmul.f32 %v6774_v13, %v5884_v62  ;;  %v5773_v13 = vmul.f32 %v5587_v32, %v16290_v34 }
 0xb7c   : > { %9317 = vrsqrt.f32 %v6001_v42  ;;  %vm6821_vm7 = vweird.f32 %v6001_v42 }
 0xb7d   : > { %v5997_v43 = vadd.f32 1e-05, %v5773_v13 }
 0xb7f   : > { %5004 = vadd.xlane.f32.xlu2 %v5003_v56  ;;  %v4320_v56 = vpop.f32.mrf.mxu2  ;;  %9319 = vrsqrt.f32 %v5997_v43  ;;  %vm6781_vm10 = vweird.f32 %v5997_v43 }
 0xb80   : > { %v4321_v32 = vadd.f32 %v4320_v56, %v3968_v54 }
 0xb82   : > { %v9318_v28 = vpop.eup %9317 }
 0xb83   : > { %v3970_v5 = vpop.f32.mrf.mxu1  ;;  %vm6822_vm6 = vweird.f32 %v9318_v28 }
 0xb84   : > { %v3620_v25 = vpop.f32.mrf.mxu0  ;;  %vm6823_vm8 = vmor %vm6821_vm7, %vm6822_vm6 }
 0xb86   : > { %v4676_v22 = vpop.f32.mrf.mxu3 }
 0xb87   : > { %v4323_v18 = vpop.f32.mrf.mxu2 }
 0xb8b   : > { %v3973_v19 = vpop.f32.mrf.mxu1 }
 0xb8c   : > { %v3974_v49 = vadd.f32 %v3973_v19, %v3620_v25  ;;  %v5118_v25 = vmul.f32 %v4966_v33, %v16290_v34  ;;  %v5122_v19 = vmul.f32 %v4978_v6, %v16290_v34  ;;  %v3971_v33 = vadd.f32 %v3970_v5, %v3617_v2 }
 0xb8e   : > { %7644 = vperm.xlu0 %9052, %v7230_v57   ;;  %v5117_v57 = vmul.f32 %v4963_v39, %v16290_v34  ;;  %v4679_v62 = vpop.f32.mrf.mxu3  ;;  %v14713_v52 = vsub.f32 %v14380_v50, %v5118_v25  ;;  %v14716_v21 = vsub.f32 %v14478_v29, %v5122_v19  ;;  %v4324_v56 = vadd.f32 %v4323_v18, %v3971_v33  ;;  %v9320_v29 = vpop.eup %9319 }
 0xb8f   : > { %7624 = vperm.xlu1 %9050, %v7226_v58   ;;  %v4326_v35 = vpop.f32.mrf.mxu2  ;;  %vm6782_vm9 = vweird.f32 %v9320_v29 }
 0xb90   : > { %v4327_v58 = vadd.f32 %v4326_v35, %v3974_v49  ;;  %16430 = vst [vmem:[#allocation131_spill] sm:$0xff] %v14713_v52  ;;  %v5346_v50 = vmul.f32 %v14716_v21, %v14716_v21  ;;  %v14729_v13 = vadd.f32 %v4676_v22, %v4324_v56  ;;  %v5596_v22 = vpop.xlane.xlu0 %5595  ;;  %vm6783_vm11 = vmor %vm6781_vm10, %vm6782_vm9 }
 0xb91   : > { %16431 = vst [vmem:[#allocation132_spill] sm:$0xff] %v14716_v21 }
 0xb92   : > { %v14702_v30 = vadd.f32 %v4679_v62, %v4327_v58  ;;  %v6816_v58 = vmul.f32 %v9318_v28, %v6001_v42  ;;  %v5648_v5 = vsel %vm358_vm0, %v5346_v50, 0.0  ;;  %v5889_v50 = vld [vmem:[%s12955_s17 + $0x270] sm:$0xff] }
 0xb94   : > { %v5015_v49 = vsel %vm358_vm0, %v14702_v30, 0.0  ;;  %v6817_v62 = vmul.f32 %v9318_v28, %v6816_v58 }
 0xb96   : > { %v6818_v25 = vmul.f32 0.5, %v6817_v62 }
 0xb97   : > { %7634 = vperm.xlu2 %9051, %v7228_v0   ;;  %v14700_v0 = vsub.f32 %v14338_v4, %v5117_v57  ;;  %v5775_v4 = vmul.f32 %v14641_v53, %v16290_v34  ;;  %v14719_v57 = vadd.f32 %v4673_v63, %v4321_v32  ;;  %v5342_v53 = vmul.f32 %v14713_v52, %v14713_v52 }
 0xb98   : > { %v6776_v63 = vmul.f32 %v9320_v29, %v5997_v43 }
 0xb99   : > { %16429 = vst [vmem:[#allocation130_spill] sm:$0xff] %v14700_v0  ;;  %v5341_v39 = vmul.f32 %v14700_v0, %v14700_v0  ;;  %v5999_v35 = vadd.f32 1e-05, %v5775_v4  ;;  %v5009_v54 = vsel %vm358_vm0, %v14719_v57, 0.0  ;;  %v5636_v2 = vsel %vm358_vm0, %v5342_v53, 0.0 }
 0xb9a   : > { %v6777_v18 = vmul.f32 %v9320_v29, %v6776_v63  ;;  %v6819_v4 = vsub.f32 1.5, %v6818_v25  ;;  %v14735_v25 = vpop.permute.xlu0 %7569 }
 0xb9b   : > { %v5633_v6 = vsel %vm358_vm0, %v5341_v39, 0.0  ;;  %9321 = vrsqrt.f32 %v5999_v35  ;;  %v5012_v39 = vsel %vm358_vm0, %v14729_v13, 0.0  ;;  %vm6801_vm12 = vweird.f32 %v5999_v35 }
 0xb9c   : > { %v6778_v32 = vmul.f32 0.5, %v6777_v18  ;;  %v6820_v33 = vmul.f32 %v9318_v28, %v6819_v4 }
 0xb9e   : > { %v6779_v58 = vsub.f32 1.5, %v6778_v32  ;;  %v6824_v56 = vsel %vm6823_vm8, %v9318_v28, %v6820_v33  ;;  %v5887_v28 = vld [vmem:[%s12955_s17 + $0x260] sm:$0xff]  ;;  %v4329_v32 = vpop.f32.mrf.mxu2 }
 0xb9f   : > { %v7233_v62 = vmul.f32 %v6824_v56, %v5889_v50 }
 0xba1   : > { %v9322_v19 = vpop.eup %9321 }
 0xba2   : > { %vm6802_vm5 = vweird.f32 %v9322_v19  ;;  %v4972_v43 = vpop.xlane.xlu0 %4971 }
 0xba3   : > { %vm6803_vm13 = vmor %vm6801_vm12, %vm6802_vm5 }
 0xbaa   : > { %v14738_v50 = vpop.xlane.xlu0 %5604 }
 0xbad   : > { %v4682_v33 = vpop.f32.mrf.mxu3 }
 0xbb5   : > { %v4685_v56 = vpop.f32.mrf.mxu3 }
 0xbb8   : > { %5016 = vadd.xlane.f32.xlu0 %v5015_v49  ;;  %v6796_v49 = vmul.f32 %v9322_v19, %v5999_v35  ;;  %v14740_v35 = vpop.permute.xlu0 %7584 }
 0xbb9   : > { %5634 = vadd.xlane.f32.xlu1 %v5633_v6  ;;  %16432 = vst [vmem:[#allocation133_spill] sm:$0xff] %v14740_v35 }
 0xbba   : > { %v6797_v6 = vmul.f32 %v9322_v19, %v6796_v49  ;;  %v3976_v49 = vpop.f32.mrf.mxu1 }
 0xbbc   : > { %v6798_v53 = vmul.f32 0.5, %v6797_v6 }
 0xbc0   : > { %5637 = vadd.xlane.f32.xlu2 %v5636_v2  ;;  %5649 = vadd.xlane.f32.xlu0 %v5648_v5  ;;  %v6799_v2 = vsub.f32 1.5, %v6798_v53  ;;  %v5885_v5 = vld [vmem:[%s12955_s17 + $0x250] sm:$0xff] }
 0xbc1   : > { %5010 = vadd.xlane.f32.xlu1 %v5009_v54  ;;  %v6780_v54 = vmul.f32 %v9320_v29, %v6779_v58 }
 0xbc2   : > { %v6800_v18 = vmul.f32 %v9322_v19, %v6799_v2  ;;  %v3979_v53 = vpop.f32.mrf.mxu1 }
 0xbc3   : > { %v6784_v63 = vsel %vm6783_vm11, %v9320_v29, %v6780_v54 }
 0xbc4   : > { %v7229_v42 = vmul.f32 %v6784_v63, %v5885_v5  ;;  %v6804_v4 = vsel %vm6803_vm13, %v9322_v19, %v6800_v18  ;;  %v5120_v19 = vmul.f32 %v4972_v43, %v16290_v34  ;;  %v5778_v43 = vmul.f32 %v14694_v8, %v16290_v34 }
 0xbc5   : > { %v7231_v6 = vmul.f32 %v6804_v4, %v5887_v28  ;;  %v4975_v28 = vpop.xlane.xlu1 %4974  ;;  %v14745_v4 = vpop.xlane.xlu0 %4980 }
 0xbc6   : > { %v14749_v52 = vsub.f32 %v14407_v16, %v5120_v19 }
 0xbc8   : > { %5013 = vadd.xlane.f32.xlu2 %v5012_v39  ;;  %v3623_v39 = vpop.f32.mrf.mxu0  ;;  %v4332_v29 = vpop.f32.mrf.mxu2  ;;  %16433 = vst [vmem:[#allocation134_spill] sm:$0xff] %v14749_v52 }
 0xbc9   : > { %v3977_v21 = vadd.f32 %v3976_v49, %v3623_v39 }
 0xbcd   : > { %v14762_v0 = vpop.xlane.xlu0 %5613 }
 0xbd0   : > { %v3626_v58 = vpop.f32.mrf.mxu0  ;;  %v4335_v5 = vpop.f32.mrf.mxu2 }
 0xbd1   : > { %v3980_v16 = vadd.f32 %v3979_v53, %v3626_v58 }
 0xbd3   : > { %v4333_v49 = vadd.f32 %v4332_v29, %v3980_v16 }
 0xbd4   : > { %7659 = vperm.xlu0 %9052, %v7233_v62   ;;  %v3982_v62 = vpop.f32.mrf.mxu1 }
 0xbd5   : > { %v14773_v53 = vpop.permute.xlu0 %7599 }
 0xbd6   : > { %16435 = vst [vmem:[#allocation136_spill] sm:$0xff] %v14773_v53 }
 0xbd8   : > { %v3629_v54 = vpop.f32.mrf.mxu0 }
 0xbd9   : > { %v3983_v2 = vadd.f32 %v3982_v62, %v3629_v54  ;;  %v5121_v62 = vmul.f32 %v4975_v28, %v16290_v34 }
 0xbda   : > { %7639 = vperm.xlu1 %9050, %v7229_v42   ;;  %v4688_v42 = vpop.f32.mrf.mxu3 }
 0xbdb   : > { %v4336_v63 = vadd.f32 %v4335_v5, %v3983_v2  ;;  %v5344_v5 = vmul.f32 %v14749_v52, %v14749_v52 }
 0xbdd   : > { %v14743_v18 = vadd.f32 %v4688_v42, %v4336_v63  ;;  %v14759_v63 = vsub.f32 %v14455_v46, %v5121_v62  ;;  %v6002_v42 = vadd.f32 1e-05, %v5778_v43  ;;  %v5642_v19 = vsel %vm358_vm0, %v5344_v5, 0.0 }
 0xbdf   : > { %v5024_v54 = vsel %vm358_vm0, %v14743_v18, 0.0  ;;  %16434 = vst [vmem:[#allocation135_spill] sm:$0xff] %v14759_v63  ;;  %v5345_v39 = vmul.f32 %v14759_v63, %v14759_v63  ;;  %vm6831_vm3 = vweird.f32 %v6002_v42 }
 0xbe0   : > { %7649 = vperm.xlu2 %9051, %v7231_v6   ;;  %v5776_v6 = vmul.f32 %v5596_v22, %v16290_v34  ;;  %v4330_v22 = vadd.f32 %v4329_v32, %v3977_v21  ;;  %v14771_v32 = vadd.f32 %v4685_v56, %v4333_v49 }
 0xbe1   : > { %v5645_v46 = vsel %vm358_vm0, %v5345_v39, 0.0  ;;  %v14782_v39 = vpop.permute.xlu1 %7579 }
 0xbe2   : > { %v6000_v2 = vadd.f32 1e-05, %v5776_v6  ;;  %v14766_v8 = vadd.f32 %v4682_v33, %v4330_v22  ;;  %v5021_v33 = vsel %vm358_vm0, %v14771_v32, 0.0  ;;  %v14778_v22 = vpop.xlane.xlu0 %4989  ;;  %16437 = vst [vmem:[#allocation138_spill] sm:$0xff] %v14782_v39 }
 0xbe4   : > { %9323 = vrsqrt.f32 %v6000_v2  ;;  %v5018_v21 = vsel %vm358_vm0, %v14766_v8, 0.0  ;;  %vm6811_vm15 = vweird.f32 %v6000_v2 }
 0xbe5   : > { %9325 = vrsqrt.f32 %v6002_v42 }
 0xbea   : > { %v9324_v28 = vpop.eup %9323 }
 0xbeb   : > { %v6806_v58 = vmul.f32 %v9324_v28, %v6000_v2  ;;  %v9326_v6 = vpop.eup %9325  ;;  %vm6812_vm14 = vweird.f32 %v9324_v28 }
 0xbec   : > { %v6826_v62 = vmul.f32 %v9326_v6, %v6002_v42  ;;  %vm6813_vm1 = vmor %vm6811_vm15, %vm6812_vm14  ;;  %vm6832_vm2 = vweird.f32 %v9326_v6 }
 0xbed   : > { %v6807_v29 = vmul.f32 %v9324_v28, %v6806_v58  ;;  %vm6833_vm4 = vmor %vm6831_vm3, %vm6832_vm2 }
 0xbee   : > { %v6827_v5 = vmul.f32 %v9326_v6, %v6826_v62  ;;  %v5608_v62 = vpop.xlane.xlu1 %5607 }
 0xbef   : > { %v6808_v43 = vmul.f32 0.5, %v6807_v29 }
 0xbf0   : > { %v6828_v16 = vmul.f32 0.5, %v6827_v5  ;;  %v5890_v5 = vld [vmem:[%s12955_s17 + $0x278] sm:$0xff] }
 0xbf1   : > { %v6809_v56 = vsub.f32 1.5, %v6808_v43 }
 0xbf3   : > { %v6810_v49 = vmul.f32 %v9324_v28, %v6809_v56  ;;  %v5780_v56 = vmul.f32 %v5608_v62, %v16290_v34 }
 0xbfe   : > { %5025 = vadd.xlane.f32.xlu0 %v5024_v54  ;;  %v7944_v54 = vld [vmem:[%s12791_s15 + $0x28] sm:$0xff] }
 0xc04   : > { %5643 = vadd.xlane.f32.xlu1 %v5642_v19  ;;  %v14780_v19 = vpop.permute.xlu2 %7589 }
 0xc05   : > { %16436 = vst [vmem:[#allocation137_spill] sm:$0xff] %v14780_v19 }
 0xc09   : > { %5646 = vadd.xlane.f32.xlu2 %v5645_v46  ;;  %v6829_v46 = vsub.f32 1.5, %v6828_v16  ;;  %v6004_v16 = vadd.f32 1e-05, %v5780_v56 }
 0xc0b   : > { %v6830_v58 = vmul.f32 %v9326_v6, %v6829_v46  ;;  %9327 = vrsqrt.f32 %v6004_v16  ;;  %vm6851_vm7 = vweird.f32 %v6004_v16 }
 0xc0c   : > { %5019 = vadd.xlane.f32.xlu1 %v5018_v21  ;;  %v14784_v21 = vpop.xlane.xlu0 %5622  ;;  %v5611_v29 = vpop.xlane.xlu2 %5610 }
 0xc0d   : > { %v6834_v63 = vsel %vm6833_vm4, %v9326_v6, %v6830_v58 }
 0xc0e   : > { %v7234_v2 = vmul.f32 %v6834_v63, %v5890_v5 }
 0xc11   : > { %5022 = vadd.xlane.f32.xlu2 %v5021_v33  ;;  %v5888_v33 = vld [vmem:[%s12955_s17 + $0x268] sm:$0xff] }
 0xc12   : > { %8078 = vperm.xlu0 %9052, %v7944_v54   ;;  %v6814_v54 = vsel %vm6813_vm1, %v9324_v28, %v6810_v49  ;;  %v9328_v49 = vpop.eup %9327 }
 0xc13   : > { %v7232_v43 = vmul.f32 %v6814_v54, %v5888_v33  ;;  %v6846_v33 = vmul.f32 %v9328_v49, %v6004_v16  ;;  %vm6852_vm6 = vweird.f32 %v9328_v49 }
 0xc14   : > { %v14789_v19 = vpop.permute.xlu0 %7614  ;;  %v4987_v52 = vpop.xlane.xlu2 %4986  ;;  %vm6853_vm8 = vmor %vm6851_vm7, %vm6852_vm6 }
 0xc15   : > { %16438 = vst [vmem:[#allocation139_spill] sm:$0xff] %v14789_v19  ;;  %v5125_v42 = vmul.f32 %v4987_v52, %v16290_v34  ;;  %v6847_v54 = vmul.f32 %v9328_v49, %v6846_v33  ;;  %v5123_v52 = vmul.f32 %v14745_v4, %v16290_v34 }
 0xc17   : > { %v14795_v28 = vsub.f32 %v14551_v1, %v5125_v42  ;;  %v6848_v62 = vmul.f32 0.5, %v6847_v54  ;;  %v4984_v1 = vpop.xlane.xlu1 %4983  ;;  %v14810_v42 = vsub.f32 %v14474_v20, %v5123_v52 }
 0xc18   : > { %v5124_v56 = vmul.f32 %v4984_v1, %v16290_v34  ;;  %v5892_v1 = vld [vmem:[%s12955_s17 + $0x288] sm:$0xff] }
 0xc19   : > { %16439 = vst [vmem:[#allocation140_spill] sm:$0xff] %v14795_v28  ;;  %v5349_v6 = vmul.f32 %v14795_v28, %v14795_v28  ;;  %v6849_v5 = vsub.f32 1.5, %v6848_v62  ;;  %v5347_v62 = vmul.f32 %v14810_v42, %v14810_v42 }
 0xc1a   : > { %16441 = vst [vmem:[#allocation142_spill] sm:$0xff] %v14810_v42 }
 0xc1b   : > { %v5657_v63 = vsel %vm358_vm0, %v5349_v6, 0.0  ;;  %v6850_v33 = vmul.f32 %v9328_v49, %v6849_v5  ;;  %v5781_v6 = vmul.f32 %v5611_v29, %v16290_v34  ;;  %v5651_v16 = vsel %vm358_vm0, %v5347_v62, 0.0 }
 0xc1c   : > { %v14791_v46 = vpop.xlane.xlu0 %4998  ;;  %v14821_v52 = vpop.permute.xlu2 %7604 }
 0xc1d   : > { %v6005_v20 = vadd.f32 1e-05, %v5781_v6  ;;  %16443 = vst [vmem:[#allocation144_spill] sm:$0xff] %v14821_v52 }
 0xc1f   : > { %v14834_v52 = vpop.permute.xlu1 %7594  ;;  %vm6861_vm12 = vweird.f32 %v6005_v20 }
 0xc20   : > { %16445 = vst [vmem:[#allocation146_spill] sm:$0xff] %v14834_v52 }
 0xc24   : > { %v14799_v58 = vpop.xlane.xlu0 %5631 }
 0xc25   : > { %7654 = vperm.xlu1 %9050, %v7232_v43  }
 0xc29   : > { %7664 = vperm.xlu2 %9051, %v7234_v2   ;;  %v5779_v2 = vmul.f32 %v14738_v50, %v16290_v34  ;;  %v6854_v50 = vsel %vm6853_vm8, %v9328_v49, %v6850_v33  ;;  %v14829_v49 = vpop.xlane.xlu2 %5619  ;;  %v7947_v33 = vld [vmem:[%s12791_s15 + $0x40] sm:$0xff] }
 0xc2a   : > { %v7236_v5 = vmul.f32 %v6854_v50, %v5892_v1 }
 0xc2b   : > { %v6003_v4 = vadd.f32 1e-05, %v5779_v2 }
 0xc2c   : > { %v14802_v43 = vpop.permute.xlu0 %7629 }
 0xc2d   : > { %16440 = vst [vmem:[#allocation141_spill] sm:$0xff] %v14802_v43  ;;  %9329 = vrsqrt.f32 %v6003_v4  ;;  %vm6841_vm10 = vweird.f32 %v6003_v4 }
 0xc2e   : > { %9331 = vrsqrt.f32 %v6005_v20 }
 0xc33   : > { %v9330_v2 = vpop.eup %9329 }
 0xc34   : > { %v14813_v54 = vpop.xlane.xlu0 %5007  ;;  %v9332_v6 = vpop.eup %9331  ;;  %v6836_v28 = vmul.f32 %v9330_v2, %v6003_v4  ;;  %vm6842_vm9 = vweird.f32 %v9330_v2 }
 0xc35   : > { %vm6862_vm11 = vweird.f32 %v9332_v6  ;;  %vm6843_vm5 = vmor %vm6841_vm10, %vm6842_vm9 }
 0xc36   : > { %v6837_v1 = vmul.f32 %v9330_v2, %v6836_v28  ;;  %v5617_v28 = vpop.xlane.xlu1 %5616  ;;  %vm6863_vm13 = vmor %vm6861_vm12, %vm6862_vm11 }
 0xc3c   : > { %5658 = vadd.xlane.f32.xlu0 %v5657_v63  ;;  %v14816_v63 = vsub.f32 %v14529_v59, %v5124_v56  ;;  %v14827_v56 = vpop.xlane.xlu0 %5640 }
 0xc3e   : > { %16442 = vst [vmem:[#allocation143_spill] sm:$0xff] %v14816_v63  ;;  %v5348_v29 = vmul.f32 %v14816_v63, %v14816_v63  ;;  %v6856_v63 = vmul.f32 %v9332_v6, %v6005_v20 }
 0xc40   : > { %v5654_v59 = vsel %vm358_vm0, %v5348_v29, 0.0  ;;  %v6857_v50 = vmul.f32 %v9332_v6, %v6856_v63 }
 0xc42   : > { %v6858_v29 = vmul.f32 0.5, %v6857_v50 }
 0xc44   : > { %v14832_v62 = vpop.permute.xlu0 %7644  ;;  %v6859_v39 = vsub.f32 1.5, %v6858_v29 }
 0xc45   : > { %16444 = vst [vmem:[#allocation145_spill] sm:$0xff] %v14832_v62 }
 0xc46   : > { %v6860_v62 = vmul.f32 %v9332_v6, %v6859_v39 }
 0xc48   : > { %v6864_v52 = vsel %vm6863_vm13, %v9332_v6, %v6860_v62 }
 0xc4f   : > { %5652 = vadd.xlane.f32.xlu1 %v5651_v16  ;;  %v6838_v16 = vmul.f32 0.5, %v6837_v1  ;;  %v5891_v1 = vld [vmem:[%s12955_s17 + $0x280] sm:$0xff] }
 0xc50   : > { %7674 = vperm.xlu0 %9052, %v7236_v5   ;;  %v4996_v5 = vpop.xlane.xlu2 %4995 }
 0xc51   : > { %v6839_v42 = vsub.f32 1.5, %v6838_v16  ;;  %v5783_v16 = vmul.f32 %v5617_v28, %v16290_v34 }
 0xc52   : > { %5655 = vadd.xlane.f32.xlu2 %v5654_v59  ;;  %v14836_v59 = vpop.xlane.xlu0 %5016 }
 0xc53   : > { %v6840_v14 = vmul.f32 %v9330_v2, %v6839_v42  ;;  %v5893_v42 = vld [vmem:[%s12955_s17 + $0x290] sm:$0xff] }
 0xc54   : > { %v7237_v39 = vmul.f32 %v6864_v52, %v5893_v42 }
 0xc55   : > { %v6844_v50 = vsel %vm6843_vm5, %v9330_v2, %v6840_v14  ;;  %v5128_v14 = vmul.f32 %v4996_v5, %v16290_v34 }
 0xc56   : > { %v7235_v43 = vmul.f32 %v6844_v50, %v5891_v1 }
 0xc57   : > { %v14853_v20 = vsub.f32 %v14615_v47, %v5128_v14  ;;  %v7832_v47 = vmul.f32 %v13500_v45, %v12711_v12  ;;  %v5782_v45 = vmul.f32 %v14762_v0, %v16290_v34 }
 0xc58   : > { %8093 = vperm.xlu0 %9052, %v7947_v33   ;;  %v7942_v33 = vld [vmem:[%s12791_s15 + $0x18] sm:$0xff]  ;;  %v14840_v63 = vpop.permute.xlu2 %7619 }
 0xc59   : > { %16446 = vst [vmem:[#allocation147_spill] sm:$0xff] %v14840_v63  ;;  %v4993_v63 = vpop.xlane.xlu1 %4992  ;;  %v5352_v62 = vmul.f32 %v14853_v20, %v14853_v20 }
 0xc5a   : > { %v14844_v29 = vpop.xlane.xlu0 %5649  ;;  %16448 = vst [vmem:[#allocation149_spill] sm:$0xff] %v14853_v20  ;;  %v5126_v20 = vmul.f32 %v14778_v22, %v16290_v34  ;;  %v5895_v22 = vld [vmem:[%s12955_s17 + $0x2a0] sm:$0xff] }
 0xc5b   : > { %v5666_v50 = vsel %vm358_vm0, %v5352_v62, 0.0 }
 0xc60   : > { %v14847_v4 = vpop.xlane.xlu2 %5628 }
 0xc61   : > { %v14857_v6 = vpop.permute.xlu1 %7609 }
 0xc62   : > { %16449 = vst [vmem:[#allocation150_spill] sm:$0xff] %v14857_v6 }
 0xc68   : > { %8073 = vperm.xlu1 %9050, %v7943_v36   ;;  %v6007_v36 = vadd.f32 1e-05, %v5783_v16  ;;  %v14855_v28 = vpop.xlane.xlu2 %5004 }
 0xc69   : > { %v5626_v5 = vpop.xlane.xlu1 %5625 }
 0xc6a   : > { %8068 = vperm.xlu2 %9051, %v7942_v33   ;;  %9333 = vrsqrt.f32 %v6007_v36  ;;  %v14849_v33 = vpop.permute.xlu0 %7659  ;;  %vm6881_vm15 = vweird.f32 %v6007_v36 }
 0xc6b   : > { %16447 = vst [vmem:[#allocation148_spill] sm:$0xff] %v14849_v33  ;;  %v7946_v33 = vld [vmem:[%s12791_s15 + $0x38] sm:$0xff] }
 0xc70   : > { %7669 = vperm.xlu1 %9050, %v7235_v43   ;;  %v9334_v2 = vpop.eup %9333 }
 0xc71   : > { %v6876_v52 = vmul.f32 %v9334_v2, %v6007_v36  ;;  %vm6882_vm14 = vweird.f32 %v9334_v2  ;;  %v14875_v12 = vpop.xlane.xlu1 %5001 }
 0xc72   : > { %7679 = vperm.xlu2 %9051, %v7237_v39   ;;  %v14859_v43 = vpop.xlane.xlu0 %5025  ;;  %v14866_v39 = vpop.permute.xlu2 %7634  ;;  %vm6883_vm1 = vmor %vm6881_vm15, %vm6882_vm14 }
 0xc73   : > { %v6877_v1 = vmul.f32 %v9334_v2, %v6876_v52  ;;  %16450 = vst [vmem:[#allocation151_spill] sm:$0xff] %v14866_v39 }
 0xc75   : > { %v6878_v42 = vmul.f32 0.5, %v6877_v1  ;;  %v14880_v1 = vsub.f32 %v14539_v11, %v5126_v20 }
 0xc77   : > { %v6879_v6 = vsub.f32 1.5, %v6878_v42  ;;  %16451 = vst [vmem:[#allocation152_spill] sm:$0xff] %v14880_v1  ;;  %v5350_v36 = vmul.f32 %v14880_v1, %v14880_v1 }
 0xc79   : > { %v6880_v52 = vmul.f32 %v9334_v2, %v6879_v6  ;;  %v14890_v0 = vpop.permute.xlu1 %7624 }
 0xc7a   : > { %v14872_v62 = vpop.xlane.xlu2 %5637  ;;  %16453 = vst [vmem:[#allocation154_spill] sm:$0xff] %v14890_v0 }
 0xc7b   : > { %v6884_v6 = vsel %vm6883_vm1, %v9334_v2, %v6880_v52  ;;  %v7950_v2 = vld [vmem:[%s12791_s15 + $0x58] sm:$0xff] }
 0xc7c   : > { %v7239_v42 = vmul.f32 %v6884_v6, %v5895_v22 }
 0xc82   : > { %5667 = vadd.xlane.f32.xlu0 %v5666_v50  ;;  %v5127_v50 = vmul.f32 %v4993_v63, %v16290_v34  ;;  %v6006_v63 = vadd.f32 1e-05, %v5782_v45  ;;  %v14894_v20 = vpop.xlane.xlu2 %5013 }
 0xc84   : > { %v8079_v16 = vpop.permute.xlu0 %8078  ;;  %9335 = vrsqrt.f32 %v6006_v63  ;;  %vm6871_vm4 = vweird.f32 %v6006_v63 }
 0xc85   : > { %v8616_v14 = vadd.f32 %v8079_v16, %v7832_v47  ;;  %v5784_v47 = vmul.f32 %v14829_v49, %v16290_v34  ;;  %v14886_v16 = vsub.f32 %v14597_v9, %v5127_v50  ;;  %v5660_v49 = vsel %vm358_vm0, %v5350_v36, 0.0  ;;  %v14899_v50 = vpop.xlane.xlu1 %5634 }
 0xc87   : > { %8728 = vst.msk [vmem:[%s13123_s23 + $0x28] sm:$0xff] %vm358_vm0, %v8616_v14  ;;  %v6008_v14 = vadd.f32 1e-05, %v5784_v47  ;;  %v5351_v11 = vmul.f32 %v14886_v16, %v14886_v16 }
 0xc88   : > { %16452 = vst [vmem:[#allocation153_spill] sm:$0xff] %v14886_v16 }
 0xc89   : > { %9337 = vrsqrt.f32 %v6008_v14  ;;  %v5663_v9 = vsel %vm358_vm0, %v5351_v11, 0.0  ;;  %vm6891_vm7 = vweird.f32 %v6008_v14 }
 0xc8a   : > { %v9336_v52 = vpop.eup %9335  ;;  %v14901_v47 = vpop.permute.xlu2 %7649 }
 0xc8b   : > { %16454 = vst [vmem:[#allocation155_spill] sm:$0xff] %v14901_v47  ;;  %v6866_v22 = vmul.f32 %v9336_v52, %v6006_v63  ;;  %vm6872_vm2 = vweird.f32 %v9336_v52 }
 0xc8c   : > { %vm6873_vm6 = vmor %vm6871_vm4, %vm6872_vm2 }
 0xc8d   : > { %v14903_v39 = vpop.xlane.xlu1 %5010 }
 0xc8f   : > { %v9338_v45 = vpop.eup %9337 }
 0xc90   : > { %v6886_v6 = vmul.f32 %v9338_v45, %v6008_v14  ;;  %vm6892_vm3 = vweird.f32 %v9338_v45 }
 0xc91   : > { %vm6893_vm8 = vmor %vm6891_vm7, %vm6892_vm3 }
 0xc92   : > { %v6887_v16 = vmul.f32 %v9338_v45, %v6886_v6  ;;  %v14905_v36 = vpop.xlane.xlu2 %5646 }
 0xc95   : > { %v14907_v0 = vpop.permute.xlu1 %7639 }
 0xc96   : > { %7689 = vperm.xlu0 %9052, %v7239_v42   ;;  %v6867_v42 = vmul.f32 %v9336_v52, %v6866_v22  ;;  %16455 = vst [vmem:[#allocation156_spill] sm:$0xff] %v14907_v0  ;;  %v5786_v22 = vmul.f32 %v5626_v5, %v16290_v34  ;;  %v5131_v5 = vmul.f32 %v14855_v28, %v16290_v34 }
 0xc98   : > { %v6868_v11 = vmul.f32 0.5, %v6867_v42  ;;  %v5894_v42 = vld [vmem:[%s12955_s17 + $0x298] sm:$0xff]  ;;  %v14925_v63 = vsub.f32 %v14680_v37, %v5131_v5 }
 0xc9a   : > { %5661 = vadd.xlane.f32.xlu1 %v5660_v49  ;;  %v6888_v49 = vmul.f32 0.5, %v6887_v16  ;;  %v14912_v6 = vpop.xlane.xlu2 %5022  ;;  %v6010_v16 = vadd.f32 1e-05, %v5786_v22  ;;  %16457 = vst [vmem:[#allocation158_spill] sm:$0xff] %v14925_v63  ;;  %v16458_v22 = vld [vmem:[#allocation26_spill] sm:$0xff] }
 0xc9b   : > { %5664 = vadd.xlane.f32.xlu2 %v5663_v9  ;;  %v6869_v9 = vsub.f32 1.5, %v6868_v11  ;;  %v7835_v37 = vmul.f32 %v13560_v51, %v16458_v22  ;;  %v5130_v51 = vmul.f32 %v14875_v12, %v16290_v34  ;;  %v5785_v12 = vmul.f32 %v14784_v21, %v16290_v34 }
 0xc9c   : > { %v6889_v1 = vsub.f32 1.5, %v6888_v49  ;;  %v5896_v49 = vld [vmem:[%s12955_s17 + $0x2a8] sm:$0xff]  ;;  %9339 = vrsqrt.f32 %v6010_v16  ;;  %vm6911_vm10 = vweird.f32 %v6010_v16 }
 0xc9d   : > { %v6870_v47 = vmul.f32 %v9336_v52, %v6869_v9  ;;  %v14916_v53 = vpop.xlane.xlu1 %5643 }
 0xc9e   : > { %8108 = vperm.xlu0 %9052, %v7950_v2   ;;  %v7945_v2 = vld [vmem:[%s12791_s15 + $0x30] sm:$0xff]  ;;  %v6890_v19 = vmul.f32 %v9338_v45, %v6889_v1 }
 0xc9f   : > { %v6874_v11 = vsel %vm6873_vm6, %v9336_v52, %v6870_v47 }
 0xca0   : > { %v6894_v0 = vsel %vm6893_vm8, %v9338_v45, %v6890_v19  ;;  %v7238_v9 = vmul.f32 %v6874_v11, %v5894_v42  ;;  %v5355_v45 = vmul.f32 %v14925_v63, %v14925_v63 }
 0xca1   : > { %v7240_v1 = vmul.f32 %v6894_v0, %v5896_v49 }
 0xca2   : > { %v9340_v14 = vpop.eup %9339 }
 0xca3   : > { %v6906_v0 = vmul.f32 %v9340_v14, %v6010_v16  ;;  %vm6912_vm9 = vweird.f32 %v9340_v14  ;;  %v14958_v16 = vsub.f32 %v14666_v17, %v5130_v51  ;;  %v7953_v17 = vld [vmem:[%s12791_s15 + $0x70] sm:$0xff] }
 0xca4   : > { %vm6913_vm11 = vmor %vm6911_vm10, %vm6912_vm9 }
 0xca5   : > { %v14927_v19 = vpop.xlane.xlu1 %5019  ;;  %v6907_v28 = vmul.f32 %v9340_v14, %v6906_v0 }
 0xca7   : > { %v6908_v49 = vmul.f32 0.5, %v6907_v28  ;;  %v5898_v28 = vld [vmem:[%s12955_s17 + $0x2b8] sm:$0xff] }
 0xca9   : > { %v6909_v0 = vsub.f32 1.5, %v6908_v49 }
 0xcad   : > { %v14938_v42 = vpop.permute.xlu1 %7654 }
 0xcaf   : > { %v14918_v35 = vpop.xlane.xlu0 %5658 }
 0xcb3   : > { %8088 = vperm.xlu1 %9050, %v7946_v33   ;;  %8083 = vperm.xlu2 %9051, %v7945_v2   ;;  %v14922_v33 = vpop.permute.xlu2 %7664  ;;  %v5675_v2 = vsel %vm358_vm0, %v5355_v45, 0.0 }
 0xcb4   : > { %16456 = vst [vmem:[#allocation157_spill] sm:$0xff] %v14922_v33 }
 0xcbb   : > { %7684 = vperm.xlu1 %9050, %v7238_v9   ;;  %7694 = vperm.xlu2 %9051, %v7240_v1   ;;  %v16459_v1 = vld [vmem:[#allocation31_spill] sm:$0xff] }
 0xcbc   : > { %v7830_v5 = vmul.f32 %v13437_v38, %v16459_v1  ;;  %v5129_v38 = vmul.f32 %v14791_v46, %v16290_v34 }
 0xcc2   : > { %v14929_v52 = vpop.permute.xlu0 %7674  ;;  %v14946_v45 = vpop.xlane.xlu1 %5652 }
 0xcc5   : > { %v14933_v47 = vpop.xlane.xlu2 %5655 }
 0xcc8   : > { %5676 = vadd.xlane.f32.xlu0 %v5675_v2  ;;  %v6910_v2 = vmul.f32 %v9340_v14, %v6909_v0 }
 0xcca   : > { %v8094_v11 = vpop.permute.xlu0 %8093  ;;  %v6914_v22 = vsel %vm6913_vm11, %v9340_v14, %v6910_v2  ;;  %v14963_v14 = vsub.f32 %v14602_v60, %v5129_v38 }
 0xccb   : > { %v8619_v9 = vadd.f32 %v8094_v11, %v7835_v37  ;;  %v7242_v49 = vmul.f32 %v6914_v22, %v5898_v28 }
 0xccc   : > { %v5353_v1 = vmul.f32 %v14963_v14, %v14963_v14 }
 0xccd   : > { %8731 = vst.msk [vmem:[%s13123_s23 + $0x40] sm:$0xff] %vm358_vm0, %v8619_v9  ;;  %v8069_v63 = vpop.permute.xlu2 %8068 }
 0xcce   : > { %v8614_v33 = vadd.f32 %v8069_v63, %v7830_v5  ;;  %v16460_v63 = vld [vmem:[#allocation66_spill] sm:$0xff]  ;;  %v5669_v60 = vsel %vm358_vm0, %v5353_v1, 0.0 }
 0xccf   : > { %v7831_v37 = vmul.f32 %v13444_v26, %v16460_v63  ;;  %v5354_v26 = vmul.f32 %v14958_v16, %v14958_v16 }
 0xcd0   : > { %8726 = vst.msk [vmem:[%s13123_s23 + $0x18] sm:$0xff] %vm358_vm0, %v8614_v33  ;;  %v5787_v33 = vmul.f32 %v14847_v4, %v16290_v34  ;;  %v6009_v4 = vadd.f32 1e-05, %v5785_v12  ;;  %v7949_v12 = vld [vmem:[%s12791_s15 + $0x50] sm:$0xff] }
 0xcd1   : > { %v5672_v5 = vsel %vm358_vm0, %v5354_v26, 0.0 }
 0xcd2   : > { %v6011_v46 = vadd.f32 1e-05, %v5787_v33  ;;  %v5789_v33 = vmul.f32 %v14899_v50, %v16290_v34  ;;  %vm6901_vm15 = vweird.f32 %v6009_v4  ;;  %v5134_v50 = vmul.f32 %v14894_v20, %v16290_v34 }
 0xcd4   : > { %9341 = vrsqrt.f32 %v6011_v46  ;;  %v6013_v26 = vadd.f32 1e-05, %v5789_v33  ;;  %vm6921_vm13 = vweird.f32 %v6011_v46 }
 0xcd5   : > { %9343 = vrsqrt.f32 %v6009_v4 }
 0xcd6   : > { %9345 = vrsqrt.f32 %v6013_v26  ;;  %vm6941_vm3 = vweird.f32 %v6013_v26 }
 0xcda   : > { %v8074_v11 = vpop.permute.xlu1 %8073  ;;  %v9342_v21 = vpop.eup %9341 }
 0xcdb   : > { %v8615_v9 = vadd.f32 %v8074_v11, %v7831_v37  ;;  %v9344_v0 = vpop.eup %9343  ;;  %v6916_v2 = vmul.f32 %v9342_v21, %v6011_v46  ;;  %vm6922_vm5 = vweird.f32 %v9342_v21  ;;  %v14985_v46 = vsub.f32 %v14729_v13, %v5134_v50 }
 0xcdc   : > { %7704 = vperm.xlu0 %9052, %v7242_v49   ;;  %v6896_v51 = vmul.f32 %v9344_v0, %v6009_v4  ;;  %v7948_v49 = vld [vmem:[%s12791_s15 + $0x48] sm:$0xff]  ;;  %vm6902_vm12 = vweird.f32 %v9344_v0  ;;  %vm6923_vm14 = vmor %vm6921_vm13, %vm6922_vm5  ;;  %v14987_v4 = vpop.permute.xlu2 %7679 }
 0xcdd   : > { %8727 = vst.msk [vmem:[%s13123_s23 + $0x20] sm:$0xff] %vm358_vm0, %v8615_v9  ;;  %v6917_v28 = vmul.f32 %v9342_v21, %v6916_v2  ;;  %vm6903_vm1 = vmor %vm6901_vm15, %vm6902_vm12  ;;  %v5897_v2 = vld [vmem:[%s12955_s17 + $0x2b0] sm:$0xff] }
 0xcde   : > { %v6897_v22 = vmul.f32 %v9344_v0, %v6896_v51 }
 0xcdf   : > { %v6918_v38 = vmul.f32 0.5, %v6917_v28 }
 0xce0   : > { %v6898_v63 = vmul.f32 0.5, %v6897_v22 }
 0xce1   : > { %v6919_v37 = vsub.f32 1.5, %v6918_v38  ;;  %v9346_v38 = vpop.eup %9345 }
 0xce2   : > { %v6899_v11 = vsub.f32 1.5, %v6898_v63  ;;  %v6936_v63 = vmul.f32 %v9346_v38, %v6013_v26  ;;  %v15002_v50 = vpop.permute.xlu1 %7669  ;;  %vm6942_vm2 = vweird.f32 %v9346_v38 }
 0xce3   : > { %v6920_v9 = vmul.f32 %v9342_v21, %v6919_v37  ;;  %v5358_v37 = vmul.f32 %v14985_v46, %v14985_v46  ;;  %vm6943_vm4 = vmor %vm6941_vm3, %vm6942_vm2 }
 0xce4   : > { %5673 = vadd.xlane.f32.xlu2 %v5672_v5  ;;  %8123 = vperm.xlu0 %9052, %v7953_v17   ;;  %v6900_v1 = vmul.f32 %v9344_v0, %v6899_v11  ;;  %v5899_v17 = vld [vmem:[%s12955_s17 + $0x2c0] sm:$0xff]  ;;  %v6937_v20 = vmul.f32 %v9346_v38, %v6936_v63  ;;  %v16461_v11 = vld [vmem:[#allocation69_spill] sm:$0xff] }
 0xce5   : > { %5670 = vadd.xlane.f32.xlu1 %v5669_v60  ;;  %v6924_v5 = vsel %vm6923_vm14, %v9342_v21, %v6920_v9  ;;  %v7838_v13 = vmul.f32 %v13632_v40, %v16461_v11  ;;  %v16463_v11 = vld [vmem:[#allocation24_spill] sm:$0xff] }
 0xce6   : > { %v6904_v51 = vsel %vm6903_vm1, %v9344_v0, %v6900_v1  ;;  %v7243_v28 = vmul.f32 %v6924_v5, %v5899_v17  ;;  %v5684_v0 = vsel %vm358_vm0, %v5358_v37, 0.0  ;;  %v6938_v9 = vmul.f32 0.5, %v6937_v20  ;;  %v16462_v1 = vld [vmem:[#allocation57_spill] sm:$0xff] }
 0xce7   : > { %v7241_v22 = vmul.f32 %v6904_v51, %v5897_v2  ;;  %v7833_v17 = vmul.f32 %v13495_v61, %v16462_v1  ;;  %v5133_v61 = vmul.f32 %v14903_v39, %v16290_v34  ;;  %v5132_v20 = vmul.f32 %v14813_v54, %v16290_v34  ;;  %v7956_v1 = vld [vmem:[%s12791_s15 + $0x88] sm:$0xff] }
 0xce8   : > { %v6939_v5 = vsub.f32 1.5, %v6938_v9  ;;  %v7834_v26 = vmul.f32 %v13498_v48, %v16463_v11 }
 0xce9   : > { %v15023_v39 = vsub.f32 %v14657_v41, %v5132_v20 }
 0xcf5   : > { %v14979_v60 = vpop.xlane.xlu0 %5667 }
 0xcfc   : > { %8098 = vperm.xlu2 %9051, %v7948_v49  }
 0xcfe   : > { %8103 = vperm.xlu1 %9050, %v7949_v12  }
 0xd04   : > { %7709 = vperm.xlu2 %9051, %v7243_v28   ;;  %v6940_v28 = vmul.f32 %v9346_v38, %v6939_v5 }
 0xd06   : > { %7699 = vperm.xlu1 %9050, %v7241_v22   ;;  %v5901_v22 = vld [vmem:[%s12955_s17 + $0x2d0] sm:$0xff]  ;;  %v6944_v63 = vsel %vm6943_vm4, %v9346_v38, %v6940_v28  ;;  %v5788_v38 = vmul.f32 %v14799_v58, %v16290_v34 }
 0xd07   : > { %v7245_v37 = vmul.f32 %v6944_v63, %v5901_v22  ;;  %v5792_v63 = vmul.f32 %v14916_v53, %v16290_v34 }
 0xd08   : > { %v14989_v21 = vpop.permute.xlu0 %7689  ;;  %v6012_v48 = vadd.f32 1e-05, %v5788_v38  ;;  %v5137_v38 = vmul.f32 %v14912_v6, %v16290_v34 }
 0xd09   : > { %v6016_v20 = vadd.f32 1e-05, %v5792_v63 }
 0xd0a   : > { %vm6931_vm10 = vweird.f32 %v6012_v48 }
 0xd0b   : > { %vm6971_vm12 = vweird.f32 %v6016_v20 }
 0xd0d   : > { %v15006_v40 = vpop.xlane.xlu1 %5661 }
 0xd0e   : > { %v14994_v33 = vpop.xlane.xlu2 %5664  ;;  %5685 = vadd.xlane.f32.xlu0 %v5684_v0  ;;  %v5790_v0 = vmul.f32 %v14872_v62, %v16290_v34 }
 0xd10   : > { %v8109_v49 = vpop.permute.xlu0 %8108 }
 0xd11   : > { %v8622_v12 = vadd.f32 %v8109_v49, %v7838_v13  ;;  %v15018_v13 = vsub.f32 %v14719_v57, %v5133_v61  ;;  %v5356_v57 = vmul.f32 %v15023_v39, %v15023_v39 }
 0xd13   : > { %8734 = vst.msk [vmem:[%s13123_s23 + $0x58] sm:$0xff] %vm358_vm0, %v8622_v12  ;;  %v6014_v12 = vadd.f32 1e-05, %v5790_v0  ;;  %v5357_v54 = vmul.f32 %v15018_v13, %v15018_v13  ;;  %v5678_v41 = vsel %vm358_vm0, %v5356_v57, 0.0  ;;  %v7951_v0 = vld [vmem:[%s12791_s15 + $0x60] sm:$0xff]  ;;  %v15044_v57 = vsub.f32 %v14771_v32, %v5137_v38  ;;  %v16465_v38 = vld [vmem:[#allocation64_spill] sm:$0xff] }
 0xd15   : > { %9347 = vrsqrt.f32 %v6014_v12  ;;  %v5681_v62 = vsel %vm358_vm0, %v5357_v54, 0.0  ;;  %vm6951_vm7 = vweird.f32 %v6014_v12 }
 0xd16   : > { %v8084_v2 = vpop.permute.xlu2 %8083  ;;  %9349 = vrsqrt.f32 %v6012_v48 }
 0xd17   : > { %v8617_v51 = vadd.f32 %v8084_v2, %v7833_v17  ;;  %9351 = vrsqrt.f32 %v6016_v20 }
 0xd19   : > { %8729 = vst.msk [vmem:[%s13123_s23 + $0x30] sm:$0xff] %vm358_vm0, %v8617_v51 }
 0xd1b   : > { %v9348_v58 = vpop.eup %9347 }
 0xd1c   : > { %v6946_v17 = vmul.f32 %v9348_v58, %v6014_v12  ;;  %v9350_v5 = vpop.eup %9349  ;;  %vm6952_vm6 = vweird.f32 %v9348_v58 }
 0xd1d   : > { %v6926_v2 = vmul.f32 %v9350_v5, %v6012_v48  ;;  %vm6953_vm8 = vmor %vm6951_vm7, %vm6952_vm6  ;;  %vm6932_vm9 = vweird.f32 %v9350_v5 }
 0xd1e   : > { %v6947_v51 = vmul.f32 %v9348_v58, %v6946_v17  ;;  %vm6933_vm11 = vmor %vm6931_vm10, %vm6932_vm9  ;;  %v15049_v6 = vpop.permute.xlu2 %7694 }
 0xd1f   : > { %v6927_v28 = vmul.f32 %v9350_v5, %v6926_v2 }
 0xd20   : > { %v6948_v22 = vmul.f32 0.5, %v6947_v51 }
 0xd21   : > { %v6928_v61 = vmul.f32 0.5, %v6927_v28 }
 0xd22   : > { %7719 = vperm.xlu0 %9052, %v7245_v37   ;;  %v6949_v37 = vsub.f32 1.5, %v6948_v22  ;;  %v16464_v22 = vld [vmem:[#allocation29_spill] sm:$0xff] }
 0xd23   : > { %v6929_v11 = vsub.f32 1.5, %v6928_v61  ;;  %v7841_v63 = vmul.f32 %v13702_v55, %v16464_v22  ;;  %v7959_v22 = vld [vmem:[%s12791_s15 + $0xa0] sm:$0xff] }
 0xd25   : > { %v8089_v49 = vpop.permute.xlu1 %8088  ;;  %v6930_v53 = vmul.f32 %v9350_v5, %v6929_v11 }
 0xd26   : > { %v8618_v9 = vadd.f32 %v8089_v49, %v7834_v26  ;;  %v6950_v26 = vmul.f32 %v9348_v58, %v6949_v37 }
 0xd27   : > { %v6934_v17 = vsel %vm6933_vm11, %v9350_v5, %v6930_v53  ;;  %v5795_v5 = vmul.f32 %v14946_v45, %v16290_v34  ;;  %v7836_v53 = vmul.f32 %v13558_v3, %v16465_v38  ;;  %v5136_v3 = vmul.f32 %v14927_v19, %v16290_v34 }
 0xd28   : > { %8730 = vst.msk [vmem:[%s13123_s23 + $0x38] sm:$0xff] %vm358_vm0, %v8618_v9  ;;  %v7952_v9 = vld [vmem:[%s12791_s15 + $0x68] sm:$0xff]  ;;  %v6954_v54 = vsel %vm6953_vm8, %v9348_v58, %v6950_v26  ;;  %v5361_v58 = vmul.f32 %v15044_v57, %v15044_v57 }
 0xd29   : > { %v6019_v26 = vadd.f32 1e-05, %v5795_v5 }
 0xd2a   : > { %8138 = vperm.xlu0 %9052, %v7956_v1   ;;  %v5902_v1 = vld [vmem:[%s12955_s17 + $0x2d8] sm:$0xff]  ;;  %v5693_v32 = vsel %vm358_vm0, %v5361_v58, 0.0 }
 0xd2b   : > { %v7246_v12 = vmul.f32 %v6954_v54, %v5902_v1  ;;  %9353 = vrsqrt.f32 %v6019_v26  ;;  %vm7001_vm15 = vweird.f32 %v6019_v26 }
 0xd2d   : > { %5682 = vadd.xlane.f32.xlu2 %v5681_v62  ;;  %v9352_v62 = vpop.eup %9351  ;;  %v15064_v45 = vpop.permute.xlu1 %7684 }
 0xd2e   : > { %v6966_v51 = vmul.f32 %v9352_v62, %v6016_v20  ;;  %vm6972_vm5 = vweird.f32 %v9352_v62  ;;  %v5135_v20 = vmul.f32 %v14836_v59, %v16290_v34 }
 0xd2f   : > { %vm6973_vm13 = vmor %vm6971_vm12, %vm6972_vm5 }
 0xd30   : > { %5679 = vadd.xlane.f32.xlu1 %v5678_v41  ;;  %v5900_v41 = vld [vmem:[%s12955_s17 + $0x2c8] sm:$0xff]  ;;  %v6967_v48 = vmul.f32 %v9352_v62, %v6966_v51 }
 0xd31   : > { %v7244_v28 = vmul.f32 %v6934_v17, %v5900_v41  ;;  %v9354_v17 = vpop.eup %9353 }
 0xd32   : > { %v6968_v37 = vmul.f32 0.5, %v6967_v48  ;;  %vm7002_vm14 = vweird.f32 %v9354_v17 }
 0xd33   : > { %vm7003_vm1 = vmor %vm7001_vm15, %vm7002_vm14 }
 0xd3b   : > { %v15037_v49 = vpop.xlane.xlu0 %5676 }
 0xd45   : > { %8113 = vperm.xlu2 %9051, %v7951_v0  }
 0xd49   : > { %8118 = vperm.xlu1 %9050, %v7952_v9   ;;  %v6969_v9 = vsub.f32 1.5, %v6968_v37 }
 0xd4b   : > { %v6970_v1 = vmul.f32 %v9352_v62, %v6969_v9  ;;  %v15086_v9 = vsub.f32 %v14702_v30, %v5135_v20 }
 0xd4d   : > { %7724 = vperm.xlu2 %9051, %v7246_v12   ;;  %v5904_v12 = vld [vmem:[%s12955_s17 + $0x2e8] sm:$0xff]  ;;  %v6974_v41 = vsel %vm6973_vm13, %v9352_v62, %v6970_v1  ;;  %v5798_v62 = vmul.f32 %v15006_v40, %v16290_v34 }
 0xd4e   : > { %v15047_v2 = vpop.permute.xlu0 %7704  ;;  %v7248_v51 = vmul.f32 %v6974_v41, %v5904_v12 }
 0xd4f   : > { %v6022_v59 = vadd.f32 1e-05, %v5798_v62  ;;  %v7965_v62 = vld [vmem:[%s12791_s15 + $0xd0] sm:$0xff] }
 0xd51   : > { %7714 = vperm.xlu1 %9050, %v7244_v28   ;;  %v6996_v28 = vmul.f32 %v9354_v17, %v6019_v26  ;;  %9355 = vrsqrt.f32 %v6022_v59  ;;  %vm7031_vm3 = vweird.f32 %v6022_v59 }
 0xd53   : > { %v6997_v48 = vmul.f32 %v9354_v17, %v6996_v28 }
 0xd54   : > { %5694 = vadd.xlane.f32.xlu0 %v5693_v32  ;;  %v15072_v32 = vsub.f32 %v14766_v8, %v5136_v3  ;;  %v5791_v8 = vmul.f32 %v14827_v56, %v16290_v34  ;;  %v5359_v56 = vmul.f32 %v15086_v9, %v15086_v9 }
 0xd56   : > { %v8124_v61 = vpop.permute.xlu0 %8123  ;;  %v6015_v1 = vadd.f32 1e-05, %v5791_v8  ;;  %v7954_v8 = vld [vmem:[%s12791_s15 + $0x78] sm:$0xff] }
 0xd57   : > { %v8625_v0 = vadd.f32 %v8124_v61, %v7841_v63  ;;  %v15058_v11 = vpop.xlane.xlu2 %5673  ;;  %v16466_v63 = vld [vmem:[#allocation34_spill] sm:$0xff]  ;;  %v6998_v61 = vmul.f32 0.5, %v6997_v48  ;;  %v9356_v41 = vpop.eup %9355 }
 0xd58   : > { %v5671_v58 = vpop.xlane.xlu1 %5670  ;;  %v7837_v5 = vmul.f32 %v13562_v31, %v16466_v63  ;;  %v5793_v31 = vmul.f32 %v14905_v36, %v16290_v34  ;;  %9357 = vrsqrt.f32 %v6015_v1  ;;  %v5687_v36 = vsel %vm358_vm0, %v5359_v56, 0.0 }
 0xd59   : > { %8737 = vst.msk [vmem:[%s13123_s23 + $0x70] sm:$0xff] %vm358_vm0, %v8625_v0  ;;  %v5360_v0 = vmul.f32 %v15072_v32, %v15072_v32  ;;  %v6999_v38 = vsub.f32 1.5, %v6998_v61  ;;  %v7026_v28 = vmul.f32 %v9356_v41, %v6022_v59  ;;  %v5801_v63 = vmul.f32 %v5671_v58, %v16290_v34 }
 0xd5a   : > { %v15096_v30 = vadd.f32 1e-05, %v5793_v31  ;;  %vm7032_vm2 = vweird.f32 %v9356_v41  ;;  %vm6961_vm7 = vweird.f32 %v6015_v1 }
 0xd5b   : > { %v5690_v40 = vsel %vm358_vm0, %v5360_v0, 0.0  ;;  %v7027_v26 = vmul.f32 %v9356_v41, %v7026_v28  ;;  %vm7033_vm4 = vmor %vm7031_vm3, %vm7032_vm2 }
 0xd5c   : > { %9359 = vrsqrt.f32 %v15096_v30  ;;  %vm6981_vm10 = vweird.f32 %v15096_v30 }
 0xd5d   : > { %v7028_v61 = vmul.f32 0.5, %v7027_v26 }
 0xd5e   : > { %v9358_v3 = vpop.eup %9357 }
 0xd5f   : > { %v8099_v55 = vpop.permute.xlu2 %8098  ;;  %v7029_v0 = vsub.f32 1.5, %v7028_v61  ;;  %vm6962_vm6 = vweird.f32 %v9358_v3  ;;  %v5905_v61 = vld [vmem:[%s12955_s17 + $0x2f0] sm:$0xff] }
 0xd60   : > { %v8620_v54 = vadd.f32 %v8099_v55, %v7836_v53  ;;  %v7962_v53 = vld [vmem:[%s12791_s15 + $0xb8] sm:$0xff]  ;;  %v7000_v55 = vmul.f32 %v9354_v17, %v6999_v38  ;;  %v5796_v38 = vmul.f32 %v14933_v47, %v16290_v34  ;;  %vm6963_vm9 = vmor %vm6961_vm7, %vm6962_vm6 }
 0xd61   : > { %v7030_v56 = vmul.f32 %v9356_v41, %v7029_v0  ;;  %v16467_v0 = vld [vmem:[#allocation72_spill] sm:$0xff] }
 0xd62   : > { %8732 = vst.msk [vmem:[%s13123_s23 + $0x48] sm:$0xff] %vm358_vm0, %v8620_v54  ;;  %v5907_v54 = vld [vmem:[%s12955_s17 + $0x300] sm:$0xff]  ;;  %v7004_v12 = vsel %vm7003_vm1, %v9354_v17, %v7000_v55  ;;  %v9360_v48 = vpop.eup %9359  ;;  %v15113_v55 = vadd.f32 1e-05, %v5796_v38 }
 0xd63   : > { %v6976_v20 = vmul.f32 %v9360_v48, %v15096_v30  ;;  %v7034_v28 = vsel %vm7033_vm4, %v9356_v41, %v7030_v56  ;;  %vm6982_vm8 = vweird.f32 %v9360_v48  ;;  %v5903_v41 = vld [vmem:[%s12955_s17 + $0x2e0] sm:$0xff] }
 0xd64   : > { %vm6983_vm11 = vmor %vm6981_vm10, %vm6982_vm8  ;;  %v7971_v56 = vld [vmem:[%s12791_s15 + $0x100] sm:$0xff]  ;;  %vm7011_vm15 = vweird.f32 %v15113_v55 }
 0xd65   : > { %v6977_v17 = vmul.f32 %v9360_v48, %v6976_v20 }
 0xd68   : > { %7734 = vperm.xlu0 %9052, %v7248_v51   ;;  %v7251_v51 = vmul.f32 %v7004_v12, %v5907_v54  ;;  %v7955_v54 = vld [vmem:[%s12791_s15 + $0x80] sm:$0xff]  ;;  %v7957_v12 = vld [vmem:[%s12791_s15 + $0x90] sm:$0xff] }
 0xd70   : > { %v8104_v37 = vpop.permute.xlu1 %8103  ;;  %8153 = vperm.xlu0 %9052, %v7959_v22   ;;  %v6956_v22 = vmul.f32 %v9358_v3, %v6015_v1 }
 0xd71   : > { %v8621_v19 = vadd.f32 %v8104_v37, %v7837_v5  ;;  %v15104_v37 = vadd.f32 1e-05, %v5801_v63 }
 0xd72   : > { %v6957_v5 = vmul.f32 %v9358_v3, %v6956_v22 }
 0xd73   : > { %8733 = vst.msk [vmem:[%s13123_s23 + $0x50] sm:$0xff] %vm358_vm0, %v8621_v19  ;;  %9361 = vrsqrt.f32 %v15104_v37  ;;  %vm7061_vm12 = vweird.f32 %v15104_v37 }
 0xd74   : > { %v6958_v19 = vmul.f32 0.5, %v6957_v5  ;;  %9363 = vrsqrt.f32 %v15113_v55  ;;  %v15127_v5 = vpop.permute.xlu2 %7709 }
 0xd76   : > { %5691 = vadd.xlane.f32.xlu2 %v5690_v40  ;;  %v6978_v40 = vmul.f32 0.5, %v6977_v17  ;;  %v6959_v58 = vsub.f32 1.5, %v6958_v19 }
 0xd78   : > { %8168 = vperm.xlu0 %9052, %v7962_v53   ;;  %v7968_v53 = vld [vmem:[%s12791_s15 + $0xe8] sm:$0xff]  ;;  %v6960_v47 = vmul.f32 %v9358_v3, %v6959_v58  ;;  %v15133_v38 = vpop.permute.xlu1 %7699 }
 0xd79   : > { %v15118_v22 = vpop.eup %9361 }
 0xd7a   : > { %v6964_v63 = vsel %vm6963_vm9, %v9358_v3, %v6960_v47  ;;  %v9364_v17 = vpop.eup %9363  ;;  %vm7062_vm5 = vweird.f32 %v15118_v22 }
 0xd7b   : > { %5688 = vadd.xlane.f32.xlu1 %v5687_v36  ;;  %v6979_v36 = vsub.f32 1.5, %v6978_v40  ;;  %v7247_v19 = vmul.f32 %v6964_v63, %v5903_v41  ;;  %v16468_v63 = vld [vmem:[#allocation59_spill] sm:$0xff]  ;;  %vm7063_vm13 = vmor %vm7061_vm12, %vm7062_vm5  ;;  %vm7012_vm14 = vweird.f32 %v9364_v17 }
 0xd7c   : > { %vm7013_vm1 = vmor %vm7011_vm15, %vm7012_vm14 }
 0xd7d   : > { %v6980_v20 = vmul.f32 %v9360_v48, %v6979_v36 }
 0xd7f   : > { %v6984_v1 = vsel %vm6983_vm11, %v9360_v48, %v6980_v20 }
 0xd80   : > { %7749 = vperm.xlu0 %9052, %v7251_v51   ;;  %v5910_v51 = vld [vmem:[%s12955_s17 + $0x318] sm:$0xff]  ;;  %v7249_v40 = vmul.f32 %v6984_v1, %v5905_v61  ;;  %v7839_v61 = vmul.f32 %v13628_v7, %v16468_v63 }
 0xd81   : > { %v15109_v31 = vpop.xlane.xlu0 %5685  ;;  %v7254_v59 = vmul.f32 %v7034_v28, %v5910_v51  ;;  %v7960_v51 = vld [vmem:[%s12791_s15 + $0xa8] sm:$0xff]  ;;  %v5799_v28 = vmul.f32 %v14994_v33, %v16290_v34  ;;  %v7966_v63 = vld [vmem:[%s12791_s15 + $0xd8] sm:$0xff] }
 0xd88   : > { %8183 = vperm.xlu0 %9052, %v7965_v62   ;;  %v7056_v62 = vmul.f32 %v15118_v22, %v15104_v37 }
 0xd8a   : > { %v7057_v30 = vmul.f32 %v15118_v22, %v7056_v62  ;;  %v7974_v62 = vld [vmem:[%s12791_s15 + $0x118] sm:$0xff] }
 0xd8c   : > { %v7058_v48 = vmul.f32 0.5, %v7057_v30  ;;  %v7963_v30 = vld [vmem:[%s12791_s15 + $0xc0] sm:$0xff] }
 0xd8e   : > { %8128 = vperm.xlu2 %9051, %v7954_v8   ;;  %v7844_v8 = vmul.f32 %v13763_v23, %v16467_v0  ;;  %v7059_v47 = vsub.f32 1.5, %v7058_v48 }
 0xd90   : > { %8198 = vperm.xlu0 %9052, %v7968_v53   ;;  %v7006_v53 = vmul.f32 %v9364_v17, %v15113_v55  ;;  %v7060_v1 = vmul.f32 %v15118_v22, %v7059_v47 }
 0xd92   : > { %v7007_v23 = vmul.f32 %v9364_v17, %v7006_v53  ;;  %v7064_v7 = vsel %vm7063_vm13, %v15118_v22, %v7060_v1  ;;  %v5794_v1 = vmul.f32 %v14844_v29, %v16290_v34 }
 0xd94   : > { %8133 = vperm.xlu1 %9050, %v7955_v54   ;;  %v15121_v26 = vpop.permute.xlu0 %7719  ;;  %v7958_v54 = vld [vmem:[%s12791_s15 + $0x98] sm:$0xff] }
 0xd96   : > { %8143 = vperm.xlu2 %9051, %v7957_v12  }
 0xd98   : > { %7764 = vperm.xlu0 %9052, %v7254_v59   ;;  %v7008_v59 = vmul.f32 0.5, %v7007_v23 }
 0xd9a   : > { %v7009_v0 = vsub.f32 1.5, %v7008_v59 }
 0xd9c   : > { %7729 = vperm.xlu1 %9050, %v7247_v19   ;;  %v8139_v3 = vpop.permute.xlu0 %8138  ;;  %v15151_v19 = vadd.f32 1e-05, %v5799_v28 }
 0xd9d   : > { %v8628_v58 = vadd.f32 %v8139_v3, %v7844_v8  ;;  %v5913_v3 = vld [vmem:[%s12955_s17 + $0x330] sm:$0xff] }
 0xd9e   : > { %7739 = vperm.xlu2 %9051, %v7249_v40   ;;  %v7010_v40 = vmul.f32 %v9364_v17, %v7009_v0  ;;  %v7980_v0 = vld [vmem:[%s12791_s15 + $0x148] sm:$0xff]  ;;  %vm7041_vm7 = vweird.f32 %v15151_v19 }
 0xd9f   : > { %8740 = vst.msk [vmem:[%s13123_s23 + $0x88] sm:$0xff] %vm358_vm0, %v8628_v58  ;;  %v7257_v58 = vmul.f32 %v7064_v7, %v5913_v3  ;;  %v5138_v3 = vmul.f32 %v14859_v43, %v16290_v34  ;;  %v7969_v7 = vld [vmem:[%s12791_s15 + $0xf0] sm:$0xff]  ;;  %v5911_v43 = vld [vmem:[%s12955_s17 + $0x320] sm:$0xff] }
 0xda0   : > { %v15139_v36 = vpop.xlane.xlu2 %5682  ;;  %8213 = vperm.xlu0 %9052, %v7971_v56   ;;  %v5908_v56 = vld [vmem:[%s12955_s17 + $0x308] sm:$0xff]  ;;  %v7014_v48 = vsel %vm7013_vm1, %v9364_v17, %v7010_v40  ;;  %v5802_v17 = vmul.f32 %v15058_v11, %v16290_v34 }
 0xda1   : > { %v7252_v22 = vmul.f32 %v7014_v48, %v5908_v56  ;;  %v5916_v40 = vld [vmem:[%s12955_s17 + $0x348] sm:$0xff] }
 0xda3   : > { %v5680_v12 = vpop.xlane.xlu1 %5679 }
 0xda4   : > { %v5804_v20 = vmul.f32 %v5680_v12, %v16290_v34  ;;  %8148 = vperm.xlu1 %9050, %v7958_v54   ;;  %v7977_v12 = vld [vmem:[%s12791_s15 + $0x130] sm:$0xff] }
 0xda6   : > { %v6028_v41 = vadd.f32 1e-05, %v5804_v20  ;;  %8158 = vperm.xlu2 %9051, %v7960_v51   ;;  %v16469_v20 = vld [vmem:[#allocation27_spill] sm:$0xff] }
 0xda7   : > { %v7840_v55 = vmul.f32 %v13630_v44, %v16469_v20  ;;  %v6026_v44 = vadd.f32 1e-05, %v5802_v17 }
 0xda8   : > { %9365 = vrsqrt.f32 %v6028_v41  ;;  %v8114_v33 = vpop.permute.xlu2 %8113  ;;  %8228 = vperm.xlu0 %9052, %v7974_v62   ;;  %vm7091_vm3 = vweird.f32 %v6028_v41 }
 0xda9   : > { %v8623_v8 = vadd.f32 %v8114_v33, %v7839_v61  ;;  %9367 = vrsqrt.f32 %v15151_v19  ;;  %vm7071_vm11 = vweird.f32 %v6026_v44 }
 0xdaa   : > { %9369 = vrsqrt.f32 %v6026_v44 }
 0xdab   : > { %8735 = vst.msk [vmem:[%s13123_s23 + $0x60] sm:$0xff] %vm358_vm0, %v8623_v8 }
 0xdae   : > { %v9366_v53 = vpop.eup %9365  ;;  %8173 = vperm.xlu2 %9051, %v7963_v30   ;;  %v6018_v30 = vadd.f32 1e-05, %v5794_v1 }
 0xdaf   : > { %v7086_v37 = vmul.f32 %v9366_v53, %v6028_v41  ;;  %v9368_v23 = vpop.eup %9367  ;;  %vm7092_vm2 = vweird.f32 %v9366_v53 }
 0xdb0   : > { %7779 = vperm.xlu0 %9052, %v7257_v58   ;;  %v7036_v47 = vmul.f32 %v9368_v23, %v15151_v19  ;;  %vm7093_vm4 = vmor %vm7091_vm3, %vm7092_vm2  ;;  %9371 = vrsqrt.f32 %v6018_v30  ;;  %v15179_v58 = vsub.f32 %v14743_v18, %v5138_v3  ;;  %vm7042_vm6 = vweird.f32 %v9368_v23  ;;  %v9370_v48 = vpop.eup %9369  ;;  %v7975_v3 = vld [vmem:[%s12791_s15 + $0x120] sm:$0xff] }
 0xdb1   : > { %v7087_v54 = vmul.f32 %v9366_v53, %v7086_v37  ;;  %vm7043_vm8 = vmor %vm7041_vm7, %vm7042_vm6  ;;  %vm7072_vm9 = vweird.f32 %v9370_v48  ;;  %vm6991_vm5 = vweird.f32 %v6018_v30 }
 0xdb2   : > { %v7037_v28 = vmul.f32 %v9368_v23, %v7036_v47  ;;  %vm7073_vm12 = vmor %vm7071_vm11, %vm7072_vm9 }
 0xdb3   : > { %v7088_v51 = vmul.f32 0.5, %v7087_v54 }
 0xdb4   : > { %v7038_v33 = vmul.f32 0.5, %v7037_v28 }
 0xdb5   : > { %v7089_v59 = vsub.f32 1.5, %v7088_v51 }
 0xdb6   : > { %7754 = vperm.xlu2 %9051, %v7252_v22   ;;  %v7039_v11 = vsub.f32 1.5, %v7038_v33  ;;  %v9372_v54 = vpop.eup %9371  ;;  %v7066_v22 = vmul.f32 %v9370_v48, %v6026_v44 }
 0xdb7   : > { %v7090_v8 = vmul.f32 %v9366_v53, %v7089_v59  ;;  %v6986_v51 = vmul.f32 %v9372_v54, %v6018_v30  ;;  %v5797_v59 = vmul.f32 %v14918_v35, %v16290_v34  ;;  %vm6992_vm10 = vweird.f32 %v9372_v54 }
 0xdb8   : > { %8243 = vperm.xlu0 %9052, %v7977_v12   ;;  %v7040_v37 = vmul.f32 %v9368_v23, %v7039_v11  ;;  %v7983_v12 = vld [vmem:[%s12791_s15 + $0x160] sm:$0xff]  ;;  %v7067_v19 = vmul.f32 %v9370_v48, %v7066_v22  ;;  %v16470_v11 = vld [vmem:[#allocation32_spill] sm:$0xff]  ;;  %vm6993_vm13 = vmor %vm6991_vm5, %vm6992_vm10 }
 0xdb9   : > { %v7094_v29 = vsel %vm7093_vm4, %v9366_v53, %v7090_v8  ;;  %v5362_v53 = vmul.f32 %v15179_v58, %v15179_v58  ;;  %v6987_v28 = vmul.f32 %v9372_v54, %v6986_v51  ;;  %v15197_v1 = vadd.f32 1e-05, %v5797_v59  ;;  %v7978_v59 = vld [vmem:[%s12791_s15 + $0x138] sm:$0xff] }
 0xdba   : > { %v7260_v56 = vmul.f32 %v7094_v29, %v5916_v40  ;;  %v7044_v41 = vsel %vm7043_vm8, %v9368_v23, %v7040_v37  ;;  %v7972_v23 = vld [vmem:[%s12791_s15 + $0x108] sm:$0xff]  ;;  %v15206_v40 = vpop.permute.xlu2 %7724  ;;  %v5914_v29 = vld [vmem:[%s12955_s17 + $0x338] sm:$0xff] }
 0xdbb   : > { %v8119_v62 = vpop.permute.xlu1 %8118  ;;  %v7255_v18 = vmul.f32 %v7044_v41, %v5911_v43  ;;  %v5696_v47 = vsel %vm358_vm0, %v5362_v53, 0.0  ;;  %v6988_v17 = vmul.f32 0.5, %v6987_v28  ;;  %v5906_v41 = vld [vmem:[%s12955_s17 + $0x2f8] sm:$0xff]  ;;  %vm7021_vm2 = vweird.f32 %v15197_v1 }
 0xdbc   : > { %v8624_v61 = vadd.f32 %v8119_v62, %v7840_v55  ;;  %v5805_v55 = vmul.f32 %v15139_v36, %v16290_v34  ;;  %v7068_v62 = vmul.f32 0.5, %v7067_v19 }
 0xdbe   : > { %8736 = vst.msk [vmem:[%s13123_s23 + $0x68] sm:$0xff] %vm358_vm0, %v8624_v61  ;;  %8188 = vperm.xlu2 %9051, %v7966_v63   ;;  %v7986_v63 = vld [vmem:[%s12791_s15 + $0x178] sm:$0xff]  ;;  %v15195_v61 = vadd.f32 1e-05, %v5805_v55  ;;  %v7069_v33 = vsub.f32 1.5, %v7068_v62 }
 0xdc0   : > { %8258 = vperm.xlu0 %9052, %v7980_v0   ;;  %v6989_v0 = vsub.f32 1.5, %v6988_v17  ;;  %9373 = vrsqrt.f32 %v15195_v61  ;;  %v7070_v35 = vmul.f32 %v9370_v48, %v7069_v33  ;;  %v5800_v17 = vmul.f32 %v14979_v60, %v16290_v34 }
 0xdc1   : > { %9375 = vrsqrt.f32 %v15197_v1  ;;  %vm7101_vm1 = vweird.f32 %v15195_v61 }
 0xdc2   : > { %v6990_v36 = vmul.f32 %v9372_v54, %v6989_v0  ;;  %v7074_v37 = vsel %vm7073_vm12, %v9370_v48, %v7070_v35  ;;  %v16472_v35 = vld [vmem:[#allocation37_spill] sm:$0xff] }
 0xdc3   : > { %v7258_v22 = vmul.f32 %v7074_v37, %v5914_v29 }
 0xdc4   : > { %v6994_v53 = vsel %vm6993_vm13, %v9372_v54, %v6990_v36  ;;  %v16471_v54 = vld [vmem:[#allocation40_spill] sm:$0xff]  ;;  %v7842_v36 = vmul.f32 %v13704_v15, %v16472_v35 }
 0xdc6   : > { %8203 = vperm.xlu2 %9051, %v7969_v7   ;;  %v7847_v7 = vmul.f32 %v13825_v24, %v16470_v11  ;;  %v7250_v24 = vmul.f32 %v6994_v53, %v5906_v41 }
 0xdc7   : > { %v15187_v20 = vpop.xlane.xlu0 %5694 }
 0xdc8   : > { %7794 = vperm.xlu0 %9052, %v7260_v56   ;;  %v15209_v56 = vpop.eup %9373 }
 0xdc9   : > { %v7096_v30 = vmul.f32 %v15209_v56, %v15195_v61  ;;  %vm7102_vm14 = vweird.f32 %v15209_v56 }
 0xdca   : > { %vm15256_vm3 = vmor %vm7101_vm1, %vm7102_vm14 }
 0xdcb   : > { %v7097_v51 = vmul.f32 %v15209_v56, %v7096_v30 }
 0xdcd   : > { %v7098_v33 = vmul.f32 0.5, %v7097_v51 }
 0xdce   : > { %7769 = vperm.xlu2 %9051, %v7255_v18   ;;  %5697 = vadd.xlane.f32.xlu1 %v5696_v47  ;;  %v15212_v18 = vpop.eup %9375  ;;  %v15220_v47 = vpop.permute.xlu1 %7714 }
 0xdcf   : > { %v7016_v48 = vmul.f32 %v15212_v18, %v15197_v1  ;;  %v7099_v60 = vsub.f32 1.5, %v7098_v33  ;;  %vm7022_vm15 = vweird.f32 %v15212_v18 }
 0xdd0   : > { %8273 = vperm.xlu0 %9052, %v7983_v12   ;;  %v7850_v12 = vmul.f32 %v13886_v10, %v16471_v54  ;;  %vm15262_vm4 = vmor %vm7021_vm2, %vm7022_vm15 }
 0xdd1   : > { %v7017_v28 = vmul.f32 %v15212_v18, %v7016_v48  ;;  %v7100_v15 = vmul.f32 %v15209_v56, %v7099_v60  ;;  %v16474_v48 = vld [vmem:[#allocation51_spill] sm:$0xff] }
 0xdd3   : > { %v7018_v0 = vmul.f32 0.5, %v7017_v28  ;;  %v16478_v28 = vld [vmem:[#allocation86_spill] sm:$0xff]  ;;  %v7104_v1 = vsel %vm15256_vm3, %v15209_v56, %v7100_v15 }
 0xdd6   : > { %8218 = vperm.xlu2 %9051, %v7972_v23  }
 0xdd8   : > { %8288 = vperm.xlu0 %9052, %v7986_v63   ;;  %v7961_v63 = vld [vmem:[%s12791_s15 + $0xb0] sm:$0xff] }
 0xdda   : > { %v15199_v8 = vpop.permute.xlu0 %7734 }
 0xdde   : > { %8233 = vperm.xlu2 %9051, %v7975_v3  }
 0xde2   : > { %v8154_v43 = vpop.permute.xlu0 %8153 }
 0xde3   : > { %v8631_v44 = vadd.f32 %v8154_v43, %v7847_v7  ;;  %v15238_v7 = vadd.f32 1e-05, %v5800_v17  ;;  %v7019_v43 = vsub.f32 1.5, %v7018_v0  ;;  %v5909_v0 = vld [vmem:[%s12955_s17 + $0x310] sm:$0xff] }
 0xde5   : > { %8743 = vst.msk [vmem:[%s13123_s23 + $0xa0] sm:$0xff] %vm358_vm0, %v8631_v44  ;;  %v7981_v44 = vld [vmem:[%s12791_s15 + $0x150] sm:$0xff]  ;;  %v7020_v30 = vmul.f32 %v15212_v18, %v7019_v43  ;;  %vm7051_vm5 = vweird.f32 %v15238_v7 }
 0xde6   : > { %7784 = vperm.xlu2 %9051, %v7258_v22   ;;  %v7964_v22 = vld [vmem:[%s12791_s15 + $0xc8] sm:$0xff] }
 0xde7   : > { %7744 = vperm.xlu1 %9050, %v7250_v24   ;;  %v16473_v24 = vld [vmem:[#allocation30_spill] sm:$0xff] }
 0xde8   : > { %v7845_v54 = vmul.f32 %v16474_v48, %v16473_v24 }
 0xde9   : > { %v5692_v19 = vpop.xlane.xlu2 %5691 }
 0xdea   : > { %v8169_v23 = vpop.permute.xlu0 %8168  ;;  %v5808_v62 = vmul.f32 %v5692_v19, %v16290_v34  ;;  %v16477_v19 = vld [vmem:[#allocation65_spill] sm:$0xff] }
 0xdeb   : > { %v8634_v55 = vadd.f32 %v8169_v23, %v7850_v12  ;;  %v7853_v23 = vmul.f32 %v16478_v28, %v16477_v19  ;;  %v5919_v19 = vld [vmem:[%s12955_s17 + $0x360] sm:$0xff] }
 0xdec   : > { %v15236_v11 = vadd.f32 1e-05, %v5808_v62 }
 0xded   : > { %8746 = vst.msk [vmem:[%s13123_s23 + $0xb8] sm:$0xff] %vm358_vm0, %v8634_v55 }
 0xdee   : > { %v5689_v10 = vpop.xlane.xlu1 %5688  ;;  %8248 = vperm.xlu2 %9051, %v7978_v59   ;;  %v5917_v59 = vld [vmem:[%s12955_s17 + $0x350] sm:$0xff]  ;;  %vm7131_vm11 = vweird.f32 %v15236_v11 }
 0xdef   : > { %v5807_v3 = vmul.f32 %v5689_v10, %v16290_v34  ;;  %8163 = vperm.xlu1 %9050, %v7961_v63   ;;  %v7024_v10 = vsel %vm15262_vm4, %v15212_v18, %v7020_v30  ;;  %v7261_v60 = vmul.f32 %v7104_v1, %v5917_v59  ;;  %v16483_v59 = vld [vmem:[#allocation67_spill] sm:$0xff] }
 0xdf0   : > { %v16484_v1 = vld [vmem:[#allocation47_spill] sm:$0xff] }
 0xdf1   : > { %v6031_v29 = vadd.f32 1e-05, %v5807_v3  ;;  %v8129_v37 = vpop.permute.xlu2 %8128 }
 0xdf2   : > { %v8626_v41 = vadd.f32 %v8129_v37, %v7842_v36  ;;  %v15240_v53 = vpop.permute.xlu0 %7749  ;;  %v7253_v37 = vmul.f32 %v7024_v10, %v5909_v0 }
 0xdf3   : > { %9377 = vrsqrt.f32 %v6031_v29  ;;  %vm7121_vm7 = vweird.f32 %v6031_v29 }
 0xdf4   : > { %9379 = vrsqrt.f32 %v15236_v11  ;;  %8738 = vst.msk [vmem:[%s13123_s23 + $0x78] sm:$0xff] %vm358_vm0, %v8626_v41 }
 0xdf5   : > { %9381 = vrsqrt.f32 %v15238_v7 }
 0xdf6   : > { %8263 = vperm.xlu2 %9051, %v7981_v44   ;;  %v16481_v44 = vld [vmem:[#allocation43_spill] sm:$0xff] }
 0xdf7   : > { %8178 = vperm.xlu1 %9050, %v7964_v22   ;;  %v16482_v22 = vld [vmem:[#allocation89_spill] sm:$0xff] }
 0xdf8   : > { %v7856_v15 = vmul.f32 %v16482_v22, %v16481_v44  ;;  %v7987_v44 = vld [vmem:[%s12791_s15 + $0x180] sm:$0xff]  ;;  %v7989_v22 = vld [vmem:[%s12791_s15 + $0x190] sm:$0xff] }
 0xdf9   : > { %v9378_v51 = vpop.eup %9377  ;;  %v8144_v61 = vpop.permute.xlu2 %8143 }
 0xdfa   : > { %v15270_v62 = vpop.eup %9379  ;;  %v7116_v63 = vmul.f32 %v9378_v51, %v6031_v29  ;;  %v8629_v17 = vadd.f32 %v8144_v61, %v7845_v54  ;;  %v8184_v33 = vpop.permute.xlu0 %8183  ;;  %vm7122_vm6 = vweird.f32 %v9378_v51  ;;  %v7967_v61 = vld [vmem:[%s12791_s15 + $0xe0] sm:$0xff] }
 0xdfb   : > { %v15276_v3 = vpop.eup %9381  ;;  %v8637_v35 = vadd.f32 %v8184_v33, %v7853_v23  ;;  %v7126_v56 = vmul.f32 %v15270_v62, %v15236_v11  ;;  %vm7123_vm8 = vmor %vm7121_vm7, %vm7122_vm6  ;;  %v7984_v23 = vld [vmem:[%s12791_s15 + $0x168] sm:$0xff]  ;;  %vm7132_vm9 = vweird.f32 %v15270_v62 }
 0xdfc   : > { %v7117_v36 = vmul.f32 %v9378_v51, %v7116_v63  ;;  %8741 = vst.msk [vmem:[%s13123_s23 + $0x90] sm:$0xff] %vm358_vm0, %v8629_v17  ;;  %v7046_v43 = vmul.f32 %v15276_v3, %v15238_v7  ;;  %v7843_v63 = vmul.f32 %v16484_v1, %v16483_v59  ;;  %v5803_v17 = vmul.f32 %v15037_v49, %v16290_v34  ;;  %vm7133_vm12 = vmor %vm7131_vm11, %vm7132_vm9  ;;  %v5920_v1 = vld [vmem:[%s12955_s17 + $0x368] sm:$0xff] }
 0xdfd   : > { %8749 = vst.msk [vmem:[%s13123_s23 + $0xd0] sm:$0xff] %vm358_vm0, %v8637_v35  ;;  %v7127_v30 = vmul.f32 %v15270_v62, %v7126_v56  ;;  %v16485_v35 = vld [vmem:[#allocation70_spill] sm:$0xff]  ;;  %vm7052_vm10 = vweird.f32 %v15276_v3 }
 0xdfe   : > { %v7118_v41 = vmul.f32 0.5, %v7117_v36  ;;  %7799 = vperm.xlu2 %9051, %v7261_v60   ;;  %v7047_v48 = vmul.f32 %v15276_v3, %v7046_v43  ;;  %v16486_v36 = vld [vmem:[#allocation5_spill] sm:$0xff]  ;;  %v15303_v56 = vadd.f32 1e-05, %v5803_v17  ;;  %vm7053_vm13 = vmor %vm7051_vm5, %vm7052_vm10 }
 0xdff   : > { %7759 = vperm.xlu1 %9050, %v7253_v37   ;;  %v7128_v33 = vmul.f32 0.5, %v7127_v30  ;;  %v7848_v60 = vmul.f32 %v16486_v36, %v16485_v35  ;;  %v16491_v35 = vld [vmem:[#allocation62_spill] sm:$0xff] }
 0xe00   : > { %v7119_v18 = vsub.f32 1.5, %v7118_v41  ;;  %v7048_v29 = vmul.f32 0.5, %v7047_v48  ;;  %9383 = vrsqrt.f32 %v15303_v56  ;;  %v16492_v36 = vld [vmem:[#allocation50_spill] sm:$0xff]  ;;  %vm7081_vm15 = vweird.f32 %v15303_v56 }
 0xe01   : > { %v15289_v24 = vpop.permute.xlu2 %7739  ;;  %v7129_v49 = vsub.f32 1.5, %v7128_v33  ;;  %v5912_v33 = vld [vmem:[%s12955_s17 + $0x328] sm:$0xff] }
 0xe02   : > { %v7120_v54 = vmul.f32 %v9378_v51, %v7119_v18  ;;  %v8199_v12 = vpop.permute.xlu0 %8198  ;;  %v7049_v43 = vsub.f32 1.5, %v7048_v29 }
 0xe03   : > { %v8640_v28 = vadd.f32 %v8199_v12, %v7856_v15  ;;  %v7970_v15 = vld [vmem:[%s12791_s15 + $0xf8] sm:$0xff]  ;;  %v7130_v30 = vmul.f32 %v15270_v62, %v7129_v49 }
 0xe04   : > { %v7124_v55 = vsel %vm7123_vm8, %v9378_v51, %v7120_v54  ;;  %v7050_v48 = vmul.f32 %v15276_v3, %v7049_v43  ;;  %v16487_v12 = vld [vmem:[#allocation33_spill] sm:$0xff]  ;;  %v16493_v43 = vld [vmem:[#allocation46_spill] sm:$0xff] }
 0xe05   : > { %8752 = vst.msk [vmem:[%s13123_s23 + $0xe8] sm:$0xff] %vm358_vm0, %v8640_v28  ;;  %v7263_v0 = vmul.f32 %v7124_v55, %v5919_v19  ;;  %v16488_v19 = vld [vmem:[#allocation13_spill] sm:$0xff]  ;;  %v16490_v55 = vld [vmem:[#allocation28_spill] sm:$0xff] }
 0xe06   : > { %v8134_v10 = vpop.permute.xlu1 %8133  ;;  %8278 = vperm.xlu2 %9051, %v7984_v23   ;;  %v7851_v28 = vmul.f32 %v16488_v19, %v16487_v12  ;;  %v16489_v23 = vld [vmem:[#allocation68_spill] sm:$0xff]  ;;  %v9384_v29 = vpop.eup %9383  ;;  %v7990_v12 = vld [vmem:[%s12791_s15 + $0x198] sm:$0xff] }
 0xe07   : > { %v8627_v51 = vadd.f32 %v8134_v10, %v7843_v63  ;;  %7809 = vperm.xlu0 %9052, %v7263_v0   ;;  %8193 = vperm.xlu1 %9050, %v7967_v61   ;;  %v7859_v61 = vmul.f32 %v16490_v55, %v16489_v23  ;;  %v7134_v63 = vsel %vm7133_vm12, %v15270_v62, %v7130_v30  ;;  %v7973_v19 = vld [vmem:[%s12791_s15 + $0x110] sm:$0xff]  ;;  %v16495_v55 = vld [vmem:[#allocation73_spill] sm:$0xff]  ;;  %vm7082_vm14 = vweird.f32 %v9384_v29 }
 0xe08   : > { %v7054_v0 = vsel %vm7053_vm13, %v15276_v3, %v7050_v48  ;;  %v7264_v7 = vmul.f32 %v7134_v63, %v5920_v1  ;;  %v7076_v49 = vmul.f32 %v9384_v29, %v15303_v56  ;;  %vm7083_vm1 = vmor %vm7081_vm15, %vm7082_vm14 }
 0xe09   : > { %8739 = vst.msk [vmem:[%s13123_s23 + $0x80] sm:$0xff] %vm358_vm0, %v8627_v51  ;;  %v8159_v37 = vpop.permute.xlu2 %8158  ;;  %v7992_v51 = vld [vmem:[%s12791_s15 + $0x1a8] sm:$0xff]  ;;  %v7256_v62 = vmul.f32 %v7054_v0, %v5912_v33  ;;  %v7993_v0 = vld [vmem:[%s12791_s15 + $0x1b0] sm:$0xff] }
 0xe0a   : > { %v8632_v41 = vadd.f32 %v8159_v37, %v7848_v60  ;;  %v15307_v18 = vpop.permute.xlu0 %7764  ;;  %v7846_v60 = vmul.f32 %v16492_v36, %v16491_v35  ;;  %v16499_v36 = vld [vmem:[#allocation41_spill] sm:$0xff] }
 0xe0c   : > { %8744 = vst.msk [vmem:[%s13123_s23 + $0xa8] sm:$0xff] %vm358_vm0, %v8632_v41  ;;  %v16494_v41 = vld [vmem:[#allocation17_spill] sm:$0xff] }
 0xe0e   : > { %v15319_v54 = vpop.permute.xlu1 %7729  ;;  %8293 = vperm.xlu2 %9051, %v7987_v44   ;;  %v7862_v44 = vmul.f32 %v16494_v41, %v16493_v43  ;;  %v5915_v43 = vld [vmem:[%s12955_s17 + $0x340] sm:$0xff] }
 0xe0f   : > { %8303 = vperm.xlu0 %9052, %v7989_v22   ;;  %8208 = vperm.xlu1 %9050, %v7970_v15   ;;  %v7077_v15 = vmul.f32 %v9384_v29, %v7076_v49 }
 0xe11   : > { %v8174_v59 = vpop.permute.xlu2 %8173  ;;  %v7078_v23 = vmul.f32 0.5, %v7077_v15 }
 0xe12   : > { %v8635_v11 = vadd.f32 %v8174_v59, %v7851_v28  ;;  %v8214_v17 = vpop.permute.xlu0 %8213  ;;  %v5806_v28 = vmul.f32 %v15109_v31, %v16290_v34 }
 0xe13   : > { %v8643_v10 = vadd.f32 %v8214_v17, %v7859_v61  ;;  %v16496_v61 = vld [vmem:[#allocation83_spill] sm:$0xff] }
 0xe14   : > { %8747 = vst.msk [vmem:[%s13123_s23 + $0xc0] sm:$0xff] %vm358_vm0, %v8635_v11  ;;  %v7854_v59 = vmul.f32 %v16496_v61, %v16495_v55  ;;  %v6030_v1 = vadd.f32 1e-05, %v5806_v28  ;;  %v7079_v11 = vsub.f32 1.5, %v7078_v23 }
 0xe15   : > { %8755 = vst.msk [vmem:[%s13123_s23 + $0x100] sm:$0xff] %vm358_vm0, %v8643_v10  ;;  %v7976_v10 = vld [vmem:[%s12791_s15 + $0x128] sm:$0xff] }
 0xe16   : > { %v8149_v37 = vpop.permute.xlu1 %8148  ;;  %7814 = vperm.xlu2 %9051, %v7264_v7   ;;  %9385 = vrsqrt.f32 %v6030_v1  ;;  %v7080_v31 = vmul.f32 %v9384_v29, %v7079_v11  ;;  %v16497_v7 = vld [vmem:[#allocation36_spill] sm:$0xff]  ;;  %v5809_v11 = vmul.f32 %v15187_v20, %v16290_v34  ;;  %v7982_v20 = vld [vmem:[%s12791_s15 + $0x158] sm:$0xff]  ;;  %vm7111_vm3 = vweird.f32 %v6030_v1 }
 0xe17   : > { %v8630_v3 = vadd.f32 %v8149_v37, %v7846_v60  ;;  %8318 = vperm.xlu0 %9052, %v7992_v51   ;;  %7774 = vperm.xlu1 %9050, %v7256_v62   ;;  %v16498_v51 = vld [vmem:[#allocation87_spill] sm:$0xff]  ;;  %v16500_v60 = vld [vmem:[#allocation12_spill] sm:$0xff] }
 0xe18   : > { %v7857_v35 = vmul.f32 %v16498_v51, %v16497_v7  ;;  %v7865_v62 = vmul.f32 %v16500_v60, %v16499_v36  ;;  %v7084_v41 = vsel %vm7083_vm1, %v9384_v29, %v7080_v31  ;;  %v15382_v7 = vadd.f32 1e-05, %v5809_v11 }
 0xe19   : > { %8742 = vst.msk [vmem:[%s13123_s23 + $0x98] sm:$0xff] %vm358_vm0, %v8630_v3  ;;  %v15343_v22 = vpop.permute.xlu2 %7754  ;;  %v7259_v56 = vmul.f32 %v7084_v41, %v5915_v43  ;;  %v16507_v41 = vld [vmem:[#allocation82_spill] sm:$0xff] }
 0xe1a   : > { %v8229_v30 = vpop.permute.xlu0 %8228  ;;  %9387 = vrsqrt.f32 %v15382_v7  ;;  %vm7141_vm10 = vweird.f32 %v15382_v7 }
 0xe1b   : > { %v8646_v48 = vadd.f32 %v8229_v30, %v7862_v44  ;;  %v7996_v30 = vld [vmem:[%s12791_s15 + $0x1c8] sm:$0xff] }
 0xe1c   : > { %v9386_v44 = vpop.eup %9385 }
 0xe1d   : > { %8758 = vst.msk [vmem:[%s13123_s23 + $0x118] sm:$0xff] %vm358_vm0, %v8646_v48  ;;  %v7106_v48 = vmul.f32 %v9386_v44, %v6030_v1  ;;  %vm7112_vm2 = vweird.f32 %v9386_v44 }
 0xe1e   : > { %8308 = vperm.xlu2 %9051, %v7990_v12   ;;  %v16501_v12 = vld [vmem:[#allocation42_spill] sm:$0xff]  ;;  %vm7113_vm4 = vmor %vm7111_vm3, %vm7112_vm2 }
 0xe1f   : > { %8223 = vperm.xlu1 %9050, %v7973_v19   ;;  %v16502_v19 = vld [vmem:[#allocation95_spill] sm:$0xff]  ;;  %v7107_v55 = vmul.f32 %v9386_v44, %v7106_v48 }
 0xe20   : > { %v7868_v28 = vmul.f32 %v16502_v19, %v16501_v12 }
 0xe21   : > { %v8189_v63 = vpop.permute.xlu2 %8188 }
 0xe22   : > { %v8638_v17 = vadd.f32 %v8189_v63, %v7854_v59  ;;  %v15353_v33 = vpop.permute.xlu0 %7779  ;;  %v7999_v59 = vld [vmem:[%s12791_s15 + $0x1e0] sm:$0xff] }
 0xe23   : > { %v7979_v63 = vld [vmem:[%s12791_s15 + $0x140] sm:$0xff] }
 0xe24   : > { %8750 = vst.msk [vmem:[%s13123_s23 + $0xd8] sm:$0xff] %vm358_vm0, %v8638_v17  ;;  %v7108_v17 = vmul.f32 0.5, %v7107_v55  ;;  %v5918_v55 = vld [vmem:[%s12955_s17 + $0x358] sm:$0xff] }
 0xe26   : > { %8323 = vperm.xlu2 %9051, %v7993_v0   ;;  %v16503_v0 = vld [vmem:[#allocation76_spill] sm:$0xff] }
 0xe27   : > { %8238 = vperm.xlu1 %9050, %v7976_v10   ;;  %v16504_v10 = vld [vmem:[#allocation60_spill] sm:$0xff] }
 0xe28   : > { %v7860_v31 = vmul.f32 %v16504_v10, %v16503_v0  ;;  %v16510_v0 = vld [vmem:[#allocation107_spill] sm:$0xff] }
 0xe29   : > { %v8204_v49 = vpop.permute.xlu2 %8203 }
 0xe2a   : > { %v8641_v37 = vadd.f32 %v8204_v49, %v7857_v35  ;;  %v8244_v3 = vpop.permute.xlu0 %8243  ;;  %v7109_v35 = vsub.f32 1.5, %v7108_v17 }
 0xe2b   : > { %v8649_v15 = vadd.f32 %v8244_v3, %v7865_v62  ;;  %v8002_v62 = vld [vmem:[%s12791_s15 + $0x1f8] sm:$0xff] }
 0xe2c   : > { %8753 = vst.msk [vmem:[%s13123_s23 + $0xf0] sm:$0xff] %vm358_vm0, %v8641_v37  ;;  %v7110_v49 = vmul.f32 %v9386_v44, %v7109_v35  ;;  %v16505_v37 = vld [vmem:[#allocation71_spill] sm:$0xff]  ;;  %v16506_v3 = vld [vmem:[#allocation61_spill] sm:$0xff] }
 0xe2d   : > { %8761 = vst.msk [vmem:[%s13123_s23 + $0x130] sm:$0xff] %vm358_vm0, %v8649_v15  ;;  %v7863_v43 = vmul.f32 %v16506_v3, %v16505_v37  ;;  %v16508_v15 = vld [vmem:[#allocation101_spill] sm:$0xff] }
 0xe2e   : > { %8338 = vperm.xlu2 %9051, %v7996_v30   ;;  %v7871_v30 = vmul.f32 %v16508_v15, %v16507_v41  ;;  %v16512_v41 = vld [vmem:[#allocation92_spill] sm:$0xff] }
 0xe2f   : > { %7789 = vperm.xlu1 %9050, %v7259_v56  }
 0xe31   : > { %v15372_v23 = vpop.permute.xlu2 %7769 }
 0xe32   : > { %v8259_v29 = vpop.permute.xlu0 %8258 }
 0xe33   : > { %v8652_v61 = vadd.f32 %v8259_v29, %v7868_v28  ;;  %v7114_v29 = vsel %vm7113_vm4, %v9386_v44, %v7110_v49 }
 0xe34   : > { %v7262_v11 = vmul.f32 %v7114_v29, %v5918_v55  ;;  %v7988_v55 = vld [vmem:[%s12791_s15 + $0x188] sm:$0xff] }
 0xe35   : > { %8764 = vst.msk [vmem:[%s13123_s23 + $0x148] sm:$0xff] %vm358_vm0, %v8652_v61  ;;  %v9388_v61 = vpop.eup %9387 }
 0xe36   : > { %8353 = vperm.xlu2 %9051, %v7999_v59   ;;  %v7136_v17 = vmul.f32 %v9388_v61, %v15382_v7  ;;  %vm7142_vm8 = vweird.f32 %v9388_v61  ;;  %v7995_v7 = vld [vmem:[%s12791_s15 + $0x1c0] sm:$0xff] }
 0xe37   : > { %8253 = vperm.xlu1 %9050, %v7979_v63   ;;  %v8005_v63 = vld [vmem:[%s12791_s15 + $0x210] sm:$0xff]  ;;  %vm7143_vm11 = vmor %vm7141_vm10, %vm7142_vm8 }
 0xe39   : > { %v8219_v51 = vpop.permute.xlu2 %8218 }
 0xe3a   : > { %v8644_v36 = vadd.f32 %v8219_v51, %v7860_v31  ;;  %v15384_v60 = vpop.permute.xlu0 %7794  ;;  %v7137_v31 = vmul.f32 %v9388_v61, %v7136_v17  ;;  %v16513_v17 = vld [vmem:[#allocation44_spill] sm:$0xff] }
 0xe3c   : > { %8756 = vst.msk [vmem:[%s13123_s23 + $0x108] sm:$0xff] %vm358_vm0, %v8644_v36  ;;  %v8008_v36 = vld [vmem:[%s12791_s15 + $0x228] sm:$0xff]  ;;  %v7138_v37 = vmul.f32 0.5, %v7137_v31 }
 0xe3e   : > { %8368 = vperm.xlu2 %9051, %v8002_v62  }
 0xe3f   : > { %8268 = vperm.xlu1 %9050, %v7982_v20   ;;  %v7985_v20 = vld [vmem:[%s12791_s15 + $0x170] sm:$0xff] }
 0xe41   : > { %v8234_v56 = vpop.permute.xlu2 %8233  ;;  %v5698_v48 = vpop.xlane.xlu1 %5697 }
 0xe42   : > { %v8647_v12 = vadd.f32 %v8234_v56, %v7863_v43  ;;  %v5810_v19 = vmul.f32 %v5698_v48, %v16290_v34  ;;  %v8274_v28 = vpop.permute.xlu0 %8273  ;;  %v16509_v34 = vld [vmem:[#allocation77_spill] sm:$0xff]  ;;  %v7139_v48 = vsub.f32 1.5, %v7138_v37  ;;  %v16516_v37 = vld [vmem:[#allocation7_spill] sm:$0xff] }
 0xe43   : > { %v8655_v59 = vadd.f32 %v8274_v28, %v7871_v30  ;;  %v7874_v44 = vmul.f32 %v16510_v0, %v16509_v34  ;;  %v16511_v43 = vld [vmem:[#allocation49_spill] sm:$0xff]  ;;  %v8011_v28 = vld [vmem:[%s12791_s15 + $0x240] sm:$0xff] }
 0xe44   : > { %8759 = vst.msk [vmem:[%s13123_s23 + $0x120] sm:$0xff] %vm358_vm0, %v8647_v12  ;;  %v6034_v1 = vadd.f32 1e-05, %v5810_v19  ;;  %v7866_v15 = vmul.f32 %v16512_v41, %v16511_v43  ;;  %v16514_v34 = vld [vmem:[#allocation98_spill] sm:$0xff] }
 0xe45   : > { %8767 = vst.msk [vmem:[%s13123_s23 + $0x160] sm:$0xff] %vm358_vm0, %v8655_v59  ;;  %v5922_v59 = vld [vmem:[%s12955_s17 + $0x378] sm:$0xff]  ;;  %v7869_v0 = vmul.f32 %v16514_v34, %v16513_v17  ;;  %v8020_v34 = vld [vmem:[%s12791_s15 + $0x288] sm:$0xff] }
 0xe46   : > { %9389 = vrsqrt.f32 %v6034_v1  ;;  %8383 = vperm.xlu2 %9051, %v8005_v63   ;;  %vm7151_vm7 = vweird.f32 %v6034_v1  ;;  %v7140_v63 = vmul.f32 %v9388_v61, %v7139_v48  ;;  %v16517_v48 = vld [vmem:[#allocation35_spill] sm:$0xff] }
 0xe47   : > { %7804 = vperm.xlu1 %9050, %v7262_v11  }
 0xe49   : > { %v15405_v10 = vpop.permute.xlu2 %7784 }
 0xe4a   : > { %v8289_v51 = vpop.permute.xlu0 %8288 }
 0xe4b   : > { %v8658_v35 = vadd.f32 %v8289_v51, %v7874_v44 }
 0xe4c   : > { %v9390_v62 = vpop.eup %9389 }
 0xe4d   : > { %v7146_v49 = vmul.f32 %v9390_v62, %v6034_v1  ;;  %8770 = vst.msk [vmem:[%s13123_s23 + $0x178] sm:$0xff] %vm358_vm0, %v8658_v35  ;;  %vm7152_vm6 = vweird.f32 %v9390_v62  ;;  %v5921_v35 = vld [vmem:[%s12955_s17 + $0x370] sm:$0xff] }
 0xe4e   : > { %8398 = vperm.xlu2 %9051, %v8008_v36   ;;  %vm7153_vm9 = vmor %vm7151_vm7, %vm7152_vm6  ;;  %v7144_v36 = vsel %vm7143_vm11, %v9388_v61, %v7140_v63  ;;  %v8017_v61 = vld [vmem:[%s12791_s15 + $0x270] sm:$0xff] }
 0xe4f   : > { %v7147_v3 = vmul.f32 %v9390_v62, %v7146_v49  ;;  %8283 = vperm.xlu1 %9050, %v7985_v20   ;;  %v8014_v20 = vld [vmem:[%s12791_s15 + $0x258] sm:$0xff]  ;;  %v16515_v49 = vld [vmem:[#allocation75_spill] sm:$0xff] }
 0xe51   : > { %v7148_v30 = vmul.f32 0.5, %v7147_v3  ;;  %v8249_v56 = vpop.permute.xlu2 %8248  ;;  %v7849_v3 = vmul.f32 %v16516_v37, %v16515_v49  ;;  %v7997_v49 = vld [vmem:[%s12791_s15 + $0x1d0] sm:$0xff]  ;;  %v8004_v37 = vld [vmem:[%s12791_s15 + $0x208] sm:$0xff] }
 0xe52   : > { %v8650_v12 = vadd.f32 %v8249_v56, %v7866_v15  ;;  %v7998_v56 = vld [vmem:[%s12791_s15 + $0x1d8] sm:$0xff] }
 0xe53   : > { %v7149_v19 = vsub.f32 1.5, %v7148_v30  ;;  %v7991_v30 = vld [vmem:[%s12791_s15 + $0x1a0] sm:$0xff] }
 0xe54   : > { %8762 = vst.msk [vmem:[%s13123_s23 + $0x138] sm:$0xff] %vm358_vm0, %v8650_v12  ;;  %v16518_v12 = vld [vmem:[#allocation8_spill] sm:$0xff] }
 0xe55   : > { %v7150_v29 = vmul.f32 %v9390_v62, %v7149_v19  ;;  %v7852_v19 = vmul.f32 %v16518_v12, %v16517_v48  ;;  %v8026_v12 = vld [vmem:[%s12791_s15 + $0x2b8] sm:$0xff] }
 0xe56   : > { %8413 = vperm.xlu2 %9051, %v8011_v28   ;;  %v16519_v28 = vld [vmem:[#allocation45_spill] sm:$0xff] }
 0xe57   : > { %8298 = vperm.xlu1 %9050, %v7988_v55   ;;  %v7154_v11 = vsel %vm7153_vm9, %v9390_v62, %v7150_v29  ;;  %v7265_v62 = vmul.f32 %v7144_v36, %v5921_v35  ;;  %v16520_v55 = vld [vmem:[#allocation104_spill] sm:$0xff] }
 0xe58   : > { %v7266_v44 = vmul.f32 %v7154_v11, %v5922_v59  ;;  %v7872_v29 = vmul.f32 %v16520_v55, %v16519_v28  ;;  %v8007_v28 = vld [vmem:[%s12791_s15 + $0x220] sm:$0xff] }
 0xe59   : > { %v8264_v31 = vpop.permute.xlu2 %8263  ;;  %v15421_v1 = vpop.permute.xlu1 %7744  ;;  %v16525_v55 = vld [vmem:[#allocation38_spill] sm:$0xff] }
 0xe5a   : > { %v8653_v51 = vadd.f32 %v8264_v31, %v7869_v0  ;;  %7824 = vperm.xlu0 %9052, %v7266_v44   ;;  %v7994_v0 = vld [vmem:[%s12791_s15 + $0x1b8] sm:$0xff]  ;;  %v8001_v44 = vld [vmem:[%s12791_s15 + $0x1f0] sm:$0xff] }
 0xe5b   : > { %v16521_v31 = vld [vmem:[#allocation48_spill] sm:$0xff] }
 0xe5c   : > { %8765 = vst.msk [vmem:[%s13123_s23 + $0x150] sm:$0xff] %vm358_vm0, %v8653_v51  ;;  %v16522_v51 = vld [vmem:[#allocation110_spill] sm:$0xff] }
 0xe5d   : > { %v7875_v35 = vmul.f32 %v16522_v51, %v16521_v31 }
 0xe5e   : > { %8428 = vperm.xlu2 %9051, %v8014_v20  }
 0xe5f   : > { %7819 = vperm.xlu1 %9050, %v7265_v62  }
 0xe61   : > { %v15430_v43 = vpop.permute.xlu2 %7799  ;;  %v8164_v41 = vpop.permute.xlu1 %8163 }
 0xe62   : > { %v8633_v15 = vadd.f32 %v8164_v41, %v7849_v3  ;;  %8333 = vperm.xlu0 %9052, %v7995_v7   ;;  %v8023_v7 = vld [vmem:[%s12791_s15 + $0x2a0] sm:$0xff]  ;;  %v16524_v41 = vld [vmem:[#allocation16_spill] sm:$0xff] }
 0xe63   : > { %v16523_v3 = vld [vmem:[#allocation78_spill] sm:$0xff] }
 0xe64   : > { %8745 = vst.msk [vmem:[%s13123_s23 + $0xb0] sm:$0xff] %vm358_vm0, %v8633_v15  ;;  %v7855_v15 = vmul.f32 %v16524_v41, %v16523_v3  ;;  %v8010_v3 = vld [vmem:[%s12791_s15 + $0x238] sm:$0xff]  ;;  %v16531_v41 = vld [vmem:[#allocation10_spill] sm:$0xff] }
 0xe66   : > { %8443 = vperm.xlu2 %9051, %v8017_v61  }
 0xe67   : > { %8313 = vperm.xlu1 %9050, %v7991_v30  }
 0xe69   : > { %v8279_v59 = vpop.permute.xlu2 %8278  ;;  %v8179_v63 = vpop.permute.xlu1 %8178 }
 0xe6a   : > { %v8656_v11 = vadd.f32 %v8279_v59, %v7872_v29  ;;  %v8636_v17 = vadd.f32 %v8179_v63, %v7852_v19  ;;  %8348 = vperm.xlu0 %9052, %v7998_v56   ;;  %v8000_v19 = vld [vmem:[%s12791_s15 + $0x1e8] sm:$0xff]  ;;  %v16526_v29 = vld [vmem:[#allocation88_spill] sm:$0xff] }
 0xe6b   : > { %v7858_v59 = vmul.f32 %v16526_v29, %v16525_v55  ;;  %v16527_v63 = vld [vmem:[#allocation4_spill] sm:$0xff] }
 0xe6c   : > { %8768 = vst.msk [vmem:[%s13123_s23 + $0x168] sm:$0xff] %vm358_vm0, %v8656_v11  ;;  %v16528_v11 = vld [vmem:[#allocation116_spill] sm:$0xff] }
 0xe6d   : > { %8748 = vst.msk [vmem:[%s13123_s23 + $0xc8] sm:$0xff] %vm358_vm0, %v8636_v17  ;;  %v7878_v17 = vmul.f32 %v16528_v11, %v16527_v63  ;;  %v8032_v11 = vld [vmem:[%s12791_s15 + $0x2e8] sm:$0xff] }
 0xe6e   : > { %8458 = vperm.xlu2 %9051, %v8020_v34   ;;  %v16529_v34 = vld [vmem:[#allocation81_spill] sm:$0xff] }
 0xe6f   : > { %8328 = vperm.xlu1 %9050, %v7994_v0   ;;  %v16530_v0 = vld [vmem:[#allocation112_spill] sm:$0xff] }
 0xe71   : > { %v8294_v36 = vpop.permute.xlu2 %8293  ;;  %v15450_v20 = vpop.permute.xlu1 %7759 }
 0xe72   : > { %v8659_v62 = vadd.f32 %v8294_v36, %v7875_v35  ;;  %8363 = vperm.xlu0 %9052, %v8001_v44   ;;  %v7877_v44 = vmul.f32 %v16530_v0, %v16529_v34  ;;  %v8013_v34 = vld [vmem:[%s12791_s15 + $0x250] sm:$0xff]  ;;  %v16535_v0 = vld [vmem:[#allocation39_spill] sm:$0xff] }
 0xe74   : > { %8771 = vst.msk [vmem:[%s13123_s23 + $0x180] sm:$0xff] %vm358_vm0, %v8659_v62 }
 0xe76   : > { %8473 = vperm.xlu2 %9051, %v8023_v7  }
 0xe77   : > { %8343 = vperm.xlu1 %9050, %v7997_v49   ;;  %v8029_v49 = vld [vmem:[%s12791_s15 + $0x2d0] sm:$0xff] }
 0xe79   : > { %v15459_v61 = vpop.permute.xlu2 %7814  ;;  %v8194_v30 = vpop.permute.xlu1 %8193 }
 0xe7a   : > { %v8639_v56 = vadd.f32 %v8194_v30, %v7855_v15  ;;  %v15461_v48 = vpop.permute.xlu0 %7809  ;;  %8378 = vperm.xlu0 %9052, %v8004_v37   ;;  %v8003_v37 = vld [vmem:[%s12791_s15 + $0x200] sm:$0xff] }
 0xe7b   : > { %v16532_v15 = vld [vmem:[#allocation122_spill] sm:$0xff] }
 0xe7c   : > { %8751 = vst.msk [vmem:[%s13123_s23 + $0xe0] sm:$0xff] %vm358_vm0, %v8639_v56  ;;  %v7881_v30 = vmul.f32 %v16532_v15, %v16531_v41  ;;  %v16533_v56 = vld [vmem:[#allocation53_spill] sm:$0xff]  ;;  %v8016_v41 = vld [vmem:[%s12791_s15 + $0x268] sm:$0xff] }
 0xe7d   : > { %v16539_v15 = vld [vmem:[#allocation19_spill] sm:$0xff] }
 0xe7e   : > { %8488 = vperm.xlu2 %9051, %v8026_v12   ;;  %v16534_v12 = vld [vmem:[#allocation118_spill] sm:$0xff] }
 0xe7f   : > { %8358 = vperm.xlu1 %9050, %v8000_v19   ;;  %v7880_v19 = vmul.f32 %v16534_v12, %v16533_v56  ;;  %v16540_v56 = vld [vmem:[#allocation80_spill] sm:$0xff] }
 0xe80   : > { %v7887_v12 = vmul.f32 %v14735_v25, %v16540_v56  ;;  %v16542_v25 = vld [vmem:[#allocation133_spill] sm:$0xff] }
 0xe81   : > { %v8309_v31 = vpop.permute.xlu2 %8308  ;;  %v8209_v51 = vpop.permute.xlu1 %8208 }
 0xe82   : > { %v8662_v35 = vadd.f32 %v8309_v31, %v7878_v17  ;;  %v8642_v36 = vadd.f32 %v8209_v51, %v7858_v59  ;;  %v8304_v62 = vpop.permute.xlu0 %8303  ;;  %8393 = vperm.xlu0 %9052, %v8007_v28   ;;  %v8006_v17 = vld [vmem:[%s12791_s15 + $0x218] sm:$0xff]  ;;  %v16537_v51 = vld [vmem:[#allocation11_spill] sm:$0xff] }
 0xe83   : > { %v8661_v7 = vadd.f32 %v8304_v62, %v7877_v44  ;;  %v16536_v44 = vld [vmem:[#allocation21_spill] sm:$0xff] }
 0xe84   : > { %8774 = vst.msk [vmem:[%s13123_s23 + $0x198] sm:$0xff] %vm358_vm0, %v8662_v35  ;;  %v7861_v31 = vmul.f32 %v16536_v44, %v16535_v0  ;;  %v7884_v35 = vmul.f32 %v14692_v27, %v16537_v51  ;;  %v16538_v27 = vld [vmem:[#allocation79_spill] sm:$0xff] }
 0xe85   : > { %8754 = vst.msk [vmem:[%s13123_s23 + $0xf8] sm:$0xff] %vm358_vm0, %v8642_v36 }
 0xe86   : > { %8773 = vst.msk [vmem:[%s13123_s23 + $0x190] sm:$0xff] %vm358_vm0, %v8661_v7  ;;  %8503 = vperm.xlu2 %9051, %v8029_v49  }
 0xe87   : > { %8373 = vperm.xlu1 %9050, %v8003_v37   ;;  %v8035_v37 = vld [vmem:[%s12791_s15 + $0x300] sm:$0xff] }
 0xe89   : > { %v8324_v28 = vpop.permute.xlu2 %8323  ;;  %v15487_v55 = vpop.permute.xlu1 %7774 }
 0xe8a   : > { %v8665_v29 = vadd.f32 %v8324_v28, %v7881_v30  ;;  %v8319_v59 = vpop.permute.xlu0 %8318  ;;  %8408 = vperm.xlu0 %9052, %v8010_v3   ;;  %v8009_v3 = vld [vmem:[%s12791_s15 + $0x230] sm:$0xff]  ;;  %v7864_v30 = vmul.f32 %v16539_v15, %v16538_v27 }
 0xe8b   : > { %v8664_v63 = vadd.f32 %v8319_v59, %v7880_v19 }
 0xe8c   : > { %8777 = vst.msk [vmem:[%s13123_s23 + $0x1b0] sm:$0xff] %vm358_vm0, %v8665_v29 }
 0xe8d   : > { %8776 = vst.msk [vmem:[%s13123_s23 + $0x1a8] sm:$0xff] %vm358_vm0, %v8664_v63  ;;  %v8038_v63 = vld [vmem:[%s12791_s15 + $0x318] sm:$0xff] }
 0xe8e   : > { %8518 = vperm.xlu2 %9051, %v8032_v11   ;;  %v8012_v11 = vld [vmem:[%s12791_s15 + $0x248] sm:$0xff] }
 0xe8f   : > { %8388 = vperm.xlu1 %9050, %v8006_v17   ;;  %v8019_v17 = vld [vmem:[%s12791_s15 + $0x280] sm:$0xff] }
 0xe91   : > { %v8339_v36 = vpop.permute.xlu2 %8338  ;;  %v8224_v62 = vpop.permute.xlu1 %8223 }
 0xe92   : > { %v8668_v7 = vadd.f32 %v8339_v36, %v7884_v35  ;;  %v8645_v49 = vadd.f32 %v8224_v62, %v7861_v31  ;;  %8423 = vperm.xlu0 %9052, %v8013_v34   ;;  %v16541_v34 = vld [vmem:[#allocation22_spill] sm:$0xff]  ;;  %v8041_v35 = vld [vmem:[%s12791_s15 + $0x330] sm:$0xff]  ;;  %v8022_v62 = vld [vmem:[%s12791_s15 + $0x298] sm:$0xff] }
 0xe93   : > { %v7890_v0 = vmul.f32 %v16542_v25, %v16541_v34  ;;  %v8015_v36 = vld [vmem:[%s12791_s15 + $0x260] sm:$0xff]  ;;  %v16550_v34 = vld [vmem:[#allocation139_spill] sm:$0xff] }
 0xe94   : > { %8780 = vst.msk [vmem:[%s13123_s23 + $0x1c8] sm:$0xff] %vm358_vm0, %v8668_v7  ;;  %v16543_v7 = vld [vmem:[#allocation74_spill] sm:$0xff] }
 0xe95   : > { %8757 = vst.msk [vmem:[%s13123_s23 + $0x110] sm:$0xff] %vm358_vm0, %v8645_v49  ;;  %v16544_v49 = vld [vmem:[#allocation18_spill] sm:$0xff] }
 0xe96   : > { %8533 = vperm.xlu2 %9051, %v8035_v37   ;;  %v7867_v37 = vmul.f32 %v16544_v49, %v16543_v7  ;;  %v8028_v7 = vld [vmem:[%s12791_s15 + $0x2c8] sm:$0xff]  ;;  %v16551_v49 = vld [vmem:[#allocation93_spill] sm:$0xff] }
 0xe97   : > { %8403 = vperm.xlu1 %9050, %v8009_v3   ;;  %v16545_v3 = vld [vmem:[#allocation58_spill] sm:$0xff] }
 0xe99   : > { %v8354_v19 = vpop.permute.xlu2 %8353  ;;  %v8239_v28 = vpop.permute.xlu1 %8238 }
 0xe9a   : > { %v8671_v29 = vadd.f32 %v8354_v19, %v7887_v12  ;;  %v8648_v59 = vadd.f32 %v8239_v28, %v7864_v30  ;;  %8438 = vperm.xlu0 %9052, %v8016_v41   ;;  %v16546_v41 = vld [vmem:[#allocation136_spill] sm:$0xff]  ;;  %v8044_v19 = vld [vmem:[%s12791_s15 + $0x348] sm:$0xff]  ;;  %v8018_v28 = vld [vmem:[%s12791_s15 + $0x278] sm:$0xff] }
 0xe9b   : > { %v7893_v27 = vmul.f32 %v16546_v41, %v16545_v3 }
 0xe9c   : > { %8783 = vst.msk [vmem:[%s13123_s23 + $0x1e0] sm:$0xff] %vm358_vm0, %v8671_v29  ;;  %v8025_v29 = vld [vmem:[%s12791_s15 + $0x2b0] sm:$0xff] }
 0xe9d   : > { %8760 = vst.msk [vmem:[%s13123_s23 + $0x128] sm:$0xff] %vm358_vm0, %v8648_v59  ;;  %v16547_v59 = vld [vmem:[#allocation52_spill] sm:$0xff] }
 0xe9e   : > { %8548 = vperm.xlu2 %9051, %v8038_v63   ;;  %v16548_v63 = vld [vmem:[#allocation94_spill] sm:$0xff] }
 0xe9f   : > { %8418 = vperm.xlu1 %9050, %v8012_v11   ;;  %v7870_v11 = vmul.f32 %v16548_v63, %v16547_v59  ;;  %v16555_v59 = vld [vmem:[#allocation99_spill] sm:$0xff]  ;;  %v16556_v63 = vld [vmem:[#allocation145_spill] sm:$0xff] }
 0xea1   : > { %v8369_v44 = vpop.permute.xlu2 %8368  ;;  %v15520_v31 = vpop.permute.xlu1 %7789 }
 0xea2   : > { %v8674_v51 = vadd.f32 %v8369_v44, %v7890_v0  ;;  %8453 = vperm.xlu0 %9052, %v8019_v17   ;;  %v16549_v17 = vld [vmem:[#allocation63_spill] sm:$0xff] }
 0xea3   : > { %v7896_v25 = vmul.f32 %v16550_v34, %v16549_v17 }
 0xea4   : > { %8786 = vst.msk [vmem:[%s13123_s23 + $0x1f8] sm:$0xff] %vm358_vm0, %v8674_v51 }
 0xea6   : > { %8563 = vperm.xlu2 %9051, %v8041_v35  }
 0xea7   : > { %8433 = vperm.xlu1 %9050, %v8015_v36   ;;  %v8047_v36 = vld [vmem:[%s12791_s15 + $0x360] sm:$0xff] }
 0xea9   : > { %v8384_v15 = vpop.permute.xlu2 %8383  ;;  %v8254_v30 = vpop.permute.xlu1 %8253 }
 0xeaa   : > { %v8677_v56 = vadd.f32 %v8384_v15, %v7893_v27  ;;  %v8651_v12 = vadd.f32 %v8254_v30, %v7867_v37  ;;  %8468 = vperm.xlu0 %9052, %v8022_v62   ;;  %v8021_v62 = vld [vmem:[%s12791_s15 + $0x290] sm:$0xff]  ;;  %v16552_v37 = vld [vmem:[#allocation141_spill] sm:$0xff] }
 0xeab   : > { %v7899_v3 = vmul.f32 %v16552_v37, %v16551_v49  ;;  %v8050_v30 = vld [vmem:[%s12791_s15 + $0x378] sm:$0xff]  ;;  %v16560_v49 = vld [vmem:[#allocation148_spill] sm:$0xff] }
 0xeac   : > { %8789 = vst.msk [vmem:[%s13123_s23 + $0x210] sm:$0xff] %vm358_vm0, %v8677_v56  ;;  %v8024_v56 = vld [vmem:[%s12791_s15 + $0x2a8] sm:$0xff] }
 0xead   : > { %8763 = vst.msk [vmem:[%s13123_s23 + $0x140] sm:$0xff] %vm358_vm0, %v8651_v12  ;;  %v8031_v12 = vld [vmem:[%s12791_s15 + $0x2e0] sm:$0xff] }
 0xeae   : > { %8578 = vperm.xlu2 %9051, %v8044_v19   ;;  %v16553_v19 = vld [vmem:[#allocation55_spill] sm:$0xff] }
 0xeaf   : > { %8448 = vperm.xlu1 %9050, %v8018_v28   ;;  %v16554_v28 = vld [vmem:[#allocation100_spill] sm:$0xff] }
 0xeb1   : > { %v8399_v0 = vpop.permute.xlu2 %8398  ;;  %v8269_v44 = vpop.permute.xlu1 %8268 }
 0xeb2   : > { %v8680_v51 = vadd.f32 %v8399_v0, %v7896_v25  ;;  %v8654_v35 = vadd.f32 %v8269_v44, %v7870_v11  ;;  %8483 = vperm.xlu0 %9052, %v8025_v29   ;;  %v7873_v29 = vmul.f32 %v16554_v28, %v16553_v19  ;;  %v7902_v11 = vmul.f32 %v16556_v63, %v16555_v59  ;;  %v8027_v44 = vld [vmem:[%s12791_s15 + $0x2c0] sm:$0xff]  ;;  %v8037_v19 = vld [vmem:[%s12791_s15 + $0x310] sm:$0xff]  ;;  %v16561_v28 = vld [vmem:[#allocation113_spill] sm:$0xff] }
 0xeb4   : > { %8792 = vst.msk [vmem:[%s13123_s23 + $0x228] sm:$0xff] %vm358_vm0, %v8680_v51  ;;  %v8034_v51 = vld [vmem:[%s12791_s15 + $0x2f8] sm:$0xff] }
 0xeb5   : > { %8766 = vst.msk [vmem:[%s13123_s23 + $0x158] sm:$0xff] %vm358_vm0, %v8654_v35  ;;  %v16557_v35 = vld [vmem:[#allocation56_spill] sm:$0xff] }
 0xeb6   : > { %8593 = vperm.xlu2 %9051, %v8047_v36   ;;  %v16558_v36 = vld [vmem:[#allocation106_spill] sm:$0xff] }
 0xeb7   : > { %8463 = vperm.xlu1 %9050, %v8021_v62   ;;  %v7876_v62 = vmul.f32 %v16558_v36, %v16557_v35  ;;  %v16564_v35 = vld [vmem:[#allocation54_spill] sm:$0xff]  ;;  %v16565_v36 = vld [vmem:[#allocation111_spill] sm:$0xff] }
 0xeb9   : > { %v8414_v41 = vpop.permute.xlu2 %8413  ;;  %v15551_v27 = vpop.permute.xlu1 %7804 }
 0xeba   : > { %v8683_v15 = vadd.f32 %v8414_v41, %v7899_v3  ;;  %8498 = vperm.xlu0 %9052, %v8028_v7   ;;  %v16559_v7 = vld [vmem:[#allocation105_spill] sm:$0xff] }
 0xebb   : > { %v7905_v37 = vmul.f32 %v16560_v49, %v16559_v7  ;;  %v16566_v7 = vld [vmem:[#allocation119_spill] sm:$0xff] }
 0xebc   : > { %8795 = vst.msk [vmem:[%s13123_s23 + $0x240] sm:$0xff] %vm358_vm0, %v8683_v15  ;;  %v7911_v49 = vmul.f32 %v14989_v21, %v16566_v7  ;;  %v8043_v21 = vld [vmem:[%s12791_s15 + $0x340] sm:$0xff] }
 0xebe   : > { %8608 = vperm.xlu2 %9051, %v8050_v30  }
 0xebf   : > { %8478 = vperm.xlu1 %9050, %v8024_v56  }
 0xec1   : > { %v8429_v17 = vpop.permute.xlu2 %8428  ;;  %v8284_v34 = vpop.permute.xlu1 %8283 }
 0xec2   : > { %v8686_v25 = vadd.f32 %v8429_v17, %v7902_v11  ;;  %v8657_v0 = vadd.f32 %v8284_v34, %v7873_v29  ;;  %8513 = vperm.xlu0 %9052, %v8031_v12   ;;  %v8030_v12 = vld [vmem:[%s12791_s15 + $0x2d8] sm:$0xff]  ;;  %v7908_v29 = vmul.f32 %v14929_v52, %v16561_v28  ;;  %v16562_v17 = vld [vmem:[#allocation2_spill] sm:$0xff]  ;;  %v16563_v34 = vld [vmem:[#allocation124_spill] sm:$0xff] }
 0xec3   : > { %v8040_v52 = vld [vmem:[%s12791_s15 + $0x328] sm:$0xff] }
 0xec4   : > { %8798 = vst.msk [vmem:[%s13123_s23 + $0x258] sm:$0xff] %vm358_vm0, %v8686_v25  ;;  %v7883_v25 = vmul.f32 %v16563_v34, %v16562_v17  ;;  %v16570_v17 = vld [vmem:[#allocation117_spill] sm:$0xff] }
 0xec5   : > { %8769 = vst.msk [vmem:[%s13123_s23 + $0x170] sm:$0xff] %vm358_vm0, %v8657_v0 }
 0xec7   : > { %8493 = vperm.xlu1 %9050, %v8027_v44   ;;  %v8033_v44 = vld [vmem:[%s12791_s15 + $0x2f0] sm:$0xff] }
 0xec9   : > { %v8444_v3 = vpop.permute.xlu2 %8443  ;;  %v8299_v41 = vpop.permute.xlu1 %8298 }
 0xeca   : > { %v8689_v15 = vadd.f32 %v8444_v3, %v7905_v37  ;;  %v8660_v30 = vadd.f32 %v8299_v41, %v7876_v62  ;;  %8528 = vperm.xlu0 %9052, %v8034_v51   ;;  %v7879_v62 = vmul.f32 %v16565_v36, %v16564_v35  ;;  %v16572_v36 = vld [vmem:[#allocation85_spill] sm:$0xff] }
 0xecc   : > { %8801 = vst.msk [vmem:[%s13123_s23 + $0x270] sm:$0xff] %vm358_vm0, %v8689_v15  ;;  %v15574_v56 = vpop.permute.xlu0 %7824 }
 0xecd   : > { %8772 = vst.msk [vmem:[%s13123_s23 + $0x188] sm:$0xff] %vm358_vm0, %v8660_v30  ;;  %v16567_v30 = vld [vmem:[#allocation6_spill] sm:$0xff] }
 0xecf   : > { %8508 = vperm.xlu1 %9050, %v8030_v12   ;;  %v16568_v12 = vld [vmem:[#allocation129_spill] sm:$0xff] }
 0xed1   : > { %v8459_v59 = vpop.permute.xlu2 %8458  ;;  %v15582_v63 = vpop.permute.xlu1 %7819 }
 0xed2   : > { %v8692_v11 = vadd.f32 %v8459_v59, %v7908_v29  ;;  %8543 = vperm.xlu0 %9052, %v8037_v19   ;;  %v7886_v19 = vmul.f32 %v16568_v12, %v16567_v30  ;;  %v8036_v29 = vld [vmem:[%s12791_s15 + $0x308] sm:$0xff]  ;;  %v16576_v12 = vld [vmem:[#allocation130_spill] sm:$0xff] }
 0xed4   : > { %8804 = vst.msk [vmem:[%s13123_s23 + $0x288] sm:$0xff] %vm358_vm0, %v8692_v11  ;;  %v8334_v0 = vpop.permute.xlu0 %8333  ;;  %v16569_v11 = vld [vmem:[#allocation3_spill] sm:$0xff] }
 0xed5   : > { %v8667_v51 = vadd.f32 %v8334_v0, %v7883_v25  ;;  %v7882_v34 = vmul.f32 %v16570_v17, %v16569_v11  ;;  %v16571_v25 = vld [vmem:[#allocation125_spill] sm:$0xff]  ;;  %v16577_v11 = vld [vmem:[#allocation15_spill] sm:$0xff]  ;;  %v16578_v17 = vld [vmem:[#allocation146_spill] sm:$0xff] }
 0xed6   : > { %v7914_v0 = vmul.f32 %v15047_v2, %v16571_v25  ;;  %v8046_v2 = vld [vmem:[%s12791_s15 + $0x358] sm:$0xff] }
 0xed7   : > { %8779 = vst.msk [vmem:[%s13123_s23 + $0x1c0] sm:$0xff] %vm358_vm0, %v8667_v51  ;;  %8523 = vperm.xlu1 %9050, %v8033_v44  }
 0xed9   : > { %v8474_v37 = vpop.permute.xlu2 %8473  ;;  %v8314_v3 = vpop.permute.xlu1 %8313 }
 0xeda   : > { %v8695_v41 = vadd.f32 %v8474_v37, %v7911_v49  ;;  %v8663_v15 = vadd.f32 %v8314_v3, %v7879_v62  ;;  %8558 = vperm.xlu0 %9052, %v8040_v52   ;;  %v16573_v62 = vld [vmem:[#allocation138_spill] sm:$0xff] }
 0xedb   : > { %v7889_v7 = vmul.f32 %v16573_v62, %v16572_v36  ;;  %v8039_v37 = vld [vmem:[%s12791_s15 + $0x320] sm:$0xff] }
 0xedc   : > { %8807 = vst.msk [vmem:[%s13123_s23 + $0x2a0] sm:$0xff] %vm358_vm0, %v8695_v41  ;;  %v8349_v28 = vpop.permute.xlu0 %8348  ;;  %v16574_v41 = vld [vmem:[#allocation9_spill] sm:$0xff]  ;;  %v16581_v36 = vld [vmem:[#allocation134_spill] sm:$0xff] }
 0xedd   : > { %8775 = vst.msk [vmem:[%s13123_s23 + $0x1a0] sm:$0xff] %vm358_vm0, %v8663_v15  ;;  %v8670_v59 = vadd.f32 %v8349_v28, %v7886_v19  ;;  %v16575_v15 = vld [vmem:[#allocation123_spill] sm:$0xff]  ;;  %v7917_v19 = vmul.f32 %v15121_v26, %v16576_v12  ;;  %v8049_v26 = vld [vmem:[%s12791_s15 + $0x370] sm:$0xff]  ;;  %v7920_v62 = vmul.f32 %v15199_v8, %v16581_v36 }
 0xede   : > { %v7885_v30 = vmul.f32 %v16575_v15, %v16574_v41  ;;  %v16583_v41 = vld [vmem:[#allocation150_spill] sm:$0xff]  ;;  %v8045_v12 = vld [vmem:[%s12791_s15 + $0x350] sm:$0xff] }
 0xedf   : > { %8782 = vst.msk [vmem:[%s13123_s23 + $0x1d8] sm:$0xff] %vm358_vm0, %v8670_v59  ;;  %8538 = vperm.xlu1 %9050, %v8036_v29   ;;  %v16584_v8 = vld [vmem:[#allocation20_spill] sm:$0xff] }
 0xee0   : > { %v16590_v36 = vld [vmem:[#allocation144_spill] sm:$0xff] }
 0xee1   : > { %v8489_v44 = vpop.permute.xlu2 %8488  ;;  %v8329_v51 = vpop.permute.xlu1 %8328 }
 0xee2   : > { %v8698_v52 = vadd.f32 %v8489_v44, %v7914_v0  ;;  %v8666_v35 = vadd.f32 %v8329_v51, %v7882_v34  ;;  %8573 = vperm.xlu0 %9052, %v8043_v21   ;;  %v7892_v34 = vmul.f32 %v16578_v17, %v16577_v11  ;;  %v8042_v0 = vld [vmem:[%s12791_s15 + $0x338] sm:$0xff]  ;;  %v16579_v51 = vld [vmem:[#allocation84_spill] sm:$0xff] }
 0xee4   : > { %8810 = vst.msk [vmem:[%s13123_s23 + $0x2b8] sm:$0xff] %vm358_vm0, %v8698_v52  ;;  %v8364_v49 = vpop.permute.xlu0 %8363  ;;  %v16580_v52 = vld [vmem:[#allocation128_spill] sm:$0xff] }
 0xee5   : > { %8778 = vst.msk [vmem:[%s13123_s23 + $0x1b8] sm:$0xff] %vm358_vm0, %v8666_v35  ;;  %v8673_v3 = vadd.f32 %v8364_v49, %v7889_v7  ;;  %v7888_v35 = vmul.f32 %v16580_v52, %v16579_v51  ;;  %v8048_v52 = vld [vmem:[%s12791_s15 + $0x368] sm:$0xff] }
 0xee7   : > { %8785 = vst.msk [vmem:[%s13123_s23 + $0x1f0] sm:$0xff] %vm358_vm0, %v8673_v3  ;;  %8553 = vperm.xlu1 %9050, %v8039_v37  }
 0xee9   : > { %v8504_v28 = vpop.permute.xlu2 %8503  ;;  %v8344_v29 = vpop.permute.xlu1 %8343 }
 0xeea   : > { %v8701_v59 = vadd.f32 %v8504_v28, %v7917_v19  ;;  %v8669_v21 = vadd.f32 %v8344_v29, %v7885_v30  ;;  %8588 = vperm.xlu0 %9052, %v8046_v2   ;;  %v16582_v2 = vld [vmem:[#allocation25_spill] sm:$0xff] }
 0xeeb   : > { %v7895_v15 = vmul.f32 %v16583_v41, %v16582_v2  ;;  %v16585_v28 = vld [vmem:[#allocation137_spill] sm:$0xff] }
 0xeec   : > { %8813 = vst.msk [vmem:[%s13123_s23 + $0x2d0] sm:$0xff] %vm358_vm0, %v8701_v59  ;;  %v8379_v25 = vpop.permute.xlu0 %8378  ;;  %v7891_v29 = vmul.f32 %v16585_v28, %v16584_v8  ;;  %v16586_v59 = vld [vmem:[#allocation142_spill] sm:$0xff] }
 0xeed   : > { %8781 = vst.msk [vmem:[%s13123_s23 + $0x1d0] sm:$0xff] %vm358_vm0, %v8669_v21  ;;  %v8676_v44 = vadd.f32 %v8379_v25, %v7892_v34  ;;  %v7923_v21 = vmul.f32 %v15240_v53, %v16586_v59  ;;  %v16589_v53 = vld [vmem:[#allocation14_spill] sm:$0xff]  ;;  %v7929_v59 = vmul.f32 %v15353_v33, %v14963_v14  ;;  %v16598_v14 = vld [vmem:[#allocation151_spill] sm:$0xff] }
 0xeee   : > { %v16594_v28 = vld [vmem:[#allocation90_spill] sm:$0xff] }
 0xeef   : > { %8788 = vst.msk [vmem:[%s13123_s23 + $0x208] sm:$0xff] %vm358_vm0, %v8676_v44  ;;  %8568 = vperm.xlu1 %9050, %v8042_v0   ;;  %v16587_v0 = vld [vmem:[#allocation23_spill] sm:$0xff]  ;;  %v16588_v44 = vld [vmem:[#allocation154_spill] sm:$0xff] }
 0xef1   : > { %v8519_v7 = vpop.permute.xlu2 %8518  ;;  %v8359_v49 = vpop.permute.xlu1 %8358 }
 0xef2   : > { %v8704_v37 = vadd.f32 %v8519_v7, %v7920_v62  ;;  %v8672_v3 = vadd.f32 %v8359_v49, %v7888_v35  ;;  %8603 = vperm.xlu0 %9052, %v8049_v26   ;;  %v7898_v26 = vmul.f32 %v16588_v44, %v16587_v0  ;;  %v7894_v62 = vmul.f32 %v16590_v36, %v16589_v53  ;;  %v16591_v7 = vld [vmem:[#allocation152_spill] sm:$0xff] }
 0xef3   : > { %v7926_v49 = vmul.f32 %v15307_v18, %v16591_v7  ;;  %v16595_v18 = vld [vmem:[#allocation147_spill] sm:$0xff] }
 0xef4   : > { %8816 = vst.msk [vmem:[%s13123_s23 + $0x2e8] sm:$0xff] %vm358_vm0, %v8704_v37  ;;  %v8394_v30 = vpop.permute.xlu0 %8393 }
 0xef5   : > { %8784 = vst.msk [vmem:[%s13123_s23 + $0x1e8] sm:$0xff] %vm358_vm0, %v8672_v3  ;;  %v8679_v19 = vadd.f32 %v8394_v30, %v7895_v15  ;;  %v16592_v15 = vld [vmem:[#allocation91_spill] sm:$0xff]  ;;  %v16593_v30 = vld [vmem:[#allocation156_spill] sm:$0xff] }
 0xef7   : > { %8791 = vst.msk [vmem:[%s13123_s23 + $0x220] sm:$0xff] %vm358_vm0, %v8679_v19  ;;  %8583 = vperm.xlu1 %9050, %v8045_v12   ;;  %v7901_v12 = vmul.f32 %v16593_v30, %v16592_v15 }
 0xef9   : > { %v8534_v11 = vpop.permute.xlu2 %8533  ;;  %v8374_v17 = vpop.permute.xlu1 %8373 }
 0xefa   : > { %v8707_v34 = vadd.f32 %v8534_v11, %v7923_v21  ;;  %v8675_v25 = vadd.f32 %v8374_v17, %v7891_v29  ;;  %v7897_v29 = vmul.f32 %v16595_v18, %v16594_v28  ;;  %v16603_v18 = vld [vmem:[#allocation108_spill] sm:$0xff] }
 0xefc   : > { %8819 = vst.msk [vmem:[%s13123_s23 + $0x300] sm:$0xff] %vm358_vm0, %v8707_v34  ;;  %v8409_v51 = vpop.permute.xlu0 %8408 }
 0xefd   : > { %8787 = vst.msk [vmem:[%s13123_s23 + $0x200] sm:$0xff] %vm358_vm0, %v8675_v25  ;;  %v8682_v35 = vadd.f32 %v8409_v51, %v7898_v26  ;;  %v16596_v25 = vld [vmem:[#allocation97_spill] sm:$0xff]  ;;  %v16597_v51 = vld [vmem:[#allocation96_spill] sm:$0xff] }
 0xefe   : > { %v7904_v0 = vmul.f32 %v14938_v42, %v16596_v25  ;;  %v7900_v33 = vmul.f32 %v16598_v14, %v16597_v51  ;;  %v16607_v51 = vld [vmem:[#allocation121_spill] sm:$0xff] }
 0xeff   : > { %8794 = vst.msk [vmem:[%s13123_s23 + $0x238] sm:$0xff] %vm358_vm0, %v8682_v35  ;;  %8598 = vperm.xlu1 %9050, %v8048_v52   ;;  %v7932_v52 = vmul.f32 %v15384_v60, %v15023_v39  ;;  %v16601_v39 = vld [vmem:[#allocation155_spill] sm:$0xff]  ;;  %v7916_v14 = vmul.f32 %v15220_v47, %v16607_v51 }
 0xf01   : > { %v8549_v37 = vpop.permute.xlu2 %8548  ;;  %v8389_v3 = vpop.permute.xlu1 %8388 }
 0xf02   : > { %v8710_v2 = vadd.f32 %v8549_v37, %v7926_v49  ;;  %v8678_v41 = vadd.f32 %v8389_v3, %v7894_v62  ;;  %v16599_v62 = vld [vmem:[#allocation103_spill] sm:$0xff]  ;;  %v16600_v3 = vld [vmem:[#allocation102_spill] sm:$0xff] }
 0xf03   : > { %v7907_v7 = vmul.f32 %v15002_v50, %v16599_v62  ;;  %v7903_v60 = vmul.f32 %v16601_v39, %v16600_v3  ;;  %v16611_v39 = vld [vmem:[#allocation132_spill] sm:$0xff] }
 0xf04   : > { %8822 = vst.msk [vmem:[%s13123_s23 + $0x318] sm:$0xff] %vm358_vm0, %v8710_v2  ;;  %v8424_v19 = vpop.permute.xlu0 %8423  ;;  %v7935_v2 = vmul.f32 %v15461_v48, %v15086_v9  ;;  %v16604_v9 = vld [vmem:[#allocation157_spill] sm:$0xff] }
 0xf05   : > { %8790 = vst.msk [vmem:[%s13123_s23 + $0x218] sm:$0xff] %vm358_vm0, %v8678_v41  ;;  %v8685_v8 = vadd.f32 %v8424_v19, %v7901_v12  ;;  %v16602_v12 = vld [vmem:[#allocation109_spill] sm:$0xff]  ;;  %v7906_v48 = vmul.f32 %v16604_v9, %v16603_v18 }
 0xf06   : > { %v7910_v19 = vmul.f32 %v15064_v45, %v16602_v12  ;;  %v16615_v9 = vld [vmem:[#allocation149_spill] sm:$0xff] }
 0xf07   : > { %8797 = vst.msk [vmem:[%s13123_s23 + $0x250] sm:$0xff] %vm358_vm0, %v8685_v8 }
 0xf09   : > { %v8564_v21 = vpop.permute.xlu2 %8563  ;;  %v8404_v11 = vpop.permute.xlu1 %8403 }
 0xf0a   : > { %v8713_v17 = vadd.f32 %v8564_v21, %v7929_v59  ;;  %v8681_v34 = vadd.f32 %v8404_v11, %v7897_v29  ;;  %v7938_v29 = vmul.f32 %v15574_v56, %v15179_v58 }
 0xf0c   : > { %8825 = vst.msk [vmem:[%s13123_s23 + $0x330] sm:$0xff] %vm358_vm0, %v8713_v17  ;;  %v8439_v44 = vpop.permute.xlu0 %8438  ;;  %v16605_v17 = vld [vmem:[#allocation115_spill] sm:$0xff] }
 0xf0d   : > { %8793 = vst.msk [vmem:[%s13123_s23 + $0x230] sm:$0xff] %vm358_vm0, %v8681_v34  ;;  %v8688_v26 = vadd.f32 %v8439_v44, %v7904_v0  ;;  %v7913_v34 = vmul.f32 %v15133_v38, %v16605_v17  ;;  %v16606_v44 = vld [vmem:[#allocation114_spill] sm:$0xff] }
 0xf0e   : > { %v7909_v58 = vmul.f32 %v14987_v4, %v16606_v44 }
 0xf0f   : > { %8800 = vst.msk [vmem:[%s13123_s23 + $0x268] sm:$0xff] %vm358_vm0, %v8688_v26 }
 0xf11   : > { %v8579_v35 = vpop.permute.xlu2 %8578  ;;  %v8419_v53 = vpop.permute.xlu1 %8418 }
 0xf12   : > { %v8716_v36 = vadd.f32 %v8579_v35, %v7932_v52  ;;  %v8684_v42 = vadd.f32 %v8419_v53, %v7900_v33  ;;  %v16608_v52 = vld [vmem:[#allocation120_spill] sm:$0xff] }
 0xf13   : > { %v7912_v35 = vmul.f32 %v15049_v6, %v16608_v52  ;;  %v7922_v6 = vmul.f32 %v15421_v1, %v16611_v39 }
 0xf14   : > { %8828 = vst.msk [vmem:[%s13123_s23 + $0x348] sm:$0xff] %vm358_vm0, %v8716_v36  ;;  %v8454_v49 = vpop.permute.xlu0 %8453 }
 0xf15   : > { %8796 = vst.msk [vmem:[%s13123_s23 + $0x248] sm:$0xff] %vm358_vm0, %v8684_v42  ;;  %v8691_v37 = vadd.f32 %v8454_v49, %v7907_v7  ;;  %v16609_v42 = vld [vmem:[#allocation127_spill] sm:$0xff]  ;;  %v16610_v7 = vld [vmem:[#allocation126_spill] sm:$0xff] }
 0xf16   : > { %v7919_v4 = vmul.f32 %v15319_v54, %v16609_v42  ;;  %v7915_v49 = vmul.f32 %v15127_v5, %v16610_v7 }
 0xf17   : > { %8803 = vst.msk [vmem:[%s13123_s23 + $0x280] sm:$0xff] %vm358_vm0, %v8691_v37 }
 0xf19   : > { %v8594_v41 = vpop.permute.xlu2 %8593  ;;  %v8434_v15 = vpop.permute.xlu1 %8433 }
 0xf1a   : > { %v8719_v30 = vadd.f32 %v8594_v41, %v7935_v2  ;;  %v8687_v50 = vadd.f32 %v8434_v15, %v7903_v60  ;;  %v16612_v2 = vld [vmem:[#allocation131_spill] sm:$0xff] }
 0xf1b   : > { %v7918_v41 = vmul.f32 %v15206_v40, %v16612_v2  ;;  %v7928_v40 = vmul.f32 %v15487_v55, %v16615_v9 }
 0xf1c   : > { %8831 = vst.msk [vmem:[%s13123_s23 + $0x360] sm:$0xff] %vm358_vm0, %v8719_v30  ;;  %v8469_v8 = vpop.permute.xlu0 %8468 }
 0xf1d   : > { %8799 = vst.msk [vmem:[%s13123_s23 + $0x260] sm:$0xff] %vm358_vm0, %v8687_v50  ;;  %v8694_v28 = vadd.f32 %v8469_v8, %v7910_v19  ;;  %v16613_v50 = vld [vmem:[#allocation140_spill] sm:$0xff]  ;;  %v16614_v19 = vld [vmem:[#allocation135_spill] sm:$0xff] }
 0xf1e   : > { %v7925_v5 = vmul.f32 %v15450_v20, %v16613_v50  ;;  %v7921_v8 = vmul.f32 %v15289_v24, %v16614_v19 }
 0xf1f   : > { %8806 = vst.msk [vmem:[%s13123_s23 + $0x298] sm:$0xff] %vm358_vm0, %v8694_v28 }
 0xf21   : > { %v8609_v59 = vpop.permute.xlu2 %8608  ;;  %v8449_v21 = vpop.permute.xlu1 %8448 }
 0xf22   : > { %v8722_v45 = vadd.f32 %v8609_v59, %v7938_v29  ;;  %v8690_v11 = vadd.f32 %v8449_v21, %v7906_v48  ;;  %v16616_v29 = vld [vmem:[#allocation143_spill] sm:$0xff] }
 0xf23   : > { %v7924_v59 = vmul.f32 %v15343_v22, %v16616_v29  ;;  %v7934_v22 = vmul.f32 %v15551_v27, %v14985_v46  ;;  %v7933_v27 = vmul.f32 %v15430_v43, %v15018_v13 }
 0xf24   : > { %8834 = vst.msk [vmem:[%s13123_s23 + $0x378] sm:$0xff] %vm358_vm0, %v8722_v45  ;;  %v8484_v25 = vpop.permute.xlu0 %8483 }
 0xf25   : > { %8802 = vst.msk [vmem:[%s13123_s23 + $0x278] sm:$0xff] %vm358_vm0, %v8690_v11  ;;  %v8697_v0 = vadd.f32 %v8484_v25, %v7913_v34  ;;  %v16617_v11 = vld [vmem:[#allocation158_spill] sm:$0xff]  ;;  %v16618_v34 = vld [vmem:[#allocation153_spill] sm:$0xff] }
 0xf26   : > { %v7931_v24 = vmul.f32 %v15520_v31, %v16617_v11  ;;  %v7927_v25 = vmul.f32 %v15372_v23, %v16618_v34  ;;  %v7937_v23 = vmul.f32 %v15582_v63, %v15044_v57 }
 0xf27   : > { %8809 = vst.msk [vmem:[%s13123_s23 + $0x2b0] sm:$0xff] %vm358_vm0, %v8697_v0 }
 0xf29   : > { %v8464_v56 = vpop.permute.xlu1 %8463 }
 0xf2a   : > { %v8693_v26 = vadd.f32 %v8464_v56, %v7909_v58  ;;  %v7930_v56 = vmul.f32 %v15405_v10, %v14958_v16  ;;  %v7936_v16 = vmul.f32 %v15459_v61, %v15072_v32 }
 0xf2c   : > { %8805 = vst.msk [vmem:[%s13123_s23 + $0x290] sm:$0xff] %vm358_vm0, %v8693_v26  ;;  %v8499_v38 = vpop.permute.xlu0 %8498 }
 0xf2d   : > { %v8700_v33 = vadd.f32 %v8499_v38, %v7916_v14 }
 0xf2f   : > { %8812 = vst.msk [vmem:[%s13123_s23 + $0x2c8] sm:$0xff] %vm358_vm0, %v8700_v33 }
 0xf31   : > { %v8479_v53 = vpop.permute.xlu1 %8478 }
 0xf32   : > { %v8696_v36 = vadd.f32 %v8479_v53, %v7912_v35 }
 0xf34   : > { %8808 = vst.msk [vmem:[%s13123_s23 + $0x2a8] sm:$0xff] %vm358_vm0, %v8696_v36  ;;  %v8514_v47 = vpop.permute.xlu0 %8513 }
 0xf35   : > { %v8703_v62 = vadd.f32 %v8514_v47, %v7919_v4 }
 0xf37   : > { %8815 = vst.msk [vmem:[%s13123_s23 + $0x2e0] sm:$0xff] %vm358_vm0, %v8703_v62 }
 0xf39   : > { %v8494_v37 = vpop.permute.xlu1 %8493 }
 0xf3a   : > { %v8699_v3 = vadd.f32 %v8494_v37, %v7915_v49 }
 0xf3c   : > { %8811 = vst.msk [vmem:[%s13123_s23 + $0x2c0] sm:$0xff] %vm358_vm0, %v8699_v3  ;;  %v8529_v54 = vpop.permute.xlu0 %8528 }
 0xf3d   : > { %v8706_v60 = vadd.f32 %v8529_v54, %v7922_v6 }
 0xf3f   : > { %8818 = vst.msk [vmem:[%s13123_s23 + $0x2f8] sm:$0xff] %vm358_vm0, %v8706_v60 }
 0xf41   : > { %v8509_v15 = vpop.permute.xlu1 %8508 }
 0xf42   : > { %v8702_v30 = vadd.f32 %v8509_v15, %v7918_v41 }
 0xf44   : > { %8814 = vst.msk [vmem:[%s13123_s23 + $0x2d8] sm:$0xff] %vm358_vm0, %v8702_v30  ;;  %v8544_v1 = vpop.permute.xlu0 %8543 }
 0xf45   : > { %v8709_v12 = vadd.f32 %v8544_v1, %v7925_v5 }
 0xf47   : > { %8821 = vst.msk [vmem:[%s13123_s23 + $0x310] sm:$0xff] %vm358_vm0, %v8709_v12 }
 0xf49   : > { %v8524_v28 = vpop.permute.xlu1 %8523 }
 0xf4a   : > { %v8705_v18 = vadd.f32 %v8524_v28, %v7921_v8 }
 0xf4c   : > { %8817 = vst.msk [vmem:[%s13123_s23 + $0x2f0] sm:$0xff] %vm358_vm0, %v8705_v18  ;;  %v8559_v20 = vpop.permute.xlu0 %8558 }
 0xf4d   : > { %v8712_v48 = vadd.f32 %v8559_v20, %v7928_v40 }
 0xf4f   : > { %8824 = vst.msk [vmem:[%s13123_s23 + $0x328] sm:$0xff] %vm358_vm0, %v8712_v48 }
 0xf51   : > { %v8539_v21 = vpop.permute.xlu1 %8538 }
 0xf52   : > { %v8708_v45 = vadd.f32 %v8539_v21, %v7924_v59 }
 0xf54   : > { %8820 = vst.msk [vmem:[%s13123_s23 + $0x308] sm:$0xff] %vm358_vm0, %v8708_v45  ;;  %v8574_v55 = vpop.permute.xlu0 %8573 }
 0xf55   : > { %v8715_v17 = vadd.f32 %v8574_v55, %v7931_v24 }
 0xf57   : > { %8827 = vst.msk [vmem:[%s13123_s23 + $0x340] sm:$0xff] %vm358_vm0, %v8715_v17 }
 0xf59   : > { %v8554_v0 = vpop.permute.xlu1 %8553 }
 0xf5a   : > { %v8711_v44 = vadd.f32 %v8554_v0, %v7927_v25 }
 0xf5c   : > { %8823 = vst.msk [vmem:[%s13123_s23 + $0x320] sm:$0xff] %vm358_vm0, %v8711_v44  ;;  %v8589_v31 = vpop.permute.xlu0 %8588 }
 0xf5d   : > { %v8718_v58 = vadd.f32 %v8589_v31, %v7934_v22 }
 0xf5f   : > { %8830 = vst.msk [vmem:[%s13123_s23 + $0x358] sm:$0xff] %vm358_vm0, %v8718_v58 }
 0xf61   : > { %v8569_v26 = vpop.permute.xlu1 %8568 }
 0xf62   : > { %v8714_v51 = vadd.f32 %v8569_v26, %v7930_v56 }
 0xf64   : > { %8826 = vst.msk [vmem:[%s13123_s23 + $0x338] sm:$0xff] %vm358_vm0, %v8714_v51  ;;  %v8604_v14 = vpop.permute.xlu0 %8603 }
 0xf65   : > { %v8721_v46 = vadd.f32 %v8604_v14, %v7937_v23 }
 0xf67   : > { %8833 = vst.msk [vmem:[%s13123_s23 + $0x370] sm:$0xff] %vm358_vm0, %v8721_v46 }
 0xf69   : > { %v8584_v38 = vpop.permute.xlu1 %8583 }
 0xf6a   : > { %v8717_v33 = vadd.f32 %v8584_v38, %v7933_v27 }
 0xf6c   : > { %8829 = vst.msk [vmem:[%s13123_s23 + $0x350] sm:$0xff] %vm358_vm0, %v8717_v33 }
 0xf71   : > { %v8599_v10 = vpop.permute.xlu1 %8598 }
 0xf72   : > { %v8720_v52 = vadd.f32 %v8599_v10, %v7936_v16 }
 0xf74   : > { %8832 = vst.msk [vmem:[%s13123_s23 + $0x368] sm:$0xff] %vm358_vm0, %v8720_v52 }
 0xf75 PF: > { %s16_s21 = sadd.s32 1, %s9453_s21  }
 0xf76   : > { %p13_p4 = scmp.ge.s32.totalorder %s16_s21, 5  }
 0xf78   :  { %15 = sbr.rel (!%p13_p4) target bundleno = 1 (0x1), region = 80 }

</bundles_post_ra>
